<compile_context>
chip_gen: v6e
topology: v6e:2x2x1
jax: 0.10.0
libtpu: 0.0.40
codegen_flags: <defaults>
</compile_context>

<pallas_src>
import functools

import numpy as np
import jax
import jax.numpy as jnp
from jax import lax
from jax.experimental import pallas as pl
from jax.experimental.pallas import tpu as pltpu


# ----------------------------------------------------------------------------------------------
# Pallas kernels
# ----------------------------------------------------------------------------------------------
def _defor_attn_kernel(q_ref, pos_ref, v_ref,
                       wv_ref, bv_ref, wproj_ref, bproj_ref, wout_ref, bout_ref,
                       g_ref, b_ref, o_ref,
                       *, shapes, starts, num_points, bev_hw, n_off, apply_ln):
    """Full DeforAttn layer (+ optional following LayerNorm) for one sample."""
    f32 = jnp.float32
    q = q_ref[...].astype(f32)                               # [nq, C] (identity / residual)
    qp = q + pos_ref[...].astype(f32)                        # query + query_pos
    nq, c = q.shape

    # value_proj (value rows may differ from query rows for cross attention)
    v = jnp.dot(v_ref[...].astype(f32), wv_ref[...], preferred_element_type=f32) + bv_ref[...]

    # fused sampling-offset + attention-weight projection: one lane-dense matmul, split in-kernel
    proj = jnp.dot(qp, wproj_ref[...], preferred_element_type=f32) + bproj_ref[...]
    off = proj[:, :n_off]                                    # [nq, L*P*2]
    logits = proj[:, n_off:]                                 # [nq, L*P]   (num_heads == 1)
    mx = jnp.max(logits, axis=-1, keepdims=True)
    e = jnp.exp(logits - mx)
    aw = e * pl.reciprocal(jnp.sum(e, axis=-1, keepdims=True), approx=True)

    # reference points (same for every level), computed in-kernel: ((q%W)+0.5)/W, ((q//W)+0.5)/H
    bh, bw = bev_hw
    qi = lax.broadcasted_iota(jnp.int32, (nq, 1), 0).astype(f32)
    row = jnp.floor(qi / float(bw))
    ref_x = (qi - row * float(bw) + 0.5) / float(bw)         # [nq, 1]
    ref_y = (row + 0.5) / float(bh)                          # [nq, 1]

    # deformable bilinear sampling as a tent-weight matmul per level (zeros padding semantics:
    # out-of-range taps simply have no column, so they contribute nothing).
    acc = jnp.zeros((nq, c), dtype=f32)
    for l, (h, w) in enumerate(shapes):
        s_l = h * w
        start = starts[l]
        sidx = lax.broadcasted_iota(jnp.int32, (1, s_l), 1).astype(f32)
        srow = jnp.floor(sidx / float(w))
        scol = sidx - srow * float(w)
        srow_b = jnp.broadcast_to(srow, (nq, s_l))           # hoisted out of the point loop
        scol_b = jnp.broadcast_to(scol, (nq, s_l))
        bx = ref_x * float(w) - 0.5                          # sampling loc -> pixel coords
        by = ref_y * float(h) - 0.5
        m = jnp.zeros((nq, s_l), dtype=f32)
        for p in range(num_points):
            col = l * num_points + p
            ox = off[:, 2 * col:2 * col + 1]
            oy = off[:, 2 * col + 1:2 * col + 2]
            a = aw[:, col:col + 1]
            ix = bx + ox                                     # = (ref_x + ox/w)*w - 0.5
            iy = by + oy
            wx = jnp.maximum(1.0 - jnp.abs(scol_b - ix), 0.0)
            wy = jnp.maximum(1.0 - jnp.abs(srow_b - iy), 0.0)
            m = m + a * (wx * wy)
        acc = acc + jnp.dot(m, v[start:start + s_l, :], preferred_element_type=f32)

    # output_proj + dropout(identity at eval) + residual, then (optionally) the following LN
    out = jnp.dot(acc, wout_ref[...], preferred_element_type=f32) + bout_ref[...] + q
    if apply_ln:
        mean = jnp.mean(out, axis=-1, keepdims=True)
        cen = out - mean
        var = jnp.mean(cen * cen, axis=-1, keepdims=True)
        out = cen * lax.rsqrt(var + 1e-5) * g_ref[...] + b_ref[...]
    o_ref[...] = out.astype(o_ref.dtype)


def pallas_defor_attn(query, pos, value, p, *, shapes, bev_hw, ln=None):
    """query:[B,nq,C]; pos:[nq,C]; value:[B,S_total,C] (== query for self attention)."""
    assert p["num_heads"] == 1, "fused softmax assumes num_heads == 1"
    B, nq, C = query.shape
    S_total = value.shape[1]
    sizes = [h * w for (h, w) in shapes]
    assert sum(sizes) == S_total, (sizes, S_total)
    assert B == 1 or (nq % 8 == 0 and S_total % 8 == 0)
    starts = tuple(int(s) for s in np.concatenate([[0], np.cumsum(sizes)[:-1]]))
    n_off = p["off_dim"]
    n_all = p["proj_w"].shape[1]
    gamma = (ln["gamma"] if ln is not None else jnp.ones((C,), query.dtype)).reshape(1, C)
    beta = (ln["beta"] if ln is not None else jnp.zeros((C,), query.dtype)).reshape(1, C)

    kern = functools.partial(_defor_attn_kernel, shapes=tuple(shapes), starts=starts,
                             num_points=p["num_points"], bev_hw=bev_hw, n_off=n_off,
                             apply_ln=ln is not None)
    out = pl.pallas_call(
        kern,
        out_shape=jax.ShapeDtypeStruct((B * nq, C), query.dtype),
        grid=(B,),
        in_specs=[pl.BlockSpec((nq, C), lambda b: (b, 0)),        # query (per sample)
                  pl.BlockSpec((nq, C), lambda b: (0, 0)),        # query_pos (shared)
                  pl.BlockSpec((S_total, C), lambda b: (b, 0)),   # value (per sample)
                  pl.BlockSpec((C, C), lambda b: (0, 0)),         # value_proj W
                  pl.BlockSpec((1, C), lambda b: (0, 0)),         # value_proj b
                  pl.BlockSpec((C, n_all), lambda b: (0, 0)),     # fused off+aw W
                  pl.BlockSpec((1, n_all), lambda b: (0, 0)),     # fused off+aw b
                  pl.BlockSpec((C, C), lambda b: (0, 0)),         # output_proj W
                  pl.BlockSpec((1, C), lambda b: (0, 0)),         # output_proj b
                  pl.BlockSpec((1, C), lambda b: (0, 0)),         # LN gamma
                  pl.BlockSpec((1, C), lambda b: (0, 0))],        # LN beta
        out_specs=pl.BlockSpec((nq, C), lambda b: (b, 0)),
        compiler_params=pltpu.CompilerParams(dimension_semantics=("parallel",)),
    )(query.reshape(B * nq, C), pos, value.reshape(B * S_total, C),
      p["value_proj_w"], p["value_proj_b"].reshape(1, C),
      p["proj_w"], p["proj_b"].reshape(1, n_all),
      p["out_proj_w"], p["out_proj_b"].reshape(1, C),
      gamma, beta)
    return out.reshape(B, nq, C)


def _ffn_kernel(x_ref, w1_ref, b1_ref, w2_ref, b2_ref, g_ref, b_ref, o_ref, *, apply_ln):
    x = x_ref[...].astype(jnp.float32)
    h = jnp.dot(x, w1_ref[...], preferred_element_type=jnp.float32) + b1_ref[...]
    h = jnp.maximum(h, 0.0)
    y = x + jnp.dot(h, w2_ref[...], preferred_element_type=jnp.float32) + b2_ref[...]
    if apply_ln:
        mean = jnp.mean(y, axis=-1, keepdims=True)
        cen = y - mean
        var = jnp.mean(cen * cen, axis=-1, keepdims=True)
        y = cen * lax.rsqrt(var + 1e-5) * g_ref[...] + b_ref[...]
    o_ref[...] = y.astype(o_ref.dtype)


def pallas_ffn(query, p, ln=None):
    B, nq, C = query.shape
    x = query.reshape(B * nq, C)
    m = x.shape[0]
    f = p["w1"].shape[1]
    gamma = (ln["gamma"] if ln is not None else jnp.ones((C,), x.dtype)).reshape(1, C)
    beta = (ln["beta"] if ln is not None else jnp.zeros((C,), x.dtype)).reshape(1, C)
    out = pl.pallas_call(
        functools.partial(_ffn_kernel, apply_ln=ln is not None),
        out_shape=jax.ShapeDtypeStruct((m, C), x.dtype),
        grid=(1,),
        in_specs=[pl.BlockSpec((m, C), lambda i: (0, 0)),
                  pl.BlockSpec((C, f), lambda i: (0, 0)),
                  pl.BlockSpec((1, f), lambda i: (0, 0)),
                  pl.BlockSpec((f, C), lambda i: (0, 0)),
                  pl.BlockSpec((1, C), lambda i: (0, 0)),
                  pl.BlockSpec((1, C), lambda i: (0, 0)),
                  pl.BlockSpec((1, C), lambda i: (0, 0))],
        out_specs=pl.BlockSpec((m, C), lambda i: (0, 0)),
        compiler_params=pltpu.CompilerParams(dimension_semantics=("arbitrary",)),
    )(x, p["w1"], p["b1"].reshape(1, f), p["w2"], p["b2"].reshape(1, C), gamma, beta)
    return out.reshape(B, nq, C)


def _layernorm_kernel(x_ref, g_ref, b_ref, o_ref):
    x = x_ref[...].astype(jnp.float32)
    mean = jnp.mean(x, axis=-1, keepdims=True)
    cen = x - mean
    var = jnp.mean(cen * cen, axis=-1, keepdims=True)
    o_ref[...] = (cen * lax.rsqrt(var + 1e-5) * g_ref[...] + b_ref[...]).astype(o_ref.dtype)


def pallas_layernorm(query, gamma, beta):
    """Stand-alone LN fallback (only used when a 'norm' is not fused into the previous layer)."""
    B, nq, C = query.shape
    x = query.reshape(B * nq, C)
    m = x.shape[0]
    out = pl.pallas_call(
        _layernorm_kernel,
        out_shape=jax.ShapeDtypeStruct((m, C), x.dtype),
        grid=(1,),
        in_specs=[pl.BlockSpec((m, C), lambda i: (0, 0)),
                  pl.BlockSpec((1, C), lambda i: (0, 0)),
                  pl.BlockSpec((1, C), lambda i: (0, 0))],
        out_specs=pl.BlockSpec((m, C), lambda i: (0, 0)),
    )(x, gamma.reshape(1, C), beta.reshape(1, C))
    return out.reshape(B, nq, C)


# ----------------------------------------------------------------------------------------------
# Plain-JAX glue: affine warp of the input feature maps
# ----------------------------------------------------------------------------------------------
def grid_sample_bilinear(img, grid, align_corners=False):
    """img: [B,C,H,W]; grid: [B,Ho,Wo,2] with (x,y) in [-1,1]; bilinear, zeros padding."""
    B, C, H, W = img.shape
    x = grid[..., 0]
    y = grid[..., 1]
    if align_corners:
        ix = (x + 1.0) * (W - 1) / 2.0
        iy = (y + 1.0) * (H - 1) / 2.0
    else:
        ix = ((x + 1.0) * W - 1.0) / 2.0
        iy = ((y + 1.0) * H - 1.0) / 2.0
    x0 = jnp.floor(ix)
    y0 = jnp.floor(iy)
    x1 = x0 + 1.0
    y1 = y0 + 1.0
    wx1 = ix - x0
    wx0 = 1.0 - wx1
    wy1 = iy - y0
    wy0 = 1.0 - wy1
    flat = img.reshape(B, C, H * W)

    def gather(xi, yi):
        valid = ((xi >= 0) & (xi <= W - 1) & (yi >= 0) & (yi <= H - 1)).astype(img.dtype)
        xc = jnp.clip(xi, 0, W - 1).astype(jnp.int32)
        yc = jnp.clip(yi, 0, H - 1).astype(jnp.int32)
        idx = (yc * W + xc).reshape(B, 1, -1)
        g = jnp.take_along_axis(flat, jnp.broadcast_to(idx, (B, C, idx.shape[-1])), axis=2)
        g = g.reshape(B, C, *xi.shape[1:])
        return g * valid[:, None, ...]

    return (gather(x0, y0) * (wx0 * wy0)[:, None]
            + gather(x1, y0) * (wx1 * wy0)[:, None]
            + gather(x0, y1) * (wx0 * wy1)[:, None]
            + gather(x1, y1) * (wx1 * wy1)[:, None])


def warp_affine_simple(src, M, dsize, align_corners=False):
    """torch: F.grid_sample(src, F.affine_grid(M, [B,C,*dsize])), align_corners=False."""
    Ho, Wo = dsize
    if align_corners:
        xs = jnp.linspace(-1.0, 1.0, Wo)
        ys = jnp.linspace(-1.0, 1.0, Ho)
    else:
        xs = (jnp.arange(Wo, dtype=jnp.float32) * 2.0 + 1.0) / Wo - 1.0
        ys = (jnp.arange(Ho, dtype=jnp.float32) * 2.0 + 1.0) / Ho - 1.0
    xg, yg = jnp.meshgrid(xs, ys, indexing="xy")                 # [Ho, Wo]
    base = jnp.stack([xg, yg, jnp.ones_like(xg)], axis=-1)       # [Ho, Wo, 3]
    grid = jnp.einsum("nij,hwj->nhwi", M, base)                  # [N, Ho, Wo, 2]
    return grid_sample_bilinear(src, grid, align_corners=align_corners)


# ----------------------------------------------------------------------------------------------
# Module forward (JAX orchestration around the Pallas kernels)
# ----------------------------------------------------------------------------------------------
def block_forward(bp, cfgs, query, pos, value, shapes_cross, shapes_self, bev_hw):
    layers = bp["layers"]
    i, n = 0, len(cfgs)
    while i < n:
        t = cfgs[i]
        lp = layers[i]
        ln, step = None, 1
        if t in ("self_attn", "cross_attn", "ffn") and i + 1 < n and cfgs[i + 1] == "norm":
            ln, step = layers[i + 1], 2                          # fuse the following LayerNorm
        if t == "self_attn":
            query = pallas_defor_attn(query, pos, query, lp,
                                      shapes=shapes_self, bev_hw=bev_hw, ln=ln)
        elif t == "cross_attn":
            query = pallas_defor_attn(query, pos, value, lp,
                                      shapes=shapes_cross, bev_hw=bev_hw, ln=ln)
        elif t == "ffn":
            query = pallas_ffn(query, lp, ln=ln)
        elif t == "norm":
            query = pallas_layernorm(query, lp["gamma"], lp["beta"])
        i += step
    return query


def positional_encoding(params, H, W):
    col = params["pos_col_embed"]                                # [W, C//2]
    row = params["pos_row_embed"]                                # [H, C//2]
    x_embed = jnp.broadcast_to(col[None, :, :], (H, W, col.shape[1]))
    y_embed = jnp.broadcast_to(row[:, None, :], (H, W, row.shape[1]))
    pos = jnp.concatenate([x_embed, y_embed], axis=-1)           # [H, W, C]
    return pos.reshape(H * W, -1)                                # [HW, C]


def encoder_forward(params, mlvl_feats, record_len, pairwise_t_matrix, cfg):
    bev_h, bev_w, C = cfg["bev_h"], cfg["bev_w"], cfg["embed_dims"]
    FL = cfg["feature_level"]
    record_len = [int(r) for r in record_len]
    B = len(record_len)
    N = record_len[0]
    # Uniform agent count is required by the reference broadcast math (N == max_num_agent);
    # it also lets us batch all samples through each kernel (grid over B).
    assert all(r == N for r in record_len), "record_len must be uniform"

    t = jnp.stack([pairwise_t_matrix[b][:N, :N][0] for b in range(B)], 0).reshape(B * N, 2, 3)
    spatial_shapes = []
    per_level = []
    for lvl in range(FL):
        feat = mlvl_feats[lvl]                                   # [B*N, C, h, w]
        _, _, h, w = feat.shape
        feat = warp_affine_simple(feat, t, (h, w))
        f = feat.reshape(B, N, C, h * w).transpose(0, 1, 3, 2)   # [B, N, hw, C]
        f = f + params["level_embeds"][lvl][None, None, None, :]
        f = f + params["agent_embeds"][:N][None, :, None, :]
        spatial_shapes.append((h, w))
        per_level.append(f)
    feat_flatten = jnp.concatenate(per_level, axis=2)            # [B, N, sum_hw, C]
    sum_hw = feat_flatten.shape[2]
    value = feat_flatten.reshape(B, N * sum_hw, C)               # agent-major value layout

    shapes_cross = spatial_shapes * N                            # [(h,w)] * (N*FL), agent-major
    shapes_self = [(bev_h, bev_w)]

    bev_pos = positional_encoding(params, bev_h, bev_w)          # [HW, C]
    query = jnp.broadcast_to(params["bev_embedding"][None], (B, bev_h * bev_w, C))
    for bp in params["blocks"]:
        query = block_forward(bp, cfg["cfgs"], query, bev_pos, value,
                              shapes_cross, shapes_self, (bev_h, bev_w))
    return query.transpose(0, 2, 1).reshape(B, C, bev_h, bev_w)


# ----------------------------------------------------------------------------------------------
# Deterministic parameter construction (shapes per the module's __init__)
# ----------------------------------------------------------------------------------------------
def init_params(key, cfg):
    C, H, W = cfg["embed_dims"], cfg["bev_h"], cfg["bev_w"]
    FL, A = cfg["feature_level"], cfg["max_num_agent"]
    kit = iter(list(jax.random.split(key, 512)))

    def nrm(shape, scale=0.02):
        return jax.random.normal(next(kit), shape, dtype=jnp.float32) * scale

    def linear_p(fan_in, fan_out):
        return nrm((fan_in, fan_out)), nrm((fan_out,))

    def attn_p(num_points, feature_levels, num_heads=1):
        assert num_heads == 1
        wv, bv = linear_p(C, C)
        wo, bo = linear_p(C, C)
        woff, boff, waw, baw = [], [], [], []
        for L in feature_levels:   # one Linear per agent, concatenated along the level axis
            w_, b_ = linear_p(C, L * num_heads * num_points * 2)
            woff.append(w_); boff.append(b_)
            w2_, b2_ = linear_p(C, L * num_heads * num_points)
            waw.append(w2_); baw.append(b2_)
        off_w = jnp.concatenate(woff, 1); off_b = jnp.concatenate(boff, 0)
        aw_w = jnp.concatenate(waw, 1);   aw_b = jnp.concatenate(baw, 0)
        return {"value_proj_w": wv, "value_proj_b": bv,
                "out_proj_w": wo, "out_proj_b": bo,
                "proj_w": jnp.concatenate([off_w, aw_w], 1),     # fused off+aw projection
                "proj_b": jnp.concatenate([off_b, aw_b], 0),
                "off_dim": int(off_w.shape[1]),
                "num_heads": num_heads, "num_points": num_points}

    def block_p():
        layers = []
        for t in cfg["cfgs"]:
            if t == "self_attn":
                layers.append(attn_p(cfg["num_points_self"], [1]))
            elif t == "cross_attn":
                layers.append(attn_p(cfg["num_points_cross"], [FL] * A))
            elif t == "norm":
                layers.append({"gamma": jnp.ones((C,), jnp.float32),
                               "beta": jnp.zeros((C,), jnp.float32)})
            elif t == "ffn":
                w1, b1 = linear_p(C, 4 * C)
                w2, b2 = linear_p(4 * C, C)
                layers.append({"w1": w1, "b1": b1, "w2": w2, "b2": b2})
        return {"layers": layers}

    return {
        "bev_embedding": nrm((H * W, C), 1.0),
        "pos_row_embed": nrm((H, C // 2), 1.0),
        "pos_col_embed": nrm((W, C // 2), 1.0),
        "level_embeds": nrm((FL, C), 1.0),
        "agent_embeds": nrm((A, C), 1.0),
        "blocks": [block_p() for _ in range(cfg["num_blocks"])],
    }


# ----------------------------------------------------------------------------------------------
if __name__ == "__main__":
    cfg = dict(
        embed_dims=32, bev_h=16, bev_w=16, feature_level=2, max_num_agent=2,
        num_points_self=4, num_points_cross=4, num_blocks=1,
        cfgs=["self_attn", "norm", "cross_attn", "norm", "ffn", "norm"],
    )
    key = jax.random.PRNGKey(0)
    kp, k0, k1 = jax.random.split(key, 3)
    params = init_params(kp, cfg)

    # 2 samples x 2 agents; two feature scales (16x16 and 8x8), C=32.
    record_len = [2, 2]
    C = cfg["embed_dims"]
    f0 = jax.random.normal(k0, (4, C, 16, 16), dtype=jnp.float32)
    f1 = jax.random.normal(k1, (4, C, 8, 8), dtype=jnp.float32)

    # pairwise_t_matrix: normalized affine matrices (B, L, L, 2, 3); identity + a small x-shift
    # for agent 1 -> ego.
    eye = jnp.array([[1.0, 0.0, 0.0], [0.0, 1.0, 0.0]], jnp.float32)
    t = jnp.broadcast_to(eye, (2, 2, 2, 2, 3))
    pairwise_t_matrix = t + jnp.zeros((2, 2, 2, 2, 3), jnp.float32).at[:, 0, 1, 0, 2].set(0.1)

    out = encoder_forward(params, [f0, f1], record_len, pairwise_t_matrix, cfg)
    out = jax.block_until_ready(out)
    assert out.shape == (2, C, cfg["bev_h"], cfg["bev_w"]), out.shape
    assert bool(jnp.all(jnp.isfinite(out)))
    print("KERNEL_OK")
</pallas_src>

<mosaic_0001>
module attributes {stable_mosaic.version = 11 : i64} {
  func.func @_defor_attn_kernel(%arg0: i32, %arg1: memref<256x32xf32, #tpu.memory_space<vmem>>, %arg2: memref<256x32xf32, #tpu.memory_space<vmem>>, %arg3: memref<256x32xf32, #tpu.memory_space<vmem>>, %arg4: memref<32x32xf32, #tpu.memory_space<vmem>>, %arg5: memref<1x32xf32, #tpu.memory_space<vmem>>, %arg6: memref<32x12xf32, #tpu.memory_space<vmem>>, %arg7: memref<1x12xf32, #tpu.memory_space<vmem>>, %arg8: memref<32x32xf32, #tpu.memory_space<vmem>>, %arg9: memref<1x32xf32, #tpu.memory_space<vmem>>, %arg10: memref<1x32xf32, #tpu.memory_space<vmem>>, %arg11: memref<1x32xf32, #tpu.memory_space<vmem>>, %arg12: memref<256x32xf32, #tpu.memory_space<vmem>>) attributes {dimension_semantics = [#tpu.dimension_semantics<parallel>], iteration_bounds = array<i64: 2>, scalar_prefetch = 0 : i64, scratch_operands = 0 : i64, tpu.core_type = #tpu.core_type<tc>, window_params = [{transform_indices = @transform_0, window_bounds = array<i64: 256, 32>}, {pipeline_mode = #tpu.pipeline_mode<synchronous>, transform_indices = @transform_1, window_bounds = array<i64: 256, 32>}, {transform_indices = @transform_2, window_bounds = array<i64: 256, 32>}, {pipeline_mode = #tpu.pipeline_mode<synchronous>, transform_indices = @transform_3, window_bounds = array<i64: 32, 32>}, {pipeline_mode = #tpu.pipeline_mode<synchronous>, transform_indices = @transform_4, window_bounds = array<i64: 1, 32>}, {pipeline_mode = #tpu.pipeline_mode<synchronous>, transform_indices = @transform_5, window_bounds = array<i64: 32, 12>}, {pipeline_mode = #tpu.pipeline_mode<synchronous>, transform_indices = @transform_6, window_bounds = array<i64: 1, 12>}, {pipeline_mode = #tpu.pipeline_mode<synchronous>, transform_indices = @transform_7, window_bounds = array<i64: 32, 32>}, {pipeline_mode = #tpu.pipeline_mode<synchronous>, transform_indices = @transform_8, window_bounds = array<i64: 1, 32>}, {pipeline_mode = #tpu.pipeline_mode<synchronous>, transform_indices = @transform_9, window_bounds = array<i64: 1, 32>}, {pipeline_mode = #tpu.pipeline_mode<synchronous>, transform_indices = @transform_10, window_bounds = array<i64: 1, 32>}, {transform_indices = @transform_11, window_bounds = array<i64: 256, 32>}]} {
    %c0 = arith.constant 0 : index
    %c0_0 = arith.constant 0 : index
    %0 = vector.load %arg1[%c0, %c0_0] : memref<256x32xf32, #tpu.memory_space<vmem>>, vector<256x32xf32>
    %c0_1 = arith.constant 0 : index
    %c0_2 = arith.constant 0 : index
    %1 = vector.load %arg2[%c0_1, %c0_2] : memref<256x32xf32, #tpu.memory_space<vmem>>, vector<256x32xf32>
    %2 = arith.addf %0, %1 : vector<256x32xf32>
    %c0_3 = arith.constant 0 : index
    %c0_4 = arith.constant 0 : index
    %3 = vector.load %arg3[%c0_3, %c0_4] : memref<256x32xf32, #tpu.memory_space<vmem>>, vector<256x32xf32>
    %c0_5 = arith.constant 0 : index
    %c0_6 = arith.constant 0 : index
    %4 = vector.load %arg4[%c0_5, %c0_6] : memref<32x32xf32, #tpu.memory_space<vmem>>, vector<32x32xf32>
    %cst = arith.constant dense<0.000000e+00> : vector<256x32xf32>
    %5 = tpu.matmul %3, %4, %cst {dimension_numbers = #tpu.dot_dimension_numbers<[1], [0], [0], [1], [0, 0, 1, 1], [], []>} : vector<256x32xf32>, vector<32x32xf32>, vector<256x32xf32> -> vector<256x32xf32>
    %c0_7 = arith.constant 0 : index
    %c0_8 = arith.constant 0 : index
    %6 = vector.load %arg5[%c0_7, %c0_8] : memref<1x32xf32, #tpu.memory_space<vmem>>, vector<1x32xf32>
    %7 = vector.broadcast %6 : vector<1x32xf32> to vector<256x32xf32>
    %8 = arith.addf %5, %7 : vector<256x32xf32>
    %c0_9 = arith.constant 0 : index
    %c0_10 = arith.constant 0 : index
    %9 = vector.load %arg6[%c0_9, %c0_10] : memref<32x12xf32, #tpu.memory_space<vmem>>, vector<32x12xf32>
    %cst_11 = arith.constant dense<0.000000e+00> : vector<256x12xf32>
    %10 = tpu.matmul %2, %9, %cst_11 {dimension_numbers = #tpu.dot_dimension_numbers<[1], [0], [0], [1], [0, 0, 1, 1], [], []>} : vector<256x32xf32>, vector<32x12xf32>, vector<256x12xf32> -> vector<256x12xf32>
    %c0_12 = arith.constant 0 : index
    %c0_13 = arith.constant 0 : index
    %11 = vector.load %arg7[%c0_12, %c0_13] : memref<1x12xf32, #tpu.memory_space<vmem>>, vector<1x12xf32>
    %12 = vector.broadcast %11 : vector<1x12xf32> to vector<256x12xf32>
    %13 = arith.addf %10, %12 : vector<256x12xf32>
    %14 = vector.extract_strided_slice %13 {offsets = [0, 0], sizes = [256, 8], strides = [1, 1]} : vector<256x12xf32> to vector<256x8xf32>
    %15 = vector.extract_strided_slice %13 {offsets = [0, 8], sizes = [256, 4], strides = [1, 1]} : vector<256x12xf32> to vector<256x4xf32>
    %cst_14 = arith.constant dense<0xFF800000> : vector<256xf32>
    %16 = vector.multi_reduction <maximumf>, %15, %cst_14 [1] : vector<256x4xf32> to vector<256xf32>
    %17 = vector.shape_cast %16 : vector<256xf32> to vector<256x1xf32>
    %18 = vector.broadcast %17 : vector<256x1xf32> to vector<256x4xf32>
    %19 = arith.subf %15, %18 : vector<256x4xf32>
    %20 = math.exp %19 : vector<256x4xf32>
    %cst_15 = arith.constant dense<0.000000e+00> : vector<256xf32>
    %21 = vector.multi_reduction <add>, %20, %cst_15 [1] : vector<256x4xf32> to vector<256xf32>
    %22 = vector.shape_cast %21 : vector<256xf32> to vector<256x1xf32>
    %23 = tpu.reciprocal %22 {approx = true} : vector<256x1xf32> -> vector<256x1xf32>
    %24 = vector.broadcast %23 : vector<256x1xf32> to vector<256x4xf32>
    %25 = arith.mulf %20, %24 : vector<256x4xf32>
    %26 = tpu.iota {dimensions = array<i32: 0>} : vector<256x1xi32>
    %27 = arith.sitofp %26 : vector<256x1xi32> to vector<256x1xf32>
    %cst_16 = arith.constant 1.600000e+01 : f32
    %28 = vector.broadcast %cst_16 : f32 to vector<256x1xf32>
    %29 = arith.divf %27, %28 : vector<256x1xf32>
    %30 = math.floor %29 : vector<256x1xf32>
    %cst_17 = arith.constant 1.600000e+01 : f32
    %31 = vector.broadcast %cst_17 : f32 to vector<256x1xf32>
    %32 = arith.mulf %30, %31 : vector<256x1xf32>
    %33 = arith.subf %27, %32 : vector<256x1xf32>
    %cst_18 = arith.constant 5.000000e-01 : f32
    %34 = vector.broadcast %cst_18 : f32 to vector<256x1xf32>
    %35 = arith.addf %33, %34 : vector<256x1xf32>
    %cst_19 = arith.constant 1.600000e+01 : f32
    %36 = vector.broadcast %cst_19 : f32 to vector<256x1xf32>
    %37 = arith.divf %35, %36 : vector<256x1xf32>
    %cst_20 = arith.constant 5.000000e-01 : f32
    %38 = vector.broadcast %cst_20 : f32 to vector<256x1xf32>
    %39 = arith.addf %30, %38 : vector<256x1xf32>
    %cst_21 = arith.constant 1.600000e+01 : f32
    %40 = vector.broadcast %cst_21 : f32 to vector<256x1xf32>
    %41 = arith.divf %39, %40 : vector<256x1xf32>
    %cst_22 = arith.constant 0.000000e+00 : f32
    %42 = vector.broadcast %cst_22 : f32 to vector<256x32xf32>
    %43 = tpu.iota {dimensions = array<i32: 1>} : vector<1x256xi32>
    %44 = arith.sitofp %43 : vector<1x256xi32> to vector<1x256xf32>
    %cst_23 = arith.constant 1.600000e+01 : f32
    %45 = vector.broadcast %cst_23 : f32 to vector<1x256xf32>
    %46 = arith.divf %44, %45 : vector<1x256xf32>
    %47 = math.floor %46 : vector<1x256xf32>
    %cst_24 = arith.constant 1.600000e+01 : f32
    %48 = vector.broadcast %cst_24 : f32 to vector<1x256xf32>
    %49 = arith.mulf %47, %48 : vector<1x256xf32>
    %50 = arith.subf %44, %49 : vector<1x256xf32>
    %51 = vector.shape_cast %47 : vector<1x256xf32> to vector<1x256xf32>
    %52 = vector.broadcast %51 : vector<1x256xf32> to vector<256x256xf32>
    %53 = vector.shape_cast %50 : vector<1x256xf32> to vector<1x256xf32>
    %54 = vector.broadcast %53 : vector<1x256xf32> to vector<256x256xf32>
    %cst_25 = arith.constant 1.600000e+01 : f32
    %55 = vector.broadcast %cst_25 : f32 to vector<256x1xf32>
    %56 = arith.mulf %37, %55 : vector<256x1xf32>
    %cst_26 = arith.constant 5.000000e-01 : f32
    %57 = vector.broadcast %cst_26 : f32 to vector<256x1xf32>
    %58 = arith.subf %56, %57 : vector<256x1xf32>
    %cst_27 = arith.constant 1.600000e+01 : f32
    %59 = vector.broadcast %cst_27 : f32 to vector<256x1xf32>
    %60 = arith.mulf %41, %59 : vector<256x1xf32>
    %cst_28 = arith.constant 5.000000e-01 : f32
    %61 = vector.broadcast %cst_28 : f32 to vector<256x1xf32>
    %62 = arith.subf %60, %61 : vector<256x1xf32>
    %cst_29 = arith.constant 0.000000e+00 : f32
    %63 = vector.broadcast %cst_29 : f32 to vector<256x256xf32>
    %64 = vector.extract_strided_slice %14 {offsets = [0, 0], sizes = [256, 1], strides = [1, 1]} : vector<256x8xf32> to vector<256x1xf32>
    %65 = vector.extract_strided_slice %14 {offsets = [0, 1], sizes = [256, 1], strides = [1, 1]} : vector<256x8xf32> to vector<256x1xf32>
    %66 = vector.extract_strided_slice %25 {offsets = [0, 0], sizes = [256, 1], strides = [1, 1]} : vector<256x4xf32> to vector<256x1xf32>
    %67 = arith.addf %58, %64 : vector<256x1xf32>
    %68 = arith.addf %62, %65 : vector<256x1xf32>
    %69 = vector.broadcast %67 : vector<256x1xf32> to vector<256x256xf32>
    %70 = arith.subf %54, %69 : vector<256x256xf32>
    %71 = math.absf %70 : vector<256x256xf32>
    %cst_30 = arith.constant 1.000000e+00 : f32
    %72 = vector.broadcast %cst_30 : f32 to vector<256x256xf32>
    %73 = arith.subf %72, %71 : vector<256x256xf32>
    %cst_31 = arith.constant 0.000000e+00 : f32
    %74 = vector.broadcast %cst_31 : f32 to vector<256x256xf32>
    %75 = arith.maximumf %73, %74 : vector<256x256xf32>
    %76 = vector.broadcast %68 : vector<256x1xf32> to vector<256x256xf32>
    %77 = arith.subf %52, %76 : vector<256x256xf32>
    %78 = math.absf %77 : vector<256x256xf32>
    %cst_32 = arith.constant 1.000000e+00 : f32
    %79 = vector.broadcast %cst_32 : f32 to vector<256x256xf32>
    %80 = arith.subf %79, %78 : vector<256x256xf32>
    %cst_33 = arith.constant 0.000000e+00 : f32
    %81 = vector.broadcast %cst_33 : f32 to vector<256x256xf32>
    %82 = arith.maximumf %80, %81 : vector<256x256xf32>
    %83 = arith.mulf %75, %82 : vector<256x256xf32>
    %84 = vector.broadcast %66 : vector<256x1xf32> to vector<256x256xf32>
    %85 = arith.mulf %84, %83 : vector<256x256xf32>
    %86 = arith.addf %63, %85 : vector<256x256xf32>
    %87 = vector.extract_strided_slice %14 {offsets = [0, 2], sizes = [256, 1], strides = [1, 1]} : vector<256x8xf32> to vector<256x1xf32>
    %88 = vector.extract_strided_slice %14 {offsets = [0, 3], sizes = [256, 1], strides = [1, 1]} : vector<256x8xf32> to vector<256x1xf32>
    %89 = vector.extract_strided_slice %25 {offsets = [0, 1], sizes = [256, 1], strides = [1, 1]} : vector<256x4xf32> to vector<256x1xf32>
    %90 = arith.addf %58, %87 : vector<256x1xf32>
    %91 = arith.addf %62, %88 : vector<256x1xf32>
    %92 = vector.broadcast %90 : vector<256x1xf32> to vector<256x256xf32>
    %93 = arith.subf %54, %92 : vector<256x256xf32>
    %94 = math.absf %93 : vector<256x256xf32>
    %cst_34 = arith.constant 1.000000e+00 : f32
    %95 = vector.broadcast %cst_34 : f32 to vector<256x256xf32>
    %96 = arith.subf %95, %94 : vector<256x256xf32>
    %cst_35 = arith.constant 0.000000e+00 : f32
    %97 = vector.broadcast %cst_35 : f32 to vector<256x256xf32>
    %98 = arith.maximumf %96, %97 : vector<256x256xf32>
    %99 = vector.broadcast %91 : vector<256x1xf32> to vector<256x256xf32>
    %100 = arith.subf %52, %99 : vector<256x256xf32>
    %101 = math.absf %100 : vector<256x256xf32>
    %cst_36 = arith.constant 1.000000e+00 : f32
    %102 = vector.broadcast %cst_36 : f32 to vector<256x256xf32>
    %103 = arith.subf %102, %101 : vector<256x256xf32>
    %cst_37 = arith.constant 0.000000e+00 : f32
    %104 = vector.broadcast %cst_37 : f32 to vector<256x256xf32>
    %105 = arith.maximumf %103, %104 : vector<256x256xf32>
    %106 = arith.mulf %98, %105 : vector<256x256xf32>
    %107 = vector.broadcast %89 : vector<256x1xf32> to vector<256x256xf32>
    %108 = arith.mulf %107, %106 : vector<256x256xf32>
    %109 = arith.addf %86, %108 : vector<256x256xf32>
    %110 = vector.extract_strided_slice %14 {offsets = [0, 4], sizes = [256, 1], strides = [1, 1]} : vector<256x8xf32> to vector<256x1xf32>
    %111 = vector.extract_strided_slice %14 {offsets = [0, 5], sizes = [256, 1], strides = [1, 1]} : vector<256x8xf32> to vector<256x1xf32>
    %112 = vector.extract_strided_slice %25 {offsets = [0, 2], sizes = [256, 1], strides = [1, 1]} : vector<256x4xf32> to vector<256x1xf32>
    %113 = arith.addf %58, %110 : vector<256x1xf32>
    %114 = arith.addf %62, %111 : vector<256x1xf32>
    %115 = vector.broadcast %113 : vector<256x1xf32> to vector<256x256xf32>
    %116 = arith.subf %54, %115 : vector<256x256xf32>
    %117 = math.absf %116 : vector<256x256xf32>
    %cst_38 = arith.constant 1.000000e+00 : f32
    %118 = vector.broadcast %cst_38 : f32 to vector<256x256xf32>
    %119 = arith.subf %118, %117 : vector<256x256xf32>
    %cst_39 = arith.constant 0.000000e+00 : f32
    %120 = vector.broadcast %cst_39 : f32 to vector<256x256xf32>
    %121 = arith.maximumf %119, %120 : vector<256x256xf32>
    %122 = vector.broadcast %114 : vector<256x1xf32> to vector<256x256xf32>
    %123 = arith.subf %52, %122 : vector<256x256xf32>
    %124 = math.absf %123 : vector<256x256xf32>
    %cst_40 = arith.constant 1.000000e+00 : f32
    %125 = vector.broadcast %cst_40 : f32 to vector<256x256xf32>
    %126 = arith.subf %125, %124 : vector<256x256xf32>
    %cst_41 = arith.constant 0.000000e+00 : f32
    %127 = vector.broadcast %cst_41 : f32 to vector<256x256xf32>
    %128 = arith.maximumf %126, %127 : vector<256x256xf32>
    %129 = arith.mulf %121, %128 : vector<256x256xf32>
    %130 = vector.broadcast %112 : vector<256x1xf32> to vector<256x256xf32>
    %131 = arith.mulf %130, %129 : vector<256x256xf32>
    %132 = arith.addf %109, %131 : vector<256x256xf32>
    %133 = vector.extract_strided_slice %14 {offsets = [0, 6], sizes = [256, 1], strides = [1, 1]} : vector<256x8xf32> to vector<256x1xf32>
    %134 = vector.extract_strided_slice %14 {offsets = [0, 7], sizes = [256, 1], strides = [1, 1]} : vector<256x8xf32> to vector<256x1xf32>
    %135 = vector.extract_strided_slice %25 {offsets = [0, 3], sizes = [256, 1], strides = [1, 1]} : vector<256x4xf32> to vector<256x1xf32>
    %136 = arith.addf %58, %133 : vector<256x1xf32>
    %137 = arith.addf %62, %134 : vector<256x1xf32>
    %138 = vector.broadcast %136 : vector<256x1xf32> to vector<256x256xf32>
    %139 = arith.subf %54, %138 : vector<256x256xf32>
    %140 = math.absf %139 : vector<256x256xf32>
    %cst_42 = arith.constant 1.000000e+00 : f32
    %141 = vector.broadcast %cst_42 : f32 to vector<256x256xf32>
    %142 = arith.subf %141, %140 : vector<256x256xf32>
    %cst_43 = arith.constant 0.000000e+00 : f32
    %143 = vector.broadcast %cst_43 : f32 to vector<256x256xf32>
    %144 = arith.maximumf %142, %143 : vector<256x256xf32>
    %145 = vector.broadcast %137 : vector<256x1xf32> to vector<256x256xf32>
    %146 = arith.subf %52, %145 : vector<256x256xf32>
    %147 = math.absf %146 : vector<256x256xf32>
    %cst_44 = arith.constant 1.000000e+00 : f32
    %148 = vector.broadcast %cst_44 : f32 to vector<256x256xf32>
    %149 = arith.subf %148, %147 : vector<256x256xf32>
    %cst_45 = arith.constant 0.000000e+00 : f32
    %150 = vector.broadcast %cst_45 : f32 to vector<256x256xf32>
    %151 = arith.maximumf %149, %150 : vector<256x256xf32>
    %152 = arith.mulf %144, %151 : vector<256x256xf32>
    %153 = vector.broadcast %135 : vector<256x1xf32> to vector<256x256xf32>
    %154 = arith.mulf %153, %152 : vector<256x256xf32>
    %155 = arith.addf %132, %154 : vector<256x256xf32>
    %cst_46 = arith.constant dense<0.000000e+00> : vector<256x32xf32>
    %156 = tpu.matmul %155, %8, %cst_46 {dimension_numbers = #tpu.dot_dimension_numbers<[1], [0], [0], [1], [0, 0, 1, 1], [], []>} : vector<256x256xf32>, vector<256x32xf32>, vector<256x32xf32> -> vector<256x32xf32>
    %157 = arith.addf %42, %156 : vector<256x32xf32>
    %c0_47 = arith.constant 0 : index
    %c0_48 = arith.constant 0 : index
    %158 = vector.load %arg8[%c0_47, %c0_48] : memref<32x32xf32, #tpu.memory_space<vmem>>, vector<32x32xf32>
    %cst_49 = arith.constant dense<0.000000e+00> : vector<256x32xf32>
    %159 = tpu.matmul %157, %158, %cst_49 {dimension_numbers = #tpu.dot_dimension_numbers<[1], [0], [0], [1], [0, 0, 1, 1], [], []>} : vector<256x32xf32>, vector<32x32xf32>, vector<256x32xf32> -> vector<256x32xf32>
    %c0_50 = arith.constant 0 : index
    %c0_51 = arith.constant 0 : index
    %160 = vector.load %arg9[%c0_50, %c0_51] : memref<1x32xf32, #tpu.memory_space<vmem>>, vector<1x32xf32>
    %161 = vector.broadcast %160 : vector<1x32xf32> to vector<256x32xf32>
    %162 = arith.addf %159, %161 : vector<256x32xf32>
    %163 = arith.addf %162, %0 : vector<256x32xf32>
    %cst_52 = arith.constant dense<0.000000e+00> : vector<256xf32>
    %164 = vector.multi_reduction <add>, %163, %cst_52 [1] : vector<256x32xf32> to vector<256xf32>
    %165 = vector.shape_cast %164 : vector<256xf32> to vector<256x1xf32>
    %cst_53 = arith.constant 3.200000e+01 : f32
    %166 = vector.broadcast %cst_53 : f32 to vector<256x1xf32>
    %167 = arith.divf %165, %166 : vector<256x1xf32>
    %168 = vector.broadcast %167 : vector<256x1xf32> to vector<256x32xf32>
    %169 = arith.subf %163, %168 : vector<256x32xf32>
    %170 = arith.mulf %169, %169 : vector<256x32xf32>
    %cst_54 = arith.constant dense<0.000000e+00> : vector<256xf32>
    %171 = vector.multi_reduction <add>, %170, %cst_54 [1] : vector<256x32xf32> to vector<256xf32>
    %172 = vector.shape_cast %171 : vector<256xf32> to vector<256x1xf32>
    %cst_55 = arith.constant 3.200000e+01 : f32
    %173 = vector.broadcast %cst_55 : f32 to vector<256x1xf32>
    %174 = arith.divf %172, %173 : vector<256x1xf32>
    %cst_56 = arith.constant 9.99999974E-6 : f32
    %175 = vector.broadcast %cst_56 : f32 to vector<256x1xf32>
    %176 = arith.addf %174, %175 : vector<256x1xf32>
    %177 = math.rsqrt %176 : vector<256x1xf32>
    %178 = vector.broadcast %177 : vector<256x1xf32> to vector<256x32xf32>
    %179 = arith.mulf %169, %178 : vector<256x32xf32>
    %c0_57 = arith.constant 0 : index
    %c0_58 = arith.constant 0 : index
    %180 = vector.load %arg10[%c0_57, %c0_58] : memref<1x32xf32, #tpu.memory_space<vmem>>, vector<1x32xf32>
    %181 = vector.broadcast %180 : vector<1x32xf32> to vector<256x32xf32>
    %182 = arith.mulf %179, %181 : vector<256x32xf32>
    %c0_59 = arith.constant 0 : index
    %c0_60 = arith.constant 0 : index
    %183 = vector.load %arg11[%c0_59, %c0_60] : memref<1x32xf32, #tpu.memory_space<vmem>>, vector<1x32xf32>
    %184 = vector.broadcast %183 : vector<1x32xf32> to vector<256x32xf32>
    %185 = arith.addf %182, %184 : vector<256x32xf32>
    %c0_61 = arith.constant 0 : index
    %c0_62 = arith.constant 0 : index
    %186 = vector.load %arg12[%c0_61, %c0_62] : memref<256x32xf32, #tpu.memory_space<vmem>>, vector<256x32xf32>
    tpu.vector_store %arg12[%c0_61, %c0_62], %185 {strides = array<i32>} : memref<256x32xf32, #tpu.memory_space<vmem>>, vector<256x32xf32>,
    return
  }
  func.func @transform_0(%arg0: i32) -> (i32, i32) {
    %c0_i32 = arith.constant 0 : i32
    %c0_i32_0 = arith.constant 0 : i32
    return %arg0, %c0_i32 : i32, i32
  }
  func.func @transform_1(%arg0: i32) -> (i32, i32) {
    %c0_i32 = arith.constant 0 : i32
    %c0_i32_0 = arith.constant 0 : i32
    %c0_i32_1 = arith.constant 0 : i32
    return %c0_i32, %c0_i32_0 : i32, i32
  }
  func.func @transform_2(%arg0: i32) -> (i32, i32) {
    %c0_i32 = arith.constant 0 : i32
    %c0_i32_0 = arith.constant 0 : i32
    return %arg0, %c0_i32 : i32, i32
  }
  func.func @transform_3(%arg0: i32) -> (i32, i32) {
    %c0_i32 = arith.constant 0 : i32
    %c0_i32_0 = arith.constant 0 : i32
    %c0_i32_1 = arith.constant 0 : i32
    return %c0_i32, %c0_i32_0 : i32, i32
  }
  func.func @transform_4(%arg0: i32) -> (i32, i32) {
    %c0_i32 = arith.constant 0 : i32
    %c0_i32_0 = arith.constant 0 : i32
    %c0_i32_1 = arith.constant 0 : i32
    return %c0_i32, %c0_i32_0 : i32, i32
  }
  func.func @transform_5(%arg0: i32) -> (i32, i32) {
    %c0_i32 = arith.constant 0 : i32
    %c0_i32_0 = arith.constant 0 : i32
    %c0_i32_1 = arith.constant 0 : i32
    return %c0_i32, %c0_i32_0 : i32, i32
  }
  func.func @transform_6(%arg0: i32) -> (i32, i32) {
    %c0_i32 = arith.constant 0 : i32
    %c0_i32_0 = arith.constant 0 : i32
    %c0_i32_1 = arith.constant 0 : i32
    return %c0_i32, %c0_i32_0 : i32, i32
  }
  func.func @transform_7(%arg0: i32) -> (i32, i32) {
    %c0_i32 = arith.constant 0 : i32
    %c0_i32_0 = arith.constant 0 : i32
    %c0_i32_1 = arith.constant 0 : i32
    return %c0_i32, %c0_i32_0 : i32, i32
  }
  func.func @transform_8(%arg0: i32) -> (i32, i32) {
    %c0_i32 = arith.constant 0 : i32
    %c0_i32_0 = arith.constant 0 : i32
    %c0_i32_1 = arith.constant 0 : i32
    return %c0_i32, %c0_i32_0 : i32, i32
  }
  func.func @transform_9(%arg0: i32) -> (i32, i32) {
    %c0_i32 = arith.constant 0 : i32
    %c0_i32_0 = arith.constant 0 : i32
    %c0_i32_1 = arith.constant 0 : i32
    return %c0_i32, %c0_i32_0 : i32, i32
  }
  func.func @transform_10(%arg0: i32) -> (i32, i32) {
    %c0_i32 = arith.constant 0 : i32
    %c0_i32_0 = arith.constant 0 : i32
    %c0_i32_1 = arith.constant 0 : i32
    return %c0_i32, %c0_i32_0 : i32, i32
  }
  func.func @transform_11(%arg0: i32) -> (i32, i32) {
    %c0_i32 = arith.constant 0 : i32
    %c0_i32_0 = arith.constant 0 : i32
    return %arg0, %c0_i32 : i32, i32
  }
}

</mosaic_0001>

<bundles_post_ra>
// kernel: tpu_custom_call.1
= control target key start
LH: loop header
LB: loop body
LE: loop exit
PB: predicated region body
PF: predicated region fallthrough
CT: control target
= control target key end

     0   :  { %s8952_s17 = smov 0   ;;  %s14766_s0 = inlined_call_operand.vmem [shape: f32[512,32], index: 0, kind: input, shape index: {}]   ;;  %s14767_s1 = inlined_call_operand.vmem [shape: f32[256,32], index: 1, kind: input, shape index: {}]   ;;  %s14768_s2 = inlined_call_operand.vmem [shape: f32[512,32], index: 2, kind: input, shape index: {}]   ;;  %s14769_s3 = inlined_call_operand.vmem [shape: f32[32,32], index: 3, kind: input, shape index: {}]   ;;  %s14770_s4 = inlined_call_operand.vmem [shape: f32[1,32], index: 4, kind: input, shape index: {}]   ;;  %s14771_s5 = inlined_call_operand.vmem [shape: f32[32,12], index: 5, kind: input, shape index: {}]   ;;  %s14772_s6 = inlined_call_operand.vmem [shape: f32[1,12], index: 6, kind: input, shape index: {}]   ;;  %s14773_s7 = inlined_call_operand.vmem [shape: f32[32,32], index: 7, kind: input, shape index: {}]   ;;  %s14774_s8 = inlined_call_operand.vmem [shape: f32[1,32], index: 8, kind: input, shape index: {}]   ;;  %s14775_s9 = inlined_call_operand.vmem [shape: f32[1,32], index: 9, kind: input, shape index: {}]   ;;  %s14776_s10 = inlined_call_operand.vmem [shape: f32[1,32], index: 10, kind: input, shape index: {}]   ;;  %s14777_s11 = inlined_call_operand.vmem [shape: f32[512,32], index: 11, kind: output, shape index: {}]  }
   0x1 LB: > { %s7846_s18 = sadd.s32 4294967295, %s8876_s17   ;;  %p7850_p0 = scmp.ge.s32.totalorder %s8876_s17, 1  ;;  %s8876_s17 = sphi %s8952_s17, %s21_s17  }
   0x2   : > { %p349_p1 = scmp.lt.s32.totalorder %s8876_s17, 3 }
   0x4   : > { %p350_p2 = pnand %p7850_p0, %p349_p1 }
   0x6   : > { %353 = sbr.rel (%p350_p2) target bundleno = 3149 (0xc4d), region = 64 }
   0xb   : > { %v876_v0 = vld [vmem:[%s14771_s5 + $0x18] sm:$0xff]  ;;  %v875_v1 = vld [vmem:[%s14771_s5 + $0x10] sm:$0xff]  ;;  %s7851_s23 = sshll.u32 %s7846_s18, 5  ;;  %v874_v2 = vld [vmem:[%s14771_s5 + $0x8] sm:$0xff]  ;;  %vm551_vm0 = vcmask 261120   ;;  %v14783_v28 = vmov 0   ;;  %v14778_v42 = vlaneseq }
   0xc   : > { %8188 = vmatprep.subr.mxu1 %v876_v0  ;;  %p395_p3 = scmp.lt.s32.totalorder %s7851_s23, 63  ;;  %v873_v3 = vld [vmem:[%s14771_s5] sm:$0xff]  ;;  %v445_v5 = vld [vmem:[%s14767_s1 + $0x8] sm:$0xff]  ;;  %v446_v6 = vld [vmem:[%s14767_s1 + $0x10] sm:$0xff]  ;;  %8386 = vset.pattern.permute.xlu1 %v14783_v28  ;;  %v14781_v35 = vmov 1   ;;  %vm1205_vm1 = vcmask 97344  }
   0xd   : > { %8189 = vmatpush3.msra.mxu1 %v876_v0  ;;  %v444_v4 = vld [vmem:[%s14767_s1] sm:$0xff]  ;;  %v447_v14 = vld [vmem:[%s14767_s1 + $0x18] sm:$0xff]  ;;  %v449_v20 = vld [vmem:[%s14767_s1 + $0x28] sm:$0xff]  ;;  %8387 = vset.pattern.permute.xlu0 %v14781_v35  ;;  %v9043_v43 = vshrl.u32 %v14778_v42, 7  ;;  %s8882_s16 = smov 120   ;;  %vm1526_vm2 = vcmask 31744  }
   0xe   : > { %8190 = vmatprep.subr.mxu1 %v875_v1  ;;  %s16519_s23 = smov (!%p395_p3, %s7851_s23), 63  ;;  %v448_v16 = vld [vmem:[%s14767_s1 + $0x20] sm:$0xff]  ;;  %v450_v22 = vld [vmem:[%s14767_s1 + $0x30] sm:$0xff]  ;;  %v451_v26 = vld [vmem:[%s14767_s1 + $0x38] sm:$0xff] }
   0xf   : > { %8191 = vmatpush3.msra.mxu1 %v875_v1  ;;  %s8972_s28 = sshll.u32 %s16519_s23, 3  ;;  %v452_v30 = vld [vmem:[%s14767_s1 + $0x40] sm:$0xff]  ;;  %v453_v33 = vld [vmem:[%s14767_s1 + $0x48] sm:$0xff]  ;;  %v454_v37 = vld [vmem:[%s14767_s1 + $0x50] sm:$0xff]  ;;  %v1689_v44 = vadd.s32 8, %v9043_v43  ;;  %v1720_v48 = vcvt.s32.f32 %v9043_v43 }
  0x10   : > { %8192 = vmatprep.subr.mxu1 %v874_v2  ;;  %s8987_s19 = scalar_lea.vmem %s14766_s0, %s8972_s28  ;;  %v455_v40 = vld [vmem:[%s14767_s1 + $0x58] sm:$0xff]  ;;  %v9050_v61 = vld [vmem:[%s14772_s6] ss:$0 sm:$0xff]  ;;  %s10433_s30 = scalar_lea.vmem %s14768_s2, %s8972_s28 }
  0x11   : > { %8193 = vmatpush3.msra.mxu1 %v874_v2  ;;  %v412_v7 = vld [vmem:[%s8987_s19] sm:$0xff]  ;;  %v413_v8 = vld [vmem:[%s8987_s19 + $0x8] sm:$0xff]  ;;  %v414_v9 = vld [vmem:[%s8987_s19 + $0x10] sm:$0xff]  ;;  %v1721_v45 = vcvt.s32.f32 %v1689_v44  ;;  %v1753_v50 = vmul.f32 0.0625, %v1720_v48  ;;  %s14604_s13 = scalar_lea.vmem %s14777_s11, %s8972_s28 }
  0x12   : > { %8194 = vmatprep.subr.mxu1 %v873_v3  ;;  %v476_v10 = vadd.f32 %v444_v4, %v412_v7  ;;  %v477_v11 = vadd.f32 %v445_v5, %v413_v8  ;;  %v478_v12 = vadd.f32 %v446_v6, %v414_v9  ;;  %v415_v13 = vld [vmem:[%s8987_s19 + $0x18] sm:$0xff]  ;;  %v416_v15 = vld [vmem:[%s8987_s19 + $0x20] sm:$0xff]  ;;  %v417_v19 = vld [vmem:[%s8987_s19 + $0x28] sm:$0xff] }
  0x13   : > { %8195 = vmatpush3.msra.mxu1 %v873_v3  ;;  %v479_v17 = vadd.f32 %v447_v14, %v415_v13  ;;  %v480_v18 = vadd.f32 %v448_v16, %v416_v15  ;;  %v418_v21 = vld [vmem:[%s8987_s19 + $0x30] sm:$0xff]  ;;  %v481_v23 = vadd.f32 %v449_v20, %v417_v19  ;;  %v419_v25 = vld [vmem:[%s8987_s19 + $0x38] sm:$0xff]  ;;  %v420_v29 = vld [vmem:[%s8987_s19 + $0x40] sm:$0xff]  ;;  %v1754_v46 = vmul.f32 0.0625, %v1721_v45 }
  0x14   : > { %8196 = vmatprep.mubr.msk.f32.mxu1 %vm551_vm0, %v476_v10  ;;  %v482_v24 = vadd.f32 %v450_v22, %v418_v21  ;;  %v483_v27 = vadd.f32 %v451_v26, %v419_v25  ;;  %v484_v31 = vadd.f32 %v452_v30, %v420_v29  ;;  %v421_v32 = vld [vmem:[%s8987_s19 + $0x48] sm:$0xff]  ;;  %v422_v36 = vld [vmem:[%s8987_s19 + $0x50] sm:$0xff]  ;;  %v423_v39 = vld [vmem:[%s8987_s19 + $0x58] sm:$0xff]  ;;  %v1785_v52 = vfloor.f32 %v1753_v50 }
  0x15   : > { %8197 = vmatmul.mubr.msk.f32.vlgmr.msra.gmra.mxu1 %vm551_vm0, %v477_v11  ;;  %v485_v34 = vadd.f32 %v453_v33, %v421_v32  ;;  %v486_v38 = vadd.f32 %v454_v37, %v422_v36  ;;  %v487_v41 = vadd.f32 %v455_v40, %v423_v39  ;;  %v1786_v47 = vfloor.f32 %v1754_v46  ;;  %v424_v4 = vld [vmem:[%s8987_s19 + $0x60] sm:$0xff]  ;;  %v425_v8 = vld [vmem:[%s8987_s19 + $0x68] sm:$0xff]  ;;  %v458_v46 = vld [vmem:[%s14767_s1 + $0x70] sm:$0xff] }
  0x16   : > { %8199 = vmatprep.mubr.msk.f32.mxu1 %vm551_vm0, %v478_v12  ;;  %v1817_v54 = vmul.f32 16.0, %v1785_v52  ;;  %v1945_v56 = vadd.f32 0.5, %v1785_v52  ;;  %v456_v5 = vld [vmem:[%s14767_s1 + $0x60] sm:$0xff]  ;;  %v457_v9 = vld [vmem:[%s14767_s1 + $0x68] sm:$0xff]  ;;  %v14785_v20 = vmov 2   ;;  %v459_v50 = vld [vmem:[%s14767_s1 + $0x78] sm:$0xff] }
  0x17   : > { %v1818_v49 = vmul.f32 16.0, %v1786_v47  ;;  %v488_v12 = vadd.f32 %v456_v5, %v424_v4  ;;  %v489_v13 = vadd.f32 %v457_v9, %v425_v8  ;;  %v1946_v16 = vadd.f32 0.5, %v1786_v47 }
  0x18   : > { %v1849_v57 = vsub.f32 %v1720_v48, %v1817_v54  ;;  %v1977_v59 = vmul.f32 0.0625, %v1945_v56  ;;  %v1690_v54 = vadd.s32 16, %v9043_v43 }
  0x19   : > { %8200 = vmatmul.mubr.msk.f32.gmra.mxu1 %vm551_vm0, %v479_v17  ;;  %v1850_v51 = vsub.f32 %v1721_v45, %v1818_v49  ;;  %v426_v45 = vld [vmem:[%s8987_s19 + $0x70] sm:$0xff]  ;;  %v427_v49 = vld [vmem:[%s8987_s19 + $0x78] sm:$0xff] }
  0x1a   : > { %8202 = vmatprep.mubr.msk.f32.mxu1 %vm551_vm0, %v480_v18  ;;  %v1881_v60 = vadd.f32 0.5, %v1849_v57  ;;  %v2086_v0 = vmul.f32 16.0, %v1977_v59  ;;  %v1978_v18 = vmul.f32 0.0625, %v1946_v16  ;;  %v490_v48 = vadd.f32 %v458_v46, %v426_v45 }
  0x1b   : > { %v1882_v53 = vadd.f32 0.5, %v1850_v51  ;;  %v491_v52 = vadd.f32 %v459_v50, %v427_v49  ;;  %v1692_v57 = vadd.s32 32, %v9043_v43  ;;  %v1693_v49 = vadd.s32 40, %v9043_v43 }
  0x1c   : > { %v1913_v2 = vmul.f32 0.0625, %v1881_v60  ;;  %v7955_v11 = vadd.f32 -0.5, %v2086_v0  ;;  %v2087_v21 = vmul.f32 16.0, %v1978_v18 }
  0x1d   : > { %8203 = vmatmul.mubr.msk.f32.gmra.mxu1 %vm551_vm0, %v481_v23  ;;  %v1914_v55 = vmul.f32 0.0625, %v1882_v53  ;;  %v1725_v50 = vcvt.s32.f32 %v1693_v49 }
  0x1e   : > { %8205 = vmatprep.mubr.msk.f32.mxu1 %vm551_vm0, %v482_v24  ;;  %v2022_v14 = vmul.f32 16.0, %v1913_v2  ;;  %v7956_v22 = vadd.f32 -0.5, %v2087_v21  ;;  %v1691_v24 = vadd.s32 24, %v9043_v43 }
  0x1f   : > { %v2023_v58 = vmul.f32 16.0, %v1914_v55  ;;  %v1722_v55 = vcvt.s32.f32 %v1690_v54  ;;  %v1758_v54 = vmul.f32 0.0625, %v1725_v50 }
  0x20   : > { %v7923_v17 = vadd.f32 -0.5, %v2022_v14  ;;  %v1723_v25 = vcvt.s32.f32 %v1691_v24 }
  0x21   : > { %8206 = vmatmul.mubr.msk.f32.gmra.mxu1 %vm551_vm0, %v483_v27  ;;  %v7924_v62 = vadd.f32 -0.5, %v2023_v58  ;;  %v1755_v56 = vmul.f32 0.0625, %v1722_v55 }
  0x22   : > { %8208 = vmatprep.mubr.msk.f32.mxu1 %vm551_vm0, %v484_v31  ;;  %v1756_v26 = vmul.f32 0.0625, %v1723_v25 }
  0x23   : > { %v1787_v60 = vfloor.f32 %v1755_v56  ;;  %v1697_v56 = vadd.s32 72, %v9043_v43 }
  0x24   : > { %v1788_v27 = vfloor.f32 %v1756_v26 }
  0x25   : > { %8209 = vmatmul.mubr.msk.f32.gmra.mxu1 %vm551_vm0, %v485_v34  ;;  %v1819_v0 = vmul.f32 16.0, %v1787_v60  ;;  %v1947_v16 = vadd.f32 0.5, %v1787_v60 }
  0x26   : > { %8211 = vmatprep.mubr.msk.f32.mxu1 %vm551_vm0, %v486_v38  ;;  %v1820_v29 = vmul.f32 16.0, %v1788_v27  ;;  %v1948_v37 = vadd.f32 0.5, %v1788_v27 }
  0x27   : > { %v1851_v5 = vsub.f32 %v1722_v55, %v1819_v0 }
  0x28   : > { %v1852_v32 = vsub.f32 %v1723_v25, %v1820_v29  ;;  %v1980_v39 = vmul.f32 0.0625, %v1948_v37  ;;  %v429_v37 = vld [vmem:[%s8987_s19 + $0x88] sm:$0xff] }
  0x29   : > { %8212 = vmatmul.mubr.msk.f32.gmra.mxu1 %vm551_vm0, %v487_v41 }
  0x2a   : > { %8214 = vmatprep.mubr.msk.f32.mxu1 %vm551_vm0, %v488_v12  ;;  %v1884_v34 = vadd.f32 0.5, %v1852_v32  ;;  %v2089_v44 = vmul.f32 16.0, %v1980_v39  ;;  %v460_v32 = vld [vmem:[%s14767_s1 + $0x80] sm:$0xff] }
  0x2c   : > { %v1916_v36 = vmul.f32 0.0625, %v1884_v34  ;;  %v7958_v51 = vadd.f32 -0.5, %v2089_v44 }
  0x2d   : > { %8215 = vmatmul.mubr.msk.f32.gmra.mxu1 %vm551_vm0, %v489_v13 }
  0x2e   : > { %v2025_v38 = vmul.f32 16.0, %v1916_v36  ;;  %8217 = vmatprep.mubr.msk.f32.mxu1 %vm551_vm0, %v490_v48 }
  0x30   : > { %v7926_v41 = vadd.f32 -0.5, %v2025_v38  ;;  %v461_v38 = vld [vmem:[%s14767_s1 + $0x88] sm:$0xff] }
  0x31   : > { %8218 = vmatmul.mubr.msk.f32.gmra.mxu1 %vm551_vm0, %v491_v52 }
  0xd5   : > { %v8198_v63 = vpop.f32.mrf.mxu1 }
  0xd6   : > { %v9053_v1 = vadd.f32 %v8198_v63, %v9050_v61 }
  0xd7   : > { %v1046_v3 = vpop.f32.mrf.mxu1 }
  0xd8   : > { %15277 = vst [vmem:[#allocation2_spill] sm:$0xff] %v9053_v1  ;;  %v1209_v6 = vsel %vm1205_vm1, %v9053_v1, -inf  ;;  %v9062_v7 = vadd.f32 %v7924_v62, %v9053_v1  ;;  %v9069_v10 = vadd.f32 %v9050_v61, %v1046_v3  ;;  %v9086_v23 = vadd.f32 %v7956_v22, %v9053_v1 }
  0xd9   : > { %1210 = vmax.xlane.f32.xlu0 %v1209_v6  ;;  %v8201_v30 = vpop.f32.mrf.mxu1  ;;  %v1724_v62 = vcvt.s32.f32 %v1692_v57  ;;  %v1979_v22 = vmul.f32 0.0625, %v1947_v16 }
  0xda   : > { %15278 = vst [vmem:[#allocation3_spill] sm:$0xff] %v9062_v7  ;;  %2221 = vperm.xlu1 %8386, %v9062_v7   ;;  %v9075_v15 = vadd.f32 %v7955_v11, %v9069_v10  ;;  %v9080_v19 = vadd.f32 %v7923_v17, %v9069_v10  ;;  %15280 = vst [vmem:[#allocation5_spill] sm:$0xff] %v9086_v23  ;;  %v9094_v31 = vadd.f32 %v8201_v30, %v9050_v61  ;;  %v428_v30 = vld [vmem:[%s8987_s19 + $0x80] sm:$0xff] }
  0xdb   : > { %v1206_v40 = vsel %vm1205_vm1, %v9069_v10, -inf  ;;  %v1056_v58 = vpop.f32.mrf.mxu1  ;;  %v1757_v2 = vmul.f32 0.0625, %v1724_v62  ;;  %v1883_v11 = vadd.f32 0.5, %v1851_v5  ;;  %v2088_v27 = vmul.f32 16.0, %v1979_v22 }
  0xdc   : > { %15279 = vst [vmem:[#allocation4_spill] sm:$0xff] %v9080_v19  ;;  %15281 = vst [vmem:[#allocation6_spill] sm:$0xff] %v9094_v31  ;;  %v1215_v33 = vsel %vm1205_vm1, %v9094_v31, -inf  ;;  %v9105_v47 = vadd.f32 %v7926_v41, %v9094_v31  ;;  %v9115_v53 = vadd.f32 %v7958_v51, %v9094_v31  ;;  %v9132_v4 = vadd.f32 %v9050_v61, %v1056_v58 }
  0xdd   : > { %v9126_v59 = vpop.f32.mrf.mxu1  ;;  %v1789_v6 = vfloor.f32 %v1757_v2  ;;  %v1915_v13 = vmul.f32 0.0625, %v1883_v11  ;;  %v492_v36 = vadd.f32 %v460_v32, %v428_v30  ;;  %v7957_v39 = vadd.f32 -0.5, %v2088_v27 }
  0xde   : > { %8390 = vset.pattern.permute.xlu1 %v14781_v35  ;;  %15282 = vst [vmem:[#allocation7_spill] sm:$0xff] %v9105_v47  ;;  %15283 = vst [vmem:[#allocation8_spill] sm:$0xff] %v9132_v4  ;;  %v1212_v9 = vsel %vm1205_vm1, %v9132_v4, -inf  ;;  %v493_v41 = vadd.f32 %v461_v38, %v429_v37  ;;  %v1694_v51 = vadd.s32 48, %v9043_v43  ;;  %v1790_v58 = vfloor.f32 %v1758_v54  ;;  %v431_v54 = vld [vmem:[%s8987_s19 + $0x98] sm:$0xff] }
  0xdf   : > { %2632 = vperm.xlu1 %8390, %v9075_v15   ;;  %v1066_v63 = vpop.f32.mrf.mxu1  ;;  %v1821_v12 = vmul.f32 16.0, %v1789_v6  ;;  %v1949_v14 = vadd.f32 0.5, %v1789_v6  ;;  %v2024_v18 = vmul.f32 16.0, %v1915_v13  ;;  %8220 = vmatprep.mubr.msk.f32.mxu1 %vm551_vm0, %v492_v36  ;;  %v9156_v45 = vadd.f32 %v7957_v39, %v9132_v4 }
  0xe0   : > { %v9129_v3 = vadd.f32 %v9050_v61, %v1066_v63  ;;  %8221 = vmatmul.mubr.msk.f32.gmra.mxu1 %vm551_vm0, %v493_v41  ;;  %v1726_v55 = vcvt.s32.f32 %v1694_v51  ;;  %v1822_v0 = vmul.f32 16.0, %v1790_v58  ;;  %v9182_v6 = vadd.f32 %v9126_v59, %v9050_v61  ;;  %v430_v41 = vld [vmem:[%s8987_s19 + $0x90] sm:$0xff] }
  0xe1   : > { %v1853_v17 = vsub.f32 %v1724_v62, %v1821_v12  ;;  %v1981_v21 = vmul.f32 0.0625, %v1949_v14  ;;  %v7925_v25 = vadd.f32 -0.5, %v2024_v18  ;;  %15286 = vst [vmem:[#allocation11_spill] sm:$0xff] %v9156_v45  ;;  %v9172_v52 = vpop.f32.mrf.mxu1  ;;  %v1729_v62 = vcvt.s32.f32 %v1697_v56 }
  0xe2   : > { %v1218_v8 = vsel %vm1205_vm1, %v9129_v3, -inf  ;;  %v1759_v60 = vmul.f32 0.0625, %v1726_v55  ;;  %15288 = vst [vmem:[#allocation13_spill] sm:$0xff] %v9182_v6  ;;  %v1221_v13 = vsel %vm1205_vm1, %v9182_v6, -inf }
  0xe3   : > { %8391 = vset.pattern.permute.xlu1 %v14785_v20  ;;  %v1885_v24 = vadd.f32 0.5, %v1853_v17  ;;  %v2090_v26 = vmul.f32 16.0, %v1981_v21  ;;  %v1076_v57 = vpop.f32.mrf.mxu1  ;;  %v9178_v5 = vmul.f32 0.0625, %v1729_v62 }
  0xe4   : > { %3399 = vperm.xlu1 %8391, %v9080_v19   ;;  %v9176_v63 = vadd.f32 %v9050_v61, %v1076_v57  ;;  %v1791_v2 = vfloor.f32 %v1759_v60 }
  0xe5   : > { %v1917_v29 = vmul.f32 0.0625, %v1885_v24  ;;  %v7959_v34 = vadd.f32 -0.5, %v2090_v26  ;;  %v1794_v12 = vfloor.f32 %v9178_v5  ;;  %v1950_v24 = vadd.f32 0.5, %v1790_v58  ;;  %v8210_v60 = vpop.f32.mrf.mxu1  ;;  %v467_v5 = vld [vmem:[%s14767_s1 + $0xb8] sm:$0xff] }
  0xe6   : > { %v1823_v11 = vmul.f32 16.0, %v1791_v2  ;;  %v1951_v14 = vadd.f32 0.5, %v1791_v2  ;;  %v9216_v2 = vadd.f32 %v8210_v60, %v9050_v61 }
  0xe7   : > { %v9153_v44 = vadd.f32 %v7959_v34, %v9129_v3  ;;  %v1826_v18 = vmul.f32 16.0, %v1794_v12  ;;  %v1982_v30 = vmul.f32 0.0625, %v1950_v24 }
  0xe8   : > { %8392 = vset.pattern.permute.xlu1 %v14783_v28  ;;  %v1855_v17 = vsub.f32 %v1726_v55, %v1823_v11  ;;  %v1983_v59 = vmul.f32 0.0625, %v1951_v14  ;;  %v463_v55 = vld [vmem:[%s14767_s1 + $0x98] sm:$0xff]  ;;  %15293 = vst [vmem:[#allocation18_spill] sm:$0xff] %v9216_v2  ;;  %v1696_v11 = vadd.s32 64, %v9043_v43 }
  0xe9   : > { %15285 = vst [vmem:[#allocation10_spill] sm:$0xff] %v9153_v44  ;;  %v2091_v38 = vmul.f32 16.0, %v1982_v30  ;;  %v495_v58 = vadd.f32 %v463_v55, %v431_v54 }
  0xea   : > { %v1887_v22 = vadd.f32 0.5, %v1855_v17  ;;  %v2092_v26 = vmul.f32 16.0, %v1983_v59  ;;  %v1728_v14 = vcvt.s32.f32 %v1696_v11  ;;  %v1699_v17 = vadd.s32 88, %v9043_v43 }
  0xeb   : > { %v7960_v56 = vadd.f32 -0.5, %v2091_v38 }
  0xec   : > { %v7961_v34 = vadd.f32 -0.5, %v2092_v26  ;;  %v1761_v59 = vmul.f32 0.0625, %v1728_v14 }
  0xef   : > { %2637 = vperm.xlu0 %8387, %v9086_v23  }
  0xf3   : > { %8388 = vset.pattern.permute.xlu0 %v14785_v20 }
  0xf4   : > { %3403 = vperm.xlu0 %8388, %v9062_v7  }
  0xf8   : > { %8389 = vset.pattern.permute.xlu0 %v14783_v28 }
 0x108   : > { %1216 = vmax.xlane.f32.xlu1 %v1215_v33  ;;  %v9143_v33 = vadd.f32 %v7925_v25, %v9132_v4  ;;  %v1858_v25 = vsub.f32 %v1729_v62, %v1826_v18  ;;  %v1086_v18 = vpop.f32.mrf.mxu1 }
 0x109   : > { %v9236_v24 = vadd.f32 %v9050_v61, %v1086_v18  ;;  %v432_v18 = vld [vmem:[%s8987_s19 + $0xa0] sm:$0xff] }
 0x10a   : > { %15284 = vst [vmem:[#allocation9_spill] sm:$0xff] %v9143_v33  ;;  %v1890_v32 = vadd.f32 0.5, %v1858_v25  ;;  %v1793_v25 = vfloor.f32 %v1761_v59  ;;  %v464_v59 = vld [vmem:[%s14767_s1 + $0xa0] sm:$0xff] }
 0x10c   : > { %v1922_v39 = vmul.f32 0.0625, %v1890_v32  ;;  %v1825_v30 = vmul.f32 16.0, %v1793_v25 }
 0x10e   : > { %v2031_v57 = vmul.f32 16.0, %v1922_v39  ;;  %v1857_v38 = vsub.f32 %v1728_v14, %v1825_v30 }
 0x113   : > { %1207 = vmax.xlane.f32.xlu0 %v1206_v40  ;;  %v2026_v40 = vmul.f32 16.0, %v1917_v29  ;;  %v1919_v29 = vmul.f32 0.0625, %v1887_v22  ;;  %v1731_v22 = vcvt.s32.f32 %v1699_v17 }
 0x115   : > { %v7927_v46 = vadd.f32 -0.5, %v2026_v40  ;;  %v2028_v37 = vmul.f32 16.0, %v1919_v29  ;;  %v9192_v40 = vadd.f32 %v7961_v34, %v9176_v63  ;;  %v1230_v29 = vsel %vm1205_vm1, %v9236_v24, -inf }
 0x117   : > { %v9162_v48 = vadd.f32 %v7927_v46, %v9129_v3  ;;  %15289 = vst [vmem:[#allocation14_spill] sm:$0xff] %v9192_v40  ;;  %v462_v46 = vld [vmem:[%s14767_s1 + $0x90] sm:$0xff] }
 0x118   : > { %v494_v51 = vadd.f32 %v462_v46, %v430_v41 }
 0x119   : > { %2231 = vperm.xlu1 %8392, %v9105_v47   ;;  %15287 = vst [vmem:[#allocation12_spill] sm:$0xff] %v9162_v48 }
 0x11a   : > { %8223 = vmatprep.mubr.msk.f32.mxu1 %vm551_vm0, %v494_v51  ;;  %v1889_v51 = vadd.f32 0.5, %v1857_v38 }
 0x11b   : > { %8224 = vmatmul.mubr.msk.f32.gmra.mxu1 %vm551_vm0, %v495_v58 }
 0x11d   : > { %8393 = vset.pattern.permute.xlu1 %v14781_v35 }
 0x11e   : > { %2647 = vperm.xlu1 %8393, %v9115_v53  }
 0x122   : > { %8394 = vset.pattern.permute.xlu1 %v14785_v20 }
 0x123   : > { %3411 = vperm.xlu1 %8394, %v9105_v47  }
 0x127   : > { %8395 = vset.pattern.permute.xlu1 %v14783_v28 }
 0x129   : > { %2216 = vperm.xlu0 %8389, %v9080_v19  }
 0x12d   : > { %8402 = vset.pattern.permute.xlu0 %v14781_v35 }
 0x147   : > { %1213 = vmax.xlane.f32.xlu1 %v1212_v9  ;;  %v1854_v9 = vsub.f32 %v1725_v50, %v1822_v0  ;;  %v7929_v50 = vadd.f32 -0.5, %v2028_v37  ;;  %v9213_v0 = vadd.f32 %v7960_v56, %v9182_v6  ;;  %v1953_v37 = vadd.f32 0.5, %v1793_v25  ;;  %v433_v25 = vld [vmem:[%s8987_s19 + $0xa8] sm:$0xff] }
 0x148   : > { %1219 = vmax.xlane.f32.xlu0 %v1218_v8  ;;  %v1224_v8 = vsel %vm1205_vm1, %v9176_v63, -inf }
 0x149   : > { %v1886_v16 = vadd.f32 0.5, %v1854_v9  ;;  %v9210_v62 = vadd.f32 %v7929_v50, %v9176_v63  ;;  %15292 = vst [vmem:[#allocation17_spill] sm:$0xff] %v9213_v0  ;;  %v1985_v50 = vmul.f32 0.0625, %v1953_v37  ;;  %v8213_v37 = vpop.f32.mrf.mxu1 }
 0x14b   : > { %v1918_v21 = vmul.f32 0.0625, %v1886_v16  ;;  %15291 = vst [vmem:[#allocation16_spill] sm:$0xff] %v9210_v62  ;;  %v2094_v56 = vmul.f32 16.0, %v1985_v50 }
 0x14d   : > { %v2027_v27 = vmul.f32 16.0, %v1918_v21 }
 0x14f   : > { %v7928_v36 = vadd.f32 -0.5, %v2027_v27  ;;  %v9238_v27 = vmul.f32 0.0625, %v1731_v22 }
 0x151   : > { %v9199_v49 = vadd.f32 %v7928_v36, %v9182_v6  ;;  %v1796_v34 = vfloor.f32 %v9238_v27  ;;  %v9245_v36 = vadd.f32 %v9172_v52, %v9050_v61  ;;  %v469_v27 = vld [vmem:[%s14767_s1 + $0xc8] sm:$0xff] }
 0x153   : > { %15290 = vst [vmem:[#allocation15_spill] sm:$0xff] %v9199_v49  ;;  %15295 = vst [vmem:[#allocation20_spill] sm:$0xff] %v9245_v36  ;;  %v1828_v41 = vmul.f32 16.0, %v1796_v34  ;;  %v1227_v46 = vsel %vm1205_vm1, %v9245_v36, -inf }
 0x155   : > { %v1860_v55 = vsub.f32 %v1731_v22, %v1828_v41  ;;  %v496_v22 = vadd.f32 %v464_v59, %v432_v18 }
 0x157   : > { %v1892_v58 = vadd.f32 0.5, %v1860_v55  ;;  %8226 = vmatprep.mubr.msk.f32.mxu1 %vm551_vm0, %v496_v22 }
 0x158   : > { %2226 = vperm.xlu1 %8395, %v9143_v33  }
 0x159   : > { %v1924_v14 = vmul.f32 0.0625, %v1892_v58  ;;  %v1096_v58 = vpop.f32.mrf.mxu1 }
 0x15b   : > { %v2033_v30 = vmul.f32 16.0, %v1924_v14 }
 0x15c   : > { %8396 = vset.pattern.permute.xlu1 %v14781_v35 }
 0x15d   : > { %2642 = vperm.xlu1 %8396, %v9156_v45   ;;  %v7934_v50 = vadd.f32 -0.5, %v2033_v30 }
 0x15e   : > { %2652 = vperm.xlu0 %8402, %v9153_v44  }
 0x161   : > { %8397 = vset.pattern.permute.xlu1 %v14785_v20 }
 0x162   : > { %3407 = vperm.xlu1 %8397, %v9143_v33   ;;  %8403 = vset.pattern.permute.xlu0 %v14785_v20 }
 0x163   : > { %3415 = vperm.xlu0 %8403, %v9162_v48  }
 0x166   : > { %8398 = vset.pattern.permute.xlu1 %v14783_v28 }
 0x167   : > { %8407 = vset.pattern.permute.xlu0 %v14781_v35 }
 0x182   : > { %1225 = vmax.xlane.f32.xlu0 %v1224_v8  ;;  %v7932_v8 = vadd.f32 -0.5, %v2031_v57  ;;  %v1921_v57 = vmul.f32 0.0625, %v1889_v51 }
 0x184   : > { %v9223_v9 = vadd.f32 %v7932_v8, %v9216_v2  ;;  %v7963_v8 = vadd.f32 -0.5, %v2094_v56  ;;  %v2030_v11 = vmul.f32 16.0, %v1921_v57  ;;  %v1698_v56 = vadd.s32 80, %v9043_v43 }
 0x186   : > { %1222 = vmax.xlane.f32.xlu1 %v1221_v13  ;;  %15294 = vst [vmem:[#allocation19_spill] sm:$0xff] %v9223_v9  ;;  %v1695_v13 = vadd.s32 56, %v9043_v43  ;;  %v9252_v17 = vadd.f32 %v7963_v8, %v9236_v24  ;;  %v1730_v57 = vcvt.s32.f32 %v1698_v56 }
 0x188   : > { %v1727_v16 = vcvt.s32.f32 %v1695_v13  ;;  %15296 = vst [vmem:[#allocation21_spill] sm:$0xff] %v9252_v17 }
 0x18a   : > { %v1760_v21 = vmul.f32 0.0625, %v1727_v16 }
 0x18c   : > { %v1792_v26 = vfloor.f32 %v1760_v21  ;;  %v7931_v21 = vadd.f32 -0.5, %v2030_v11  ;;  %v9296_v11 = vadd.f32 %v9050_v61, %v1096_v58 }
 0x18e   : > { %v1824_v32 = vmul.f32 16.0, %v1792_v26  ;;  %v1952_v60 = vadd.f32 0.5, %v1792_v26  ;;  %v465_v26 = vld [vmem:[%s14767_s1 + $0xa8] sm:$0xff] }
 0x190   : > { %v1856_v39 = vsub.f32 %v1727_v16, %v1824_v32  ;;  %v1984_v16 = vmul.f32 0.0625, %v1952_v60  ;;  %v497_v32 = vadd.f32 %v465_v26, %v433_v25  ;;  %v1763_v60 = vmul.f32 0.0625, %v1730_v57 }
 0x192   : > { %v1888_v54 = vadd.f32 0.5, %v1856_v39  ;;  %v2093_v38 = vmul.f32 16.0, %v1984_v16  ;;  %8227 = vmatmul.mubr.msk.f32.gmra.mxu1 %vm551_vm0, %v497_v32  ;;  %v9266_v39 = vadd.f32 %v7931_v21, %v9236_v24  ;;  %v1236_v16 = vsel %vm1205_vm1, %v9296_v11, -inf }
 0x194   : > { %v1920_v52 = vmul.f32 0.0625, %v1888_v54  ;;  %15297 = vst [vmem:[#allocation22_spill] sm:$0xff] %v9266_v39  ;;  %v7962_v51 = vadd.f32 -0.5, %v2093_v38 }
 0x196   : > { %v2029_v13 = vmul.f32 16.0, %v1920_v52  ;;  %v9281_v55 = vadd.f32 %v7962_v51, %v9245_v36  ;;  %v1701_v52 = vadd.s32 104, %v9043_v43  ;;  %v1954_v51 = vadd.f32 0.5, %v1794_v12 }
 0x197   : > { %2241 = vperm.xlu1 %8398, %v9199_v49  }
 0x198   : > { %2662 = vperm.xlu0 %8407, %v9192_v40   ;;  %15301 = vst [vmem:[#allocation26_spill] sm:$0xff] %v9281_v55  ;;  %v1733_v8 = vcvt.s32.f32 %v1701_v52  ;;  %v1986_v58 = vmul.f32 0.0625, %v1954_v51  ;;  %v1700_v51 = vadd.s32 96, %v9043_v43 }
 0x19a   : > { %v9298_v14 = vmul.f32 0.0625, %v1733_v8 }
 0x19b   : > { %8399 = vset.pattern.permute.xlu1 %v14781_v35 }
 0x19c   : > { %2657 = vperm.xlu1 %8399, %v9213_v0   ;;  %8408 = vset.pattern.permute.xlu0 %v14785_v20  ;;  %v14779_v59 = vfloor.f32 %v9298_v14 }
 0x19d   : > { %3423 = vperm.xlu0 %8408, %v9210_v62  }
 0x19e   : > { %v1830_v25 = vmul.f32 16.0, %v14779_v59 }
 0x1a0   : > { %8400 = vset.pattern.permute.xlu1 %v14785_v20  ;;  %v1862_v30 = vsub.f32 %v1733_v8, %v1830_v25  ;;  %v466_v8 = vld [vmem:[%s14767_s1 + $0xb0] sm:$0xff]  ;;  %v2095_v25 = vmul.f32 16.0, %v1986_v58 }
 0x1a1   : > { %3419 = vperm.xlu1 %8400, %v9199_v49   ;;  %8409 = vset.pattern.permute.xlu0 %v14783_v28 }
 0x1a2   : > { %2261 = vperm.xlu0 %8409, %v9223_v9  }
 0x1a5   : > { %8401 = vset.pattern.permute.xlu1 %v14783_v28 }
 0x1a6   : > { %2236 = vperm.xlu1 %8401, %v9162_v48   ;;  %8413 = vset.pattern.permute.xlu0 %v14781_v35 }
 0x1c1   : > { %1231 = vmax.xlane.f32.xlu0 %v1230_v29  ;;  %v7930_v29 = vadd.f32 -0.5, %v2029_v13  ;;  %v1795_v13 = vfloor.f32 %v1763_v60 }
 0x1c3   : > { %v9269_v41 = vadd.f32 %v7930_v29, %v9245_v36  ;;  %v1827_v18 = vmul.f32 16.0, %v1795_v13  ;;  %v1955_v21 = vadd.f32 0.5, %v1795_v13  ;;  %v434_v13 = vld [vmem:[%s8987_s19 + $0xb0] sm:$0xff] }
 0x1c5   : > { %15298 = vst [vmem:[#allocation23_spill] sm:$0xff] %v9269_v41  ;;  %v1859_v22 = vsub.f32 %v1730_v57, %v1827_v18  ;;  %v1987_v26 = vmul.f32 0.0625, %v1955_v21  ;;  %v498_v18 = vadd.f32 %v466_v8, %v434_v13  ;;  %v435_v21 = vld [vmem:[%s8987_s19 + $0xb8] sm:$0xff] }
 0x1c7   : > { %v1891_v29 = vadd.f32 0.5, %v1859_v22  ;;  %v2096_v32 = vmul.f32 16.0, %v1987_v26  ;;  %v8216_v22 = vpop.f32.mrf.mxu1  ;;  %8229 = vmatprep.mubr.msk.f32.mxu1 %vm551_vm0, %v498_v18  ;;  %v499_v26 = vadd.f32 %v467_v5, %v435_v21 }
 0x1c9   : > { %v1923_v38 = vmul.f32 0.0625, %v1891_v29  ;;  %v7965_v56 = vadd.f32 -0.5, %v2096_v32  ;;  %8230 = vmatmul.mubr.msk.f32.gmra.mxu1 %vm551_vm0, %v499_v26 }
 0x1ca   : > { %1228 = vmax.xlane.f32.xlu1 %v1227_v46  ;;  %v9272_v46 = vadd.f32 %v8213_v37, %v9050_v61  ;;  %v1233_v37 = vsel %vm1205_vm1, %v9216_v2, -inf }
 0x1cb   : > { %v2032_v57 = vmul.f32 16.0, %v1923_v38  ;;  %v9310_v60 = vadd.f32 %v7965_v56, %v9296_v11  ;;  %v1732_v56 = vcvt.s32.f32 %v1700_v51 }
 0x1cc   : > { %15299 = vst [vmem:[#allocation24_spill] sm:$0xff] %v9272_v46  ;;  %v9278_v54 = vadd.f32 %v7934_v50, %v9272_v46  ;;  %v1894_v50 = vadd.f32 0.5, %v1862_v30  ;;  %v9327_v30 = vadd.f32 %v8216_v22, %v9050_v61 }
 0x1cd   : > { %15302 = vst [vmem:[#allocation27_spill] sm:$0xff] %v9310_v60  ;;  %v1765_v58 = vmul.f32 0.0625, %v1732_v56 }
 0x1ce   : > { %15300 = vst [vmem:[#allocation25_spill] sm:$0xff] %v9278_v54  ;;  %v1926_v52 = vmul.f32 0.0625, %v1894_v50  ;;  %15304 = vst [vmem:[#allocation29_spill] sm:$0xff] %v9327_v30 }
 0x1d0   : > { %v2035_v12 = vmul.f32 16.0, %v1926_v52  ;;  %v1106_v52 = vpop.f32.mrf.mxu1 }
 0x1d1   : > { %v9349_v8 = vadd.f32 %v9050_v61, %v1106_v52  ;;  %v1239_v52 = vsel %vm1205_vm1, %v9272_v46, -inf }
 0x1d2   : > { %v7936_v32 = vadd.f32 -0.5, %v2035_v12 }
 0x1d3   : > { %v1242_v21 = vsel %vm1205_vm1, %v9349_v8, -inf }
 0x1d4   : > { %v9332_v38 = vadd.f32 %v7936_v32, %v9327_v30 }
 0x1d6   : > { %15305 = vst [vmem:[#allocation30_spill] sm:$0xff] %v9332_v38 }
 0x1d7   : > { %2672 = vperm.xlu0 %8413, %v9252_v17  }
 0x1db   : > { %2251 = vperm.xlu1 %8401, %v9269_v41   ;;  %8414 = vset.pattern.permute.xlu0 %v14785_v20 }
 0x1dc   : > { %3431 = vperm.xlu0 %8414, %v9266_v39  }
 0x1df   : > { %8404 = vset.pattern.permute.xlu1 %v14781_v35 }
 0x1e0   : > { %2667 = vperm.xlu1 %8404, %v9281_v55   ;;  %8415 = vset.pattern.permute.xlu0 %v14783_v28 }
 0x1e1   : > { %2271 = vperm.xlu0 %8415, %v9278_v54  }
 0x1e4   : > { %8405 = vset.pattern.permute.xlu1 %v14785_v20 }
 0x1e5   : > { %3427 = vperm.xlu1 %8405, %v9269_v41   ;;  %8419 = vset.pattern.permute.xlu0 %v14781_v35  ;;  %v440_v41 = vld [vmem:[%s8987_s19 + $0xe0] sm:$0xff] }
 0x1e9   : > { %8406 = vset.pattern.permute.xlu1 %v14783_v28 }
 0x1ea   : > { %2246 = vperm.xlu1 %8406, %v9210_v62  }
 0x1ee   : > { %8410 = vset.pattern.permute.xlu1 %v14781_v35 }
 0x200   : > { %1237 = vmax.xlane.f32.xlu0 %v1236_v16  ;;  %v7933_v16 = vadd.f32 -0.5, %v2032_v57  ;;  %v1703_v57 = vadd.s32 120, %v9043_v43 }
 0x202   : > { %v9323_v29 = vadd.f32 %v7933_v16, %v9296_v11  ;;  %v1735_v13 = vcvt.s32.f32 %v1703_v57  ;;  %v1797_v16 = vfloor.f32 %v1765_v58 }
 0x204   : > { %15303 = vst [vmem:[#allocation28_spill] sm:$0xff] %v9323_v29  ;;  %v9351_v18 = vmul.f32 0.0625, %v1735_v13  ;;  %v1829_v5 = vmul.f32 16.0, %v1797_v16  ;;  %v1957_v22 = vadd.f32 0.5, %v1797_v16 }
 0x206   : > { %v14780_v12 = vfloor.f32 %v9351_v18  ;;  %v1989_v32 = vmul.f32 0.0625, %v1957_v22  ;;  %v436_v22 = vld [vmem:[%s8987_s19 + $0xc0] sm:$0xff] }
 0x208   : > { %v1832_v26 = vmul.f32 16.0, %v14780_v12  ;;  %v2098_v57 = vmul.f32 16.0, %v1989_v32  ;;  %v437_v32 = vld [vmem:[%s8987_s19 + $0xc8] sm:$0xff] }
 0x20a   : > { %v1864_v51 = vsub.f32 %v1735_v13, %v1832_v26  ;;  %v7967_v16 = vadd.f32 -0.5, %v2098_v57  ;;  %v468_v13 = vld [vmem:[%s14767_s1 + $0xc0] sm:$0xff] }
 0x20b   : > { %v500_v26 = vadd.f32 %v468_v13, %v436_v22  ;;  %v1705_v22 = vadd.s32 136, %v9043_v43 }
 0x20c   : > { %v1896_v42 = vadd.f32 0.5, %v1864_v51  ;;  %v9363_v12 = vadd.f32 %v7967_v16, %v9349_v8  ;;  %v8219_v51 = vpop.f32.mrf.mxu1 }
 0x20d   : > { %8232 = vmatprep.mubr.msk.f32.mxu1 %vm551_vm0, %v500_v26  ;;  %v1737_v26 = vcvt.s32.f32 %v1705_v22 }
 0x20e   : > { %1234 = vmax.xlane.f32.xlu1 %v1233_v37  ;;  %v7964_v37 = vadd.f32 -0.5, %v2095_v25  ;;  %v1861_v25 = vsub.f32 %v1732_v56, %v1829_v5  ;;  %v1928_v5 = vmul.f32 0.0625, %v1896_v42  ;;  %15307 = vst [vmem:[#allocation32_spill] sm:$0xff] %v9363_v12  ;;  %v1116_v13 = vpop.f32.mrf.mxu1 }
 0x210   : > { %v9335_v50 = vadd.f32 %v7964_v37, %v9216_v2  ;;  %v1893_v37 = vadd.f32 0.5, %v1861_v25 }
 0x212   : > { %15306 = vst [vmem:[#allocation31_spill] sm:$0xff] %v9335_v50  ;;  %v1925_v58 = vmul.f32 0.0625, %v1893_v37  ;;  %v501_v37 = vadd.f32 %v469_v27, %v437_v32  ;;  %v9402_v32 = vadd.f32 %v9050_v61, %v1116_v13 }
 0x214   : > { %v2034_v56 = vmul.f32 16.0, %v1925_v58  ;;  %8233 = vmatmul.mubr.msk.f32.gmra.mxu1 %vm551_vm0, %v501_v37  ;;  %v1248_v37 = vsel %vm1205_vm1, %v9402_v32, -inf }
 0x216   : > { %2682 = vperm.xlu0 %8419, %v9310_v60   ;;  %v7935_v25 = vadd.f32 -0.5, %v2034_v56  ;;  %v1702_v56 = vadd.s32 112, %v9043_v43 }
 0x218   : > { %v9377_v57 = vadd.f32 %v7935_v25, %v9349_v8 }
 0x21a   : > { %8420 = vset.pattern.permute.xlu0 %v14785_v20  ;;  %15308 = vst [vmem:[#allocation33_spill] sm:$0xff] %v9377_v57 }
 0x21b   : > { %3439 = vperm.xlu0 %8420, %v9323_v29  }
 0x21f   : > { %2677 = vperm.xlu1 %8410, %v9335_v50   ;;  %8421 = vset.pattern.permute.xlu0 %v14783_v28 }
 0x220   : > { %2281 = vperm.xlu0 %8421, %v9332_v38  }
 0x223   : > { %8411 = vset.pattern.permute.xlu1 %v14785_v20 }
 0x224   : > { %3435 = vperm.xlu1 %8411, %v9223_v9   ;;  %8425 = vset.pattern.permute.xlu0 %v14781_v35 }
 0x228   : > { %8412 = vset.pattern.permute.xlu1 %v14783_v28 }
 0x229   : > { %2256 = vperm.xlu1 %8412, %v9266_v39  }
 0x22d   : > { %8416 = vset.pattern.permute.xlu1 %v14781_v35 }
 0x23f   : > { %1243 = vmax.xlane.f32.xlu0 %v1242_v21  ;;  %v1956_v21 = vadd.f32 0.5, %v1796_v34  ;;  %v2037_v34 = vmul.f32 16.0, %v1928_v5  ;;  %v1734_v5 = vcvt.s32.f32 %v1702_v56 }
 0x241   : > { %v1988_v59 = vmul.f32 0.0625, %v1956_v21  ;;  %v7938_v58 = vadd.f32 -0.5, %v2037_v34  ;;  %v1767_v25 = vmul.f32 0.0625, %v1734_v5  ;;  %v9404_v34 = vmul.f32 0.0625, %v1737_v26 }
 0x243   : > { %v2097_v42 = vmul.f32 16.0, %v1988_v59  ;;  %v1799_v27 = vfloor.f32 %v1767_v25 }
 0x245   : > { %v7966_v21 = vadd.f32 -0.5, %v2097_v42  ;;  %v14793_v42 = vfloor.f32 %v9404_v34 }
 0x247   : > { %v9388_v16 = vadd.f32 %v7966_v21, %v9272_v46  ;;  %v1834_v56 = vmul.f32 16.0, %v14793_v42  ;;  %v443_v46 = vld [vmem:[%s8987_s19 + $0xf8] sm:$0xff] }
 0x249   : > { %15311 = vst [vmem:[#allocation36_spill] sm:$0xff] %v9388_v16  ;;  %v1866_v13 = vsub.f32 %v1737_v26, %v1834_v56  ;;  %v470_v26 = vld [vmem:[%s14767_s1 + $0xd0] sm:$0xff] }
 0x24d   : > { %1240 = vmax.xlane.f32.xlu1 %v1239_v52  ;;  %v9380_v52 = vadd.f32 %v8219_v51, %v9050_v61  ;;  %v1831_v51 = vmul.f32 16.0, %v1799_v27 }
 0x24f   : > { %15309 = vst [vmem:[#allocation34_spill] sm:$0xff] %v9380_v52  ;;  %v9385_v59 = vadd.f32 %v7938_v58, %v9380_v52  ;;  %v1959_v58 = vadd.f32 0.5, %v1799_v27  ;;  %v1863_v21 = vsub.f32 %v1734_v5, %v1831_v51  ;;  %v1251_v48 = vsel %vm1205_vm1, %v9380_v52, -inf }
 0x251   : > { %15310 = vst [vmem:[#allocation35_spill] sm:$0xff] %v9385_v59  ;;  %v1991_v22 = vmul.f32 0.0625, %v1959_v58  ;;  %v438_v58 = vld [vmem:[%s8987_s19 + $0xd0] sm:$0xff] }
 0x252   : > { %v502_v56 = vadd.f32 %v470_v26, %v438_v58  ;;  %v15320_v58 = vmov 1   ;;  %v1704_v26 = vadd.s32 128, %v9043_v43 }
 0x253   : > { %v2100_v25 = vmul.f32 16.0, %v1991_v22 }
 0x254   : > { %8235 = vmatprep.mubr.msk.f32.mxu1 %vm551_vm0, %v502_v56  ;;  %v1707_v56 = vadd.s32 152, %v9043_v43 }
 0x255   : > { %2692 = vperm.xlu0 %8425, %v9363_v12   ;;  %v7969_v27 = vadd.f32 -0.5, %v2100_v25 }
 0x257   : > { %v9416_v42 = vadd.f32 %v7969_v27, %v9402_v32  ;;  %v15316_v27 = vmov 2  }
 0x259   : > { %8426 = vset.pattern.permute.xlu0 %v14785_v20  ;;  %15313 = vst [vmem:[#allocation37_spill] sm:$0xff] %v9416_v42 }
 0x25a   : > { %3447 = vperm.xlu0 %8426, %v9377_v57  }
 0x25e   : > { %2687 = vperm.xlu1 %8416, %v9388_v16   ;;  %8427 = vset.pattern.permute.xlu0 %v14783_v28 }
 0x25f   : > { %2291 = vperm.xlu0 %8427, %v9385_v59  }
 0x262   : > { %8417 = vset.pattern.permute.xlu1 %v14785_v20 }
 0x263   : > { %3443 = vperm.xlu1 %8417, %v9278_v54   ;;  %8431 = vset.pattern.permute.xlu0 %v14781_v35 }
 0x267   : > { %8418 = vset.pattern.permute.xlu1 %v14783_v28  ;;  %v1245_v28 = vsel %vm1205_vm1, %v9327_v30, -inf }
 0x268   : > { %2266 = vperm.xlu1 %8418, %v9323_v29   ;;  %v1898_v29 = vadd.f32 0.5, %v1866_v13 }
 0x26a   : > { %v1930_v51 = vmul.f32 0.0625, %v1898_v29 }
 0x26c   : > { %8422 = vset.pattern.permute.xlu1 %v14781_v35  ;;  %v1895_v35 = vadd.f32 0.5, %v1863_v21 }
 0x26e   : > { %v1927_v20 = vmul.f32 0.0625, %v1895_v35  ;;  %v439_v35 = vld [vmem:[%s8987_s19 + $0xd8] sm:$0xff] }
 0x270   : > { %v2036_v5 = vmul.f32 16.0, %v1927_v20  ;;  %v8222_v20 = vpop.f32.mrf.mxu1 }
 0x271   : > { %v9433_v13 = vadd.f32 %v8222_v20, %v9050_v61 }
 0x272   : > { %v7937_v21 = vadd.f32 -0.5, %v2036_v5 }
 0x273   : > { %15315 = vst [vmem:[#allocation39_spill] sm:$0xff] %v9433_v13 }
 0x27e   : > { %1249 = vmax.xlane.f32.xlu0 %v1248_v37  ;;  %v15312_v37 = vfloor.f32 %v9298_v14  ;;  %v471_v14 = vld [vmem:[%s14767_s1 + $0xd8] sm:$0xff] }
 0x27f   : > { %v503_v22 = vadd.f32 %v471_v14, %v439_v35  ;;  %v1126_v35 = vpop.f32.mrf.mxu1 }
 0x280   : > { %v1958_v39 = vadd.f32 0.5, %v15312_v37 }
 0x281   : > { %8236 = vmatmul.mubr.msk.f32.gmra.mxu1 %vm551_vm0, %v503_v22  ;;  %v9455_v22 = vadd.f32 %v9050_v61, %v1126_v35 }
 0x282   : > { %v1990_v54 = vmul.f32 0.0625, %v1958_v39  ;;  %v9430_v39 = vadd.f32 %v7937_v21, %v9402_v32  ;;  %v1736_v21 = vcvt.s32.f32 %v1704_v26 }
 0x284   : > { %v2099_v29 = vmul.f32 16.0, %v1990_v54  ;;  %15314 = vst [vmem:[#allocation38_spill] sm:$0xff] %v9430_v39  ;;  %v1769_v14 = vmul.f32 0.0625, %v1736_v21 }
 0x286   : > { %v7968_v37 = vadd.f32 -0.5, %v2099_v29  ;;  %v1801_v20 = vfloor.f32 %v1769_v14 }
 0x288   : > { %v9441_v5 = vadd.f32 %v7968_v37, %v9327_v30  ;;  %v1833_v37 = vmul.f32 16.0, %v1801_v20  ;;  %v1961_v26 = vadd.f32 0.5, %v1801_v20  ;;  %v15321_v30 = vfloor.f32 %v9351_v18 }
 0x28a   : > { %15318 = vst [vmem:[#allocation41_spill] sm:$0xff] %v9441_v5  ;;  %v1993_v9 = vmul.f32 0.0625, %v1961_v26  ;;  %v441_v26 = vld [vmem:[%s8987_s19 + $0xe8] sm:$0xff] }
 0x28c   : > { %1246 = vmax.xlane.f32.xlu1 %v1245_v28  ;;  %v2039_v28 = vmul.f32 16.0, %v1930_v51  ;;  %v15319_v51 = vmov 0   ;;  %v2102_v14 = vmul.f32 16.0, %v1993_v9  ;;  %v473_v9 = vld [vmem:[%s14767_s1 + $0xe8] sm:$0xff] }
 0x28e   : > { %v7940_v25 = vadd.f32 -0.5, %v2039_v28  ;;  %v1739_v28 = vcvt.s32.f32 %v1707_v56  ;;  %v7971_v20 = vadd.f32 -0.5, %v2102_v14 }
 0x290   : > { %v9438_v54 = vadd.f32 %v7940_v25, %v9433_v13  ;;  %v9457_v29 = vmul.f32 0.0625, %v1739_v28  ;;  %v1254_v25 = vsel %vm1205_vm1, %v9455_v22, -inf }
 0x292   : > { %15317 = vst [vmem:[#allocation40_spill] sm:$0xff] %v9438_v54  ;;  %v15333_v36 = vfloor.f32 %v9457_v29 }
 0x294   : > { %2702 = vperm.xlu0 %8431, %v9416_v42   ;;  %v1964_v19 = vadd.f32 0.5, %v15333_v36 }
 0x298   : > { %8432 = vset.pattern.permute.xlu0 %v15316_v27 }
 0x299   : > { %3455 = vperm.xlu0 %8432, %v9430_v39  }
 0x29d   : > { %2697 = vperm.xlu1 %8422, %v9441_v5   ;;  %8433 = vset.pattern.permute.xlu0 %v15319_v51 }
 0x29e   : > { %2301 = vperm.xlu0 %8433, %v9438_v54  }
 0x2a1   : > { %8423 = vset.pattern.permute.xlu1 %v15316_v27 }
 0x2a2   : > { %3451 = vperm.xlu1 %8423, %v9332_v38   ;;  %8437 = vset.pattern.permute.xlu0 %v15320_v58  ;;  %v1865_v38 = vsub.f32 %v1736_v21, %v1833_v37  ;;  %v472_v21 = vld [vmem:[%s14767_s1 + $0xe0] sm:$0xff] }
 0x2a3   : > { %v504_v37 = vadd.f32 %v472_v21, %v440_v41 }
 0x2a4   : > { %v1897_v35 = vadd.f32 0.5, %v1865_v38 }
 0x2a5   : > { %8238 = vmatprep.mubr.msk.f32.mxu1 %vm551_vm0, %v504_v37 }
 0x2a6   : > { %8424 = vset.pattern.permute.xlu1 %v15319_v51  ;;  %v1929_v33 = vmul.f32 0.0625, %v1897_v35  ;;  %v8225_v35 = vpop.f32.mrf.mxu1 }
 0x2a7   : > { %2276 = vperm.xlu1 %8424, %v9377_v57   ;;  %v14811_v57 = vfloor.f32 %v9457_v29 }
 0x2a8   : > { %v2038_v38 = vmul.f32 16.0, %v1929_v33  ;;  %v9486_v33 = vadd.f32 %v8225_v35, %v9050_v61  ;;  %v1706_v61 = vadd.s32 144, %v9043_v43 }
 0x2a9   : > { %v1836_v56 = vmul.f32 16.0, %v14811_v57 }
 0x2aa   : > { %v7939_v18 = vadd.f32 -0.5, %v2038_v38  ;;  %15324 = vst [vmem:[#allocation44_spill] sm:$0xff] %v9486_v33  ;;  %v1738_v37 = vcvt.s32.f32 %v1706_v61 }
 0x2ab   : > { %8428 = vset.pattern.permute.xlu1 %v15320_v58  ;;  %v1868_v62 = vsub.f32 %v1739_v28, %v1836_v56  ;;  %v505_v28 = vadd.f32 %v473_v9, %v441_v26  ;;  %v1709_v26 = vadd.s32 168, %v9043_v43  ;;  %v1136_v9 = vpop.f32.mrf.mxu1 }
 0x2ac   : > { %v9483_v14 = vadd.f32 %v7939_v18, %v9455_v22  ;;  %v1771_v38 = vmul.f32 0.0625, %v1738_v37 }
 0x2ad   : > { %v1900_v7 = vadd.f32 0.5, %v1868_v62  ;;  %8239 = vmatmul.mubr.msk.f32.gmra.mxu1 %vm551_vm0, %v505_v28  ;;  %v1741_v28 = vcvt.s32.f32 %v1709_v26  ;;  %v8228_v2 = vpop.f32.mrf.mxu1 }
 0x2ae   : > { %15323 = vst [vmem:[#allocation43_spill] sm:$0xff] %v9483_v14  ;;  %v1803_v18 = vfloor.f32 %v1771_v38  ;;  %v474_v38 = vld [vmem:[%s14767_s1 + $0xf0] sm:$0xff] }
 0x2af   : > { %v1932_v56 = vmul.f32 0.0625, %v1900_v7 }
 0x2bd   : > { %1255 = vmax.xlane.f32.xlu0 %v1254_v25  ;;  %v1960_v25 = vadd.f32 0.5, %v15321_v30  ;;  %v9479_v30 = vadd.f32 %v7971_v20, %v9455_v22 }
 0x2bf   : > { %v1992_v62 = vmul.f32 0.0625, %v1960_v25  ;;  %15322 = vst [vmem:[#allocation42_spill] sm:$0xff] %v9479_v30 }
 0x2c1   : > { %v2101_v41 = vmul.f32 16.0, %v1992_v62 }
 0x2c3   : > { %v7970_v21 = vadd.f32 -0.5, %v2101_v41  ;;  %v1835_v41 = vmul.f32 16.0, %v1803_v18 }
 0x2c5   : > { %v9494_v20 = vadd.f32 %v7970_v21, %v9380_v52  ;;  %v1963_v21 = vadd.f32 0.5, %v1803_v18  ;;  %v1867_v61 = vsub.f32 %v1738_v37, %v1835_v41  ;;  %v1257_v37 = vsel %vm1205_vm1, %v9433_v13, -inf }
 0x2c7   : > { %15326 = vst [vmem:[#allocation46_spill] sm:$0xff] %v9494_v20  ;;  %v1995_v57 = vmul.f32 0.0625, %v1963_v21  ;;  %v15327_v21 = vfloor.f32 %v9404_v34 }
 0x2c9   : > { %v2104_v49 = vmul.f32 16.0, %v1995_v57 }
 0x2cb   : > { %1252 = vmax.xlane.f32.xlu1 %v1251_v48  ;;  %v2041_v48 = vmul.f32 16.0, %v1932_v56  ;;  %v9510_v56 = vld [vmem:[%s14772_s6] ss:$0 sm:$0xff] }
 0x2cc   : > { %v9513_v62 = vadd.f32 %v9510_v56, %v1136_v9  ;;  %v9544_v34 = vadd.f32 %v9510_v56, %v8228_v2  ;;  %v1708_v2 = vadd.s32 160, %v9043_v43 }
 0x2cd   : > { %v7942_v7 = vadd.f32 -0.5, %v2041_v48  ;;  %v9515_v48 = vmul.f32 0.0625, %v1741_v28 }
 0x2ce   : > { %v1260_v35 = vsel %vm1205_vm1, %v9513_v62, -inf  ;;  %15330 = vst [vmem:[#allocation49_spill] sm:$0xff] %v9544_v34 }
 0x2cf   : > { %v9491_v25 = vadd.f32 %v7942_v7, %v9486_v33  ;;  %v14820_v7 = vfloor.f32 %v9515_v48  ;;  %v15339_v4 = vfloor.f32 %v9515_v48 }
 0x2d1   : > { %15325 = vst [vmem:[#allocation45_spill] sm:$0xff] %v9491_v25  ;;  %v1838_v26 = vmul.f32 16.0, %v14820_v7 }
 0x2d3   : > { %2712 = vperm.xlu0 %8437, %v9479_v30   ;;  %v1870_v9 = vsub.f32 %v1741_v28, %v1838_v26 }
 0x2d5   : > { %v1902_v28 = vadd.f32 0.5, %v1870_v9 }
 0x2d7   : > { %8438 = vset.pattern.permute.xlu0 %v15316_v27 }
 0x2d8   : > { %3463 = vperm.xlu0 %8438, %v9483_v14  }
 0x2dc   : > { %2707 = vperm.xlu1 %8428, %v9494_v20   ;;  %8439 = vset.pattern.permute.xlu0 %v15319_v51 }
 0x2dd   : > { %2311 = vperm.xlu0 %8439, %v9491_v25  }
 0x2e0   : > { %8429 = vset.pattern.permute.xlu1 %v15316_v27 }
 0x2e1   : > { %3459 = vperm.xlu1 %8429, %v9385_v59   ;;  %8443 = vset.pattern.permute.xlu0 %v15320_v58  ;;  %v442_v59 = vld [vmem:[%s8987_s19 + $0xf0] sm:$0xff] }
 0x2e2   : > { %v506_v52 = vadd.f32 %v474_v38, %v442_v59  ;;  %v7973_v59 = vadd.f32 -0.5, %v2104_v49  ;;  %v1934_v38 = vmul.f32 0.0625, %v1902_v28  ;;  %v1146_v28 = vpop.f32.mrf.mxu1 }
 0x2e4   : > { %8241 = vmatprep.mubr.msk.f32.mxu1 %vm551_vm0, %v506_v52  ;;  %v9537_v57 = vadd.f32 %v7973_v59, %v9513_v62  ;;  %v9566_v59 = vadd.f32 %v9510_v56, %v1146_v28 }
 0x2e5   : > { %8430 = vset.pattern.permute.xlu1 %v15319_v51 }
 0x2e6   : > { %2286 = vperm.xlu1 %8430, %v9430_v39   ;;  %v1899_v39 = vadd.f32 0.5, %v1867_v61  ;;  %v1962_v61 = vadd.f32 0.5, %v15327_v21  ;;  %15328 = vst [vmem:[#allocation47_spill] sm:$0xff] %v9537_v57 }
 0x2e8   : > { %v1931_v41 = vmul.f32 0.0625, %v1899_v39  ;;  %v1994_v7 = vmul.f32 0.0625, %v1962_v61 }
 0x2ea   : > { %8434 = vset.pattern.permute.xlu1 %v15320_v58  ;;  %v2040_v26 = vmul.f32 16.0, %v1931_v41  ;;  %v2103_v39 = vmul.f32 16.0, %v1994_v7  ;;  %v1740_v7 = vcvt.s32.f32 %v1708_v2  ;;  %v1711_v41 = vadd.s32 184, %v9043_v43 }
 0x2ec   : > { %v7972_v49 = vadd.f32 -0.5, %v2103_v39  ;;  %v1773_v21 = vmul.f32 0.0625, %v1740_v7  ;;  %v1743_v61 = vcvt.s32.f32 %v1711_v41 }
 0x2fc   : > { %1261 = vmax.xlane.f32.xlu0 %v1260_v35  ;;  %v475_v35 = vld [vmem:[%s14767_s1 + $0xf8] sm:$0xff] }
 0x2fd   : > { %v507_v18 = vadd.f32 %v475_v35, %v443_v46  ;;  %v7941_v46 = vadd.f32 -0.5, %v2040_v26  ;;  %v2043_v35 = vmul.f32 16.0, %v1934_v38  ;;  %v1805_v26 = vfloor.f32 %v1773_v21 }
 0x2fe   : > { %v9568_v38 = vmul.f32 0.0625, %v1743_v61  ;;  %v1263_v21 = vsel %vm1205_vm1, %v9486_v33, -inf }
 0x2ff   : > { %8242 = vmatmul.mubr.msk.f32.gmra.mxu1 %vm551_vm0, %v507_v18  ;;  %v9541_v52 = vadd.f32 %v7941_v46, %v9513_v62  ;;  %v7944_v9 = vadd.f32 -0.5, %v2043_v35  ;;  %v1266_v46 = vsel %vm1205_vm1, %v9566_v59, -inf  ;;  %v1837_v35 = vmul.f32 16.0, %v1805_v26 }
 0x300   : > { %v14833_v39 = vfloor.f32 %v9568_v38  ;;  %v15346_v1 = vfloor.f32 %v9568_v38 }
 0x301   : > { %15329 = vst [vmem:[#allocation48_spill] sm:$0xff] %v9541_v52  ;;  %v9549_v18 = vadd.f32 %v7944_v9, %v9544_v34  ;;  %v1965_v9 = vadd.f32 0.5, %v1805_v26 }
 0x302   : > { %v1840_v2 = vmul.f32 16.0, %v14833_v39  ;;  %v1968_v30 = vadd.f32 0.5, %v15346_v1 }
 0x303   : > { %15331 = vst [vmem:[#allocation50_spill] sm:$0xff] %v9549_v18 }
 0x304   : > { %v2000_v42 = vmul.f32 0.0625, %v1968_v30  ;;  %v9687_v30 = vpop.xlane.xlu0 %1210 }
 0x305   : > { %15351 = vst [vmem:[#allocation67_spill] sm:$0xff] %v9687_v30 }
 0x30a   : > { %1258 = vmax.xlane.f32.xlu1 %v1257_v37  ;;  %v9552_v37 = vadd.f32 %v7972_v49, %v9433_v13  ;;  %v1869_v49 = vsub.f32 %v1740_v7, %v1837_v35  ;;  %v1996_v7 = vmul.f32 0.0625, %v1964_v19 }
 0x30c   : > { %15332 = vst [vmem:[#allocation51_spill] sm:$0xff] %v9552_v37  ;;  %v1901_v41 = vadd.f32 0.5, %v1869_v49 }
 0x30e   : > { %v1933_v13 = vmul.f32 0.0625, %v1901_v41  ;;  %v1713_v41 = vadd.s32 200, %v9043_v43 }
 0x310   : > { %v2042_v6 = vmul.f32 16.0, %v1933_v13 }
 0x312   : > { %2722 = vperm.xlu0 %8443, %v9537_v57  }
 0x316   : > { %8444 = vset.pattern.permute.xlu0 %v15316_v27 }
 0x317   : > { %3471 = vperm.xlu0 %8444, %v9541_v52  }
 0x31b   : > { %2717 = vperm.xlu1 %8434, %v9552_v37   ;;  %8445 = vset.pattern.permute.xlu0 %v15319_v51 }
 0x31c   : > { %2321 = vperm.xlu0 %8445, %v9549_v18  }
 0x31f   : > { %8435 = vset.pattern.permute.xlu1 %v15316_v27 }
 0x320   : > { %3467 = vperm.xlu1 %8435, %v9438_v54   ;;  %8449 = vset.pattern.permute.xlu0 %v15320_v58  ;;  %v1872_v54 = vsub.f32 %v1743_v61, %v1840_v2  ;;  %v8231_v61 = vpop.f32.mrf.mxu1 }
 0x322   : > { %v1904_v47 = vadd.f32 0.5, %v1872_v54  ;;  %v9587_v54 = vadd.f32 %v9510_v56, %v8231_v61 }
 0x324   : > { %8436 = vset.pattern.permute.xlu1 %v15319_v51  ;;  %v1936_v26 = vmul.f32 0.0625, %v1904_v47  ;;  %15336 = vst [vmem:[#allocation54_spill] sm:$0xff] %v9587_v54 }
 0x325   : > { %2296 = vperm.xlu1 %8436, %v9483_v14   ;;  %v1997_v14 = vmul.f32 0.0625, %v1965_v9  ;;  %v7943_v9 = vadd.f32 -0.5, %v2042_v6  ;;  %v1710_v6 = vadd.s32 176, %v9043_v43 }
 0x326   : > { %v2045_v49 = vmul.f32 16.0, %v1936_v26 }
 0x327   : > { %v2106_v28 = vmul.f32 16.0, %v1997_v14  ;;  %v2105_v14 = vmul.f32 16.0, %v1996_v7  ;;  %v9584_v2 = vadd.f32 %v7943_v9, %v9566_v59  ;;  %v1742_v13 = vcvt.s32.f32 %v1710_v6 }
 0x328   : > { %v7946_v36 = vadd.f32 -0.5, %v2045_v49 }
 0x329   : > { %8440 = vset.pattern.permute.xlu1 %v15320_v58  ;;  %15335 = vst [vmem:[#allocation53_spill] sm:$0xff] %v9584_v2  ;;  %v7974_v29 = vadd.f32 -0.5, %v2105_v14 }
 0x32a   : > { %v9592_v19 = vadd.f32 %v7946_v36, %v9587_v54 }
 0x32b   : > { %v9595_v47 = vadd.f32 %v7974_v29, %v9486_v33 }
 0x32c   : > { %15337 = vst [vmem:[#allocation55_spill] sm:$0xff] %v9592_v19 }
 0x32d   : > { %15338 = vst [vmem:[#allocation56_spill] sm:$0xff] %v9595_v47 }
 0x33b   : > { %1267 = vmax.xlane.f32.xlu0 %v1266_v46  ;;  %v7975_v46 = vadd.f32 -0.5, %v2106_v28  ;;  %v1156_v28 = vpop.f32.mrf.mxu1 }
 0x33c   : > { %v9609_v26 = vadd.f32 %v9510_v56, %v1156_v28 }
 0x33d   : > { %v9580_v35 = vadd.f32 %v7975_v46, %v9566_v59  ;;  %v1745_v46 = vcvt.s32.f32 %v1713_v41 }
 0x33e   : > { %v1272_v49 = vsel %vm1205_vm1, %v9609_v26, -inf }
 0x33f   : > { %15334 = vst [vmem:[#allocation52_spill] sm:$0xff] %v9580_v35  ;;  %v9611_v9 = vmul.f32 0.0625, %v1745_v46 }
 0x341   : > { %v14843_v14 = vfloor.f32 %v9611_v9  ;;  %v15368_v17 = vfloor.f32 %v9611_v9 }
 0x343   : > { %v1842_v6 = vmul.f32 16.0, %v14843_v14 }
 0x349   : > { %1264 = vmax.xlane.f32.xlu1 %v1263_v21  ;;  %v1775_v21 = vmul.f32 0.0625, %v1742_v13 }
 0x34b   : > { %v1807_v7 = vfloor.f32 %v1775_v21  ;;  %v1269_v21 = vsel %vm1205_vm1, %v9544_v34, -inf }
 0x34d   : > { %v1839_v61 = vmul.f32 16.0, %v1807_v7  ;;  %v1967_v36 = vadd.f32 0.5, %v1807_v7 }
 0x34f   : > { %v1871_v29 = vsub.f32 %v1742_v13, %v1839_v61  ;;  %v1999_v39 = vmul.f32 0.0625, %v1967_v36 }
 0x351   : > { %2732 = vperm.xlu0 %8449, %v9580_v35   ;;  %v1903_v41 = vadd.f32 0.5, %v1871_v29  ;;  %v2108_v28 = vmul.f32 16.0, %v1999_v39  ;;  %v1966_v35 = vadd.f32 0.5, %v15339_v4 }
 0x353   : > { %v1998_v13 = vmul.f32 0.0625, %v1966_v35  ;;  %v1712_v35 = vadd.s32 192, %v9043_v43 }
 0x355   : > { %8450 = vset.pattern.permute.xlu0 %v15316_v27  ;;  %v2107_v39 = vmul.f32 16.0, %v1998_v13 }
 0x356   : > { %3479 = vperm.xlu0 %8450, %v9584_v2  }
 0x357   : > { %v7976_v48 = vadd.f32 -0.5, %v2107_v39 }
 0x35a   : > { %2727 = vperm.xlu1 %8440, %v9595_v47   ;;  %8451 = vset.pattern.permute.xlu0 %v15319_v51 }
 0x35b   : > { %2331 = vperm.xlu0 %8451, %v9592_v19  }
 0x35e   : > { %8441 = vset.pattern.permute.xlu1 %v15316_v27 }
 0x35f   : > { %3475 = vperm.xlu1 %8441, %v9491_v25   ;;  %8455 = vset.pattern.permute.xlu0 %v15320_v58  ;;  %v1874_v25 = vsub.f32 %v1745_v46, %v1842_v6  ;;  %v8234_v46 = vpop.f32.mrf.mxu1 }
 0x361   : > { %v1906_v33 = vadd.f32 0.5, %v1874_v25  ;;  %v9630_v25 = vadd.f32 %v9510_v56, %v8234_v46 }
 0x363   : > { %8442 = vset.pattern.permute.xlu1 %v15319_v51  ;;  %v1938_v7 = vmul.f32 0.0625, %v1906_v33  ;;  %15342 = vst [vmem:[#allocation59_spill] sm:$0xff] %v9630_v25  ;;  %v1281_v60 = vsel %vm1205_vm1, %v9630_v25, -inf }
 0x364   : > { %2306 = vperm.xlu1 %8442, %v9541_v52   ;;  %v1935_v52 = vmul.f32 0.0625, %v1903_v41 }
 0x365   : > { %v2047_v29 = vmul.f32 16.0, %v1938_v7  ;;  %v1166_v7 = vpop.f32.mrf.mxu1 }
 0x366   : > { %v2044_v31 = vmul.f32 16.0, %v1935_v52  ;;  %v1714_v52 = vadd.s32 208, %v9043_v43  ;;  %v9656_v46 = vadd.f32 %v9510_v56, %v1166_v7 }
 0x367   : > { %v7948_v4 = vadd.f32 -0.5, %v2047_v29 }
 0x368   : > { %8446 = vset.pattern.permute.xlu1 %v15320_v58  ;;  %v7945_v36 = vadd.f32 -0.5, %v2044_v31  ;;  %v9638_v31 = vadd.f32 %v7976_v48, %v9544_v34  ;;  %v1746_v41 = vcvt.s32.f32 %v1714_v52  ;;  %15345 = vst [vmem:[#allocation62_spill] sm:$0xff] %v9656_v46 }
 0x369   : > { %v9635_v33 = vadd.f32 %v7948_v4, %v9630_v25 }
 0x36a   : > { %v9627_v6 = vadd.f32 %v7945_v36, %v9609_v26  ;;  %15344 = vst [vmem:[#allocation61_spill] sm:$0xff] %v9638_v31 }
 0x36b   : > { %15343 = vst [vmem:[#allocation60_spill] sm:$0xff] %v9635_v33 }
 0x36c   : > { %15341 = vst [vmem:[#allocation58_spill] sm:$0xff] %v9627_v6 }
 0x37a   : > { %1273 = vmax.xlane.f32.xlu0 %v1272_v49  ;;  %v7977_v49 = vadd.f32 -0.5, %v2108_v28  ;;  %v1744_v28 = vcvt.s32.f32 %v1712_v35  ;;  %v1278_v35 = vsel %vm1205_vm1, %v9656_v46, -inf }
 0x37c   : > { %v9623_v61 = vadd.f32 %v7977_v49, %v9609_v26  ;;  %v9652_v49 = vmul.f32 0.0625, %v1746_v41  ;;  %v1777_v13 = vmul.f32 0.0625, %v1744_v28 }
 0x37e   : > { %15340 = vst [vmem:[#allocation57_spill] sm:$0xff] %v9623_v61  ;;  %v14851_v29 = vfloor.f32 %v9652_v49  ;;  %v1809_v4 = vfloor.f32 %v1777_v13 }
 0x380   : > { %v1843_v39 = vmul.f32 16.0, %v14851_v29  ;;  %v1841_v14 = vmul.f32 16.0, %v1809_v4 }
 0x382   : > { %v9662_v52 = vsub.f32 %v1746_v41, %v1843_v39  ;;  %v1275_v41 = vsel %vm1205_vm1, %v9587_v54, -inf }
 0x388   : > { %1270 = vmax.xlane.f32.xlu1 %v1269_v21  ;;  %v1715_v21 = vadd.s32 216, %v9043_v43 }
 0x38a   : > { %v1747_v36 = vcvt.s32.f32 %v1715_v21 }
 0x38c   : > { %v9660_v48 = vmul.f32 0.0625, %v1747_v36 }
 0x38e   : > { %v14859_v21 = vfloor.f32 %v9660_v48 }
 0x390   : > { %2742 = vperm.xlu0 %8455, %v9623_v61   ;;  %v1844_v7 = vmul.f32 16.0, %v14859_v21 }
 0x392   : > { %v1876_v29 = vsub.f32 %v1747_v36, %v1844_v7  ;;  %v8237_v36 = vpop.f32.mrf.mxu1  ;;  %v2109_v7 = vmul.f32 16.0, %v2000_v42 }
 0x393   : > { %v9683_v1 = vadd.f32 %v9510_v56, %v8237_v36 }
 0x394   : > { %8456 = vset.pattern.permute.xlu0 %v15316_v27  ;;  %v1908_v57 = vadd.f32 0.5, %v1876_v29  ;;  %v7978_v29 = vadd.f32 -0.5, %v2109_v7  ;;  %v1717_v7 = vadd.s32 232, %v9043_v43 }
 0x395   : > { %3487 = vperm.xlu0 %8456, %v9627_v6   ;;  %15350 = vst [vmem:[#allocation66_spill] sm:$0xff] %v9683_v1 }
 0x396   : > { %v9693_v42 = vadd.f32 %v7978_v29, %v9587_v54  ;;  %v1749_v21 = vcvt.s32.f32 %v1717_v7 }
 0x398   : > { %15353 = vst [vmem:[#allocation69_spill] sm:$0xff] %v9693_v42 }
 0x399   : > { %2737 = vperm.xlu1 %8446, %v9638_v31   ;;  %8457 = vset.pattern.permute.xlu0 %v15319_v51 }
 0x39a   : > { %2341 = vperm.xlu0 %8457, %v9635_v33  }
 0x39d   : > { %8447 = vset.pattern.permute.xlu1 %v15316_v27 }
 0x39e   : > { %3483 = vperm.xlu1 %8447, %v9549_v18   ;;  %8460 = vset.pattern.permute.xlu0 %v15320_v58  ;;  %v1969_v18 = vadd.f32 0.5, %v1809_v4 }
 0x3a0   : > { %v2001_v34 = vmul.f32 0.0625, %v1969_v18 }
 0x3a2   : > { %8448 = vset.pattern.permute.xlu1 %v15319_v51  ;;  %v2110_v13 = vmul.f32 16.0, %v2001_v34 }
 0x3a3   : > { %2316 = vperm.xlu1 %8448, %v9584_v2   ;;  %v1873_v2 = vsub.f32 %v1744_v28, %v1841_v14  ;;  %v1940_v28 = vmul.f32 0.0625, %v1908_v57 }
 0x3a4   : > { %v7979_v4 = vadd.f32 -0.5, %v2110_v13 }
 0x3a5   : > { %v1905_v61 = vadd.f32 0.5, %v1873_v2  ;;  %v2049_v34 = vmul.f32 16.0, %v1940_v28 }
 0x3a6   : > { %v9676_v18 = vadd.f32 %v7979_v4, %v9656_v46 }
 0x3a7   : > { %8452 = vset.pattern.permute.xlu1 %v15320_v58  ;;  %v1937_v39 = vmul.f32 0.0625, %v1905_v61  ;;  %v7950_v38 = vadd.f32 -0.5, %v2049_v34 }
 0x3a8   : > { %15348 = vst [vmem:[#allocation64_spill] sm:$0xff] %v9676_v18 }
 0x3a9   : > { %v2046_v14 = vmul.f32 16.0, %v1937_v39  ;;  %v9690_v57 = vadd.f32 %v7950_v38, %v9683_v1 }
 0x3ab   : > { %v7947_v2 = vadd.f32 -0.5, %v2046_v14  ;;  %15352 = vst [vmem:[#allocation68_spill] sm:$0xff] %v9690_v57  ;;  %v1716_v14 = vadd.s32 224, %v9043_v43 }
 0x3ad   : > { %v9680_v61 = vadd.f32 %v7947_v2, %v9656_v46  ;;  %v1748_v34 = vcvt.s32.f32 %v1716_v14  ;;  %v9729_v14 = vmul.f32 0.0625, %v1749_v21 }
 0x3af   : > { %15349 = vst [vmem:[#allocation65_spill] sm:$0xff] %v9680_v61  ;;  %v9720_v38 = vmul.f32 0.0625, %v1748_v34 }
 0x3b9   : > { %1279 = vmax.xlane.f32.xlu0 %v1278_v35  ;;  %v9673_v35 = vpop.permute.xlu1 %2221 }
 0x3ba   : > { %15347 = vst [vmem:[#allocation63_spill] sm:$0xff] %v9673_v35 }
 0x3bd   : > { %v9695_v13 = vpop.permute.xlu1 %2632 }
 0x3be   : > { %15354 = vst [vmem:[#allocation70_spill] sm:$0xff] %v9695_v13  ;;  %v14880_v13 = vfloor.f32 %v9729_v14 }
 0x3c1   : > { %v9703_v39 = vpop.permute.xlu1 %3399 }
 0x3c2   : > { %15356 = vst [vmem:[#allocation72_spill] sm:$0xff] %v9703_v39 }
 0x3c5   : > { %v9711_v28 = vpop.xlane.xlu1 %1216 }
 0x3c6   : > { %15358 = vst [vmem:[#allocation74_spill] sm:$0xff] %v9711_v28 }
 0x3c7   : > { %1276 = vmax.xlane.f32.xlu1 %v1275_v41  ;;  %v9699_v41 = vpop.permute.xlu0 %2637 }
 0x3c8   : > { %15355 = vst [vmem:[#allocation71_spill] sm:$0xff] %v9699_v41 }
 0x3c9   : > { %v9749_v28 = vpop.permute.xlu1 %2231 }
 0x3ca   : > { %15365 = vst [vmem:[#allocation80_spill] sm:$0xff] %v9749_v28 }
 0x3cb   : > { %v9707_v4 = vpop.permute.xlu0 %3403 }
 0x3cc   : > { %15357 = vst [vmem:[#allocation73_spill] sm:$0xff] %v9707_v4 }
 0x3cf   : > { %2752 = vperm.xlu0 %8460, %v9676_v18   ;;  %v9714_v2 = vpop.xlane.xlu0 %1207 }
 0x3d3   : > { %8461 = vset.pattern.permute.xlu0 %v15316_v27  ;;  %v9717_v36 = vpop.permute.xlu0 %2216 }
 0x3d4   : > { %3495 = vperm.xlu0 %8461, %v9680_v61   ;;  %15359 = vst [vmem:[#allocation75_spill] sm:$0xff] %v9717_v36 }
 0x3d7   : > { %v9722_v29 = vpop.xlane.xlu0 %1219 }
 0x3d8   : > { %2747 = vperm.xlu1 %8452, %v9693_v42   ;;  %8462 = vset.pattern.permute.xlu0 %v15319_v51 }
 0x3d9   : > { %2351 = vperm.xlu0 %8462, %v9690_v57  }
 0x3db   : > { %v9727_v39 = vpop.permute.xlu0 %2652 }
 0x3dc   : > { %8453 = vset.pattern.permute.xlu1 %v15316_v27  ;;  %15360 = vst [vmem:[#allocation76_spill] sm:$0xff] %v9727_v39  ;;  %v15363_v39 = vfloor.f32 %v9652_v49  ;;  %v1970_v49 = vadd.f32 0.5, %v15368_v17 }
 0x3dd   : > { %3491 = vperm.xlu1 %8453, %v9592_v19   ;;  %8465 = vset.pattern.permute.xlu0 %v15320_v58  ;;  %v14870_v19 = vfloor.f32 %v9720_v38 }
 0x3df   : > { %v1845_v4 = vmul.f32 16.0, %v14870_v19  ;;  %v9737_v35 = vpop.permute.xlu0 %3415  ;;  %v1846_v19 = vmul.f32 16.0, %v14880_v13 }
 0x3e0   : > { %15362 = vst [vmem:[#allocation78_spill] sm:$0xff] %v9737_v35 }
 0x3e1   : > { %8454 = vset.pattern.permute.xlu1 %v15319_v51  ;;  %v9731_v41 = vsub.f32 %v1748_v34, %v1845_v4  ;;  %v1971_v4 = vadd.f32 0.5, %v15363_v39  ;;  %v1878_v34 = vsub.f32 %v1749_v21, %v1846_v19 }
 0x3e2   : > { %2326 = vperm.xlu1 %8454, %v9627_v6   ;;  %v1176_v6 = vpop.f32.mrf.mxu1 }
 0x3e3   : > { %v9734_v36 = vadd.f32 %v9510_v56, %v1176_v6  ;;  %v9743_v54 = vpop.xlane.xlu0 %1225  ;;  %v2003_v6 = vmul.f32 0.0625, %v1971_v4  ;;  %v1910_v30 = vadd.f32 0.5, %v1878_v34 }
 0x3e4   : > { %v8240_v39 = vpop.f32.mrf.mxu1 }
 0x3e5   : > { %15361 = vst [vmem:[#allocation77_spill] sm:$0xff] %v9734_v36  ;;  %v1284_v7 = vsel %vm1205_vm1, %v9734_v36, -inf  ;;  %v2112_v35 = vmul.f32 16.0, %v2003_v6  ;;  %v1942_v13 = vmul.f32 0.0625, %v1910_v30 }
 0x3e6   : > { %8458 = vset.pattern.permute.xlu1 %v15320_v58 }
 0x3e7   : > { %v9747_v18 = vpop.permute.xlu0 %2662  ;;  %v7981_v19 = vadd.f32 -0.5, %v2112_v35  ;;  %v2051_v21 = vmul.f32 16.0, %v1942_v13 }
 0x3e8   : > { %15364 = vst [vmem:[#allocation79_spill] sm:$0xff] %v9747_v18  ;;  %v2002_v18 = vmul.f32 0.0625, %v1970_v49 }
 0x3e9   : > { %v9762_v34 = vadd.f32 %v7981_v19, %v9734_v36  ;;  %v7952_v30 = vadd.f32 -0.5, %v2051_v21 }
 0x3eb   : > { %v9751_v12 = vpop.permute.xlu0 %3423  ;;  %15370 = vst [vmem:[#allocation84_spill] sm:$0xff] %v9762_v34 }
 0x3ec   : > { %15366 = vst [vmem:[#allocation81_spill] sm:$0xff] %v9751_v12  ;;  %v9767_v12 = vadd.f32 %v9510_v56, %v8240_v39 }
 0x3ee   : > { %v9775_v9 = vadd.f32 %v7952_v30, %v9767_v12  ;;  %v1719_v30 = vadd.s32 248, %v9043_v43 }
 0x3ef   : > { %v9759_v4 = vpop.permute.xlu0 %2261 }
 0x3f0   : > { %15369 = vst [vmem:[#allocation83_spill] sm:$0xff] %v9759_v4  ;;  %15373 = vst [vmem:[#allocation87_spill] sm:$0xff] %v9775_v9  ;;  %v1751_v4 = vcvt.s32.f32 %v1719_v30 }
 0x3f8   : > { %1285 = vmax.xlane.f32.xlu0 %v1284_v7  ;;  %v9755_v7 = vpop.permute.xlu1 %2647 }
 0x3f9   : > { %15367 = vst [vmem:[#allocation82_spill] sm:$0xff] %v9755_v7  ;;  %v2111_v7 = vmul.f32 16.0, %v2002_v18 }
 0x3fb   : > { %v7980_v35 = vadd.f32 -0.5, %v2111_v7 }
 0x3fc   : > { %v9764_v6 = vpop.permute.xlu1 %3411 }
 0x3fd   : > { %15371 = vst [vmem:[#allocation85_spill] sm:$0xff] %v9764_v6  ;;  %v9784_v18 = vadd.f32 %v7980_v35, %v9630_v25 }
 0x3ff   : > { %15376 = vst [vmem:[#allocation90_spill] sm:$0xff] %v9784_v18 }
 0x400   : > { %v9770_v17 = vpop.xlane.xlu1 %1213 }
 0x401   : > { %15372 = vst [vmem:[#allocation86_spill] sm:$0xff] %v9770_v17 }
 0x404   : > { %v9781_v49 = vpop.permute.xlu1 %2226 }
 0x405   : > { %15375 = vst [vmem:[#allocation89_spill] sm:$0xff] %v9781_v49 }
 0x406   : > { %1282 = vmax.xlane.f32.xlu1 %v1281_v60  ;;  %v9772_v60 = vpop.xlane.xlu0 %1231 }
 0x408   : > { %v9790_v21 = vpop.permute.xlu1 %2642 }
 0x409   : > { %15378 = vst [vmem:[#allocation92_spill] sm:$0xff] %v9790_v21  ;;  %v9806_v21 = vmul.f32 0.0625, %v1751_v4 }
 0x40a   : > { %v9778_v13 = vpop.permute.xlu0 %2672 }
 0x40b   : > { %15374 = vst [vmem:[#allocation88_spill] sm:$0xff] %v9778_v13 }
 0x40c   : > { %v9797_v39 = vpop.permute.xlu1 %3407 }
 0x40d   : > { %15380 = vst [vmem:[#allocation94_spill] sm:$0xff] %v9797_v39 }
 0x40e   : > { %2762 = vperm.xlu0 %8465, %v9762_v34   ;;  %v9788_v19 = vpop.permute.xlu0 %3431 }
 0x40f   : > { %15377 = vst [vmem:[#allocation91_spill] sm:$0xff] %v9788_v19  ;;  %v1186_v19 = vpop.f32.mrf.mxu1 }
 0x410   : > { %v9800_v35 = vpop.xlane.xlu1 %1222 }
 0x411   : > { %15381 = vst [vmem:[#allocation95_spill] sm:$0xff] %v9800_v35 }
 0x412   : > { %8466 = vset.pattern.permute.xlu0 %v15319_v51  ;;  %v9794_v7 = vpop.permute.xlu0 %2271 }
 0x413   : > { %2361 = vperm.xlu0 %8466, %v9775_v9   ;;  %15379 = vst [vmem:[#allocation93_spill] sm:$0xff] %v9794_v7  ;;  %v9811_v7 = vadd.f32 %v9510_v56, %v1186_v19 }
 0x414   : > { %v9808_v6 = vpop.permute.xlu1 %2241 }
 0x415   : > { %15383 = vst [vmem:[#allocation97_spill] sm:$0xff] %v9808_v6  ;;  %v1290_v28 = vsel %vm1205_vm1, %v9811_v7, -inf }
 0x416   : > { %v9802_v13 = vpop.xlane.xlu0 %1237 }
 0x417   : > { %2757 = vperm.xlu1 %8458, %v9784_v18   ;;  %8469 = vset.pattern.permute.xlu0 %v15320_v58 }
 0x418   : > { %v9818_v25 = vpop.permute.xlu1 %2657 }
 0x419   : > { %15385 = vst [vmem:[#allocation99_spill] sm:$0xff] %v9818_v25  ;;  %v1287_v25 = vsel %vm1205_vm1, %v9683_v1, -inf }
 0x41a   : > { %v9804_v49 = vpop.permute.xlu0 %2682 }
 0x41b   : > { %8459 = vset.pattern.permute.xlu1 %v15319_v51  ;;  %15382 = vst [vmem:[#allocation96_spill] sm:$0xff] %v9804_v49  ;;  %v15386_v49 = vfloor.f32 %v9720_v38  ;;  %v15391_v38 = vfloor.f32 %v9660_v48 }
 0x41c   : > { %2336 = vperm.xlu1 %8459, %v9680_v61   ;;  %v14910_v61 = vfloor.f32 %v9806_v21  ;;  %v9826_v35 = vpop.permute.xlu1 %3419 }
 0x41d   : > { %v1973_v34 = vadd.f32 0.5, %v15386_v49  ;;  %15388 = vst [vmem:[#allocation101_spill] sm:$0xff] %v9826_v35  ;;  %v1972_v49 = vadd.f32 0.5, %v15391_v38 }
 0x41e   : > { %v9814_v39 = vpop.permute.xlu0 %3439  ;;  %v1848_v30 = vmul.f32 16.0, %v14910_v61 }
 0x41f   : > { %15384 = vst [vmem:[#allocation98_spill] sm:$0xff] %v9814_v39  ;;  %v2005_v17 = vmul.f32 0.0625, %v1973_v34 }
 0x420   : > { %8463 = vset.pattern.permute.xlu1 %v15320_v58  ;;  %v1880_v19 = vsub.f32 %v1751_v4, %v1848_v30  ;;  %v9830_v45 = vpop.permute.xlu1 %2236 }
 0x421   : > { %v2114_v44 = vmul.f32 16.0, %v2005_v17  ;;  %15389 = vst [vmem:[#allocation102_spill] sm:$0xff] %v9830_v45  ;;  %v1907_v45 = vadd.f32 0.5, %v9662_v52 }
 0x422   : > { %v9824_v6 = vpop.permute.xlu0 %2281  ;;  %v1912_v40 = vadd.f32 0.5, %v1880_v19  ;;  %v8243_v19 = vpop.f32.mrf.mxu1 }
 0x423   : > { %15387 = vst [vmem:[#allocation100_spill] sm:$0xff] %v9824_v6  ;;  %v7983_v4 = vadd.f32 -0.5, %v2114_v44  ;;  %v2004_v6 = vmul.f32 0.0625, %v1972_v49  ;;  %v1939_v44 = vmul.f32 0.0625, %v1907_v45 }
 0x424   : > { %v1944_v61 = vmul.f32 0.0625, %v1912_v40  ;;  %v9838_v30 = vpop.xlane.xlu1 %1228  ;;  %v9847_v40 = vadd.f32 %v9510_v56, %v8243_v19 }
 0x425   : > { %15392 = vst [vmem:[#allocation104_spill] sm:$0xff] %v9838_v30  ;;  %v9841_v17 = vadd.f32 %v7983_v4, %v9811_v7  ;;  %v2048_v52 = vmul.f32 16.0, %v1939_v44 }
 0x426   : > { %v9828_v39 = vpop.xlane.xlu0 %1243  ;;  %v2053_v34 = vmul.f32 16.0, %v1944_v61 }
 0x427   : > { %15393 = vst [vmem:[#allocation105_spill] sm:$0xff] %v9841_v17 }
 0x428   : > { %v9849_v48 = vpop.permute.xlu1 %2251 }
 0x429   : > { %15395 = vst [vmem:[#allocation107_spill] sm:$0xff] %v9849_v48 }
 0x42c   : > { %v9858_v4 = vpop.permute.xlu1 %2667 }
 0x42d   : > { %15398 = vst [vmem:[#allocation110_spill] sm:$0xff] %v9858_v4 }
 0x430   : > { %v9868_v45 = vpop.permute.xlu1 %3427 }
 0x431   : > { %15400 = vst [vmem:[#allocation112_spill] sm:$0xff] %v9868_v45 }
 0x432   : > { %1291 = vmax.xlane.f32.xlu0 %v1290_v28  ;;  %v9834_v28 = vpop.permute.xlu0 %2692 }
 0x433   : > { %15390 = vst [vmem:[#allocation103_spill] sm:$0xff] %v9834_v28  ;;  %v7954_v28 = vadd.f32 -0.5, %v2053_v34 }
 0x434   : > { %v9877_v44 = vpop.permute.xlu1 %2246 }
 0x435   : > { %v9853_v61 = vadd.f32 %v7954_v28, %v9847_v40  ;;  %15403 = vst [vmem:[#allocation115_spill] sm:$0xff] %v9877_v44 }
 0x436   : > { %v9844_v35 = vpop.permute.xlu0 %3447 }
 0x437   : > { %15394 = vst [vmem:[#allocation106_spill] sm:$0xff] %v9844_v35  ;;  %15396 = vst [vmem:[#allocation108_spill] sm:$0xff] %v9853_v61 }
 0x43a   : > { %v9855_v38 = vpop.permute.xlu0 %2291 }
 0x43b   : > { %15397 = vst [vmem:[#allocation109_spill] sm:$0xff] %v9855_v38  ;;  %v1718_v38 = vadd.s32 240, %v9043_v43 }
 0x43d   : > { %v1750_v45 = vcvt.s32.f32 %v1718_v38 }
 0x43e   : > { %v9864_v19 = vpop.xlane.xlu0 %1249 }
 0x43f   : > { %v1783_v48 = vmul.f32 0.0625, %v1750_v45 }
 0x440   : > { %1288 = vmax.xlane.f32.xlu1 %v1287_v25  ;;  %v2113_v25 = vmul.f32 16.0, %v2004_v6  ;;  %v7949_v6 = vadd.f32 -0.5, %v2048_v52  ;;  %v9882_v52 = vpop.xlane.xlu1 %1234 }
 0x441   : > { %15405 = vst [vmem:[#allocation117_spill] sm:$0xff] %v9882_v52 }
 0x442   : > { %v7982_v49 = vadd.f32 -0.5, %v2113_v25  ;;  %v9871_v28 = vadd.f32 %v7949_v6, %v9734_v36  ;;  %v9873_v25 = vpop.permute.xlu0 %2702  ;;  %v1196_v6 = vpop.f32.mrf.mxu1 }
 0x443   : > { %15402 = vst [vmem:[#allocation114_spill] sm:$0xff] %v9873_v25  ;;  %v9890_v25 = vadd.f32 %v9510_v56, %v1196_v6 }
 0x444   : > { %v9862_v34 = vadd.f32 %v7982_v49, %v9683_v1  ;;  %15401 = vst [vmem:[#allocation113_spill] sm:$0xff] %v9871_v28  ;;  %v9887_v4 = vpop.permute.xlu1 %2677  ;;  %v1815_v1 = vfloor.f32 %v1783_v48 }
 0x445   : > { %15407 = vst [vmem:[#allocation119_spill] sm:$0xff] %v9887_v4 }
 0x446   : > { %15399 = vst [vmem:[#allocation111_spill] sm:$0xff] %v9862_v34  ;;  %v9880_v49 = vpop.permute.xlu0 %3455  ;;  %v1975_v43 = vadd.f32 0.5, %v1815_v1  ;;  %v1847_v6 = vmul.f32 16.0, %v1815_v1 }
 0x447   : > { %15404 = vst [vmem:[#allocation116_spill] sm:$0xff] %v9880_v49  ;;  %v1296_v49 = vsel %vm1205_vm1, %v9890_v25, -inf }
 0x448   : > { %2772 = vperm.xlu0 %8469, %v9841_v17   ;;  %v9894_v44 = vpop.permute.xlu1 %3435  ;;  %v2007_v4 = vmul.f32 0.0625, %v1975_v43  ;;  %v1879_v46 = vsub.f32 %v1750_v45, %v1847_v6 }
 0x449   : > { %15408 = vst [vmem:[#allocation120_spill] sm:$0xff] %v9894_v44  ;;  %v1293_v44 = vsel %vm1205_vm1, %v9767_v12, -inf }
 0x44a   : > { %v9885_v35 = vpop.permute.xlu0 %2301  ;;  %v2116_v30 = vmul.f32 16.0, %v2007_v4  ;;  %v1911_v43 = vadd.f32 0.5, %v1879_v46 }
 0x44b   : > { %15406 = vst [vmem:[#allocation118_spill] sm:$0xff] %v9885_v35 }
 0x44c   : > { %8470 = vset.pattern.permute.xlu0 %v15319_v51  ;;  %v9900_v35 = vpop.permute.xlu1 %2256  ;;  %v1943_v45 = vmul.f32 0.0625, %v1911_v43 }
 0x44d   : > { %2371 = vperm.xlu0 %8470, %v9853_v61   ;;  %15410 = vst [vmem:[#allocation122_spill] sm:$0xff] %v9900_v35  ;;  %v1909_v35 = vadd.f32 0.5, %v9731_v41 }
 0x44e   : > { %v9892_v17 = vpop.xlane.xlu0 %1255  ;;  %v2052_v41 = vmul.f32 16.0, %v1943_v45 }
 0x44f   : > { %v1941_v4 = vmul.f32 0.0625, %v1909_v35 }
 0x450   : > { %v9904_v56 = vpop.xlane.xlu1 %1240 }
 0x451   : > { %2767 = vperm.xlu1 %8463, %v9862_v34   ;;  %8474 = vset.pattern.permute.xlu0 %v15320_v58  ;;  %15412 = vst [vmem:[#allocation124_spill] sm:$0xff] %v9904_v56 }
 0x452   : > { %v9898_v52 = vpop.permute.xlu0 %2712 }
 0x453   : > { %15409 = vst [vmem:[#allocation121_spill] sm:$0xff] %v9898_v52 }
 0x454   : > { %v9910_v48 = vpop.permute.xlu1 %2687 }
 0x455   : > { %8464 = vset.pattern.permute.xlu1 %v15319_v51  ;;  %15414 = vst [vmem:[#allocation126_spill] sm:$0xff] %v9910_v48 }
 0x456   : > { %2346 = vperm.xlu1 %8464, %v9871_v28   ;;  %v9902_v38 = vpop.permute.xlu0 %3463 }
 0x457   : > { %15411 = vst [vmem:[#allocation123_spill] sm:$0xff] %v9902_v38  ;;  %v7985_v38 = vadd.f32 -0.5, %v2116_v30 }
 0x458   : > { %v9920_v56 = vpop.permute.xlu1 %3443 }
 0x459   : > { %15417 = vst [vmem:[#allocation128_spill] sm:$0xff] %v9920_v56 }
 0x45a   : > { %8467 = vset.pattern.permute.xlu1 %v15320_v58  ;;  %v9906_v36 = vpop.permute.xlu0 %2311 }
 0x45b   : > { %15413 = vst [vmem:[#allocation125_spill] sm:$0xff] %v9906_v36  ;;  %v9918_v36 = vadd.f32 %v7985_v38, %v9890_v25 }
 0x45d   : > { %15416 = vst [vmem:[#allocation127_spill] sm:$0xff] %v9918_v36 }
 0x45e   : > { %v9915_v23 = vpop.xlane.xlu0 %1261 }
 0x462   : > { %v9922_v6 = vpop.permute.xlu0 %2722 }
 0x463   : > { %15418 = vst [vmem:[#allocation129_spill] sm:$0xff] %v9922_v6 }
 0x466   : > { %v9928_v35 = vpop.permute.xlu0 %3471 }
 0x467   : > { %15420 = vst [vmem:[#allocation131_spill] sm:$0xff] %v9928_v35 }
 0x46c   : > { %1297 = vmax.xlane.f32.xlu0 %v1296_v49  ;;  %v15415_v49 = vfloor.f32 %v9729_v14  ;;  %v2050_v14 = vmul.f32 16.0, %v1941_v4 }
 0x46e   : > { %v1974_v52 = vadd.f32 0.5, %v15415_v49  ;;  %v7951_v30 = vadd.f32 -0.5, %v2050_v14  ;;  %v14939_v14 = vmov 3  }
 0x470   : > { %v2006_v1 = vmul.f32 0.0625, %v1974_v52  ;;  %v7953_v52 = vadd.f32 -0.5, %v2052_v41  ;;  %v9937_v43 = vadd.f32 %v7951_v30, %v9811_v7 }
 0x472   : > { %v2115_v48 = vmul.f32 16.0, %v2006_v1  ;;  %15422 = vst [vmem:[#allocation133_spill] sm:$0xff] %v9937_v43  ;;  %v9944_v1 = vpop.permute.xlu0 %2321 }
 0x473   : > { %15424 = vst [vmem:[#allocation135_spill] sm:$0xff] %v9944_v1 }
 0x474   : > { %v7984_v46 = vadd.f32 -0.5, %v2115_v48  ;;  %v9942_v48 = vadd.f32 %v7953_v52, %v9890_v25 }
 0x476   : > { %v9934_v49 = vadd.f32 %v7984_v46, %v9767_v12  ;;  %15423 = vst [vmem:[#allocation134_spill] sm:$0xff] %v9942_v48  ;;  %v9951_v45 = vpop.xlane.xlu0 %1267 }
 0x478   : > { %15421 = vst [vmem:[#allocation132_spill] sm:$0xff] %v9934_v49 }
 0x47a   : > { %1294 = vmax.xlane.f32.xlu1 %v1293_v44  ;;  %v9925_v44 = vpop.permute.xlu1 %2266  ;;  %v9958_v46 = vpop.permute.xlu0 %2732 }
 0x47b   : > { %15419 = vst [vmem:[#allocation130_spill] sm:$0xff] %v9925_v44  ;;  %15427 = vst [vmem:[#allocation138_spill] sm:$0xff] %v9958_v46  ;;  %v15550_v44 = vld [vmem:[#allocation16_spill] sm:$0xff] }
 0x47e   : > { %v9931_v38 = vpop.xlane.xlu1 %1246  ;;  %v9964_v52 = vpop.permute.xlu0 %3479 }
 0x47f   : > { %15429 = vst [vmem:[#allocation140_spill] sm:$0xff] %v9964_v52 }
 0x482   : > { %2782 = vperm.xlu0 %8474, %v9918_v36   ;;  %v9946_v4 = vpop.permute.xlu1 %2697 }
 0x483   : > { %15425 = vst [vmem:[#allocation136_spill] sm:$0xff] %v9946_v4 }
 0x486   : > { %8475 = vset.pattern.permute.xlu0 %v15316_v27  ;;  %v9956_v41 = vpop.permute.xlu1 %3451 }
 0x487   : > { %3503 = vperm.xlu0 %8475, %v9871_v28   ;;  %15426 = vst [vmem:[#allocation137_spill] sm:$0xff] %v9956_v41 }
 0x48a   : > { %v9961_v30 = vpop.permute.xlu1 %2276 }
 0x48b   : > { %2777 = vperm.xlu1 %8467, %v9934_v49   ;;  %3511 = vperm.xlu0 %8475, %v9937_v43   ;;  %15428 = vst [vmem:[#allocation139_spill] sm:$0xff] %v9961_v30 }
 0x48e   : > { %v9966_v1 = vpop.xlane.xlu1 %1252 }
 0x48f   : > { %8468 = vset.pattern.permute.xlu1 %v15319_v51  ;;  %3519 = vperm.xlu0 %8475, %v9942_v48  }
 0x490   : > { %2356 = vperm.xlu1 %8468, %v9937_v43  }
 0x493   : > { %8476 = vset.pattern.permute.xlu0 %v14939_v14  ;;  %v9969_v14 = vpop.permute.xlu0 %2331 }
 0x494   : > { %3783 = vperm.xlu0 %8476, %v9075_v15   ;;  %8471 = vset.pattern.permute.xlu1 %v15320_v58  ;;  %15430 = vst [vmem:[#allocation141_spill] sm:$0xff] %v9969_v14  ;;  %v9972_v58 = vpop.permute.xlu1 %2707  ;;  %v1299_v14 = vsel %vm1205_vm1, %v9847_v40, -inf }
 0x495   : > { %15431 = vst [vmem:[#allocation142_spill] sm:$0xff] %v9972_v58  ;;  %v15436_v58 = vfloor.f32 %v9806_v21 }
 0x497   : > { %v9975_v46 = vpop.xlane.xlu0 %1273 }
 0x498   : > { %3795 = vperm.xlu0 %8476, %v9115_v53   ;;  %v9977_v35 = vpop.permute.xlu1 %3459 }
 0x499   : > { %15432 = vst [vmem:[#allocation143_spill] sm:$0xff] %v9977_v35 }
 0x49b   : > { %v9980_v6 = vpop.permute.xlu0 %2742 }
 0x49c   : > { %3803 = vperm.xlu0 %8476, %v9213_v0   ;;  %15433 = vst [vmem:[#allocation144_spill] sm:$0xff] %v9980_v6  ;;  %v9983_v52 = vpop.permute.xlu1 %2286 }
 0x49d   : > { %15434 = vst [vmem:[#allocation145_spill] sm:$0xff] %v9983_v52 }
 0x4a0   : > { %3811 = vperm.xlu0 %8476, %v9281_v55   ;;  %v9992_v35 = vpop.xlane.xlu1 %1258 }
 0x4a4   : > { %3819 = vperm.xlu0 %8476, %v9335_v50   ;;  %v9987_v50 = vpop.permute.xlu0 %3487  ;;  %v10001_v41 = vpop.permute.xlu1 %2717 }
 0x4a5   : > { %15435 = vst [vmem:[#allocation146_spill] sm:$0xff] %v9987_v50  ;;  %v1306_v50 = vsub.f32 %v9129_v3, %v9722_v29  ;;  %15438 = vst [vmem:[#allocation148_spill] sm:$0xff] %v10001_v41  ;;  %v1310_v3 = vsub.f32 %v9236_v24, %v9772_v60  ;;  %v1314_v60 = vsub.f32 %v9349_v8, %v9828_v39  ;;  %v15540_v41 = vld [vmem:[#allocation12_spill] sm:$0xff] }
 0x4a8   : > { %3827 = vperm.xlu0 %8476, %v9388_v16   ;;  %v1976_v16 = vadd.f32 0.5, %v15436_v58  ;;  %v1308_v58 = vsub.f32 %v9176_v63, %v9743_v54  ;;  %v1350_v63 = vmul.f32 1.442695, %v1310_v3 }
 0x4aa   : > { %v2008_v6 = vmul.f32 0.0625, %v1976_v16 }
 0x4ac   : > { %3835 = vperm.xlu0 %8476, %v9441_v5   ;;  %v1302_v5 = vsub.f32 %v9069_v10, %v9714_v2  ;;  %v2117_v21 = vmul.f32 16.0, %v2008_v6  ;;  %v10009_v2 = vpop.permute.xlu1 %3467 }
 0x4ad   : > { %15439 = vst [vmem:[#allocation149_spill] sm:$0xff] %v10009_v2 }
 0x4ae   : > { %v1334_v52 = vmul.f32 1.442695, %v1302_v5  ;;  %v7986_v16 = vadd.f32 -0.5, %v2117_v21  ;;  %v1346_v5 = vmul.f32 1.442695, %v1308_v58 }
 0x4b0   : > { %3843 = vperm.xlu0 %8476, %v9494_v20   ;;  %v9997_v20 = vpop.permute.xlu0 %2341  ;;  %8645 = vpow2.f32 %v1334_v52  ;;  %v10016_v6 = vadd.f32 %v7986_v16, %v9847_v40  ;;  %v10022_v54 = vpop.permute.xlu1 %2296  ;;  %v1318_v16 = vsub.f32 %v9455_v22, %v9892_v17 }
 0x4b1   : > { %15437 = vst [vmem:[#allocation147_spill] sm:$0xff] %v9997_v20  ;;  %15442 = vst [vmem:[#allocation152_spill] sm:$0xff] %v10022_v54  ;;  %v15477_v20 = vld [vmem:[#allocation52_spill] sm:$0xff] }
 0x4b2   : > { %15441 = vst [vmem:[#allocation151_spill] sm:$0xff] %v10016_v6 }
 0x4b4   : > { %1300 = vmax.xlane.f32.xlu1 %v1299_v14  ;;  %3851 = vperm.xlu0 %8476, %v9552_v37   ;;  %v1342_v14 = vmul.f32 1.442695, %v1306_v50  ;;  %v10006_v10 = vpop.xlane.xlu0 %1279  ;;  %v1312_v50 = vsub.f32 %v9296_v11, %v9802_v13  ;;  %v1358_v11 = vmul.f32 1.442695, %v1314_v60  ;;  %v1324_v60 = vsub.f32 %v9609_v26, %v9975_v46  ;;  %v15453_v26 = vld [vmem:[#allocation11_spill] sm:$0xff] }
 0x4b6   : > { %8647 = vpow2.f32 %v1342_v14  ;;  %v1354_v24 = vmul.f32 1.442695, %v1312_v50  ;;  %v10033_v14 = vpop.xlane.xlu1 %1264  ;;  %v1322_v50 = vsub.f32 %v9566_v59, %v9951_v45  ;;  %v15451_v59 = vld [vmem:[#allocation5_spill] sm:$0xff] }
 0x4b7   : > { %8649 = vpow2.f32 %v1346_v5 }
 0x4b8   : > { %3859 = vperm.xlu0 %8476, %v9595_v47   ;;  %v10013_v29 = vpop.permute.xlu0 %2752  ;;  %8651 = vpow2.f32 %v1350_v63 }
 0x4b9   : > { %15440 = vst [vmem:[#allocation150_spill] sm:$0xff] %v10013_v29  ;;  %8653 = vpow2.f32 %v1354_v24  ;;  %v15473_v29 = vld [vmem:[#allocation47_spill] sm:$0xff] }
 0x4ba   : > { %v10047_v39 = vpop.permute.xlu1 %2727  ;;  %8655 = vpow2.f32 %v1358_v11 }
 0x4bb   : > { %15445 = vst [vmem:[#allocation155_spill] sm:$0xff] %v10047_v39 }
 0x4bc   : > { %3867 = vperm.xlu0 %8476, %v9638_v31   ;;  %v10025_v52 = vpop.permute.xlu0 %3495 }
 0x4bd   : > { %15443 = vst [vmem:[#allocation153_spill] sm:$0xff] %v10025_v52  ;;  %v10031_v21 = vpop.eup %8645 }
 0x4be   : > { %v10060_v63 = vpop.permute.xlu1 %3475 }
 0x4bf   : > { %15446 = vst [vmem:[#allocation156_spill] sm:$0xff] %v10060_v63 }
 0x4c0   : > { %3875 = vperm.xlu0 %8476, %v9693_v42   ;;  %v10042_v8 = vpop.permute.xlu0 %2351 }
 0x4c1   : > { %15444 = vst [vmem:[#allocation154_spill] sm:$0xff] %v10042_v8  ;;  %v15469_v8 = vld [vmem:[#allocation67_spill] sm:$0xff] }
 0x4c3   : > { %v10040_v13 = vpop.eup %8647 }
 0x4c4   : > { %3883 = vperm.xlu0 %8476, %v9784_v18   ;;  %v10051_v5 = vpop.eup %8649 }
 0x4c5   : > { %2787 = vperm.xlu1 %8471, %v10016_v6   ;;  %v10058_v3 = vpop.eup %8651 }
 0x4c6   : > { %v10069_v24 = vpop.eup %8653 }
 0x4c7   : > { %v10078_v11 = vpop.eup %8655 }
 0x4c8   : > { %3891 = vperm.xlu0 %8476, %v9862_v34  }
 0x4c9   : > { %8472 = vset.pattern.permute.xlu1 %v15319_v51  ;;  %v1316_v51 = vsub.f32 %v9402_v32, %v9864_v19  ;;  %v1286_v32 = vpop.xlane.xlu0 %1285  ;;  %v1320_v19 = vsub.f32 %v9513_v62, %v9915_v23  ;;  %v10074_v23 = vpop.permute.xlu1 %2306  ;;  %v1374_v62 = vmul.f32 1.442695, %v1322_v50 }
 0x4ca   : > { %2366 = vperm.xlu1 %8472, %v9942_v48   ;;  %15448 = vst [vmem:[#allocation158_spill] sm:$0xff] %v10074_v23 }
 0x4cb   : > { %v1362_v58 = vmul.f32 1.442695, %v1316_v51  ;;  %v1370_v17 = vmul.f32 1.442695, %v1320_v19 }
 0x4cc   : > { %1430 = vrot.lane.b32.xlu0 %v10031_v21, %s8882_s16 }
 0x4cd   : > { %8657 = vpow2.f32 %v1362_v58  ;;  %v10065_v22 = vpop.permute.xlu0 %2762  ;;  %v15450_v58 = vmov 3   ;;  %v10086_v45 = vpop.xlane.xlu1 %1270 }
 0x4ce   : > { %8473 = vset.pattern.permute.xlu1 %v15316_v27  ;;  %v1366_v27 = vmul.f32 1.442695, %v1318_v16  ;;  %15447 = vst [vmem:[#allocation157_spill] sm:$0xff] %v10065_v22  ;;  %v1378_v16 = vmul.f32 1.442695, %v1324_v60 }
 0x4cf   : > { %3499 = vperm.xlu1 %8473, %v9635_v33  }
 0x4d0   : > { %1438 = vrot.lane.b32.xlu0 %v10040_v13, %s8882_s16  ;;  %8659 = vpow2.f32 %v1366_v27  ;;  %v15452_v27 = vld [vmem:[#allocation62_spill] sm:$0xff] }
 0x4d1   : > { %8661 = vpow2.f32 %v1370_v17  ;;  %v10080_v51 = vpop.permute.xlu0 %2361  ;;  %v1326_v19 = vsub.f32 %v15452_v27, %v10006_v10  ;;  %v10098_v37 = vpop.permute.xlu1 %2737 }
 0x4d2   : > { %15449 = vst [vmem:[#allocation159_spill] sm:$0xff] %v10080_v51  ;;  %8663 = vpow2.f32 %v1374_v62  ;;  %15455 = vst [vmem:[#allocation62_spill] sm:$0xff] %v10098_v37  ;;  %v15456_v62 = vld [vmem:[#allocation10_spill] sm:$0xff] }
 0x4d3   : > { %3507 = vperm.xlu1 %8473, %v9690_v57   ;;  %8665 = vpow2.f32 %v1378_v16  ;;  %v1382_v50 = vmul.f32 1.442695, %v1326_v19  ;;  %v15458_v16 = vld [vmem:[#allocation14_spill] sm:$0xff] }
 0x4d4   : > { %1442 = vrot.lane.b32.xlu0 %v10051_v5, %s8882_s16 }
 0x4d5   : > { %v1292_v46 = vpop.xlane.xlu0 %1291  ;;  %8667 = vpow2.f32 %v1382_v50 }
 0x4d6   : > { %v1330_v27 = vsub.f32 %v9811_v7, %v1292_v46  ;;  %v15463_v46 = vld [vmem:[#allocation27_spill] sm:$0xff] }
 0x4d7   : > { %3515 = vperm.xlu1 %8473, %v9775_v9  }
 0x4d8   : > { %1446 = vrot.lane.b32.xlu0 %v10058_v3, %s8882_s16  ;;  %v1390_v19 = vmul.f32 1.442695, %v1330_v27 }
 0x4d9   : > { %v10103_v10 = vpop.permute.xlu0 %2772 }
 0x4da   : > { %v10090_v17 = vpop.eup %8657  ;;  %15457 = vst [vmem:[#allocation11_spill] sm:$0xff] %v10103_v10  ;;  %v15461_v10 = vld [vmem:[#allocation21_spill] sm:$0xff] }
 0x4db   : > { %3523 = vperm.xlu1 %8473, %v9853_v61  }
 0x4dc   : > { %1450 = vrot.lane.b32.xlu0 %v10069_v24, %s8882_s16 }
 0x4dd   : > { %v10096_v18 = vpop.eup %8659  ;;  %v10115_v51 = vpop.permute.xlu0 %2371 }
 0x4de   : > { %v10106_v47 = vpop.eup %8661  ;;  %15460 = vst [vmem:[#allocation160_spill] sm:$0xff] %v10115_v51 }
 0x4df   : > { %8477 = vset.pattern.permute.xlu1 %v15450_v58  ;;  %v15454_v58 = vld [vmem:[#allocation77_spill] sm:$0xff] }
 0x4e0   : > { %3787 = vperm.xlu1 %8477, %v15451_v59   ;;  %1454 = vrot.lane.b32.xlu0 %v10078_v11, %s8882_s16  ;;  %v1328_v42 = vsub.f32 %v15454_v58, %v1286_v32  ;;  %v10111_v32 = vpop.permute.xlu1 %3483  ;;  %v10113_v58 = vpop.eup %8663 }
 0x4e1   : > { %15459 = vst [vmem:[#allocation77_spill] sm:$0xff] %v10111_v32  ;;  %v15475_v32 = vld [vmem:[#allocation6_spill] sm:$0xff] }
 0x4e2   : > { %v1386_v60 = vmul.f32 1.442695, %v1328_v42  ;;  %v10120_v42 = vpop.eup %8665 }
 0x4e3   : > { %v10128_v27 = vpop.eup %8667 }
 0x4e4   : > { %3791 = vperm.xlu1 %8477, %v15453_v26   ;;  %1458 = vrot.lane.b32.xlu0 %v10090_v17, %s8882_s16  ;;  %8669 = vpow2.f32 %v1386_v60  ;;  %v10122_v7 = vpop.permute.xlu1 %2316 }
 0x4e5   : > { %8671 = vpow2.f32 %v1390_v19  ;;  %15462 = vst [vmem:[#allocation161_spill] sm:$0xff] %v10122_v7 }
 0x4e8   : > { %3799 = vperm.xlu1 %8477, %v15456_v62   ;;  %1462 = vrot.lane.b32.xlu0 %v10096_v18, %s8882_s16  ;;  %v10130_v51 = vpop.xlane.xlu1 %1276 }
 0x4ec   : > { %3807 = vperm.xlu1 %8477, %v15458_v16   ;;  %1466 = vrot.lane.b32.xlu0 %v10106_v47, %s8882_s16  ;;  %v10140_v22 = vpop.permute.xlu1 %2747 }
 0x4ed   : > { %15466 = vst [vmem:[#allocation162_spill] sm:$0xff] %v10140_v22 }
 0x4f0   : > { %3815 = vperm.xlu1 %8477, %v15461_v10   ;;  %1470 = vrot.lane.b32.xlu0 %v10113_v58, %s8882_s16  ;;  %v15464_v10 = vld [vmem:[#allocation32_spill] sm:$0xff] }
 0x4f1   : > { %v10135_v19 = vpop.eup %8669 }
 0x4f4   : > { %3823 = vperm.xlu1 %8477, %v15463_v46   ;;  %1474 = vrot.lane.b32.xlu0 %v10120_v42, %s8882_s16  ;;  %v15465_v46 = vld [vmem:[#allocation37_spill] sm:$0xff] }
 0x4f5   : > { %v1298_v50 = vpop.xlane.xlu0 %1297 }
 0x4f6   : > { %v1332_v60 = vsub.f32 %v9890_v25, %v1298_v50  ;;  %v10144_v50 = vpop.eup %8671 }
 0x4f8   : > { %v1394_v34 = vmul.f32 1.442695, %v1332_v60  ;;  %3831 = vperm.xlu1 %8477, %v15464_v10   ;;  %1478 = vrot.lane.b32.xlu0 %v10128_v27, %s8882_s16  ;;  %v15468_v60 = vld [vmem:[#allocation42_spill] sm:$0xff] }
 0x4fa   : > { %8673 = vpow2.f32 %v1394_v34  ;;  %v15470_v34 = vld [vmem:[#allocation2_spill] sm:$0xff] }
 0x4fb   : > { %v1303_v31 = vsub.f32 %v15470_v34, %v15469_v8 }
 0x4fc   : > { %3839 = vperm.xlu1 %8477, %v15465_v46   ;;  %1482 = vrot.lane.b32.xlu0 %v10135_v19, %s8882_s16  ;;  %v10153_v46 = vpop.permute.xlu1 %3491 }
 0x4fd   : > { %v10142_v25 = vpop.permute.xlu0 %2782  ;;  %15472 = vst [vmem:[#allocation2_spill] sm:$0xff] %v10153_v46  ;;  %v1336_v22 = vmul.f32 1.442695, %v1303_v31  ;;  %v15480_v46 = vld [vmem:[#allocation8_spill] sm:$0xff] }
 0x4fe   : > { %15467 = vst [vmem:[#allocation163_spill] sm:$0xff] %v10142_v25  ;;  %v15474_v25 = vld [vmem:[#allocation74_spill] sm:$0xff] }
 0x4ff   : > { %v1305_v7 = vsub.f32 %v15475_v32, %v15474_v25  ;;  %8675 = vpow2.f32 %v1336_v22  ;;  %v15486_v22 = vld [vmem:[#allocation64_spill] sm:$0xff] }
 0x500   : > { %3847 = vperm.xlu1 %8477, %v15468_v60   ;;  %1486 = vrot.lane.b32.xlu0 %v10144_v50, %s8882_s16  ;;  %v10166_v8 = vpop.permute.xlu1 %2326 }
 0x501   : > { %15478 = vst [vmem:[#allocation6_spill] sm:$0xff] %v10166_v8  ;;  %v1340_v34 = vmul.f32 1.442695, %v1305_v7  ;;  %v14994_v7 = vmov 4  }
 0x502   : > { %v10151_v52 = vpop.permute.xlu0 %3503 }
 0x503   : > { %15471 = vst [vmem:[#allocation67_spill] sm:$0xff] %v10151_v52  ;;  %v15479_v52 = vld [vmem:[#allocation86_spill] sm:$0xff]  ;;  %8677 = vpow2.f32 %v1340_v34  ;;  %v15492_v34 = vld [vmem:[#allocation84_spill] sm:$0xff] }
 0x504   : > { %3855 = vperm.xlu1 %8477, %v15473_v29   ;;  %3899 = vperm.xlu0 %8476, %v9934_v49   ;;  %v1304_v49 = vsub.f32 %v15480_v46, %v15479_v52  ;;  %v15482_v29 = vld [vmem:[#allocation57_spill] sm:$0xff]  ;;  %v10174_v32 = vpop.xlane.xlu1 %1282  ;;  %v15487_v52 = vld [vmem:[#allocation4_spill] sm:$0xff] }
 0x506   : > { %v10159_v10 = vpop.permute.xlu0 %3511  ;;  %v1338_v25 = vmul.f32 1.442695, %v1304_v49 }
 0x507   : > { %15476 = vst [vmem:[#allocation74_spill] sm:$0xff] %v10159_v10  ;;  %v10161_v60 = vpop.eup %8673  ;;  %v15484_v10 = vld [vmem:[#allocation13_spill] sm:$0xff] }
 0x508   : > { %3863 = vperm.xlu1 %8477, %v15477_v20   ;;  %1490 = vrot.lane.b32.xlu0 %v10161_v60, %s8882_s16  ;;  %v15483_v20 = vld [vmem:[#allocation95_spill] sm:$0xff]  ;;  %8679 = vpow2.f32 %v1338_v25  ;;  %v10185_v8 = vpop.permute.xlu1 %2757 }
 0x509   : > { %v1307_v37 = vsub.f32 %v15484_v10, %v15483_v20  ;;  %15490 = vst [vmem:[#allocation95_spill] sm:$0xff] %v10185_v8  ;;  %v15493_v20 = vld [vmem:[#allocation7_spill] sm:$0xff]  ;;  %v15500_v8 = vld [vmem:[#allocation24_spill] sm:$0xff] }
 0x50a   : > { %v10170_v31 = vpop.permute.xlu0 %3519 }
 0x50b   : > { %15481 = vst [vmem:[#allocation86_spill] sm:$0xff] %v10170_v31  ;;  %v1344_v46 = vmul.f32 1.442695, %v1307_v37 }
 0x50c   : > { %3871 = vperm.xlu1 %8477, %v15482_v29   ;;  %3907 = vperm.xlu0 %8476, %v10016_v6   ;;  %v15488_v29 = vld [vmem:[#allocation104_spill] sm:$0xff]  ;;  %v10193_v63 = vpop.eup %8675  ;;  %v10199_v37 = vpop.permute.xlu1 %2336 }
 0x50d   : > { %v15489_v6 = vld [vmem:[#allocation20_spill] sm:$0xff]  ;;  %8681 = vpow2.f32 %v1344_v46 }
 0x50e   : > { %v1309_v31 = vsub.f32 %v15489_v6, %v15488_v29  ;;  %15497 = vst [vmem:[#allocation20_spill] sm:$0xff] %v10199_v37  ;;  %v15498_v29 = vld [vmem:[#allocation15_spill] sm:$0xff]  ;;  %v15503_v37 = vld [vmem:[#allocation29_spill] sm:$0xff] }
 0x50f   : > { %v10178_v16 = vpop.permute.xlu0 %3783  ;;  %v1315_v23 = vsub.f32 %v15503_v37, %v9931_v38  ;;  %v15508_v37 = vld [vmem:[#allocation39_spill] sm:$0xff] }
 0x510   : > { %15485 = vst [vmem:[#allocation8_spill] sm:$0xff] %v10178_v16  ;;  %3879 = vperm.xlu1 %8477, %v15486_v22   ;;  %8478 = vset.pattern.permute.xlu0 %v14994_v7  ;;  %v1348_v10 = vmul.f32 1.442695, %v1309_v31  ;;  %v15494_v22 = vld [vmem:[#allocation117_spill] sm:$0xff]  ;;  %v15495_v16 = vld [vmem:[#allocation18_spill] sm:$0xff]  ;;  %v10204_v31 = vpop.eup %8677 }
 0x511   : > { %4487 = vperm.xlu0 %8478, %v15487_v52   ;;  %v1311_v7 = vsub.f32 %v15495_v16, %v15494_v22  ;;  %v1289_v16 = vpop.xlane.xlu1 %1288  ;;  %v15502_v22 = vld [vmem:[#allocation23_spill] sm:$0xff] }
 0x512   : > { %8683 = vpow2.f32 %v1348_v10 }
 0x513   : > { %v10187_v49 = vpop.permute.xlu0 %3795  ;;  %v1352_v6 = vmul.f32 1.442695, %v1311_v7 }
 0x514   : > { %15491 = vst [vmem:[#allocation13_spill] sm:$0xff] %v10187_v49  ;;  %3887 = vperm.xlu1 %8477, %v15492_v34   ;;  %v15499_v49 = vld [vmem:[#allocation124_spill] sm:$0xff] }
 0x515   : > { %4499 = vperm.xlu0 %8478, %v15493_v20   ;;  %v1313_v46 = vsub.f32 %v15500_v8, %v15499_v49  ;;  %8685 = vpow2.f32 %v1352_v6  ;;  %v10213_v10 = vpop.eup %8679  ;;  %v1360_v8 = vmul.f32 1.442695, %v1315_v23  ;;  %v15505_v49 = vld [vmem:[#allocation34_spill] sm:$0xff] }
 0x517   : > { %v10195_v25 = vpop.permute.xlu0 %3803 }
 0x518   : > { %15496 = vst [vmem:[#allocation104_spill] sm:$0xff] %v10195_v25  ;;  %1432 = vrot.lane.b32.xlu1 %v10193_v63, %s8882_s16  ;;  %v1356_v25 = vmul.f32 1.442695, %v1313_v46  ;;  %v1319_v46 = vsub.f32 %v15508_v37, %v9992_v35  ;;  %v15513_v37 = vld [vmem:[#allocation49_spill] sm:$0xff] }
 0x519   : > { %4507 = vperm.xlu0 %8478, %v15498_v29  }
 0x51a   : > { %8687 = vpow2.f32 %v1356_v25  ;;  %v10221_v39 = vpop.eup %8681  ;;  %v1368_v25 = vmul.f32 1.442695, %v1319_v46  ;;  %v15515_v46 = vld [vmem:[#allocation54_spill] sm:$0xff] }
 0x51b   : > { %v10206_v34 = vpop.permute.xlu0 %3811  ;;  %8689 = vpow2.f32 %v1360_v8 }
 0x51c   : > { %15501 = vst [vmem:[#allocation117_spill] sm:$0xff] %v10206_v34  ;;  %1436 = vrot.lane.b32.xlu1 %v10204_v31, %s8882_s16  ;;  %v1317_v34 = vsub.f32 %v15505_v49, %v9966_v1  ;;  %v15511_v49 = vld [vmem:[#allocation44_spill] sm:$0xff] }
 0x51d   : > { %4515 = vperm.xlu0 %8478, %v15502_v22   ;;  %v10223_v22 = vpop.permute.xlu1 %2767 }
 0x51e   : > { %15506 = vst [vmem:[#allocation124_spill] sm:$0xff] %v10223_v22  ;;  %v1364_v38 = vmul.f32 1.442695, %v1317_v34 }
 0x51f   : > { %v10215_v7 = vpop.permute.xlu0 %3819 }
 0x520   : > { %15504 = vst [vmem:[#allocation18_spill] sm:$0xff] %v10215_v7  ;;  %1434 = vrot.lane.b32.xlu1 %v10213_v10, %s8882_s16  ;;  %v10231_v7 = vpop.eup %8683  ;;  %8691 = vpow2.f32 %v1364_v38 }
 0x521   : > { %v10237_v1 = vpop.permute.xlu1 %2346  ;;  %8693 = vpow2.f32 %v1368_v25  ;;  %v15518_v25 = vld [vmem:[#allocation59_spill] sm:$0xff] }
 0x522   : > { %15510 = vst [vmem:[#allocation34_spill] sm:$0xff] %v10237_v1  ;;  %v10241_v22 = vpop.eup %8685 }
 0x523   : > { %v10225_v6 = vpop.permute.xlu0 %3827 }
 0x524   : > { %15507 = vst [vmem:[#allocation24_spill] sm:$0xff] %v10225_v6  ;;  %1440 = vrot.lane.b32.xlu1 %v10221_v39, %s8882_s16  ;;  %v1321_v6 = vsub.f32 %v15511_v49, %v10033_v14  ;;  %v1325_v49 = vsub.f32 %v15515_v46, %v10130_v51  ;;  %v15521_v46 = vld [vmem:[#allocation66_spill] sm:$0xff] }
 0x525   : > { %v1295_v35 = vpop.xlane.xlu1 %1294 }
 0x526   : > { %v1372_v8 = vmul.f32 1.442695, %v1321_v6 }
 0x527   : > { %v10233_v23 = vpop.permute.xlu0 %3835  ;;  %v10249_v54 = vpop.eup %8687 }
 0x528   : > { %15509 = vst [vmem:[#allocation29_spill] sm:$0xff] %v10233_v23  ;;  %1444 = vrot.lane.b32.xlu1 %v10231_v7, %s8882_s16  ;;  %v1323_v23 = vsub.f32 %v15513_v37, %v10086_v45  ;;  %8695 = vpow2.f32 %v1372_v8  ;;  %v1380_v45 = vmul.f32 1.442695, %v1325_v49  ;;  %v1327_v37 = vsub.f32 %v15518_v25, %v10174_v32 }
 0x529   : > { %v10259_v1 = vpop.permute.xlu1 %2777  ;;  %v1331_v25 = vsub.f32 %v9767_v12, %v1295_v35 }
 0x52a   : > { %v1376_v14 = vmul.f32 1.442695, %v1323_v23  ;;  %15516 = vst [vmem:[#allocation49_spill] sm:$0xff] %v10259_v1  ;;  %v1384_v8 = vmul.f32 1.442695, %v1327_v37 }
 0x52b   : > { %v10243_v34 = vpop.permute.xlu0 %3843 }
 0x52c   : > { %15512 = vst [vmem:[#allocation39_spill] sm:$0xff] %v10243_v34  ;;  %1448 = vrot.lane.b32.xlu1 %v10241_v22, %s8882_s16  ;;  %v10257_v34 = vpop.eup %8689  ;;  %8697 = vpow2.f32 %v1376_v14 }
 0x52d   : > { %v10273_v51 = vpop.permute.xlu1 %2356  ;;  %8699 = vpow2.f32 %v1380_v45  ;;  %v1392_v45 = vmul.f32 1.442695, %v1331_v25 }
 0x52e   : > { %15520 = vst [vmem:[#allocation164_spill] sm:$0xff] %v10273_v51  ;;  %8701 = vpow2.f32 %v1384_v8 }
 0x52f   : > { %v10251_v38 = vpop.permute.xlu0 %3851 }
 0x530   : > { %15514 = vst [vmem:[#allocation44_spill] sm:$0xff] %v10251_v38  ;;  %1452 = vrot.lane.b32.xlu1 %v10249_v54, %s8882_s16  ;;  %v10267_v38 = vpop.eup %8691 }
 0x531   : > { %v10276_v1 = vpop.eup %8693 }
 0x533   : > { %v10261_v6 = vpop.permute.xlu0 %3859 }
 0x534   : > { %15517 = vst [vmem:[#allocation54_spill] sm:$0xff] %v10261_v6  ;;  %1456 = vrot.lane.b32.xlu1 %v10257_v34, %s8882_s16  ;;  %v1329_v6 = vsub.f32 %v15521_v46, %v1289_v16 }
 0x536   : > { %v1388_v49 = vmul.f32 1.442695, %v1329_v6 }
 0x537   : > { %v10269_v23 = vpop.permute.xlu0 %3867 }
 0x538   : > { %15519 = vst [vmem:[#allocation59_spill] sm:$0xff] %v10269_v23  ;;  %1460 = vrot.lane.b32.xlu1 %v10267_v38, %s8882_s16  ;;  %v10283_v23 = vpop.eup %8695  ;;  %8703 = vpow2.f32 %v1388_v49 }
 0x539   : > { %v10292_v46 = vpop.eup %8697  ;;  %8705 = vpow2.f32 %v1392_v45 }
 0x53a   : > { %v10300_v6 = vpop.eup %8699 }
 0x53b   : > { %v10278_v14 = vpop.permute.xlu0 %3875  ;;  %v10307_v49 = vpop.eup %8701 }
 0x53c   : > { %15522 = vst [vmem:[#allocation66_spill] sm:$0xff] %v10278_v14  ;;  %1464 = vrot.lane.b32.xlu1 %v10276_v1, %s8882_s16 }
 0x53d   : > { %v1301_v32 = vpop.xlane.xlu1 %1300 }
 0x53e   : > { %v1333_v37 = vsub.f32 %v9847_v40, %v1301_v32 }
 0x53f   : > { %v10285_v2 = vpop.permute.xlu0 %3883 }
 0x540   : > { %15523 = vst [vmem:[#allocation165_spill] sm:$0xff] %v10285_v2  ;;  %1468 = vrot.lane.b32.xlu1 %v10283_v23, %s8882_s16  ;;  %v1396_v35 = vmul.f32 1.442695, %v1333_v37  ;;  %v15538_v2 = vld [vmem:[#allocation9_spill] sm:$0xff] }
 0x541   : > { %v10289_v16 = vpop.permute.xlu1 %2787 }
 0x542   : > { %15524 = vst [vmem:[#allocation166_spill] sm:$0xff] %v10289_v16  ;;  %8707 = vpow2.f32 %v1396_v35  ;;  %v15536_v16 = vld [vmem:[#allocation3_spill] sm:$0xff] }
 0x543   : > { %v10294_v14 = vpop.permute.xlu0 %3891 }
 0x544   : > { %15525 = vst [vmem:[#allocation167_spill] sm:$0xff] %v10294_v14  ;;  %1472 = vrot.lane.b32.xlu1 %v10292_v46, %s8882_s16  ;;  %v15535_v14 = vmov 4  }
 0x545   : > { %v10298_v12 = vpop.permute.xlu1 %2366  ;;  %v10313_v45 = vpop.eup %8703 }
 0x546   : > { %15526 = vst [vmem:[#allocation168_spill] sm:$0xff] %v10298_v12  ;;  %v10319_v12 = vpop.eup %8705 }
 0x547   : > { %v1431_v8 = vpop.permute.xlu0 %1430 }
 0x548   : > { %1476 = vrot.lane.b32.xlu1 %v10300_v6, %s8882_s16  ;;  %v1527_v40 = vsel %vm1526_vm2, %v1431_v8, 0.0 }
 0x549   : > { %1528 = vadd.xlane.f32.xlu0 %v1527_v40 }
 0x54a   : > { %v10305_v32 = vpop.permute.xlu1 %3499 }
 0x54b   : > { %15527 = vst [vmem:[#allocation169_spill] sm:$0xff] %v10305_v32 }
 0x54c   : > { %1480 = vrot.lane.b32.xlu1 %v10307_v49, %s8882_s16 }
 0x54e   : > { %v10311_v25 = vpop.permute.xlu1 %3507 }
 0x54f   : > { %15528 = vst [vmem:[#allocation170_spill] sm:$0xff] %v10311_v25  ;;  %v10325_v8 = vpop.eup %8707  ;;  %v15532_v25 = vld [vmem:[#allocation105_spill] sm:$0xff] }
 0x550   : > { %1484 = vrot.lane.b32.xlu1 %v10313_v45, %s8882_s16 }
 0x552   : > { %v10317_v37 = vpop.permute.xlu1 %3515 }
 0x553   : > { %15529 = vst [vmem:[#allocation171_spill] sm:$0xff] %v10317_v37 }
 0x554   : > { %1488 = vrot.lane.b32.xlu1 %v10319_v12, %s8882_s16 }
 0x556   : > { %v10323_v35 = vpop.permute.xlu1 %3523 }
 0x557   : > { %15530 = vst [vmem:[#allocation172_spill] sm:$0xff] %v10323_v35 }
 0x558   : > { %1492 = vrot.lane.b32.xlu1 %v10325_v8, %s8882_s16 }
 0x55b   : > { %v10329_v40 = vpop.permute.xlu1 %3787 }
 0x55c   : > { %15531 = vst [vmem:[#allocation173_spill] sm:$0xff] %v10329_v40  ;;  %3895 = vperm.xlu1 %8477, %v15532_v25  }
 0x55f   : > { %v10332_v32 = vpop.permute.xlu1 %3791 }
 0x560   : > { %15533 = vst [vmem:[#allocation174_spill] sm:$0xff] %v10332_v32  ;;  %3903 = vperm.xlu1 %8477, %v9918_v36  }
 0x563   : > { %v10335_v37 = vpop.permute.xlu1 %3799 }
 0x564   : > { %15534 = vst [vmem:[#allocation175_spill] sm:$0xff] %v10335_v37  ;;  %8479 = vset.pattern.permute.xlu1 %v15535_v14  ;;  %v1439_v37 = vpop.permute.xlu0 %1438 }
 0x565   : > { %4491 = vperm.xlu1 %8479, %v15536_v16  }
 0x567   : > { %v10339_v35 = vpop.permute.xlu1 %3807 }
 0x568   : > { %15537 = vst [vmem:[#allocation176_spill] sm:$0xff] %v10339_v35  ;;  %v1443_v30 = vpop.permute.xlu0 %1442 }
 0x569   : > { %4495 = vperm.xlu1 %8479, %v15538_v2  }
 0x56b   : > { %v10342_v51 = vpop.permute.xlu1 %3815 }
 0x56c   : > { %15539 = vst [vmem:[#allocation177_spill] sm:$0xff] %v10342_v51  ;;  %v1447_v2 = vpop.permute.xlu0 %1446 }
 0x56d   : > { %4503 = vperm.xlu1 %8479, %v15540_v41  }
 0x56f   : > { %v10345_v40 = vpop.permute.xlu1 %3823 }
 0x570   : > { %15541 = vst [vmem:[#allocation178_spill] sm:$0xff] %v10345_v40  ;;  %v1451_v41 = vpop.permute.xlu0 %1450 }
 0x573   : > { %v10347_v25 = vpop.permute.xlu1 %3831 }
 0x574   : > { %15542 = vst [vmem:[#allocation179_spill] sm:$0xff] %v10347_v25 }
 0x577   : > { %v10349_v32 = vpop.permute.xlu1 %3839 }
 0x578   : > { %15543 = vst [vmem:[#allocation180_spill] sm:$0xff] %v10349_v32  ;;  %v1455_v32 = vpop.permute.xlu0 %1454 }
 0x57b   : > { %v10351_v36 = vpop.permute.xlu1 %3847 }
 0x57c   : > { %15544 = vst [vmem:[#allocation181_spill] sm:$0xff] %v10351_v36 }
 0x57f   : > { %v10353_v20 = vpop.permute.xlu1 %3855 }
 0x580   : > { %15545 = vst [vmem:[#allocation182_spill] sm:$0xff] %v10353_v20  ;;  %v1459_v20 = vpop.permute.xlu0 %1458 }
 0x583   : > { %v10355_v4 = vpop.permute.xlu1 %3863 }
 0x584   : > { %15546 = vst [vmem:[#allocation183_spill] sm:$0xff] %v10355_v4 }
 0x587   : > { %v10357_v35 = vpop.permute.xlu1 %3871 }
 0x588   : > { %15547 = vst [vmem:[#allocation184_spill] sm:$0xff] %v10357_v35  ;;  %v1539_v35 = vsel %vm1526_vm2, %v1439_v37, 0.0 }
 0x58b   : > { %v10359_v51 = vpop.permute.xlu1 %3879 }
 0x58c   : > { %15548 = vst [vmem:[#allocation185_spill] sm:$0xff] %v10359_v51  ;;  %v1463_v51 = vpop.permute.xlu0 %1462 }
 0x58f   : > { %v10361_v16 = vpop.permute.xlu1 %3887 }
 0x590   : > { %15549 = vst [vmem:[#allocation186_spill] sm:$0xff] %v10361_v16  ;;  %v1545_v16 = vsel %vm1526_vm2, %v1443_v30, 0.0 }
 0x593   : > { %v1433_v40 = vpop.permute.xlu1 %1432 }
 0x594   : > { %v1530_v25 = vsel %vm1526_vm2, %v1433_v40, 0.0  ;;  %v1467_v40 = vpop.permute.xlu0 %1466 }
 0x595   : > { %1531 = vadd.xlane.f32.xlu1 %v1530_v25  ;;  %v1551_v25 = vsel %vm1526_vm2, %v1447_v2, 0.0  ;;  %v1581_v2 = vsel %vm1526_vm2, %v1467_v40, 0.0 }
 0x597   : > { %v1437_v36 = vpop.permute.xlu1 %1436 }
 0x598   : > { %v1536_v29 = vsel %vm1526_vm2, %v1437_v36, 0.0  ;;  %v1471_v56 = vpop.permute.xlu0 %1470 }
 0x599   : > { %1537 = vadd.xlane.f32.xlu0 %v1536_v29  ;;  %v1557_v29 = vsel %vm1526_vm2, %v1451_v41, 0.0 }
 0x59b   : > { %v1435_v52 = vpop.permute.xlu1 %1434 }
 0x59c   : > { %v1533_v4 = vsel %vm1526_vm2, %v1435_v52, 0.0  ;;  %v1475_v37 = vpop.permute.xlu0 %1474 }
 0x59d   : > { %1534 = vadd.xlane.f32.xlu0 %v1533_v4  ;;  %v1563_v4 = vsel %vm1526_vm2, %v1455_v32, 0.0 }
 0x59f   : > { %v1441_v36 = vpop.permute.xlu1 %1440 }
 0x5a1   : > { %1540 = vadd.xlane.f32.xlu0 %v1539_v35  ;;  %v1569_v35 = vsel %vm1526_vm2, %v1459_v20, 0.0 }
 0x5a3   : > { %v1445_v52 = vpop.permute.xlu1 %1444 }
 0x5a5   : > { %1546 = vadd.xlane.f32.xlu0 %v1545_v16  ;;  %v1575_v16 = vsel %vm1526_vm2, %v1463_v51, 0.0  ;;  %v1542_v51 = vsel %vm1526_vm2, %v1441_v36, 0.0 }
 0x5a6   : > { %4511 = vperm.xlu1 %8479, %v15550_v44   ;;  %v1479_v44 = vpop.permute.xlu0 %1478 }
 0x5a7   : > { %v1449_v30 = vpop.permute.xlu1 %1448  ;;  %v1599_v20 = vsel %vm1526_vm2, %v1479_v44, 0.0 }
 0x5a8   : > { %v1554_v44 = vsel %vm1526_vm2, %v1449_v30, 0.0 }
 0x5a9   : > { %1552 = vadd.xlane.f32.xlu0 %v1551_v25 }
 0x5aa   : > { %v1483_v41 = vpop.permute.xlu0 %1482 }
 0x5ab   : > { %v1453_v25 = vpop.permute.xlu1 %1452  ;;  %v1605_v40 = vsel %vm1526_vm2, %v1483_v41, 0.0 }
 0x5ad   : > { %1558 = vadd.xlane.f32.xlu0 %v1557_v29  ;;  %v1587_v29 = vsel %vm1526_vm2, %v1471_v56, 0.0  ;;  %v1548_v56 = vsel %vm1526_vm2, %v1445_v52, 0.0 }
 0x5ae   : > { %v1487_v55 = vpop.permute.xlu0 %1486 }
 0x5af   : > { %v1457_v32 = vpop.permute.xlu1 %1456 }
 0x5b0   : > { %v1566_v41 = vsel %vm1526_vm2, %v1457_v32, 0.0 }
 0x5b1   : > { %1564 = vadd.xlane.f32.xlu0 %v1563_v4  ;;  %v1593_v4 = vsel %vm1526_vm2, %v1475_v37, 0.0  ;;  %v1611_v37 = vsel %vm1526_vm2, %v1487_v55, 0.0 }
 0x5b5   : > { %1570 = vadd.xlane.f32.xlu0 %v1569_v35  ;;  %v1461_v35 = vpop.permute.xlu1 %1460 }
 0x5b9   : > { %1576 = vadd.xlane.f32.xlu0 %v1575_v16  ;;  %v10379_v16 = vpop.permute.xlu0 %3899 }
 0x5ba   : > { %15551 = vst [vmem:[#allocation187_spill] sm:$0xff] %v10379_v16  ;;  %v511_v16 = vld [vmem:[%s10433_s30 + $0x18] sm:$0xff] }
 0x5bd   : > { %1582 = vadd.xlane.f32.xlu0 %v1581_v2  ;;  %v1465_v2 = vpop.permute.xlu1 %1464 }
 0x5be   : > { %v1578_v55 = vsel %vm1526_vm2, %v1465_v2, 0.0  ;;  %v15554_v2 = vld [vmem:[#allocation30_spill] sm:$0xff] }
 0x5c1   : > { %1588 = vadd.xlane.f32.xlu0 %v1587_v29  ;;  %v1491_v29 = vpop.permute.xlu0 %1490 }
 0x5c2   : > { %v1617_v36 = vsel %vm1526_vm2, %v1491_v29, 0.0 }
 0x5c5   : > { %1594 = vadd.xlane.f32.xlu0 %v1593_v4  ;;  %v1560_v4 = vsel %vm1526_vm2, %v1453_v25, 0.0  ;;  %v15552_v25 = vld [vmem:[#allocation19_spill] sm:$0xff] }
 0x5c9   : > { %1600 = vadd.xlane.f32.xlu0 %v1599_v20  ;;  %v1469_v20 = vpop.permute.xlu1 %1468 }
 0x5ca   : > { %1543 = vadd.xlane.f32.xlu1 %v1542_v51  ;;  %v1572_v51 = vsel %vm1526_vm2, %v1461_v35, 0.0  ;;  %v1584_v30 = vsel %vm1526_vm2, %v1469_v20, 0.0  ;;  %v15555_v20 = vld [vmem:[#allocation35_spill] sm:$0xff] }
 0x5cd   : > { %1606 = vadd.xlane.f32.xlu0 %v1605_v40  ;;  %v1473_v52 = vpop.permute.xlu1 %1472 }
 0x5ce   : > { %1549 = vadd.xlane.f32.xlu1 %v1548_v56 }
 0x5d1   : > { %1612 = vadd.xlane.f32.xlu0 %v1611_v37  ;;  %v1477_v40 = vpop.permute.xlu1 %1476  ;;  %v1590_v37 = vsel %vm1526_vm2, %v1473_v52, 0.0 }
 0x5d2   : > { %1555 = vadd.xlane.f32.xlu1 %v1554_v44  ;;  %v1596_v32 = vsel %vm1526_vm2, %v1477_v40, 0.0  ;;  %v15553_v44 = vld [vmem:[#allocation25_spill] sm:$0xff]  ;;  %v15049_v40 = vmov 9  }
 0x5d5   : > { %1618 = vadd.xlane.f32.xlu0 %v1617_v36  ;;  %v1481_v56 = vpop.permute.xlu1 %1480 }
 0x5d6   : > { %1561 = vadd.xlane.f32.xlu1 %v1560_v4  ;;  %v1602_v35 = vsel %vm1526_vm2, %v1481_v56, 0.0 }
 0x5d9   : > { %v1485_v29 = vpop.permute.xlu1 %1484 }
 0x5da   : > { %1567 = vadd.xlane.f32.xlu1 %v1566_v41  ;;  %v1608_v4 = vsel %vm1526_vm2, %v1485_v29, 0.0  ;;  %v543_v29 = vld [vmem:[%s14769_s3 + $0x18] sm:$0xff] }
 0x5db   : > { %8132 = vmatprep.subr.mxu0 %v543_v29 }
 0x5dc   : > { %8133 = vmatpush3.msra.mxu0 %v543_v29 }
 0x5dd   : > { %v1489_v36 = vpop.permute.xlu1 %1488 }
 0x5de   : > { %1573 = vadd.xlane.f32.xlu1 %v1572_v51  ;;  %v1614_v41 = vsel %vm1526_vm2, %v1489_v36, 0.0  ;;  %v15556_v51 = vld [vmem:[#allocation40_spill] sm:$0xff] }
 0x5e1   : > { %v1493_v52 = vpop.permute.xlu1 %1492 }
 0x5e2   : > { %1579 = vadd.xlane.f32.xlu1 %v1578_v55  ;;  %v1620_v55 = vsel %vm1526_vm2, %v1493_v52, 0.0  ;;  %v541_v52 = vld [vmem:[%s14769_s3 + $0x8] sm:$0xff] }
 0x5e5   : > { %v10405_v56 = vpop.permute.xlu1 %3895 }
 0x5e6   : > { %1585 = vadd.xlane.f32.xlu1 %v1584_v30  ;;  %v10403_v30 = vpop.permute.xlu0 %3907  ;;  %15558 = vst [vmem:[#allocation188_spill] sm:$0xff] %v10405_v56  ;;  %v15567_v56 = vld [vmem:[#allocation33_spill] sm:$0xff] }
 0x5e7   : > { %15557 = vst [vmem:[#allocation19_spill] sm:$0xff] %v10403_v30  ;;  %v510_v30 = vld [vmem:[%s10433_s30 + $0x10] sm:$0xff] }
 0x5ea   : > { %1591 = vadd.xlane.f32.xlu1 %v1590_v37  ;;  %v10407_v37 = vpop.permute.xlu0 %4487 }
 0x5eb   : > { %4523 = vperm.xlu0 %8478, %v15552_v25   ;;  %15559 = vst [vmem:[#allocation189_spill] sm:$0xff] %v10407_v37 }
 0x5ee   : > { %1597 = vadd.xlane.f32.xlu1 %v1596_v32  ;;  %v10409_v32 = vpop.permute.xlu1 %3903 }
 0x5ef   : > { %4531 = vperm.xlu0 %8478, %v15553_v44   ;;  %15560 = vst [vmem:[#allocation190_spill] sm:$0xff] %v10409_v32  ;;  %v509_v32 = vld [vmem:[%s10433_s30 + $0x8] sm:$0xff] }
 0x5f2   : > { %1603 = vadd.xlane.f32.xlu1 %v1602_v35  ;;  %v10414_v35 = vpop.permute.xlu0 %4499  ;;  %v10416_v36 = vpop.permute.xlu1 %4491 }
 0x5f3   : > { %4539 = vperm.xlu0 %8478, %v15554_v2   ;;  %15561 = vst [vmem:[#allocation191_spill] sm:$0xff] %v10414_v35  ;;  %15562 = vst [vmem:[#allocation192_spill] sm:$0xff] %v10416_v36 }
 0x5f6   : > { %1609 = vadd.xlane.f32.xlu1 %v1608_v4  ;;  %v15563_v4 = vld [vmem:[#allocation22_spill] sm:$0xff]  ;;  %v10435_v29 = vpop.permute.xlu0 %4507 }
 0x5f7   : > { %4547 = vperm.xlu0 %8478, %v15555_v20   ;;  %15565 = vst [vmem:[#allocation193_spill] sm:$0xff] %v10435_v29  ;;  %v15694_v20 = vld [vmem:[#allocation93_spill] sm:$0xff] }
 0x5fa   : > { %1615 = vadd.xlane.f32.xlu1 %v1614_v41  ;;  %v542_v41 = vld [vmem:[%s14769_s3 + $0x10] sm:$0xff] }
 0x5fb   : > { %4555 = vperm.xlu0 %8478, %v15556_v51   ;;  %8134 = vmatprep.subr.mxu0 %v542_v41  ;;  %v10447_v51 = vpop.permute.xlu0 %4515 }
 0x5fc   : > { %8135 = vmatpush3.msra.mxu0 %v542_v41  ;;  %v10437_v41 = vpop.permute.xlu1 %4495  ;;  %15568 = vst [vmem:[#allocation195_spill] sm:$0xff] %v10447_v51  ;;  %v514_v51 = vld [vmem:[%s10433_s30 + $0x30] sm:$0xff] }
 0x5fd   : > { %8136 = vmatprep.subr.mxu0 %v541_v52  ;;  %15566 = vst [vmem:[#allocation194_spill] sm:$0xff] %v10437_v41 }
 0x5fe   : > { %1621 = vadd.xlane.f32.xlu1 %v1620_v55  ;;  %v15564_v55 = vld [vmem:[#allocation28_spill] sm:$0xff]  ;;  %8137 = vmatpush3.msra.mxu0 %v541_v52  ;;  %v508_v52 = vld [vmem:[%s10433_s30] sm:$0xff] }
 0x5ff   : > { %8481 = vset.pattern.permute.xlu0 %v15049_v40  ;;  %v540_v40 = vld [vmem:[%s14769_s3] sm:$0xff]  ;;  %8140 = vmatprep.mubr.msk.f32.mxu0 %vm551_vm0, %v508_v52  ;;  %v1529_v41 = vpop.xlane.xlu0 %1528 }
 0x600   : > { %8138 = vmatprep.subr.mxu0 %v540_v40  ;;  %v10449_v2 = vpop.permute.xlu1 %4503  ;;  %v512_v52 = vld [vmem:[%s10433_s30 + $0x20] sm:$0xff] }
 0x601   : > { %8139 = vmatpush3.msra.mxu0 %v540_v40  ;;  %15569 = vst [vmem:[#allocation196_spill] sm:$0xff] %v10449_v2  ;;  %v15570_v40 = vld [vmem:[#allocation38_spill] sm:$0xff] }
 0x602   : > { %8141 = vmatmul.mubr.msk.f32.vlgmr.msra.gmra.mxu0 %vm551_vm0, %v509_v32  ;;  %v513_v32 = vld [vmem:[%s10433_s30 + $0x28] sm:$0xff]  ;;  %v516_v2 = vld [vmem:[%s10433_s30 + $0x40] sm:$0xff] }
 0x603   : > { %8143 = vmatprep.mubr.msk.f32.mxu0 %vm551_vm0, %v510_v30  ;;  %v15571_v30 = vld [vmem:[#allocation43_spill] sm:$0xff] }
 0x606   : > { %8144 = vmatmul.mubr.msk.f32.gmra.mxu0 %vm551_vm0, %v511_v16  ;;  %v515_v16 = vld [vmem:[%s10433_s30 + $0x38] sm:$0xff] }
 0x607   : > { %8146 = vmatprep.mubr.msk.f32.mxu0 %vm551_vm0, %v512_v52  ;;  %v15572_v52 = vld [vmem:[#allocation48_spill] sm:$0xff] }
 0x60a   : > { %8147 = vmatmul.mubr.msk.f32.gmra.mxu0 %vm551_vm0, %v513_v32  ;;  %v517_v32 = vld [vmem:[%s10433_s30 + $0x48] sm:$0xff] }
 0x60b   : > { %8149 = vmatprep.mubr.msk.f32.mxu0 %vm551_vm0, %v514_v51  ;;  %v519_v51 = vld [vmem:[%s10433_s30 + $0x58] sm:$0xff] }
 0x60e   : > { %8150 = vmatmul.mubr.msk.f32.gmra.mxu0 %vm551_vm0, %v515_v16 }
 0x60f   : > { %4519 = vperm.xlu1 %8479, %v15563_v4   ;;  %8152 = vmatprep.mubr.msk.f32.mxu0 %vm551_vm0, %v516_v2  ;;  %v520_v2 = vld [vmem:[%s10433_s30 + $0x60] sm:$0xff] }
 0x612   : > { %8153 = vmatmul.mubr.msk.f32.gmra.mxu0 %vm551_vm0, %v517_v32 }
 0x613   : > { %4527 = vperm.xlu1 %8479, %v15564_v55  }
 0x617   : > { %4535 = vperm.xlu1 %8479, %v15567_v56  }
 0x61b   : > { %4543 = vperm.xlu1 %8479, %v15570_v40  }
 0x61e   : > { %v1532_v36 = vpop.xlane.xlu1 %1531 }
 0x61f   : > { %8709 = vrcp.f32 %v1532_v36  ;;  %4551 = vperm.xlu1 %8479, %v15571_v30   ;;  %v518_v36 = vld [vmem:[%s10433_s30 + $0x50] sm:$0xff]  ;;  %v15059_v30 = vmov 8  }
 0x620   : > { %8711 = vrcp.f32 %v1529_v41  ;;  %8155 = vmatprep.mubr.msk.f32.mxu0 %vm551_vm0, %v518_v36  ;;  %v522_v36 = vld [vmem:[%s10433_s30 + $0x70] sm:$0xff] }
 0x621   : > { %8156 = vmatmul.mubr.msk.f32.gmra.mxu0 %vm551_vm0, %v519_v51  ;;  %v523_v51 = vld [vmem:[%s10433_s30 + $0x78] sm:$0xff] }
 0x622   : > { %v1538_v40 = vpop.xlane.xlu0 %1537  ;;  %8158 = vmatprep.mubr.msk.f32.mxu0 %vm551_vm0, %v520_v2  ;;  %v524_v2 = vld [vmem:[%s10433_s30 + $0x80] sm:$0xff] }
 0x623   : > { %4559 = vperm.xlu1 %8479, %v15572_v52   ;;  %8713 = vrcp.f32 %v1538_v40  ;;  %v521_v40 = vld [vmem:[%s10433_s30 + $0x68] sm:$0xff] }
 0x625   : > { %8159 = vmatmul.mubr.msk.f32.gmra.mxu0 %vm551_vm0, %v521_v40  ;;  %v525_v40 = vld [vmem:[%s10433_s30 + $0x88] sm:$0xff] }
 0x626   : > { %v1535_v41 = vpop.xlane.xlu0 %1534  ;;  %8161 = vmatprep.mubr.msk.f32.mxu0 %vm551_vm0, %v522_v36 }
 0x627   : > { %8480 = vset.pattern.permute.xlu1 %v15059_v30  ;;  %8715 = vrcp.f32 %v1535_v41 }
 0x629   : > { %8162 = vmatmul.mubr.msk.f32.gmra.mxu0 %vm551_vm0, %v523_v51  ;;  %v527_v51 = vld [vmem:[%s10433_s30 + $0x98] sm:$0xff] }
 0x62a   : > { %8164 = vmatprep.mubr.msk.f32.mxu0 %vm551_vm0, %v524_v2  ;;  %v528_v2 = vld [vmem:[%s10433_s30 + $0xa0] sm:$0xff]  ;;  %v1541_v29 = vpop.xlane.xlu0 %1540 }
 0x62c   : > { %v8710_v16 = vpop.eup %8709 }
 0x62d   : > { %v10474_v52 = vmul.f32 %v8710_v16, %v10193_v63  ;;  %v8712_v32 = vpop.eup %8711  ;;  %v15574_v16 = vmov 9   ;;  %8165 = vmatmul.mubr.msk.f32.gmra.mxu0 %vm551_vm0, %v525_v40  ;;  %v530_v40 = vld [vmem:[%s10433_s30 + $0xb0] sm:$0xff] }
 0x62e   : > { %v10485_v63 = vmul.f32 %v8712_v32, %v10031_v21  ;;  %v526_v32 = vld [vmem:[%s10433_s30 + $0x90] sm:$0xff] }
 0x62f   : > { %15573 = vst [vmem:[#allocation197_spill] sm:$0xff] %v10474_v52  ;;  %3117 = vperm.xlu1 %8480, %v10474_v52   ;;  %4235 = vperm.xlu0 %8481, %v10474_v52  }
 0x630   : > { %v8714_v41 = vpop.eup %8713  ;;  %8167 = vmatprep.mubr.msk.f32.mxu0 %vm551_vm0, %v526_v32  ;;  %v531_v32 = vld [vmem:[%s10433_s30 + $0xb8] sm:$0xff] }
 0x631   : > { %v10496_v21 = vmul.f32 %v8714_v41, %v10204_v31  ;;  %8168 = vmatmul.mubr.msk.f32.gmra.mxu0 %vm551_vm0, %v527_v51  ;;  %v529_v41 = vld [vmem:[%s10433_s30 + $0xa8] sm:$0xff]  ;;  %v534_v51 = vld [vmem:[%s10433_s30 + $0xd0] sm:$0xff] }
 0x632   : > { %8170 = vmatprep.mubr.msk.f32.mxu0 %vm551_vm0, %v528_v2  ;;  %v535_v2 = vld [vmem:[%s10433_s30 + $0xd8] sm:$0xff] }
 0x633   : > { %8483 = vset.pattern.permute.xlu1 %v15574_v16  ;;  %8482 = vset.pattern.permute.xlu0 %v15059_v30  ;;  %15575 = vst [vmem:[#allocation198_spill] sm:$0xff] %v10496_v21 }
 0x634   : > { %4231 = vperm.xlu1 %8483, %v10485_v63   ;;  %3112 = vperm.xlu0 %8482, %v10485_v63   ;;  %v8716_v36 = vpop.eup %8715 }
 0x635   : > { %v10507_v31 = vmul.f32 %v8716_v36, %v10213_v10  ;;  %8171 = vmatmul.mubr.msk.f32.gmra.mxu0 %vm551_vm0, %v529_v41  ;;  %v532_v10 = vld [vmem:[%s10433_s30 + $0xc0] sm:$0xff]  ;;  %v533_v36 = vld [vmem:[%s10433_s30 + $0xc8] sm:$0xff] }
 0x636   : > { %8173 = vmatprep.mubr.msk.f32.mxu0 %vm551_vm0, %v530_v40  ;;  %v536_v41 = vld [vmem:[%s10433_s30 + $0xe0] sm:$0xff]  ;;  %v537_v40 = vld [vmem:[%s10433_s30 + $0xe8] sm:$0xff] }
 0x637   : > { %15576 = vst [vmem:[#allocation199_spill] sm:$0xff] %v10507_v31 }
 0x638   : > { %4243 = vperm.xlu1 %8483, %v10496_v21   ;;  %3127 = vperm.xlu0 %8482, %v10496_v21  }
 0x639   : > { %8174 = vmatmul.mubr.msk.f32.gmra.mxu0 %vm551_vm0, %v531_v32  ;;  %v538_v32 = vld [vmem:[%s10433_s30 + $0xf0] sm:$0xff] }
 0x63a   : > { %8176 = vmatprep.mubr.msk.f32.mxu0 %vm551_vm0, %v532_v10  ;;  %v539_v10 = vld [vmem:[%s10433_s30 + $0xf8] sm:$0xff] }
 0x63c   : > { %8484 = vset.pattern.permute.xlu1 %v15059_v30  ;;  %v10533_v30 = vpop.permute.xlu1 %4511 }
 0x63d   : > { %3122 = vperm.xlu1 %8484, %v10507_v31   ;;  %8177 = vmatmul.mubr.msk.f32.gmra.mxu0 %vm551_vm0, %v533_v36  ;;  %15577 = vst [vmem:[#allocation200_spill] sm:$0xff] %v10533_v30 }
 0x63e   : > { %8179 = vmatprep.mubr.msk.f32.mxu0 %vm551_vm0, %v534_v51 }
 0x641   : > { %8485 = vset.pattern.permute.xlu1 %v15574_v16  ;;  %8180 = vmatmul.mubr.msk.f32.gmra.mxu0 %vm551_vm0, %v535_v2  ;;  %v1547_v2 = vpop.xlane.xlu0 %1546 }
 0x642   : > { %4239 = vperm.xlu1 %8485, %v10507_v31   ;;  %8182 = vmatprep.mubr.msk.f32.mxu0 %vm551_vm0, %v536_v41 }
 0x645   : > { %8183 = vmatmul.mubr.msk.f32.gmra.mxu0 %vm551_vm0, %v537_v40 }
 0x646   : > { %8185 = vmatprep.mubr.msk.f32.mxu0 %vm551_vm0, %v538_v32 }
 0x649   : > { %8186 = vmatmul.mubr.msk.f32.gmra.mxu0 %vm551_vm0, %v539_v10 }
 0x653   : > { %v1544_v36 = vpop.xlane.xlu1 %1543 }
 0x654   : > { %8717 = vrcp.f32 %v1544_v36  ;;  %v15580_v36 = vmov 8  }
 0x655   : > { %8719 = vrcp.f32 %v1541_v29  ;;  %v1553_v29 = vpop.xlane.xlu0 %1552 }
 0x657   : > { %v1550_v51 = vpop.xlane.xlu1 %1549 }
 0x658   : > { %8721 = vrcp.f32 %v1550_v51 }
 0x659   : > { %8723 = vrcp.f32 %v1547_v2  ;;  %v1559_v2 = vpop.xlane.xlu0 %1558 }
 0x65b   : > { %v1556_v35 = vpop.xlane.xlu1 %1555 }
 0x65c   : > { %8725 = vrcp.f32 %v1556_v35 }
 0x65d   : > { %8727 = vrcp.f32 %v1553_v29 }
 0x65f   : > { %v1562_v41 = vpop.xlane.xlu1 %1561 }
 0x660   : > { %8729 = vrcp.f32 %v1562_v41  ;;  %v1565_v41 = vpop.xlane.xlu0 %1564 }
 0x661   : > { %v8718_v44 = vpop.eup %8717  ;;  %8731 = vrcp.f32 %v1559_v2 }
 0x662   : > { %v10539_v40 = vmul.f32 %v8718_v44, %v10221_v39  ;;  %v8720_v30 = vpop.eup %8719 }
 0x663   : > { %v1568_v32 = vpop.xlane.xlu1 %1567  ;;  %v10544_v10 = vmul.f32 %v8720_v30, %v10040_v13 }
 0x664   : > { %15578 = vst [vmem:[#allocation201_spill] sm:$0xff] %v10539_v40  ;;  %3137 = vperm.xlu0 %8482, %v10539_v40   ;;  %4251 = vperm.xlu1 %8485, %v10539_v40   ;;  %8733 = vrcp.f32 %v1568_v32 }
 0x665   : > { %15579 = vst [vmem:[#allocation202_spill] sm:$0xff] %v10544_v10  ;;  %v8722_v51 = vpop.eup %8721  ;;  %8735 = vrcp.f32 %v1565_v41 }
 0x666   : > { %v10551_v44 = vmul.f32 %v8722_v51, %v10231_v7  ;;  %v8724_v13 = vpop.eup %8723 }
 0x667   : > { %v1574_v39 = vpop.xlane.xlu1 %1573  ;;  %v10558_v30 = vmul.f32 %v8724_v13, %v10051_v5 }
 0x668   : > { %8487 = vset.pattern.permute.xlu0 %v15574_v16  ;;  %8486 = vset.pattern.permute.xlu1 %v15580_v36  ;;  %15581 = vst [vmem:[#allocation203_spill] sm:$0xff] %v10551_v44  ;;  %8737 = vrcp.f32 %v1574_v39 }
 0x669   : > { %4247 = vperm.xlu0 %8487, %v10544_v10   ;;  %3132 = vperm.xlu1 %8486, %v10544_v10   ;;  %15582 = vst [vmem:[#allocation204_spill] sm:$0xff] %v10558_v30  ;;  %v8726_v7 = vpop.eup %8725 }
 0x66a   : > { %v10565_v29 = vmul.f32 %v8726_v7, %v10241_v22  ;;  %v8728_v5 = vpop.eup %8727  ;;  %v1571_v7 = vpop.xlane.xlu0 %1570 }
 0x66b   : > { %v1580_v35 = vpop.xlane.xlu1 %1579  ;;  %v10572_v13 = vmul.f32 %v8728_v5, %v10058_v3  ;;  %8739 = vrcp.f32 %v1571_v7 }
 0x66c   : > { %15583 = vst [vmem:[#allocation205_spill] sm:$0xff] %v10565_v29  ;;  %8741 = vrcp.f32 %v1580_v35 }
 0x66d   : > { %8488 = vset.pattern.permute.xlu0 %v15580_v36  ;;  %8489 = vset.pattern.permute.xlu1 %v15574_v16  ;;  %15584 = vst [vmem:[#allocation206_spill] sm:$0xff] %v10572_v13  ;;  %v8730_v22 = vpop.eup %8729 }
 0x66e   : > { %3147 = vperm.xlu0 %8488, %v10551_v44   ;;  %4259 = vperm.xlu1 %8489, %v10551_v44   ;;  %v10581_v55 = vmul.f32 %v8730_v22, %v10249_v54  ;;  %v8732_v3 = vpop.eup %8731  ;;  %v1577_v5 = vpop.xlane.xlu0 %1576 }
 0x66f   : > { %v1586_v51 = vpop.xlane.xlu1 %1585  ;;  %8743 = vrcp.f32 %v1577_v5 }
 0x670   : > { %15585 = vst [vmem:[#allocation207_spill] sm:$0xff] %v10581_v55  ;;  %8745 = vrcp.f32 %v1586_v51 }
 0x671   : > { %v8734_v54 = vpop.eup %8733 }
 0x672   : > { %8491 = vset.pattern.permute.xlu0 %v15574_v16  ;;  %8490 = vset.pattern.permute.xlu1 %v15580_v36  ;;  %v1583_v22 = vpop.xlane.xlu0 %1582 }
 0x673   : > { %4255 = vperm.xlu0 %8491, %v10558_v30   ;;  %3142 = vperm.xlu1 %8490, %v10558_v30   ;;  %v10576_v2 = vpop.xlane.xlu1 %1591  ;;  %8747 = vrcp.f32 %v1583_v22 }
 0x674   : > { %8749 = vrcp.f32 %v10576_v2 }
 0x677   : > { %8492 = vset.pattern.permute.xlu0 %v15580_v36  ;;  %8493 = vset.pattern.permute.xlu1 %v15574_v16  ;;  %v10587_v32 = vpop.xlane.xlu1 %1597 }
 0x678   : > { %3157 = vperm.xlu0 %8492, %v10565_v29   ;;  %4267 = vperm.xlu1 %8493, %v10565_v29  }
 0x67b   : > { %v10596_v41 = vpop.xlane.xlu1 %1603 }
 0x67c   : > { %8495 = vset.pattern.permute.xlu0 %v15574_v16  ;;  %8494 = vset.pattern.permute.xlu1 %v15580_v36 }
 0x67d   : > { %4263 = vperm.xlu0 %8495, %v10572_v13   ;;  %3152 = vperm.xlu1 %8494, %v10572_v13   ;;  %v10590_v13 = vmul.f32 %v8732_v3, %v10069_v24  ;;  %v8736_v24 = vpop.eup %8735  ;;  %v1589_v3 = vpop.xlane.xlu0 %1588 }
 0x67e   : > { %v10608_v7 = vmul.f32 %v8736_v24, %v10078_v11  ;;  %8751 = vrcp.f32 %v1589_v3 }
 0x67f   : > { %15586 = vst [vmem:[#allocation208_spill] sm:$0xff] %v10590_v13  ;;  %v10605_v39 = vpop.xlane.xlu1 %1609  ;;  %8753 = vrcp.f32 %v10587_v32 }
 0x680   : > { %15588 = vst [vmem:[#allocation210_spill] sm:$0xff] %v10608_v7 }
 0x681   : > { %8496 = vset.pattern.permute.xlu0 %v15580_v36  ;;  %8497 = vset.pattern.permute.xlu1 %v15574_v16  ;;  %v1595_v24 = vpop.xlane.xlu0 %1594 }
 0x682   : > { %3167 = vperm.xlu0 %8496, %v10581_v55   ;;  %4275 = vperm.xlu1 %8497, %v10581_v55   ;;  %v10599_v55 = vmul.f32 %v8734_v54, %v10257_v34  ;;  %v8738_v34 = vpop.eup %8737  ;;  %8755 = vrcp.f32 %v1595_v24 }
 0x683   : > { %v10615_v54 = vmul.f32 %v8738_v34, %v10267_v38  ;;  %v10617_v35 = vpop.xlane.xlu1 %1615  ;;  %v8740_v11 = vpop.eup %8739  ;;  %8757 = vrcp.f32 %v10596_v41 }
 0x684   : > { %15587 = vst [vmem:[#allocation209_spill] sm:$0xff] %v10599_v55  ;;  %v10624_v37 = vmul.f32 %v8740_v11, %v10090_v17  ;;  %v8742_v38 = vpop.eup %8741 }
 0x685   : > { %15589 = vst [vmem:[#allocation211_spill] sm:$0xff] %v10615_v54  ;;  %v1601_v34 = vpop.xlane.xlu0 %1600  ;;  %v8744_v17 = vpop.eup %8743 }
 0x686   : > { %8499 = vset.pattern.permute.xlu0 %v15574_v16  ;;  %8498 = vset.pattern.permute.xlu1 %v15580_v36  ;;  %15590 = vst [vmem:[#allocation212_spill] sm:$0xff] %v10624_v37  ;;  %v10645_v22 = vmul.f32 %v8744_v17, %v10096_v18  ;;  %8759 = vrcp.f32 %v1601_v34 }
 0x687   : > { %4271 = vperm.xlu0 %8499, %v10590_v13   ;;  %3162 = vperm.xlu1 %8498, %v10590_v13   ;;  %v10628_v5 = vpop.xlane.xlu1 %1621  ;;  %8761 = vrcp.f32 %v10605_v39 }
 0x688   : > { %15593 = vst [vmem:[#allocation215_spill] sm:$0xff] %v10645_v22 }
 0x689   : > { %v10641_v11 = vpop.xlane.xlu0 %1606 }
 0x68a   : > { %8763 = vrcp.f32 %v10641_v11 }
 0x68b   : > { %8500 = vset.pattern.permute.xlu0 %v15580_v36  ;;  %8501 = vset.pattern.permute.xlu1 %v15574_v16  ;;  %v10639_v51 = vpop.permute.xlu1 %4519  ;;  %8765 = vrcp.f32 %v10617_v35 }
 0x68c   : > { %3177 = vperm.xlu0 %8500, %v10599_v55   ;;  %4283 = vperm.xlu1 %8501, %v10599_v55   ;;  %15592 = vst [vmem:[#allocation214_spill] sm:$0xff] %v10639_v51 }
 0x68f   : > { %v10652_v51 = vpop.permute.xlu1 %4527 }
 0x690   : > { %8503 = vset.pattern.permute.xlu0 %v15574_v16  ;;  %8502 = vset.pattern.permute.xlu1 %v15580_v36  ;;  %15595 = vst [vmem:[#allocation216_spill] sm:$0xff] %v10652_v51 }
 0x691   : > { %4279 = vperm.xlu0 %8503, %v10608_v7   ;;  %3172 = vperm.xlu1 %8502, %v10608_v7   ;;  %v10633_v7 = vmul.f32 %v8742_v38, %v10276_v1  ;;  %v8746_v1 = vpop.eup %8745  ;;  %v15594_v38 = vlaneseq }
 0x692   : > { %v10657_v2 = vmul.f32 %v8746_v1, %v10283_v23  ;;  %v8748_v18 = vpop.eup %8747 }
 0x693   : > { %15591 = vst [vmem:[#allocation213_spill] sm:$0xff] %v10633_v7  ;;  %v10667_v51 = vmul.f32 %v8748_v18, %v10106_v47  ;;  %v8750_v29 = vpop.eup %8749 }
 0x694   : > { %15596 = vst [vmem:[#allocation217_spill] sm:$0xff] %v10657_v2  ;;  %v10678_v47 = vmul.f32 %v8750_v29, %v10292_v46 }
 0x695   : > { %8504 = vset.pattern.permute.xlu0 %v15580_v36  ;;  %8505 = vset.pattern.permute.xlu1 %v15574_v16  ;;  %15598 = vst [vmem:[#allocation219_spill] sm:$0xff] %v10667_v51 }
 0x696   : > { %3187 = vperm.xlu0 %8504, %v10615_v54   ;;  %4291 = vperm.xlu1 %8505, %v10615_v54   ;;  %v10654_v54 = vpop.xlane.xlu0 %1612  ;;  %15600 = vst [vmem:[#allocation221_spill] sm:$0xff] %v10678_v47 }
 0x697   : > { %8767 = vrcp.f32 %v10654_v54 }
 0x698   : > { %8769 = vrcp.f32 %v10628_v5 }
 0x69a   : > { %8507 = vset.pattern.permute.xlu0 %v15574_v16  ;;  %8506 = vset.pattern.permute.xlu1 %v15580_v36  ;;  %v10669_v1 = vpop.xlane.xlu0 %1618 }
 0x69b   : > { %4287 = vperm.xlu0 %8507, %v10624_v37   ;;  %3182 = vperm.xlu1 %8506, %v10624_v37   ;;  %v2010_v37 = vand.u32 127, %v15594_v38  ;;  %v10664_v38 = vpop.permute.xlu1 %4535  ;;  %8771 = vrcp.f32 %v10669_v1 }
 0x69c   : > { %15597 = vst [vmem:[#allocation218_spill] sm:$0xff] %v10664_v38 }
 0x69d   : > { %v2011_v17 = vadd.s32 128, %v2010_v37  ;;  %v2012_v3 = vcvt.s32.f32 %v2010_v37 }
 0x69e   : > { %v10675_v32 = vpop.permute.xlu0 %4523 }
 0x69f   : > { %8508 = vset.pattern.permute.xlu0 %v15580_v36  ;;  %8509 = vset.pattern.permute.xlu1 %v15574_v16  ;;  %v2013_v23 = vcvt.s32.f32 %v2011_v17  ;;  %15599 = vst [vmem:[#allocation220_spill] sm:$0xff] %v10675_v32  ;;  %v10680_v18 = vpop.permute.xlu1 %4543  ;;  %v8752_v17 = vpop.eup %8751 }
 0x6a0   : > { %3197 = vperm.xlu0 %8508, %v10633_v7   ;;  %4299 = vperm.xlu1 %8509, %v10633_v7   ;;  %15601 = vst [vmem:[#allocation222_spill] sm:$0xff] %v10680_v18  ;;  %v10692_v46 = vmul.f32 %v8752_v17, %v10113_v58  ;;  %v8754_v18 = vpop.eup %8753  ;;  %v15625_v7 = vld [vmem:[#allocation75_spill] sm:$0xff] }
 0x6a1   : > { %v2015_v37 = vmul.f32 0.0625, %v2013_v23  ;;  %v10705_v58 = vmul.f32 %v8754_v18, %v10300_v6  ;;  %v15608_v6 = vld [vmem:[#allocation63_spill] sm:$0xff] }
 0x6a2   : > { %15602 = vst [vmem:[#allocation223_spill] sm:$0xff] %v10692_v46  ;;  %v10694_v29 = vpop.permute.xlu0 %4531 }
 0x6a3   : > { %v10688_v24 = vfloor.f32 %v2015_v37  ;;  %15603 = vst [vmem:[#allocation224_spill] sm:$0xff] %v10694_v29  ;;  %v10698_v32 = vpop.permute.xlu1 %4551  ;;  %15605 = vst [vmem:[#allocation226_spill] sm:$0xff] %v10705_v58  ;;  %v8756_v37 = vpop.eup %8755 }
 0x6a4   : > { %8511 = vset.pattern.permute.xlu0 %v15574_v16  ;;  %8510 = vset.pattern.permute.xlu1 %v15580_v36  ;;  %15604 = vst [vmem:[#allocation225_spill] sm:$0xff] %v10698_v32 }
 0x6a5   : > { %4295 = vperm.xlu0 %8511, %v10645_v22   ;;  %3192 = vperm.xlu1 %8510, %v10645_v22  }
 0x6a6   : > { %v10712_v32 = vpop.permute.xlu0 %4539 }
 0x6a7   : > { %15606 = vst [vmem:[#allocation227_spill] sm:$0xff] %v10712_v32  ;;  %v10716_v29 = vpop.permute.xlu1 %4559 }
 0x6a8   : > { %15607 = vst [vmem:[#allocation228_spill] sm:$0xff] %v10716_v29 }
 0x6a9   : > { %8512 = vset.pattern.permute.xlu0 %v15580_v36  ;;  %8513 = vset.pattern.permute.xlu1 %v15574_v16 }
 0x6aa   : > { %3207 = vperm.xlu0 %8512, %v10657_v2   ;;  %4307 = vperm.xlu1 %8513, %v10657_v2   ;;  %v2014_v2 = vmul.f32 0.0625, %v2012_v3  ;;  %v10734_v29 = vpop.permute.xlu0 %4547 }
 0x6ab   : > { %v10728_v18 = vpop.permute.xlu1 %3117 }
 0x6ac   : > { %v10685_v38 = vfloor.f32 %v2014_v2  ;;  %v2019_v2 = vmul.f32 16.0, %v10688_v24  ;;  %15610 = vst [vmem:[#allocation229_spill] sm:$0xff] %v10728_v18 }
 0x6ae   : > { %8515 = vset.pattern.permute.xlu0 %v15574_v16  ;;  %8514 = vset.pattern.permute.xlu1 %v15580_v36  ;;  %v10710_v17 = vsub.f32 %v2013_v23, %v2019_v2  ;;  %v8758_v23 = vpop.eup %8757  ;;  %v15611_v2 = vld [vmem:[#allocation70_spill] sm:$0xff] }
 0x6af   : > { %4303 = vperm.xlu0 %8515, %v10667_v51   ;;  %3202 = vperm.xlu1 %8514, %v10667_v51   ;;  %v2018_v51 = vmul.f32 16.0, %v10685_v38  ;;  %v2790_v39 = vsub.f32 %v10685_v38, %v15611_v2  ;;  %15612 = vst [vmem:[#allocation70_spill] sm:$0xff] %v10734_v29  ;;  %v10745_v18 = vmul.f32 %v8758_v23, %v10307_v49  ;;  %v8760_v29 = vpop.eup %8759 }
 0x6b0   : > { %v8762_v4 = vpop.eup %8761 }
 0x6b1   : > { %v10707_v41 = vsub.f32 %v2012_v3, %v2018_v51  ;;  %v10723_v51 = vmul.f32 %v8756_v37, %v10120_v42  ;;  %v2377_v3 = vsub.f32 %v10710_v17, %v15608_v6  ;;  %v2791_v37 = vsub.f32 %v10688_v24, %v15611_v2 }
 0x6b3   : > { %8516 = vset.pattern.permute.xlu0 %v15580_v36  ;;  %8517 = vset.pattern.permute.xlu1 %v15574_v16  ;;  %v2376_v34 = vsub.f32 %v10707_v41, %v15608_v6  ;;  %15609 = vst [vmem:[#allocation63_spill] sm:$0xff] %v10723_v51  ;;  %v2441_v6 = vand.u32 2147483647, %v2377_v3  ;;  %v2855_v11 = vand.u32 2147483647, %v2791_v37  ;;  %v15615_v3 = vld [vmem:[#allocation72_spill] sm:$0xff]  ;;  %v2374_v22 = vsub.f32 %v10707_v41, %v15625_v7 }
 0x6b4   : > { %3217 = vperm.xlu0 %8516, %v10678_v47   ;;  %4315 = vperm.xlu1 %8517, %v10678_v47   ;;  %v3526_v2 = vsub.f32 %v10707_v41, %v15615_v3  ;;  %v3527_v47 = vsub.f32 %v10710_v17, %v15615_v3 }
 0x6b5   : > { %v2440_v42 = vand.u32 2147483647, %v2376_v34  ;;  %v2505_v49 = vsub.f32 1.0, %v2441_v6  ;;  %v2919_v40 = vsub.f32 1.0, %v2855_v11 }
 0x6b6   : > { %v3590_v3 = vand.u32 2147483647, %v3526_v2  ;;  %v3591_v21 = vand.u32 2147483647, %v3527_v47 }
 0x6b7   : > { %v2504_v34 = vsub.f32 1.0, %v2440_v42  ;;  %v10761_v42 = vmul.f32 %v8760_v29, %v10128_v27  ;;  %v15620_v27 = vld [vmem:[#allocation73_spill] sm:$0xff]  ;;  %v15621_v29 = vld [vmem:[#allocation80_spill] sm:$0xff] }
 0x6b8   : > { %8519 = vset.pattern.permute.xlu0 %v15574_v16  ;;  %8518 = vset.pattern.permute.xlu1 %v15580_v36  ;;  %v3528_v35 = vsub.f32 %v10707_v41, %v15620_v27  ;;  %v2381_v47 = vsub.f32 %v10710_v17, %v15621_v29  ;;  %v3529_v54 = vsub.f32 %v10710_v17, %v15620_v27  ;;  %v15626_v27 = vld [vmem:[#allocation85_spill] sm:$0xff] }
 0x6b9   : > { %4311 = vperm.xlu0 %8519, %v10692_v46   ;;  %3212 = vperm.xlu1 %8518, %v10692_v46   ;;  %v15613_v46 = vld [vmem:[#allocation71_spill] sm:$0xff]  ;;  %15618 = vst [vmem:[#allocation231_spill] sm:$0xff] %v10761_v42 }
 0x6ba   : > { %v2792_v32 = vsub.f32 %v10685_v38, %v15613_v46  ;;  %15614 = vst [vmem:[#allocation71_spill] sm:$0xff] %v10745_v18 }
 0x6bc   : > { %v2856_v23 = vand.u32 2147483647, %v2792_v32  ;;  %v2568_v32 = vmax.f32 %v2504_v34, 0.0 }
 0x6bd   : > { %8520 = vset.pattern.permute.xlu0 %v15580_v36  ;;  %8521 = vset.pattern.permute.xlu1 %v15574_v16 }
 0x6be   : > { %3227 = vperm.xlu0 %8520, %v10705_v58   ;;  %4323 = vperm.xlu1 %8521, %v10705_v58   ;;  %v2793_v58 = vsub.f32 %v10688_v24, %v15613_v46  ;;  %v10754_v46 = vpop.permute.xlu1 %4231  ;;  %v2920_v6 = vsub.f32 1.0, %v2856_v23  ;;  %v10785_v23 = vmul.f32 %v8762_v4, %v10313_v45  ;;  %v3592_v45 = vand.u32 2147483647, %v3528_v35 }
 0x6bf   : > { %15616 = vst [vmem:[#allocation72_spill] sm:$0xff] %v10754_v46  ;;  %v3654_v46 = vsub.f32 1.0, %v3590_v3  ;;  %v3533_v35 = vsub.f32 %v10710_v17, %v15626_v27 }
 0x6c0   : > { %v2857_v30 = vand.u32 2147483647, %v2793_v58  ;;  %v2569_v58 = vmax.f32 %v2505_v49, 0.0  ;;  %15624 = vst [vmem:[#allocation80_spill] sm:$0xff] %v10785_v23 }
 0x6c1   : > { %v10804_v55 = vmax.f32 %v3654_v46, 0.0 }
 0x6c2   : > { %8523 = vset.pattern.permute.xlu0 %v15574_v16  ;;  %8522 = vset.pattern.permute.xlu1 %v15580_v36  ;;  %v10776_v11 = vpop.permute.xlu1 %4243  ;;  %v10818_v5 = vpop.f32.mrf.mxu0 }
 0x6c3   : > { %4319 = vperm.xlu0 %8523, %v10723_v51   ;;  %3222 = vperm.xlu1 %8522, %v10723_v51   ;;  %v2854_v51 = vand.u32 2147483647, %v2790_v39  ;;  %v10757_v39 = vpop.permute.xlu0 %4555  ;;  %15622 = vst [vmem:[#allocation73_spill] sm:$0xff] %v10776_v11  ;;  %15628 = vst [vmem:[#allocation75_spill] sm:$0xff] %v10804_v55 }
 0x6c4   : > { %15617 = vst [vmem:[#allocation230_spill] sm:$0xff] %v10757_v39 }
 0x6c5   : > { %v2918_v37 = vsub.f32 1.0, %v2854_v51  ;;  %v2380_v51 = vsub.f32 %v10707_v41, %v15621_v29  ;;  %v2984_v29 = vmax.f32 %v2920_v6, 0.0 }
 0x6c7   : > { %8524 = vset.pattern.permute.xlu0 %v15580_v36  ;;  %8525 = vset.pattern.permute.xlu1 %v15574_v16  ;;  %v10766_v39 = vpop.permute.xlu0 %4235  ;;  %v10778_v34 = vmax.f32 %v2918_v37, 0.0  ;;  %v8764_v37 = vpop.eup %8763  ;;  %v2444_v4 = vand.u32 2147483647, %v2380_v51  ;;  %v10815_v31 = vmul.f32 %v2984_v29, %v2568_v32  ;;  %v3597_v29 = vand.u32 2147483647, %v3533_v35 }
 0x6c8   : > { %3237 = vperm.xlu0 %8524, %v10745_v18   ;;  %4331 = vperm.xlu1 %8525, %v10745_v18   ;;  %v2921_v18 = vsub.f32 1.0, %v2857_v30  ;;  %15619 = vst [vmem:[#allocation232_spill] sm:$0xff] %v10766_v39  ;;  %v15623_v30 = vld [vmem:[#allocation82_spill] sm:$0xff]  ;;  %v10787_v39 = vmax.f32 %v2919_v40, 0.0  ;;  %v10810_v51 = vpop.permute.xlu1 %3122  ;;  %v8766_v46 = vpop.eup %8765 }
 0x6c9   : > { %v2796_v2 = vsub.f32 %v10685_v38, %v15623_v30  ;;  %v2797_v49 = vsub.f32 %v10688_v24, %v15623_v30  ;;  %v2375_v30 = vsub.f32 %v10710_v17, %v15625_v7  ;;  %15630 = vst [vmem:[#allocation233_spill] sm:$0xff] %v10810_v51  ;;  %15632 = vst [vmem:[#allocation235_spill] sm:$0xff] %v10815_v31  ;;  %v3661_v31 = vsub.f32 1.0, %v3597_v29 }
 0x6ca   : > { %v2985_v11 = vmax.f32 %v2921_v18, 0.0  ;;  %v3532_v18 = vsub.f32 %v10707_v41, %v15626_v27 }
 0x6cb   : > { %v2860_v40 = vand.u32 2147483647, %v2796_v2  ;;  %v2861_v3 = vand.u32 2147483647, %v2797_v49  ;;  %v10802_v6 = vpop.permute.xlu0 %3112  ;;  %v3593_v2 = vand.u32 2147483647, %v3529_v54 }
 0x6cc   : > { %8527 = vset.pattern.permute.xlu0 %v15574_v16  ;;  %8526 = vset.pattern.permute.xlu1 %v15580_v36  ;;  %15627 = vst [vmem:[#allocation82_spill] sm:$0xff] %v10802_v6  ;;  %v2438_v49 = vand.u32 2147483647, %v2374_v22  ;;  %v2508_v6 = vsub.f32 1.0, %v2444_v4  ;;  %v10822_v55 = vmul.f32 %v2985_v11, %v2569_v58  ;;  %v3596_v54 = vand.u32 2147483647, %v3532_v18 }
 0x6cd   : > { %4327 = vperm.xlu0 %8527, %v10761_v42   ;;  %3232 = vperm.xlu1 %8526, %v10761_v42   ;;  %v3655_v42 = vsub.f32 1.0, %v3591_v21  ;;  %v2445_v21 = vand.u32 2147483647, %v2381_v47  ;;  %v10813_v47 = vmul.f32 %v8764_v37, %v10135_v19  ;;  %v2924_v22 = vsub.f32 1.0, %v2860_v40  ;;  %v10827_v37 = vpop.f32.mrf.mxu0 }
 0x6ce   : > { %v2925_v32 = vsub.f32 1.0, %v2861_v3  ;;  %v2502_v11 = vsub.f32 1.0, %v2438_v49  ;;  %v10839_v3 = vmul.f32 %v8766_v46, %v10319_v12  ;;  %v3657_v18 = vsub.f32 1.0, %v3593_v2 }
 0x6cf   : > { %v10806_v7 = vmax.f32 %v3655_v42, 0.0  ;;  %15631 = vst [vmem:[#allocation234_spill] sm:$0xff] %v10813_v47  ;;  %v3656_v42 = vsub.f32 1.0, %v3592_v45  ;;  %v2509_v19 = vsub.f32 1.0, %v2445_v21  ;;  %v15635_v45 = vld [vmem:[#allocation92_spill] sm:$0xff]  ;;  %v10836_v40 = vpop.permute.xlu0 %3127  ;;  %v10848_v1 = vpop.f32.mrf.mxu0  ;;  %v2988_v46 = vmax.f32 %v2924_v22, 0.0 }
 0x6d0   : > { %v2794_v58 = vsub.f32 %v10685_v38, %v15635_v45  ;;  %v2795_v21 = vsub.f32 %v10688_v24, %v15635_v45  ;;  %15636 = vst [vmem:[#allocation92_spill] sm:$0xff] %v10836_v40  ;;  %15637 = vst [vmem:[#allocation236_spill] sm:$0xff] %v10839_v3  ;;  %v2572_v45 = vmax.f32 %v2508_v6, 0.0  ;;  %v2989_v2 = vmax.f32 %v2925_v32, 0.0 }
 0x6d1   : > { %8528 = vset.pattern.permute.xlu0 %v15580_v36  ;;  %8529 = vset.pattern.permute.xlu1 %v15574_v16  ;;  %15629 = vst [vmem:[#allocation85_spill] sm:$0xff] %v10806_v7  ;;  %v15633_v7 = vld [vmem:[#allocation89_spill] sm:$0xff]  ;;  %v10850_v49 = vmax.f32 %v3656_v42, 0.0  ;;  %v2573_v12 = vmax.f32 %v2509_v19, 0.0  ;;  %v2566_v13 = vmax.f32 %v2502_v11, 0.0 }
 0x6d2   : > { %3247 = vperm.xlu0 %8528, %v10785_v23   ;;  %4339 = vperm.xlu1 %8529, %v10785_v23   ;;  %v2439_v23 = vand.u32 2147483647, %v2375_v30  ;;  %v2378_v27 = vsub.f32 %v10707_v41, %v15633_v7  ;;  %15634 = vst [vmem:[#allocation89_spill] sm:$0xff] %v10822_v55  ;;  %v2379_v30 = vsub.f32 %v10710_v17, %v15633_v7  ;;  %v10845_v55 = vpop.permute.xlu1 %4239  ;;  %v2859_v42 = vand.u32 2147483647, %v2795_v21 }
 0x6d3   : > { %15640 = vst [vmem:[#allocation237_spill] sm:$0xff] %v10850_v49  ;;  %v10870_v11 = vmul.f32 %v2988_v46, %v2572_v45  ;;  %v10883_v45 = vmax.f32 %v3661_v31, 0.0 }
 0x6d4   : > { %v2503_v4 = vsub.f32 1.0, %v2439_v23  ;;  %v2442_v35 = vand.u32 2147483647, %v2378_v27  ;;  %v8768_v23 = vpop.eup %8767  ;;  %v3660_v27 = vsub.f32 1.0, %v3596_v54  ;;  %v2443_v40 = vand.u32 2147483647, %v2379_v30 }
 0x6d5   : > { %v10862_v32 = vmul.f32 %v8768_v23, %v10144_v50  ;;  %v10864_v54 = vmax.f32 %v3657_v18, 0.0  ;;  %v15645_v30 = vld [vmem:[#allocation94_spill] sm:$0xff]  ;;  %v10877_v18 = vmul.f32 %v2989_v2, %v2573_v12  ;;  %15650 = vst [vmem:[#allocation243_spill] sm:$0xff] %v10883_v45  ;;  %v2923_v46 = vsub.f32 1.0, %v2859_v42 }
 0x6d6   : > { %8531 = vset.pattern.permute.xlu0 %v15574_v16  ;;  %8530 = vset.pattern.permute.xlu1 %v15580_v36  ;;  %v2567_v44 = vmax.f32 %v2503_v4, 0.0  ;;  %v2506_v49 = vsub.f32 1.0, %v2442_v35  ;;  %v3531_v29 = vsub.f32 %v10710_v17, %v15645_v30  ;;  %15646 = vst [vmem:[#allocation94_spill] sm:$0xff] %v10870_v11  ;;  %v8770_v4 = vpop.eup %8769  ;;  %v2507_v21 = vsub.f32 1.0, %v2443_v40 }
 0x6d7   : > { %4335 = vperm.xlu0 %8531, %v10813_v47   ;;  %3242 = vperm.xlu1 %8530, %v10813_v47   ;;  %v15638_v47 = vld [vmem:[#allocation76_spill] sm:$0xff]  ;;  %15643 = vst [vmem:[#allocation240_spill] sm:$0xff] %v10862_v32  ;;  %15644 = vst [vmem:[#allocation241_spill] sm:$0xff] %v10864_v54  ;;  %v10881_v23 = vmax.f32 %v3660_v27, 0.0 }
 0x6d8   : > { %v2798_v7 = vsub.f32 %v10685_v38, %v15638_v47  ;;  %v2799_v51 = vsub.f32 %v10688_v24, %v15638_v47  ;;  %15639 = vst [vmem:[#allocation76_spill] sm:$0xff] %v10845_v55  ;;  %v2858_v47 = vand.u32 2147483647, %v2794_v58  ;;  %v10855_v55 = vpop.f32.mrf.mxu0  ;;  %v3530_v58 = vsub.f32 %v10707_v41, %v15645_v30 }
 0x6d9   : > { %15649 = vst [vmem:[#allocation242_spill] sm:$0xff] %v10881_v23  ;;  %v10886_v30 = vmul.f32 %v10778_v34, %v2566_v13  ;;  %v10892_v2 = vmul.f32 %v10787_v39, %v2567_v44  ;;  %v10901_v13 = vmul.f32 %v8770_v4, %v10325_v8  ;;  %v2571_v34 = vmax.f32 %v2507_v21, 0.0 }
 0x6da   : > { %v2862_v6 = vand.u32 2147483647, %v2798_v7  ;;  %v2863_v19 = vand.u32 2147483647, %v2799_v51  ;;  %v10873_v51 = vpop.f32.mrf.mxu0  ;;  %v2922_v35 = vsub.f32 1.0, %v2858_v47  ;;  %v15647_v7 = vld [vmem:[#allocation78_spill] sm:$0xff] }
 0x6db   : > { %8532 = vset.pattern.permute.xlu0 %v15580_v36  ;;  %8533 = vset.pattern.permute.xlu1 %v15574_v16  ;;  %v3534_v50 = vsub.f32 %v10707_v41, %v15647_v7  ;;  %15648 = vst [vmem:[#allocation78_spill] sm:$0xff] %v10877_v18  ;;  %15651 = vst [vmem:[#allocation244_spill] sm:$0xff] %v10886_v30  ;;  %v2570_v47 = vmax.f32 %v2506_v49, 0.0  ;;  %v3535_v31 = vsub.f32 %v10710_v17, %v15647_v7  ;;  %v15657_v7 = vld [vmem:[#allocation99_spill] sm:$0xff] }
 0x6dc   : > { %3257 = vperm.xlu0 %8532, %v10839_v3   ;;  %4347 = vperm.xlu1 %8533, %v10839_v3   ;;  %v10889_v40 = vpop.f32.mrf.mxu0  ;;  %v2926_v3 = vsub.f32 1.0, %v2862_v6  ;;  %v2927_v12 = vsub.f32 1.0, %v2863_v19  ;;  %15652 = vst [vmem:[#allocation245_spill] sm:$0xff] %v10892_v2  ;;  %15655 = vst [vmem:[#allocation248_spill] sm:$0xff] %v10901_v13  ;;  %v15656_v6 = vld [vmem:[#allocation97_spill] sm:$0xff]  ;;  %v8772_v19 = vpop.eup %8771  ;;  %v2800_v8 = vsub.f32 %v10685_v38, %v15657_v7 }
 0x6dd   : > { %v10903_v49 = vand.u32 2147483647, %v3534_v50  ;;  %v2384_v44 = vsub.f32 %v10707_v41, %v15656_v6  ;;  %v2801_v4 = vsub.f32 %v10688_v24, %v15657_v7  ;;  %v3599_v54 = vand.u32 2147483647, %v3535_v31 }
 0x6de   : > { %v10908_v39 = vpop.f32.mrf.mxu0  ;;  %v10918_v21 = vmax.f32 %v2926_v3, 0.0  ;;  %v10929_v11 = vmax.f32 %v2927_v12, 0.0  ;;  %v10939_v23 = vmul.f32 %v8772_v19, %v10161_v60  ;;  %v2864_v52 = vand.u32 2147483647, %v2800_v8  ;;  %v15665_v19 = vld [vmem:[#allocation101_spill] sm:$0xff] }
 0x6df   : > { %v10857_v22 = vpop.permute.xlu1 %4251  ;;  %v10859_v10 = vpop.permute.xlu0 %3137  ;;  %v3662_v3 = vsub.f32 1.0, %v10903_v49  ;;  %v2448_v2 = vand.u32 2147483647, %v2384_v44  ;;  %v3663_v60 = vsub.f32 1.0, %v3599_v54 }
 0x6e0   : > { %15641 = vst [vmem:[#allocation238_spill] sm:$0xff] %v10857_v22  ;;  %15642 = vst [vmem:[#allocation239_spill] sm:$0xff] %v10859_v10  ;;  %8535 = vset.pattern.permute.xlu0 %v15574_v16  ;;  %8534 = vset.pattern.permute.xlu1 %v15580_v36  ;;  %v3594_v10 = vand.u32 2147483647, %v3530_v58  ;;  %v3595_v22 = vand.u32 2147483647, %v3531_v29  ;;  %v2385_v29 = vsub.f32 %v10710_v17, %v15656_v6 }
 0x6e1   : > { %4343 = vperm.xlu0 %8535, %v10862_v32   ;;  %3252 = vperm.xlu1 %8534, %v10862_v32   ;;  %v2986_v32 = vmax.f32 %v2922_v35, 0.0  ;;  %v2987_v58 = vmax.f32 %v2923_v46, 0.0  ;;  %v15658_v35 = vld [vmem:[#allocation79_spill] sm:$0xff] }
 0x6e2   : > { %v2802_v50 = vsub.f32 %v10685_v38, %v15658_v35  ;;  %v2803_v46 = vsub.f32 %v10688_v24, %v15658_v35  ;;  %v3658_v7 = vsub.f32 1.0, %v3594_v10  ;;  %v3659_v18 = vsub.f32 1.0, %v3595_v22  ;;  %15662 = vst [vmem:[#allocation79_spill] sm:$0xff] %v10939_v23 }
 0x6e3   : > { %v2865_v10 = vand.u32 2147483647, %v2801_v4  ;;  %v10941_v22 = vmul.f32 %v2986_v32, %v2570_v47  ;;  %v3537_v32 = vsub.f32 %v10710_v17, %v15665_v19  ;;  %v15666_v47 = vld [vmem:[#allocation83_spill] sm:$0xff] }
 0x6e4   : > { %v10896_v27 = vpop.permute.xlu1 %3132  ;;  %v10898_v42 = vpop.permute.xlu0 %4247  ;;  %v2866_v31 = vand.u32 2147483647, %v2802_v50  ;;  %v2867_v49 = vand.u32 2147483647, %v2803_v46  ;;  %v2512_v50 = vsub.f32 1.0, %v2448_v2  ;;  %v2928_v46 = vsub.f32 1.0, %v2864_v52 }
 0x6e5   : > { %15653 = vst [vmem:[#allocation246_spill] sm:$0xff] %v10896_v27  ;;  %15654 = vst [vmem:[#allocation247_spill] sm:$0xff] %v10898_v42  ;;  %8536 = vset.pattern.permute.xlu0 %v15580_v36  ;;  %8537 = vset.pattern.permute.xlu1 %v15574_v16  ;;  %v15659_v42 = vld [vmem:[#allocation81_spill] sm:$0xff]  ;;  %v10927_v27 = vpop.f32.mrf.mxu0 }
 0x6e6   : > { %3267 = vperm.xlu0 %8536, %v10901_v13   ;;  %v3538_v6 = vsub.f32 %v10707_v41, %v15659_v42  ;;  %4355 = vperm.xlu1 %8537, %v10901_v13   ;;  %v3539_v30 = vsub.f32 %v10710_v17, %v15659_v42  ;;  %v2449_v13 = vand.u32 2147483647, %v2385_v29  ;;  %15663 = vst [vmem:[#allocation81_spill] sm:$0xff] %v10941_v22 }
 0x6e7   : > { %v10944_v12 = vpop.f32.mrf.mxu0  ;;  %v10946_v42 = vmul.f32 %v2987_v58, %v2571_v34  ;;  %v3536_v29 = vsub.f32 %v10707_v41, %v15665_v19  ;;  %v10959_v34 = vmax.f32 %v3658_v7, 0.0  ;;  %v10961_v58 = vmax.f32 %v3659_v18, 0.0 }
 0x6e8   : > { %v3602_v44 = vand.u32 2147483647, %v3538_v6  ;;  %v3603_v4 = vand.u32 2147483647, %v3539_v30  ;;  %v2929_v6 = vsub.f32 1.0, %v2865_v10  ;;  %v2393_v19 = vsub.f32 %v10710_v17, %v15666_v47  ;;  %v15672_v10 = vld [vmem:[#allocation45_spill] sm:$0xff] }
 0x6e9   : > { %v10934_v45 = vpop.permute.xlu1 %4259  ;;  %v10936_v35 = vpop.permute.xlu0 %3147  ;;  %15664 = vst [vmem:[#allocation249_spill] sm:$0xff] %v10946_v42  ;;  %15667 = vst [vmem:[#allocation101_spill] sm:$0xff] %v10959_v34  ;;  %v2930_v42 = vsub.f32 1.0, %v2866_v31  ;;  %v2931_v7 = vsub.f32 1.0, %v2867_v49  ;;  %v3601_v30 = vand.u32 2147483647, %v3537_v32 }
 0x6ea   : > { %15660 = vst [vmem:[#allocation97_spill] sm:$0xff] %v10934_v45  ;;  %15661 = vst [vmem:[#allocation99_spill] sm:$0xff] %v10936_v35  ;;  %8539 = vset.pattern.permute.xlu0 %v15574_v16  ;;  %8538 = vset.pattern.permute.xlu1 %v15580_v36  ;;  %v2392_v16 = vsub.f32 %v10707_v41, %v15666_v47  ;;  %v10957_v8 = vpop.f32.mrf.mxu0  ;;  %v15669_v36 = vld [vmem:[#allocation102_spill] sm:$0xff]  ;;  %v3666_v22 = vsub.f32 1.0, %v3602_v44  ;;  %v10978_v47 = vmax.f32 %v3662_v3, 0.0  ;;  %v3667_v49 = vsub.f32 1.0, %v3603_v4 }
 0x6eb   : > { %4351 = vperm.xlu0 %8539, %v10939_v23   ;;  %3262 = vperm.xlu1 %8538, %v10939_v23   ;;  %15668 = vst [vmem:[#allocation83_spill] sm:$0xff] %v10961_v58  ;;  %v2382_v54 = vsub.f32 %v10707_v41, %v15669_v36  ;;  %v2513_v23 = vsub.f32 1.0, %v2449_v13  ;;  %v3600_v58 = vand.u32 2147483647, %v3536_v29  ;;  %v2383_v52 = vsub.f32 %v10710_v17, %v15669_v36  ;;  %v15675_v44 = vld [vmem:[#allocation53_spill] sm:$0xff] }
 0x6ec   : > { %v10972_v18 = vpop.f32.mrf.mxu0  ;;  %v2456_v2 = vand.u32 2147483647, %v2392_v16  ;;  %15673 = vst [vmem:[#allocation251_spill] sm:$0xff] %v10978_v47  ;;  %v10980_v13 = vmax.f32 %v3663_v60, 0.0  ;;  %v2576_v29 = vmax.f32 %v2512_v50, 0.0  ;;  %v2992_v32 = vmax.f32 %v2928_v46, 0.0 }
 0x6ed   : > { %v2446_v31 = vand.u32 2147483647, %v2382_v54  ;;  %v2457_v34 = vand.u32 2147483647, %v2393_v19  ;;  %v2577_v36 = vmax.f32 %v2513_v23, 0.0  ;;  %v10985_v16 = vmax.f32 %v2930_v42, 0.0 }
 0x6ee   : > { %v10967_v35 = vpop.permute.xlu1 %3142  ;;  %v10969_v45 = vpop.permute.xlu0 %4255  ;;  %15674 = vst [vmem:[#allocation252_spill] sm:$0xff] %v10980_v13  ;;  %v3664_v54 = vsub.f32 1.0, %v3600_v58  ;;  %v3665_v4 = vsub.f32 1.0, %v3601_v30  ;;  %v2520_v13 = vsub.f32 1.0, %v2456_v2  ;;  %v15679_v47 = vld [vmem:[#allocation50_spill] sm:$0xff]  ;;  %v15681_v23 = vld [vmem:[#allocation88_spill] sm:$0xff]  ;;  %v11005_v30 = vmul.f32 %v2992_v32, %v2576_v29 }
 0x6ef   : > { %15670 = vst [vmem:[#allocation102_spill] sm:$0xff] %v10967_v35  ;;  %15671 = vst [vmem:[#allocation250_spill] sm:$0xff] %v10969_v45  ;;  %8540 = vset.pattern.permute.xlu0 %v15535_v14  ;;  %8541 = vset.pattern.permute.xlu1 %v15535_v14  ;;  %v10983_v45 = vpop.f32.mrf.mxu0  ;;  %v2993_v35 = vmax.f32 %v2929_v6, 0.0  ;;  %v10987_v14 = vmax.f32 %v2931_v7, 0.0  ;;  %v2510_v46 = vsub.f32 1.0, %v2446_v31  ;;  %v10996_v6 = vmax.f32 %v3667_v49, 0.0 }
 0x6f0   : > { %4563 = vperm.xlu0 %8540, %v15672_v10   ;;  %4567 = vperm.xlu1 %8541, %v15675_v44   ;;  %v10989_v10 = vmax.f32 %v3666_v22, 0.0  ;;  %v2447_v44 = vand.u32 2147483647, %v2383_v52  ;;  %v2806_v42 = vsub.f32 %v10685_v38, %v15681_v23  ;;  %v2807_v22 = vsub.f32 %v10688_v24, %v15681_v23  ;;  %v15682_v19 = vld [vmem:[#allocation58_spill] sm:$0xff]  ;;  %15684 = vst [vmem:[#allocation88_spill] sm:$0xff] %v11005_v30  ;;  %v15686_v49 = vld [vmem:[#allocation91_spill] sm:$0xff] }
 0x6f1   : > { %v8160_v50 = vpop.f32.mrf.mxu0  ;;  %15680 = vst [vmem:[#allocation256_spill] sm:$0xff] %v10996_v6  ;;  %v2521_v7 = vsub.f32 1.0, %v2457_v34  ;;  %v11007_v52 = vmul.f32 %v2993_v35, %v2577_v36  ;;  %v3543_v23 = vsub.f32 %v10710_v17, %v15686_v49  ;;  %v11018_v34 = vld [vmem:[%s14770_s4] ss:$0 sm:$0xff]  ;;  %v11022_v29 = vmax.f32 %v3665_v4, 0.0  ;;  %v15693_v4 = vld [vmem:[#allocation65_spill] sm:$0xff] }
 0x6f2   : > { %15676 = vst [vmem:[#allocation253_spill] sm:$0xff] %v10989_v10  ;;  %v2511_v35 = vsub.f32 1.0, %v2447_v44  ;;  %v11024_v32 = vmax.f32 %v2520_v13, 0.0  ;;  %v15692_v30 = vld [vmem:[#allocation110_spill] sm:$0xff]  ;;  %v2871_v10 = vand.u32 2147483647, %v2807_v22 }
 0x6f3   : > { %v10991_v3 = vpop.permute.xlu1 %4267  ;;  %v10993_v60 = vpop.permute.xlu0 %3157  ;;  %15688 = vst [vmem:[#allocation257_spill] sm:$0xff] %v11022_v29  ;;  %v2804_v6 = vsub.f32 %v10685_v38, %v15692_v30  ;;  %v11035_v13 = vmax.f32 %v2521_v7, 0.0  ;;  %v2397_v7 = vsub.f32 %v10710_v17, %v15694_v20 }
 0x6f4   : > { %15677 = vst [vmem:[#allocation254_spill] sm:$0xff] %v10991_v3  ;;  %15678 = vst [vmem:[#allocation255_spill] sm:$0xff] %v10993_v60  ;;  %4571 = vperm.xlu0 %8540, %v15679_v47   ;;  %4575 = vperm.xlu1 %8541, %v15682_v19   ;;  %v15683_v60 = vld [vmem:[#allocation107_spill] sm:$0xff]  ;;  %v774_v2 = vpop.f32.mrf.mxu0  ;;  %v3542_v47 = vsub.f32 %v10707_v41, %v15686_v49  ;;  %v11020_v19 = vmax.f32 %v3664_v54, 0.0  ;;  %v2574_v49 = vmax.f32 %v2510_v46, 0.0  ;;  %v2575_v56 = vmax.f32 %v2511_v35, 0.0 }
 0x6f5   : > { %v2388_v58 = vsub.f32 %v10707_v41, %v15683_v60  ;;  %15685 = vst [vmem:[#allocation107_spill] sm:$0xff] %v11007_v52  ;;  %v2389_v31 = vsub.f32 %v10710_v17, %v15683_v60  ;;  %v15690_v60 = vld [vmem:[#allocation55_spill] sm:$0xff]  ;;  %v15170_v52 = vmov 0.0   ;;  %v2870_v54 = vand.u32 2147483647, %v2806_v42 }
 0x6f6   : > { %15687 = vst [vmem:[#allocation91_spill] sm:$0xff] %v11020_v19  ;;  %6662 = vmatprep.subr.mxu0 %v15170_v52  ;;  %v8163_v44 = vpop.f32.mrf.mxu0  ;;  %8300 = vmatprep.subr.mxu1 %v15170_v52  ;;  %v3606_v46 = vand.u32 2147483647, %v3542_v47  ;;  %v3607_v19 = vand.u32 2147483647, %v3543_v23  ;;  %v2396_v42 = vsub.f32 %v10707_v41, %v15694_v20  ;;  %v2935_v23 = vsub.f32 1.0, %v2871_v10 }
 0x6f7   : > { %v2452_v29 = vand.u32 2147483647, %v2388_v58  ;;  %v11047_v58 = vadd.f32 %v8160_v50, %v11018_v34  ;;  %v2934_v47 = vsub.f32 1.0, %v2870_v54 }
 0x6f8   : > { %v11026_v36 = vpop.permute.xlu1 %3152  ;;  %4579 = vperm.xlu0 %8540, %v15690_v60   ;;  %v11029_v3 = vpop.permute.xlu0 %4263  ;;  %4583 = vperm.xlu1 %8541, %v15693_v4   ;;  %v2805_v60 = vsub.f32 %v10688_v24, %v15692_v30  ;;  %v15698_v4 = vld [vmem:[#allocation115_spill] sm:$0xff]  ;;  %v3671_v54 = vsub.f32 1.0, %v3607_v19 }
 0x6f9   : > { %15689 = vst [vmem:[#allocation258_spill] sm:$0xff] %v11026_v36  ;;  %15691 = vst [vmem:[#allocation259_spill] sm:$0xff] %v11029_v3  ;;  %v790_v3 = vadd.f32 %v8163_v44, %v11018_v34  ;;  %v2453_v36 = vand.u32 2147483647, %v2389_v31  ;;  %v784_v22 = vpop.f32.mrf.mxu0  ;;  %v2868_v31 = vand.u32 2147483647, %v2804_v6  ;;  %v11053_v44 = vmul.f32 %v10918_v21, %v2574_v49 }
 0x6fa   : > { %v11050_v30 = vadd.f32 %v11018_v34, %v784_v22  ;;  %v2516_v50 = vsub.f32 1.0, %v2452_v29  ;;  %v2386_v22 = vsub.f32 %v10707_v41, %v15698_v4  ;;  %v11064_v6 = vadd.f32 %v11018_v34, %v774_v2 }
 0x6fb   : > { %6663 = vmatpush1.msra.mxu0 %v790_v3  ;;  %15695 = vst [vmem:[#allocation110_spill] sm:$0xff] %v11053_v44  ;;  %v11066_v10 = vpop.f32.mrf.mxu0  ;;  %v2517_v21 = vsub.f32 1.0, %v2453_v36  ;;  %v3670_v49 = vsub.f32 1.0, %v3606_v46  ;;  %8332 = vmatpush1.msra.mxu1 %v790_v3  ;;  %v11077_v2 = vadd.f32 %v10972_v18, %v11018_v34  ;;  %v2932_v19 = vsub.f32 1.0, %v2868_v31 }
 0x6fc   : > { %4587 = vperm.xlu0 %8540, %v9635_v33   ;;  %4591 = vperm.xlu1 %8541, %v9871_v28   ;;  %v2869_v33 = vand.u32 2147483647, %v2805_v60  ;;  %15699 = vst [vmem:[#allocation115_spill] sm:$0xff] %v11066_v10  ;;  %v2460_v28 = vand.u32 2147483647, %v2396_v42  ;;  %v2387_v60 = vsub.f32 %v10710_v17, %v15698_v4  ;;  %v11082_v46 = vmax.f32 %v2934_v47, 0.0 }
 0x6fd   : > { %v11056_v35 = vpop.permute.xlu1 %4275  ;;  %v11058_v20 = vpop.permute.xlu0 %3167  ;;  %6664 = vmatprep.subr.mxu0 %v15170_v52  ;;  %v11084_v3 = vmax.f32 %v2935_v23, 0.0  ;;  %v11087_v42 = vmul.f32 %v10929_v11, %v2575_v56  ;;  %v2580_v4 = vmax.f32 %v2516_v50, 0.0  ;;  %v2450_v18 = vand.u32 2147483647, %v2386_v22  ;;  %8301 = vmatprep.subr.mxu1 %v15170_v52 }
 0x6fe   : > { %15696 = vst [vmem:[#allocation93_spill] sm:$0xff] %v11056_v35  ;;  %15697 = vst [vmem:[#allocation260_spill] sm:$0xff] %v11058_v20  ;;  %6665 = vmatpush1.msra.mxu0 %v11050_v30  ;;  %v15700_v20 = vld [vmem:[#allocation112_spill] sm:$0xff]  ;;  %v2461_v35 = vand.u32 2147483647, %v2397_v7  ;;  %v11079_v36 = vpop.f32.mrf.mxu0  ;;  %v2933_v7 = vsub.f32 1.0, %v2869_v33  ;;  %v11097_v31 = vadd.f32 %v11018_v34, %v10983_v45  ;;  %8333 = vmatpush1.msra.mxu1 %v11050_v30 }
 0x6ff   : > { %6666 = vmatprep.subr.mxu0 %v15170_v52  ;;  %v3540_v29 = vsub.f32 %v10707_v41, %v15700_v20  ;;  %15701 = vst [vmem:[#allocation112_spill] sm:$0xff] %v11079_v36  ;;  %15702 = vst [vmem:[#allocation261_spill] sm:$0xff] %v11087_v42  ;;  %v2581_v56 = vmax.f32 %v2517_v21, 0.0  ;;  %v3541_v11 = vsub.f32 %v10710_v17, %v15700_v20  ;;  %v11103_v47 = vmax.f32 %v3670_v49, 0.0 }
 0x700   : > { %4595 = vperm.xlu0 %8540, %v9690_v57   ;;  %6667 = vmatpush1.msra.mxu0 %v11047_v58  ;;  %v11105_v33 = vmax.f32 %v3671_v54, 0.0  ;;  %v11107_v23 = vpop.f32.mrf.mxu0  ;;  %v2451_v22 = vand.u32 2147483647, %v2387_v60  ;;  %v2524_v45 = vsub.f32 1.0, %v2460_v28  ;;  %v2996_v21 = vmax.f32 %v2932_v19, 0.0  ;;  %v15710_v60 = vld [vmem:[#allocation98_spill] sm:$0xff] }
 0x701   : > { %4599 = vperm.xlu1 %8541, %v9937_v43   ;;  %6668 = vmatprep.subr.mxu0 %v15170_v52  ;;  %15705 = vst [vmem:[#allocation264_spill] sm:$0xff] %v11103_v47  ;;  %15707 = vst [vmem:[#allocation266_spill] sm:$0xff] %v11107_v23  ;;  %v3604_v50 = vand.u32 2147483647, %v3540_v29  ;;  %v2525_v43 = vsub.f32 1.0, %v2461_v35  ;;  %v11119_v54 = vadd.f32 %v10944_v12, %v11018_v34  ;;  %v2997_v28 = vmax.f32 %v2933_v7, 0.0 }
 0x702   : > { %v11091_v44 = vpop.permute.xlu1 %3162  ;;  %v11093_v57 = vpop.permute.xlu0 %4271  ;;  %6669 = vmatpush1.msra.mxu0 %v11064_v6  ;;  %15706 = vst [vmem:[#allocation265_spill] sm:$0xff] %v11105_v33  ;;  %v2514_v35 = vsub.f32 1.0, %v2450_v18  ;;  %v3546_v19 = vsub.f32 %v10707_v41, %v15710_v60  ;;  %v3547_v12 = vsub.f32 %v10710_v17, %v15710_v60  ;;  %v11138_v7 = vadd.f32 %v11018_v34, %v10957_v8 }
 0x703   : > { %15703 = vst [vmem:[#allocation262_spill] sm:$0xff] %v11091_v44  ;;  %15704 = vst [vmem:[#allocation263_spill] sm:$0xff] %v11093_v57  ;;  %6670 = vmatprep.subr.mxu0 %v15170_v52  ;;  %v15708_v57 = vld [vmem:[#allocation96_spill] sm:$0xff]  ;;  %v11121_v29 = vpop.f32.mrf.mxu0  ;;  %v15711_v44 = vld [vmem:[#allocation119_spill] sm:$0xff]  ;;  %8302 = vmatprep.subr.mxu1 %v15170_v52  ;;  %v3668_v30 = vsub.f32 1.0, %v3604_v50  ;;  %v2515_v18 = vsub.f32 1.0, %v2451_v22  ;;  %v11169_v10 = vmul.f32 %v2997_v28, %v2581_v56 }
 0x704   : > { %4603 = vperm.xlu0 %8540, %v9775_v9   ;;  %6671 = vmatpush1.msra.mxu0 %v11077_v2  ;;  %v2810_v20 = vsub.f32 %v10685_v38, %v15708_v57  ;;  %v2811_v49 = vsub.f32 %v10688_v24, %v15708_v57  ;;  %15709 = vst [vmem:[#allocation96_spill] sm:$0xff] %v11121_v29  ;;  %v3605_v57 = vand.u32 2147483647, %v3541_v11  ;;  %v11142_v11 = vmax.f32 %v2524_v45, 0.0  ;;  %v15714_v22 = vld [vmem:[#allocation100_spill] sm:$0xff]  ;;  %v15721_v28 = vld [vmem:[#allocation122_spill] sm:$0xff] }
 0x705   : > { %4607 = vperm.xlu1 %8541, %v9942_v48   ;;  %6672 = vmatprep.subr.mxu0 %v15170_v52  ;;  %v2808_v33 = vsub.f32 %v10685_v38, %v15711_v44  ;;  %v11144_v9 = vmax.f32 %v2525_v43, 0.0  ;;  %v11147_v60 = vpop.f32.mrf.mxu0  ;;  %v15172_v42 = vmov 5   ;;  %v2578_v50 = vmax.f32 %v2514_v35, 0.0  ;;  %15717 = vst [vmem:[#allocation267_spill] sm:$0xff] %v11169_v10 }
 0x706   : > { %6673 = vmatpush1.msra.mxu0 %v11097_v31  ;;  %v2875_v8 = vand.u32 2147483647, %v2811_v49  ;;  %v2400_v45 = vsub.f32 %v10707_v41, %v15714_v22  ;;  %v2401_v43 = vsub.f32 %v10710_v17, %v15714_v22  ;;  %v11165_v35 = vmul.f32 %v2996_v21, %v2580_v4  ;;  %8334 = vmatpush1.msra.mxu1 %v11047_v58 }
 0x707   : > { %v11132_v47 = vpop.permute.xlu1 %4283  ;;  %v11134_v48 = vpop.permute.xlu0 %3177  ;;  %6674 = vmatprep.subr.mxu0 %v15170_v52  ;;  %v11160_v52 = vadd.f32 %v10908_v39, %v11018_v34  ;;  %v2872_v49 = vand.u32 2147483647, %v2808_v33  ;;  %v3669_v22 = vsub.f32 1.0, %v3605_v57  ;;  %v2579_v36 = vmax.f32 %v2515_v18, 0.0 }
 0x708   : > { %15712 = vst [vmem:[#allocation98_spill] sm:$0xff] %v11132_v47  ;;  %15713 = vst [vmem:[#allocation119_spill] sm:$0xff] %v11134_v48  ;;  %4611 = vperm.xlu0 %8540, %v9853_v61   ;;  %v2809_v48 = vsub.f32 %v10688_v24, %v15711_v44  ;;  %v2874_v47 = vand.u32 2147483647, %v2810_v20  ;;  %6675 = vmatpush1.msra.mxu0 %v11119_v54  ;;  %v11162_v44 = vpop.f32.mrf.mxu0  ;;  %v15715_v20 = vmov 0.0   ;;  %v15175_v39 = vmov 7  }
 0x709   : > { %8542 = vset.pattern.permute.xlu1 %v15172_v42  ;;  %6676 = vmatprep.subr.mxu0 %v15715_v20  ;;  %v3610_v42 = vand.u32 2147483647, %v3546_v19  ;;  %v3611_v61 = vand.u32 2147483647, %v3547_v12  ;;  %15716 = vst [vmem:[#allocation100_spill] sm:$0xff] %v11165_v35  ;;  %v11178_v33 = vadd.f32 %v11018_v34, %v10927_v27  ;;  %v11181_v4 = vmax.f32 %v3668_v30, 0.0 }
 0x70a   : > { %4871 = vperm.xlu1 %8542, %v9075_v15   ;;  %6677 = vmatpush1.msra.mxu0 %v11138_v7  ;;  %v2873_v58 = vand.u32 2147483647, %v2809_v48  ;;  %v2938_v21 = vsub.f32 1.0, %v2874_v47  ;;  %v2939_v19 = vsub.f32 1.0, %v2875_v8  ;;  %v11184_v56 = vpop.f32.mrf.mxu0  ;;  %v2390_v57 = vsub.f32 %v10707_v41, %v15721_v28 }
 0x70b   : > { %6678 = vmatprep.subr.mxu0 %v15715_v20  ;;  %15720 = vst [vmem:[#allocation270_spill] sm:$0xff] %v11181_v4  ;;  %v2464_v12 = vand.u32 2147483647, %v2400_v45  ;;  %v2465_v18 = vand.u32 2147483647, %v2401_v43  ;;  %v2936_v27 = vsub.f32 1.0, %v2872_v49  ;;  %v11195_v30 = vadd.f32 %v10873_v51, %v11018_v34  ;;  %8303 = vmatprep.subr.mxu1 %v15715_v20 }
 0x70c   : > { %v11171_v29 = vpop.permute.xlu1 %3172  ;;  %8545 = vset.pattern.permute.xlu0 %v15175_v39  ;;  %v11174_v23 = vpop.permute.xlu0 %4279  ;;  %v11189_v39 = vmul.f32 %v10985_v16, %v2578_v50  ;;  %6679 = vmatpush1.msra.mxu0 %v11160_v52  ;;  %v3674_v48 = vsub.f32 1.0, %v3610_v42  ;;  %v3675_v47 = vsub.f32 1.0, %v3611_v61  ;;  %v11201_v45 = vmax.f32 %v3669_v22, 0.0  ;;  %v15724_v16 = vld [vmem:[#allocation120_spill] sm:$0xff] }
 0x70d   : > { %15718 = vst [vmem:[#allocation268_spill] sm:$0xff] %v11171_v29  ;;  %15719 = vst [vmem:[#allocation269_spill] sm:$0xff] %v11174_v23  ;;  %5963 = vperm.xlu0 %8545, %v15451_v59   ;;  %v11197_v8 = vpop.f32.mrf.mxu0  ;;  %6680 = vmatprep.subr.mxu0 %v15715_v20  ;;  %v3544_v50 = vsub.f32 %v10707_v41, %v15724_v16  ;;  %v2391_v43 = vsub.f32 %v10710_v17, %v15721_v28  ;;  %v2937_v51 = vsub.f32 1.0, %v2873_v58  ;;  %v15732_v29 = vld [vmem:[#allocation106_spill] sm:$0xff] }
 0x70e   : > { %15722 = vst [vmem:[#allocation122_spill] sm:$0xff] %v11189_v39  ;;  %4879 = vperm.xlu1 %8542, %v15453_v26   ;;  %15723 = vst [vmem:[#allocation271_spill] sm:$0xff] %v11201_v45  ;;  %v11208_v61 = vmul.f32 %v10987_v14, %v2579_v36  ;;  %6681 = vmatpush1.msra.mxu0 %v11178_v33  ;;  %v11212_v42 = vmax.f32 %v2938_v21, 0.0  ;;  %v11214_v49 = vmax.f32 %v2939_v19, 0.0  ;;  %v2528_v36 = vsub.f32 1.0, %v2464_v12 }
 0x70f   : > { %8335 = vmatpush1.msra.mxu1 %v11064_v6  ;;  %v11223_v28 = vadd.f32 %v11018_v34, %v10889_v40  ;;  %6682 = vmatprep.subr.mxu0 %v15715_v20  ;;  %v3545_v14 = vsub.f32 %v10710_v17, %v15724_v16  ;;  %v2454_v6 = vand.u32 2147483647, %v2390_v57  ;;  %v2529_v58 = vsub.f32 1.0, %v2465_v18  ;;  %v11229_v21 = vpop.f32.mrf.mxu0  ;;  %v15730_v18 = vld [vmem:[#allocation103_spill] sm:$0xff] }
 0x710   : > { %15725 = vst [vmem:[#allocation120_spill] sm:$0xff] %v11208_v61  ;;  %v3000_v19 = vmax.f32 %v2936_v27, 0.0  ;;  %v11237_v40 = vadd.f32 %v10848_v1, %v11018_v34  ;;  %6683 = vmatpush1.msra.mxu0 %v11195_v30  ;;  %8304 = vmatprep.subr.mxu1 %v15715_v20  ;;  %v11241_v57 = vand.u32 2147483647, %v3544_v50  ;;  %v2455_v12 = vand.u32 2147483647, %v2391_v43 }
 0x711   : > { %v11216_v22 = vpop.permute.xlu1 %4291  ;;  %5967 = vperm.xlu0 %8545, %v15453_v26   ;;  %v11219_v23 = vpop.permute.xlu0 %3187  ;;  %v11231_v26 = vmax.f32 %v3674_v48, 0.0  ;;  %v2814_v16 = vsub.f32 %v10685_v38, %v15730_v18  ;;  %v2815_v27 = vsub.f32 %v10688_v24, %v15730_v18  ;;  %6684 = vmatprep.subr.mxu0 %v15715_v20  ;;  %v3001_v1 = vmax.f32 %v2937_v51, 0.0 }
 0x712   : > { %15726 = vst [vmem:[#allocation272_spill] sm:$0xff] %v11216_v22  ;;  %15727 = vst [vmem:[#allocation273_spill] sm:$0xff] %v11219_v23  ;;  %4883 = vperm.xlu1 %8542, %v9115_v53   ;;  %v11233_v23 = vmax.f32 %v3675_v47, 0.0  ;;  %v11247_v48 = vpop.f32.mrf.mxu0  ;;  %8336 = vmatpush1.msra.mxu1 %v11077_v2  ;;  %v15731_v47 = vld [vmem:[#allocation126_spill] sm:$0xff]  ;;  %v3550_v50 = vsub.f32 %v10707_v41, %v15732_v29  ;;  %v11258_v43 = vadd.f32 %v11018_v34, %v10855_v55 }
 0x713   : > { %15728 = vst [vmem:[#allocation274_spill] sm:$0xff] %v11231_v26  ;;  %v2812_v22 = vsub.f32 %v10685_v38, %v15731_v47  ;;  %6685 = vmatpush1.msra.mxu0 %v11223_v28  ;;  %v3609_v18 = vand.u32 2147483647, %v3545_v14  ;;  %v11261_v26 = vmax.f32 %v2528_v36, 0.0  ;;  %v11263_v2 = vmax.f32 %v2529_v58, 0.0  ;;  %v15735_v14 = vld [vmem:[#allocation109_spill] sm:$0xff]  ;;  %8305 = vmatprep.subr.mxu1 %v15715_v20 }
 0x714   : > { %15729 = vst [vmem:[#allocation275_spill] sm:$0xff] %v11233_v23  ;;  %v2518_v23 = vsub.f32 1.0, %v2454_v6  ;;  %6686 = vmatprep.subr.mxu0 %v15715_v20  ;;  %v2813_v55 = vsub.f32 %v10688_v24, %v15731_v47  ;;  %v3551_v35 = vsub.f32 %v10710_v17, %v15732_v29  ;;  %v2404_v6 = vsub.f32 %v10707_v41, %v15735_v14  ;;  %v11281_v58 = vpop.f32.mrf.mxu0 }
 0x715   : > { %5975 = vperm.xlu0 %8545, %v15456_v62   ;;  %v11279_v36 = vadd.f32 %v10818_v5, %v11018_v34  ;;  %6687 = vmatpush1.msra.mxu0 %v11237_v40  ;;  %v2878_v61 = vand.u32 2147483647, %v2814_v16  ;;  %v2405_v47 = vsub.f32 %v10710_v17, %v15735_v14  ;;  %v2876_v29 = vand.u32 2147483647, %v2812_v22  ;;  %v15736_v5 = vld [vmem:[#allocation26_spill] sm:$0xff] }
 0x716   : > { %4891 = vperm.xlu1 %8542, %v9213_v0   ;;  %v11266_v51 = vpop.permute.xlu1 %3182  ;;  %v11268_v10 = vpop.permute.xlu0 %4287  ;;  %6688 = vmatprep.subr.mxu0 %v15715_v20  ;;  %v2879_v39 = vand.u32 2147483647, %v2815_v27  ;;  %v3614_v45 = vand.u32 2147483647, %v3550_v50  ;;  %v11292_v4 = vadd.f32 %v11018_v34, %v10827_v37  ;;  %v11298_v16 = vmul.f32 %v3000_v19, %v11024_v32 }
 0x717   : > { %15733 = vst [vmem:[#allocation103_spill] sm:$0xff] %v11266_v51  ;;  %15734 = vst [vmem:[#allocation126_spill] sm:$0xff] %v11268_v10  ;;  %v3672_v10 = vsub.f32 1.0, %v11241_v57  ;;  %v2519_v51 = vsub.f32 1.0, %v2455_v12  ;;  %v11294_v0 = vpop.f32.mrf.mxu0  ;;  %6689 = vmatpush1.msra.mxu0 %v11258_v43  ;;  %v3673_v57 = vsub.f32 1.0, %v3609_v18  ;;  %v2582_v12 = vmax.f32 %v2518_v23, 0.0  ;;  %8337 = vmatpush1.msra.mxu1 %v11097_v31 }
 0x718   : > { %15737 = vst [vmem:[#allocation106_spill] sm:$0xff] %v11298_v16  ;;  %6690 = vmatprep.subr.mxu0 %v15715_v20  ;;  %v2877_v22 = vand.u32 2147483647, %v2813_v55  ;;  %v3615_v27 = vand.u32 2147483647, %v3551_v35  ;;  %v11303_v14 = vmul.f32 %v3001_v1, %v11035_v13  ;;  %v15741_v23 = vld [vmem:[#allocation128_spill] sm:$0xff]  ;;  %8306 = vmatprep.subr.mxu1 %v15715_v20 }
 0x719   : > { %5987 = vperm.xlu0 %8545, %v15736_v5   ;;  %v2468_v50 = vand.u32 2147483647, %v2404_v6  ;;  %6691 = vmatpush1.msra.mxu0 %v11279_v36  ;;  %v2583_v32 = vmax.f32 %v2519_v51, 0.0  ;;  %v3548_v19 = vsub.f32 %v10707_v41, %v15741_v23  ;;  %v15742_v18 = vld [vmem:[#allocation130_spill] sm:$0xff]  ;;  %v2469_v35 = vand.u32 2147483647, %v2405_v47  ;;  %v8184_v6 = vpop.f32.mrf.mxu0 }
 0x71a   : > { %4899 = vperm.xlu1 %8542, %v15736_v5   ;;  %15738 = vst [vmem:[#allocation109_spill] sm:$0xff] %v11303_v14  ;;  %v2394_v55 = vsub.f32 %v10707_v41, %v15742_v18  ;;  %6692 = vmatprep.subr.mxu0 %v15715_v20  ;;  %v2940_v13 = vsub.f32 1.0, %v2876_v29  ;;  %v2942_v1 = vsub.f32 1.0, %v2878_v61  ;;  %v2943_v5 = vsub.f32 1.0, %v2879_v39  ;;  %v15746_v61 = vld [vmem:[#allocation4_spill] sm:$0xff] }
 0x71b   : > { %v11305_v37 = vpop.permute.xlu1 %4299  ;;  %v11307_v62 = vpop.permute.xlu0 %3197  ;;  %6693 = vmatpush1.msra.mxu0 %v11292_v4  ;;  %v11318_v31 = vmax.f32 %v3672_v10, 0.0  ;;  %v11320_v51 = vmax.f32 %v3673_v57, 0.0  ;;  %v3549_v14 = vsub.f32 %v10710_v17, %v15741_v23  ;;  %v2395_v47 = vsub.f32 %v10710_v17, %v15742_v18  ;;  %8338 = vmatpush1.msra.mxu1 %v11119_v54 }
 0x71c   : > { %15739 = vst [vmem:[#allocation26_spill] sm:$0xff] %v11305_v37  ;;  %15740 = vst [vmem:[#allocation276_spill] sm:$0xff] %v11307_v62  ;;  %v3678_v37 = vsub.f32 1.0, %v3614_v45  ;;  %v15187_v62 = vmov 6   ;;  %v15745_v16 = vmov 7   ;;  %v854_v39 = vpop.f32.mrf.mxu0  ;;  %v2941_v45 = vsub.f32 1.0, %v2877_v22  ;;  %6694 = vmatprep.subr.mxu0 %v15715_v20  ;;  %8307 = vmatprep.subr.mxu1 %v15715_v20 }
 0x71d   : > { %8561 = vset.pattern.permute.xlu0 %v15187_v62  ;;  %15743 = vst [vmem:[#allocation128_spill] sm:$0xff] %v11318_v31  ;;  %15744 = vst [vmem:[#allocation130_spill] sm:$0xff] %v11320_v51  ;;  %v3679_v29 = vsub.f32 1.0, %v3615_v27  ;;  %v2532_v62 = vsub.f32 1.0, %v2468_v50  ;;  %v11329_v59 = vmul.f32 %v11082_v46, %v2582_v12  ;;  %v3612_v10 = vand.u32 2147483647, %v3548_v19  ;;  %8339 = vmatpush1.msra.mxu1 %v11138_v7 }
 0x71e   : > { %8543 = vset.pattern.permute.xlu1 %v15745_v16  ;;  %5575 = vperm.xlu0 %8561, %v15746_v61   ;;  %v2458_v57 = vand.u32 2147483647, %v2394_v55  ;;  %v2533_v23 = vsub.f32 1.0, %v2469_v35  ;;  %v11334_v18 = vmul.f32 %v11084_v3, %v2583_v32  ;;  %v3004_v22 = vmax.f32 %v2940_v13, 0.0  ;;  %v8187_v12 = vpop.f32.mrf.mxu0  ;;  %v15752_v3 = vld [vmem:[#allocation114_spill] sm:$0xff]  ;;  %v15753_v55 = vld [vmem:[#allocation15_spill] sm:$0xff] }
 0x71f   : > { %15747 = vst [vmem:[#allocation4_spill] sm:$0xff] %v11329_v59  ;;  %5959 = vperm.xlu1 %8543, %v9075_v15   ;;  %v11341_v27 = vmax.f32 %v2942_v1, 0.0  ;;  %v11343_v46 = vmax.f32 %v2943_v5, 0.0  ;;  %v11345_v15 = vmax.f32 %v3678_v37, 0.0  ;;  %v3613_v50 = vand.u32 2147483647, %v3549_v14  ;;  %8308 = vmatprep.subr.mxu1 %v15715_v20 }
 0x720   : > { %15748 = vst [vmem:[#allocation277_spill] sm:$0xff] %v11334_v18  ;;  %v11336_v51 = vpop.permute.xlu1 %3192  ;;  %v11338_v61 = vpop.permute.xlu0 %4295  ;;  %v2459_v19 = vand.u32 2147483647, %v2395_v47  ;;  %v2818_v32 = vsub.f32 %v10685_v38, %v15752_v3  ;;  %v11352_v35 = vadd.f32 %v8187_v12, %v11018_v34  ;;  %v3005_v13 = vmax.f32 %v2941_v45, 0.0  ;;  %v15756_v12 = vld [vmem:[#allocation3_spill] sm:$0xff]  ;;  %8340 = vmatpush1.msra.mxu1 %v11160_v52  ;;  %v15816_v31 = vld [vmem:[#allocation112_spill] sm:$0xff] }
 0x721   : > { %15749 = vst [vmem:[#allocation278_spill] sm:$0xff] %v11336_v51  ;;  %15750 = vst [vmem:[#allocation279_spill] sm:$0xff] %v11338_v61  ;;  %v11355_v1 = vmax.f32 %v3679_v29, 0.0  ;;  %v11357_v37 = vmax.f32 %v2532_v62, 0.0  ;;  %v2819_v54 = vsub.f32 %v10688_v24, %v15752_v3  ;;  %v15755_v14 = vmov 6   ;;  %v864_v5 = vpop.f32.mrf.mxu0  ;;  %v15757_v62 = vld [vmem:[#allocation136_spill] sm:$0xff]  ;;  %8309 = vmatprep.subr.mxu1 %v15715_v20 }
 0x722   : > { %15751 = vst [vmem:[#allocation280_spill] sm:$0xff] %v11345_v15  ;;  %5595 = vperm.xlu0 %8561, %v15753_v55   ;;  %v3676_v47 = vsub.f32 1.0, %v3612_v10  ;;  %v2522_v55 = vsub.f32 1.0, %v2458_v57  ;;  %v11363_v61 = vmax.f32 %v2533_v23, 0.0  ;;  %v11367_v45 = vadd.f32 %v11018_v34, %v864_v5  ;;  %6695 = vmatpush2.msra.mxu0 %v11352_v35  ;;  %v15758_v3 = vld [vmem:[#allocation116_spill] sm:$0xff] }
 0x723   : > { %15754 = vst [vmem:[#allocation114_spill] sm:$0xff] %v11355_v1  ;;  %8544 = vset.pattern.permute.xlu1 %v15755_v14  ;;  %v2816_v29 = vsub.f32 %v10685_v38, %v15757_v62  ;;  %v3554_v51 = vsub.f32 %v10707_v41, %v15758_v3  ;;  %v11379_v10 = vadd.f32 %v8184_v6, %v11018_v34  ;;  %v3677_v57 = vsub.f32 1.0, %v3613_v50 }
 0x724   : > { %5579 = vperm.xlu1 %8544, %v15756_v12   ;;  %6696 = vmatprep.subr.mxu0 %v15715_v20  ;;  %v2523_v23 = vsub.f32 1.0, %v2459_v19  ;;  %v2882_v5 = vand.u32 2147483647, %v2818_v32  ;;  %v11384_v12 = vmul.f32 %v3004_v22, %v11142_v11  ;;  %v2883_v15 = vand.u32 2147483647, %v2819_v54  ;;  %v15763_v11 = vld [vmem:[#allocation118_spill] sm:$0xff] }
 0x725   : > { %v11374_v1 = vpop.permute.xlu1 %4307  ;;  %v11376_v7 = vpop.permute.xlu0 %3207  ;;  %v3555_v6 = vsub.f32 %v10710_v17, %v15758_v3  ;;  %6697 = vmatpush2.msra.mxu0 %v11367_v45  ;;  %v11396_v50 = vmax.f32 %v3676_v47, 0.0  ;;  %v2408_v22 = vsub.f32 %v10707_v41, %v15763_v11  ;;  %v11403_v19 = vmul.f32 %v3005_v13, %v11144_v9  ;;  %v15765_v3 = vld [vmem:[#allocation139_spill] sm:$0xff]  ;;  %8341 = vmatpush1.msra.mxu1 %v11178_v33 }
 0x726   : > { %15759 = vst [vmem:[#allocation15_spill] sm:$0xff] %v11374_v1  ;;  %15760 = vst [vmem:[#allocation3_spill] sm:$0xff] %v11376_v7  ;;  %5611 = vperm.xlu0 %8561, %v15552_v25   ;;  %v2817_v1 = vsub.f32 %v10688_v24, %v15757_v62  ;;  %v11392_v7 = vadd.f32 %v11018_v34, %v854_v39  ;;  %v2409_v25 = vsub.f32 %v10710_v17, %v15763_v11  ;;  %v15194_v32 = vmov 10  }
 0x727   : > { %15761 = vst [vmem:[#allocation136_spill] sm:$0xff] %v11384_v12  ;;  %15762 = vst [vmem:[#allocation116_spill] sm:$0xff] %v11396_v50  ;;  %6698 = vmatprep.subr.mxu0 %v15715_v20  ;;  %v2586_v39 = vmax.f32 %v2522_v55, 0.0  ;;  %v2880_v54 = vand.u32 2147483647, %v2816_v29  ;;  %v11410_v52 = vadd.f32 %v11281_v58, %v11018_v34  ;;  %v2587_v47 = vmax.f32 %v2523_v23, 0.0  ;;  %8310 = vmatprep.subr.mxu1 %v15715_v20 }
 0x728   : > { %15764 = vst [vmem:[#allocation118_spill] sm:$0xff] %v11403_v19  ;;  %8546 = vset.pattern.permute.xlu1 %v15194_v32  ;;  %v3618_v62 = vand.u32 2147483647, %v3554_v51  ;;  %6699 = vmatpush2.msra.mxu0 %v11379_v10  ;;  %v2398_v9 = vsub.f32 %v10707_v41, %v15765_v3  ;;  %v2399_v13 = vsub.f32 %v10710_v17, %v15765_v3  ;;  %v2946_v11 = vsub.f32 1.0, %v2882_v5  ;;  %v15767_v55 = vld [vmem:[#allocation33_spill] sm:$0xff] }
 0x729   : > { %5319 = vperm.xlu1 %8546, %v10485_v63   ;;  %6700 = vmatprep.subr.mxu0 %v15715_v20  ;;  %v11423_v58 = vmax.f32 %v3677_v57, 0.0  ;;  %v2881_v29 = vand.u32 2147483647, %v2817_v1  ;;  %v2947_v19 = vsub.f32 1.0, %v2883_v15  ;;  %v3619_v23 = vand.u32 2147483647, %v3555_v6 }
 0x72a   : > { %v11417_v32 = vpop.permute.xlu1 %3202  ;;  %5623 = vperm.xlu0 %8561, %v15767_v55   ;;  %v11420_v51 = vpop.permute.xlu0 %4303  ;;  %6701 = vmatpush2.msra.mxu0 %v11392_v7  ;;  %v15770_v12 = vld [vmem:[#allocation137_spill] sm:$0xff]  ;;  %v2472_v3 = vand.u32 2147483647, %v2408_v22  ;;  %v2473_v5 = vand.u32 2147483647, %v2409_v25  ;;  %v2944_v57 = vsub.f32 1.0, %v2880_v54  ;;  %v11437_v6 = vmul.f32 %v11212_v42, %v2586_v39 }
 0x72b   : > { %15766 = vst [vmem:[#allocation139_spill] sm:$0xff] %v11417_v32  ;;  %15768 = vst [vmem:[#allocation33_spill] sm:$0xff] %v11420_v51  ;;  %v3552_v50 = vsub.f32 %v10707_v41, %v15770_v12  ;;  %v11430_v32 = vadd.f32 %v11018_v34, %v11294_v0  ;;  %6702 = vmatprep.subr.mxu0 %v15715_v20  ;;  %v3553_v15 = vsub.f32 %v10710_v17, %v15770_v12  ;;  %v15773_v51 = vld [vmem:[#allocation9_spill] sm:$0xff]  ;;  %v15774_v54 = vld [vmem:[#allocation35_spill] sm:$0xff] }
 0x72c   : > { %15769 = vst [vmem:[#allocation281_spill] sm:$0xff] %v11423_v58  ;;  %v3682_v1 = vsub.f32 1.0, %v3618_v62  ;;  %15771 = vst [vmem:[#allocation137_spill] sm:$0xff] %v11437_v6  ;;  %6703 = vmatpush2.msra.mxu0 %v11410_v52  ;;  %v2462_v22 = vand.u32 2147483647, %v2398_v9  ;;  %v11441_v0 = vmax.f32 %v2946_v11, 0.0  ;;  %v11444_v55 = vmul.f32 %v11214_v49, %v2587_v47  ;;  %8342 = vmatpush1.msra.mxu1 %v11195_v30 }
 0x72d   : > { %8547 = vset.pattern.permute.xlu1 %v15755_v14  ;;  %v2463_v25 = vand.u32 2147483647, %v2399_v13  ;;  %v2945_v12 = vsub.f32 1.0, %v2881_v29  ;;  %v11448_v62 = vmax.f32 %v2947_v19, 0.0  ;;  %v3683_v42 = vsub.f32 1.0, %v3619_v23  ;;  %6704 = vmatprep.subr.mxu0 %v15715_v20  ;;  %v15778_v29 = vld [vmem:[#allocation121_spill] sm:$0xff] }
 0x72e   : > { %15772 = vst [vmem:[#allocation282_spill] sm:$0xff] %v11444_v55  ;;  %5583 = vperm.xlu1 %8547, %v15773_v51   ;;  %5635 = vperm.xlu0 %8561, %v15774_v54   ;;  %v3616_v9 = vand.u32 2147483647, %v3552_v50  ;;  %v2536_v13 = vsub.f32 1.0, %v2472_v3  ;;  %v2537_v11 = vsub.f32 1.0, %v2473_v5  ;;  %v11458_v49 = vadd.f32 %v11229_v21, %v11018_v34  ;;  %v15812_v55 = vld [vmem:[#allocation135_spill] sm:$0xff] }
 0x72f   : > { %v11450_v39 = vpop.permute.xlu0 %3217  ;;  %v11454_v58 = vpop.permute.xlu1 %4315  ;;  %6705 = vmatpush2.msra.mxu0 %v11430_v32  ;;  %v3008_v19 = vmax.f32 %v2944_v57, 0.0  ;;  %v3617_v47 = vand.u32 2147483647, %v3553_v15  ;;  %v11462_v51 = vmax.f32 %v3682_v1, 0.0  ;;  %v2822_v33 = vsub.f32 %v10685_v38, %v15778_v29  ;;  %v15780_v1 = vld [vmem:[#allocation123_spill] sm:$0xff]  ;;  %8311 = vmatprep.subr.mxu1 %v15715_v20  ;;  %v15813_v6 = vld [vmem:[#allocation209_spill] sm:$0xff] }
 0x730   : > { %15775 = vst [vmem:[#allocation9_spill] sm:$0xff] %v11450_v39  ;;  %15776 = vst [vmem:[#allocation35_spill] sm:$0xff] %v11454_v58  ;;  %6706 = vmatprep.subr.mxu0 %v15715_v20  ;;  %v2526_v50 = vsub.f32 1.0, %v2462_v22  ;;  %v2527_v23 = vsub.f32 1.0, %v2463_v25  ;;  %v2823_v21 = vsub.f32 %v10688_v24, %v15778_v29  ;;  %v15198_v3 = vmov 11   ;;  %v15781_v25 = vld [vmem:[#allocation197_spill] sm:$0xff]  ;;  %8343 = vmatpush1.msra.mxu1 %v11223_v28 }
 0x731   : > { %15777 = vst [vmem:[#allocation283_spill] sm:$0xff] %v11462_v51  ;;  %v11474_v5 = vadd.f32 %v11018_v34, %v11247_v48  ;;  %v3009_v57 = vmax.f32 %v2945_v12, 0.0  ;;  %v11476_v15 = vmax.f32 %v3683_v42, 0.0  ;;  %v3558_v30 = vsub.f32 %v10707_v41, %v15780_v1  ;;  %v15782_v48 = vld [vmem:[#allocation142_spill] sm:$0xff]  ;;  %6707 = vmatpush2.msra.mxu0 %v11458_v49  ;;  %8312 = vmatprep.subr.mxu1 %v15715_v20 }
 0x732   : > { %8548 = vset.pattern.permute.xlu1 %v15198_v3  ;;  %8588 = vset.pattern.permute.xlu0 %v15198_v3  ;;  %v3559_v22 = vsub.f32 %v10710_v17, %v15780_v1  ;;  %v3680_v54 = vsub.f32 1.0, %v3616_v9  ;;  %v11484_v29 = vmax.f32 %v2536_v13, 0.0  ;;  %v11486_v3 = vmax.f32 %v2537_v11, 0.0 }
 0x733   : > { %15779 = vst [vmem:[#allocation121_spill] sm:$0xff] %v11476_v15  ;;  %6407 = vperm.xlu1 %8548, %v10485_v63   ;;  %6411 = vperm.xlu0 %8588, %v15781_v25   ;;  %v2820_v12 = vsub.f32 %v10685_v38, %v15782_v48  ;;  %v3681_v58 = vsub.f32 1.0, %v3617_v47  ;;  %v2886_v1 = vand.u32 2147483647, %v2822_v33  ;;  %v11495_v63 = vmul.f32 %v3008_v19, %v11261_v26  ;;  %v15786_v33 = vld [vmem:[#allocation125_spill] sm:$0xff] }
 0x734   : > { %v11490_v42 = vpop.permute.xlu0 %4311  ;;  %v11497_v39 = vpop.permute.xlu1 %3212  ;;  %v11501_v9 = vadd.f32 %v11184_v56, %v11018_v34  ;;  %6708 = vmatprep.subr.mxu0 %v15715_v20  ;;  %v2590_v13 = vmax.f32 %v2526_v50, 0.0  ;;  %v2591_v11 = vmax.f32 %v2527_v23, 0.0  ;;  %v2887_v47 = vand.u32 2147483647, %v2823_v21  ;;  %v15792_v15 = vld [vmem:[#allocation145_spill] sm:$0xff]  ;;  %8344 = vmatpush1.msra.mxu1 %v11237_v40 }
 0x735   : > { %15783 = vst [vmem:[#allocation123_spill] sm:$0xff] %v11490_v42  ;;  %15784 = vst [vmem:[#allocation197_spill] sm:$0xff] %v11495_v63  ;;  %v2821_v42 = vsub.f32 %v10688_v24, %v15782_v48  ;;  %6709 = vmatpush2.msra.mxu0 %v11474_v5  ;;  %v3622_v26 = vand.u32 2147483647, %v3558_v30  ;;  %v3623_v19 = vand.u32 2147483647, %v3559_v22  ;;  %v2412_v56 = vsub.f32 %v10707_v41, %v15786_v33 }
 0x736   : > { %15785 = vst [vmem:[#allocation142_spill] sm:$0xff] %v11497_v39  ;;  %v15787_v39 = vld [vmem:[#allocation202_spill] sm:$0xff]  ;;  %v11515_v28 = vadd.f32 %v11018_v34, %v11197_v8  ;;  %v11517_v50 = vmax.f32 %v3680_v54, 0.0  ;;  %v2884_v23 = vand.u32 2147483647, %v2820_v12  ;;  %v2413_v21 = vsub.f32 %v10710_v17, %v15786_v33  ;;  %v15790_v22 = vld [vmem:[#allocation7_spill] sm:$0xff]  ;;  %6710 = vmatprep.subr.mxu0 %v15715_v20  ;;  %8313 = vmatprep.subr.mxu1 %v15715_v20 }
 0x737   : > { %8549 = vset.pattern.permute.xlu1 %v15755_v14  ;;  %6423 = vperm.xlu0 %8588, %v15787_v39   ;;  %v11522_v30 = vmul.f32 %v3009_v57, %v11263_v2  ;;  %v11526_v48 = vmax.f32 %v3681_v58, 0.0  ;;  %v2402_v51 = vsub.f32 %v10707_v41, %v15792_v15  ;;  %v2950_v8 = vsub.f32 1.0, %v2886_v1 }
 0x738   : > { %15788 = vst [vmem:[#allocation125_spill] sm:$0xff] %v11517_v50  ;;  %5587 = vperm.xlu1 %8549, %v15790_v22   ;;  %v11534_v54 = vadd.f32 %v11147_v60, %v11018_v34  ;;  %6711 = vmatpush2.msra.mxu0 %v11501_v9  ;;  %v2885_v2 = vand.u32 2147483647, %v2821_v42  ;;  %v2951_v57 = vsub.f32 1.0, %v2887_v47  ;;  %v11539_v12 = vmul.f32 %v11341_v27, %v2590_v13  ;;  %v15811_v50 = vld [vmem:[#allocation199_spill] sm:$0xff] }
 0x739   : > { %15789 = vst [vmem:[#allocation202_spill] sm:$0xff] %v11522_v30  ;;  %15791 = vst [vmem:[#allocation7_spill] sm:$0xff] %v11526_v48  ;;  %v11530_v63 = vpop.permute.xlu0 %3227  ;;  %v11542_v58 = vmul.f32 %v11343_v46, %v2591_v11  ;;  %v11544_v33 = vpop.permute.xlu1 %4323  ;;  %6712 = vmatprep.subr.mxu0 %v15715_v20  ;;  %v3686_v60 = vsub.f32 1.0, %v3622_v26  ;;  %v3687_v1 = vsub.f32 1.0, %v3623_v19  ;;  %v2476_v22 = vand.u32 2147483647, %v2412_v56  ;;  %8345 = vmatpush1.msra.mxu1 %v11258_v43 }
 0x73a   : > { %15793 = vst [vmem:[#allocation145_spill] sm:$0xff] %v11530_v63  ;;  %15794 = vst [vmem:[#allocation284_spill] sm:$0xff] %v11539_v12  ;;  %v15797_v63 = vld [vmem:[#allocation203_spill] sm:$0xff]  ;;  %v11551_v40 = vadd.f32 %v11018_v34, %v11162_v44  ;;  %6713 = vmatpush2.msra.mxu0 %v11515_v28  ;;  %v2948_v27 = vsub.f32 1.0, %v2884_v23  ;;  %v2403_v13 = vsub.f32 %v10710_v17, %v15792_v15  ;;  %v2477_v11 = vand.u32 2147483647, %v2413_v21 }
 0x73b   : > { %15795 = vst [vmem:[#allocation285_spill] sm:$0xff] %v11542_v58  ;;  %15796 = vst [vmem:[#allocation286_spill] sm:$0xff] %v11544_v33  ;;  %6435 = vperm.xlu0 %8588, %v15797_v63   ;;  %v15798_v46 = vld [vmem:[#allocation143_spill] sm:$0xff]  ;;  %6714 = vmatprep.subr.mxu0 %v15715_v20  ;;  %v2466_v26 = vand.u32 2147483647, %v2402_v51  ;;  %v11562_v44 = vmax.f32 %v2950_v8, 0.0 }
 0x73c   : > { %v3556_v42 = vsub.f32 %v10707_v41, %v15798_v46  ;;  %8550 = vset.pattern.permute.xlu1 %v15745_v16  ;;  %v3557_v47 = vsub.f32 %v10710_v17, %v15798_v46  ;;  %v15799_v19 = vld [vmem:[#allocation266_spill] sm:$0xff]  ;;  %6715 = vmatpush2.msra.mxu0 %v11534_v54  ;;  %v2949_v15 = vsub.f32 1.0, %v2885_v2  ;;  %v11570_v23 = vmax.f32 %v2951_v57, 0.0  ;;  %v15800_v21 = vld [vmem:[#allocation129_spill] sm:$0xff]  ;;  %v15805_v57 = vld [vmem:[#allocation208_spill] sm:$0xff] }
 0x73d   : > { %5971 = vperm.xlu1 %8550, %v9115_v53   ;;  %v11567_v56 = vadd.f32 %v15799_v19, %v11018_v34  ;;  %v2826_v33 = vsub.f32 %v10685_v38, %v15800_v21  ;;  %v2827_v46 = vsub.f32 %v10688_v24, %v15800_v21  ;;  %6716 = vmatprep.subr.mxu0 %v15715_v20  ;;  %v11580_v53 = vmax.f32 %v3686_v60, 0.0  ;;  %v15806_v30 = vld [vmem:[#allocation96_spill] sm:$0xff] }
 0x73e   : > { %v11576_v51 = vpop.permute.xlu0 %4319  ;;  %v11582_v8 = vmax.f32 %v3687_v1, 0.0  ;;  %v2540_v19 = vsub.f32 1.0, %v2476_v22  ;;  %v11584_v2 = vpop.permute.xlu1 %3222  ;;  %v11589_v58 = vadd.f32 %v11018_v34, %v15806_v30  ;;  %6717 = vmatpush2.msra.mxu0 %v11551_v40  ;;  %v3012_v21 = vmax.f32 %v2948_v27, 0.0  ;;  %8314 = vmatprep.subr.mxu1 %v15715_v20  ;;  %v15807_v1 = vld [vmem:[#allocation131_spill] sm:$0xff] }
 0x73f   : > { %15801 = vst [vmem:[#allocation203_spill] sm:$0xff] %v11576_v51  ;;  %15802 = vst [vmem:[#allocation143_spill] sm:$0xff] %v11580_v53  ;;  %6447 = vperm.xlu0 %8588, %v15805_v57   ;;  %v3620_v51 = vand.u32 2147483647, %v3556_v42  ;;  %v2467_v12 = vand.u32 2147483647, %v2403_v13  ;;  %6718 = vmatprep.subr.mxu0 %v15715_v20  ;;  %v3562_v22 = vsub.f32 %v10707_v41, %v15807_v1 }
 0x740   : > { %15803 = vst [vmem:[#allocation266_spill] sm:$0xff] %v11582_v8  ;;  %15804 = vst [vmem:[#allocation129_spill] sm:$0xff] %v11584_v2  ;;  %v2541_v48 = vsub.f32 1.0, %v2477_v11  ;;  %v3621_v43 = vand.u32 2147483647, %v3557_v47  ;;  %v2530_v60 = vsub.f32 1.0, %v2466_v26  ;;  %6719 = vmatpush2.msra.mxu0 %v11567_v56  ;;  %8346 = vmatpush1.msra.mxu1 %v11279_v36 }
 0x741   : > { %v15808_v2 = vmov 10   ;;  %v15809_v30 = vld [vmem:[#allocation115_spill] sm:$0xff]  ;;  %v3013_v27 = vmax.f32 %v2949_v15, 0.0  ;;  %v15810_v42 = vld [vmem:[#allocation148_spill] sm:$0xff]  ;;  %v2890_v11 = vand.u32 2147483647, %v2826_v33  ;;  %6720 = vmatprep.subr.mxu0 %v15715_v20  ;;  %v2416_v15 = vsub.f32 %v10707_v41, %v15812_v55  ;;  %8315 = vmatprep.subr.mxu1 %v15715_v20 }
 0x742   : > { %8551 = vset.pattern.permute.xlu1 %v15808_v2  ;;  %v11599_v8 = vadd.f32 %v15809_v30, %v11018_v34  ;;  %v2824_v13 = vsub.f32 %v10685_v38, %v15810_v42  ;;  %v2891_v53 = vand.u32 2147483647, %v2827_v46  ;;  %v11606_v47 = vmax.f32 %v2540_v19, 0.0  ;;  %6721 = vmatpush2.msra.mxu0 %v11589_v58 }
 0x743   : > { %5327 = vperm.xlu1 %8551, %v15811_v50   ;;  %v2825_v26 = vsub.f32 %v10688_v24, %v15810_v42  ;;  %v3563_v30 = vsub.f32 %v10710_v17, %v15807_v1  ;;  %6459 = vperm.xlu0 %8588, %v15813_v6   ;;  %v11615_v18 = vpop.permute.xlu0 %3237  ;;  %v3684_v33 = vsub.f32 1.0, %v3620_v51  ;;  %v2531_v46 = vsub.f32 1.0, %v2467_v12  ;;  %v11620_v19 = vpop.permute.xlu1 %4331 }
 0x744   : > { %15814 = vst [vmem:[#allocation96_spill] sm:$0xff] %v11615_v18  ;;  %v11618_v59 = vmax.f32 %v2541_v48, 0.0  ;;  %15815 = vst [vmem:[#allocation131_spill] sm:$0xff] %v11620_v19  ;;  %v11624_v42 = vadd.f32 %v11018_v34, %v15816_v31  ;;  %6722 = vmatprep.subr.mxu0 %v15715_v20  ;;  %v3685_v1 = vsub.f32 1.0, %v3621_v43  ;;  %v2594_v6 = vmax.f32 %v2530_v60, 0.0  ;;  %v15820_v60 = vld [vmem:[#allocation215_spill] sm:$0xff]  ;;  %8347 = vmatpush1.msra.mxu1 %v11292_v4 }
 0x745   : > { %v3626_v57 = vand.u32 2147483647, %v3562_v22  ;;  %v11629_v18 = vmul.f32 %v3012_v21, %v11357_v37  ;;  %6723 = vmatpush2.msra.mxu0 %v11599_v8  ;;  %v2888_v48 = vand.u32 2147483647, %v2824_v13  ;;  %v2954_v12 = vsub.f32 1.0, %v2890_v11  ;;  %v15819_v21 = vld [vmem:[#allocation12_spill] sm:$0xff]  ;;  %8316 = vmatprep.subr.mxu1 %v15715_v20 }
 0x746   : > { %v2955_v51 = vsub.f32 1.0, %v2891_v53  ;;  %v2417_v34 = vsub.f32 %v10710_v17, %v15812_v55  ;;  %6724 = vmatprep.subr.mxu0 %v15715_v20  ;;  %v2889_v36 = vand.u32 2147483647, %v2825_v26  ;;  %v3627_v31 = vand.u32 2147483647, %v3563_v30  ;;  %v15821_v13 = vld [vmem:[#allocation149_spill] sm:$0xff]  ;;  %8348 = vmatpush2.msra.mxu1 %v11352_v35 }
 0x747   : > { %15817 = vst [vmem:[#allocation115_spill] sm:$0xff] %v11629_v18  ;;  %8552 = vset.pattern.permute.xlu1 %v15755_v14  ;;  %v2480_v43 = vand.u32 2147483647, %v2416_v15  ;;  %v11638_v37 = vmul.f32 %v3013_v27, %v11363_v61  ;;  %6471 = vperm.xlu0 %8588, %v15820_v60   ;;  %v2595_v22 = vmax.f32 %v2531_v46, 0.0  ;;  %v3560_v53 = vsub.f32 %v10707_v41, %v15821_v13  ;;  %v15822_v11 = vld [vmem:[#allocation152_spill] sm:$0xff]  ;;  %v15997_v60 = vld [vmem:[#allocation245_spill] sm:$0xff] }
 0x748   : > { %5591 = vperm.xlu1 %8552, %v15819_v21   ;;  %v2406_v55 = vsub.f32 %v10707_v41, %v15822_v11  ;;  %v2407_v19 = vsub.f32 %v10710_v17, %v15822_v11  ;;  %v11648_v26 = vpop.permute.xlu0 %4327  ;;  %6725 = vmatpush2.msra.mxu0 %v11624_v42  ;;  %v11652_v61 = vmax.f32 %v3684_v33, 0.0  ;;  %v11654_v27 = vmax.f32 %v3685_v1, 0.0  ;;  %v11659_v46 = vpop.permute.xlu1 %3232 }
 0x749   : > { %15818 = vst [vmem:[#allocation148_spill] sm:$0xff] %v11638_v37  ;;  %15823 = vst [vmem:[#allocation199_spill] sm:$0xff] %v11648_v26  ;;  %v3690_v30 = vsub.f32 1.0, %v3626_v57  ;;  %v11657_v15 = vmul.f32 %v11441_v0, %v2594_v6  ;;  %v2952_v21 = vsub.f32 1.0, %v2888_v48  ;;  %v3561_v11 = vsub.f32 %v10710_v17, %v15821_v13  ;;  %v15829_v0 = vld [vmem:[#allocation213_spill] sm:$0xff]  ;;  %8317 = vmatprep.subr.mxu1 %v15715_v20 }
 0x74a   : > { %15824 = vst [vmem:[#allocation135_spill] sm:$0xff] %v11652_v61  ;;  %15825 = vst [vmem:[#allocation112_spill] sm:$0xff] %v11654_v27  ;;  %v11664_v26 = vmax.f32 %v2954_v12, 0.0  ;;  %v2481_v37 = vand.u32 2147483647, %v2417_v34  ;;  %v2953_v4 = vsub.f32 1.0, %v2889_v36  ;;  %8349 = vmatpush2.msra.mxu1 %v11367_v45 }
 0x74b   : > { %15826 = vst [vmem:[#allocation12_spill] sm:$0xff] %v11657_v15  ;;  %15827 = vst [vmem:[#allocation149_spill] sm:$0xff] %v11659_v46  ;;  %v11667_v33 = vmax.f32 %v2955_v51, 0.0  ;;  %v3691_v57 = vsub.f32 1.0, %v3627_v31  ;;  %v2544_v1 = vsub.f32 1.0, %v2480_v43  ;;  %v15828_v6 = vmov 11   ;;  %6475 = vperm.xlu0 %8588, %v15829_v0   ;;  %8318 = vmatprep.subr.mxu1 %v15715_v20 }
 0x74c   : > { %8553 = vset.pattern.permute.xlu1 %v15828_v6  ;;  %v3624_v46 = vand.u32 2147483647, %v3560_v53  ;;  %v2470_v18 = vand.u32 2147483647, %v2406_v55  ;;  %v2471_v48 = vand.u32 2147483647, %v2407_v19  ;;  %v11672_v15 = vmul.f32 %v11448_v62, %v2595_v22  ;;  %8350 = vmatpush2.msra.mxu1 %v11379_v10 }
 0x74d   : > { %6415 = vperm.xlu1 %8553, %v15811_v50   ;;  %v11676_v35 = vmax.f32 %v3690_v30, 0.0  ;;  %v15832_v12 = vld [vmem:[#allocation138_spill] sm:$0xff]  ;;  %v15833_v36 = vld [vmem:[#allocation140_spill] sm:$0xff]  ;;  %v11684_v43 = vpop.permute.xlu0 %3247  ;;  %v3016_v62 = vmax.f32 %v2952_v21, 0.0  ;;  %v3625_v19 = vand.u32 2147483647, %v3561_v11  ;;  %v11689_v13 = vpop.permute.xlu1 %4339  ;;  %8319 = vmatprep.subr.mxu1 %v15715_v20 }
 0x74e   : > { %15830 = vst [vmem:[#allocation152_spill] sm:$0xff] %v11672_v15  ;;  %v2830_v51 = vsub.f32 %v10685_v38, %v15832_v12  ;;  %v2831_v34 = vsub.f32 %v10688_v24, %v15832_v12  ;;  %v3566_v31 = vsub.f32 %v10707_v41, %v15833_v36  ;;  %15834 = vst [vmem:[#allocation138_spill] sm:$0xff] %v11684_v43  ;;  %v2545_v50 = vsub.f32 1.0, %v2481_v37  ;;  %v15837_v30 = vld [vmem:[#allocation155_spill] sm:$0xff]  ;;  %v15992_v0 = vld [vmem:[#allocation174_spill] sm:$0xff] }
 0x74f   : > { %15831 = vst [vmem:[#allocation287_spill] sm:$0xff] %v11676_v35  ;;  %v3567_v22 = vsub.f32 %v10710_v17, %v15833_v36  ;;  %15835 = vst [vmem:[#allocation140_spill] sm:$0xff] %v11689_v13  ;;  %v3017_v53 = vmax.f32 %v2953_v4, 0.0  ;;  %v11692_v55 = vmax.f32 %v3691_v57, 0.0  ;;  %v2828_v12 = vsub.f32 %v10685_v38, %v15837_v30  ;;  %v15839_v4 = vld [vmem:[#allocation5_spill] sm:$0xff]  ;;  %8351 = vmatpush2.msra.mxu1 %v11392_v7  ;;  %v15848_v7 = vld [vmem:[#allocation10_spill] sm:$0xff] }
 0x750   : > { %v2829_v43 = vsub.f32 %v10688_v24, %v15837_v30  ;;  %v15838_v45 = vmov 5   ;;  %v3688_v37 = vsub.f32 1.0, %v3624_v46  ;;  %v2534_v21 = vsub.f32 1.0, %v2470_v18  ;;  %v15840_v35 = vld [vmem:[#allocation141_spill] sm:$0xff]  ;;  %v15841_v30 = vld [vmem:[#allocation198_spill] sm:$0xff]  ;;  %8320 = vmatprep.subr.mxu1 %v15715_v20 }
 0x751   : > { %15836 = vst [vmem:[#allocation288_spill] sm:$0xff] %v11692_v55  ;;  %8604 = vset.pattern.permute.xlu0 %v15838_v45  ;;  %v2535_v11 = vsub.f32 1.0, %v2471_v48  ;;  %v11700_v36 = vmax.f32 %v2544_v1, 0.0  ;;  %8554 = vset.pattern.permute.xlu1 %v15808_v2  ;;  %v2894_v57 = vand.u32 2147483647, %v2830_v51  ;;  %v2420_v15 = vsub.f32 %v10707_v41, %v15840_v35 }
 0x752   : > { %4875 = vperm.xlu0 %8604, %v15839_v4   ;;  %v2895_v13 = vand.u32 2147483647, %v2831_v34  ;;  %v3630_v55 = vand.u32 2147483647, %v3566_v31  ;;  %5331 = vperm.xlu1 %8554, %v15841_v30   ;;  %v3689_v10 = vsub.f32 1.0, %v3625_v19  ;;  %v11708_v46 = vmax.f32 %v2545_v50, 0.0  ;;  %v11713_v48 = vpop.permute.xlu0 %4335  ;;  %v11721_v27 = vpop.permute.xlu1 %3242 }
 0x753   : > { %v3631_v18 = vand.u32 2147483647, %v3567_v22  ;;  %v11711_v1 = vmul.f32 %v3016_v62, %v11484_v29  ;;  %15843 = vst [vmem:[#allocation5_spill] sm:$0xff] %v11713_v48  ;;  %v2892_v51 = vand.u32 2147483647, %v2828_v12  ;;  %v2421_v31 = vsub.f32 %v10710_v17, %v15840_v35  ;;  %15845 = vst [vmem:[#allocation198_spill] sm:$0xff] %v11721_v27  ;;  %8352 = vmatpush2.msra.mxu1 %v11410_v52 }
 0x754   : > { %v2893_v34 = vand.u32 2147483647, %v2829_v43  ;;  %v11719_v4 = vmul.f32 %v3017_v53, %v11486_v3  ;;  %v11724_v19 = vmax.f32 %v3688_v37, 0.0  ;;  %v2598_v29 = vmax.f32 %v2534_v21, 0.0  ;;  %v15847_v50 = vld [vmem:[#allocation158_spill] sm:$0xff]  ;;  %8321 = vmatprep.subr.mxu1 %v15715_v20  ;;  %v15850_v37 = vld [vmem:[#allocation156_spill] sm:$0xff] }
 0x755   : > { %15842 = vst [vmem:[#allocation155_spill] sm:$0xff] %v11711_v1  ;;  %v2599_v62 = vmax.f32 %v2535_v11, 0.0  ;;  %v2410_v22 = vsub.f32 %v10707_v41, %v15847_v50  ;;  %v2958_v43 = vsub.f32 1.0, %v2894_v57  ;;  %v2959_v35 = vsub.f32 1.0, %v2895_v13  ;;  %8353 = vmatpush2.msra.mxu1 %v11430_v32  ;;  %v15853_v48 = vld [vmem:[#allocation144_spill] sm:$0xff] }
 0x756   : > { %15844 = vst [vmem:[#allocation141_spill] sm:$0xff] %v11719_v4  ;;  %15846 = vst [vmem:[#allocation289_spill] sm:$0xff] %v11724_v19  ;;  %4887 = vperm.xlu0 %8604, %v15848_v7   ;;  %v3694_v12 = vsub.f32 1.0, %v3630_v55  ;;  %v2484_v3 = vand.u32 2147483647, %v2420_v15  ;;  %8555 = vset.pattern.permute.xlu1 %v15745_v16  ;;  %v11732_v53 = vmax.f32 %v3689_v10, 0.0  ;;  %v3564_v21 = vsub.f32 %v10707_v41, %v15850_v37 }
 0x757   : > { %v3565_v11 = vsub.f32 %v10710_v17, %v15850_v37  ;;  %v3695_v27 = vsub.f32 1.0, %v3631_v18  ;;  %v15851_v7 = vld [vmem:[#allocation17_spill] sm:$0xff]  ;;  %v2956_v52 = vsub.f32 1.0, %v2892_v51  ;;  %v2957_v13 = vsub.f32 1.0, %v2893_v34  ;;  %v11742_v57 = vpop.permute.xlu0 %3257  ;;  %8322 = vmatprep.subr.mxu1 %v15715_v20  ;;  %v11753_v32 = vpop.permute.xlu1 %4347  ;;  %v15857_v51 = vld [vmem:[#allocation14_spill] sm:$0xff] }
 0x758   : > { %15849 = vst [vmem:[#allocation158_spill] sm:$0xff] %v11732_v53  ;;  %5979 = vperm.xlu1 %8555, %v15851_v7   ;;  %v2411_v15 = vsub.f32 %v10710_v17, %v15847_v50  ;;  %v2485_v55 = vand.u32 2147483647, %v2421_v31  ;;  %15852 = vst [vmem:[#allocation10_spill] sm:$0xff] %v11742_v57  ;;  %v2474_v10 = vand.u32 2147483647, %v2410_v22  ;;  %v2834_v4 = vsub.f32 %v10685_v38, %v15853_v48 }
 0x759   : > { %v11748_v18 = vmul.f32 %v11562_v44, %v2598_v29  ;;  %v11751_v37 = vmul.f32 %v11570_v23, %v2599_v62  ;;  %15856 = vst [vmem:[#allocation144_spill] sm:$0xff] %v11753_v32  ;;  %8354 = vmatpush2.msra.mxu1 %v11458_v49  ;;  %v11757_v34 = vmax.f32 %v2958_v43, 0.0  ;;  %v11759_v31 = vmax.f32 %v2959_v35, 0.0  ;;  %v15862_v32 = vld [vmem:[#allocation31_spill] sm:$0xff] }
 0x75a   : > { %4895 = vperm.xlu0 %8604, %v15857_v51   ;;  %v11761_v50 = vmax.f32 %v3694_v12, 0.0  ;;  %v2548_v22 = vsub.f32 1.0, %v2484_v3  ;;  %8323 = vmatprep.subr.mxu1 %v15715_v20  ;;  %v3628_v44 = vand.u32 2147483647, %v3564_v21  ;;  %v3629_v29 = vand.u32 2147483647, %v3565_v11 }
 0x75b   : > { %15854 = vst [vmem:[#allocation156_spill] sm:$0xff] %v11748_v18  ;;  %15855 = vst [vmem:[#allocation17_spill] sm:$0xff] %v11751_v37  ;;  %v11764_v7 = vmax.f32 %v3695_v27, 0.0  ;;  %v2835_v23 = vsub.f32 %v10688_v24, %v15853_v48  ;;  %8355 = vmatpush2.msra.mxu1 %v11474_v5  ;;  %v3020_v49 = vmax.f32 %v2956_v52, 0.0  ;;  %v3021_v62 = vmax.f32 %v2957_v13, 0.0  ;;  %v15860_v3 = vld [vmem:[#allocation62_spill] sm:$0xff] }
 0x75c   : > { %15858 = vst [vmem:[#allocation14_spill] sm:$0xff] %v11761_v50  ;;  %8556 = vset.pattern.permute.xlu1 %v15828_v6  ;;  %v2475_v43 = vand.u32 2147483647, %v2411_v15  ;;  %v2549_v35 = vsub.f32 1.0, %v2485_v55  ;;  %8324 = vmatprep.subr.mxu1 %v15715_v20  ;;  %v2538_v12 = vsub.f32 1.0, %v2474_v10  ;;  %v2832_v27 = vsub.f32 %v10685_v38, %v15860_v3  ;;  %v15861_v11 = vld [vmem:[#allocation146_spill] sm:$0xff]  ;;  %v11777_v57 = vpop.permute.xlu0 %4343  ;;  %v11788_v15 = vpop.permute.xlu1 %3252 }
 0x75d   : > { %15859 = vst [vmem:[#allocation290_spill] sm:$0xff] %v11764_v7  ;;  %6419 = vperm.xlu1 %8556, %v15841_v30   ;;  %v2898_v21 = vand.u32 2147483647, %v2834_v4  ;;  %v3570_v48 = vsub.f32 %v10707_v41, %v15861_v11  ;;  %15863 = vst [vmem:[#allocation62_spill] sm:$0xff] %v11777_v57  ;;  %8356 = vmatpush2.msra.mxu1 %v11501_v9  ;;  %v11780_v5 = vmax.f32 %v2548_v22, 0.0  ;;  %v15864_v13 = vld [vmem:[#allocation147_spill] sm:$0xff] }
 0x75e   : > { %4907 = vperm.xlu0 %8604, %v15862_v32   ;;  %v2833_v30 = vsub.f32 %v10688_v24, %v15860_v3  ;;  %v3571_v52 = vsub.f32 %v10710_v17, %v15861_v11  ;;  %v2424_v4 = vsub.f32 %v10707_v41, %v15864_v13  ;;  %15865 = vst [vmem:[#allocation146_spill] sm:$0xff] %v11788_v15  ;;  %v3692_v55 = vsub.f32 1.0, %v3628_v44  ;;  %v15972_v18 = vld [vmem:[#allocation117_spill] sm:$0xff] }
 0x75f   : > { %8325 = vmatprep.subr.mxu1 %v15715_v20  ;;  %v3693_v10 = vsub.f32 1.0, %v3629_v29  ;;  %v2899_v57 = vand.u32 2147483647, %v2835_v23  ;;  %v2425_v9 = vsub.f32 %v10710_v17, %v15864_v13  ;;  %v2539_v22 = vsub.f32 1.0, %v2475_v43  ;;  %v15868_v13 = vld [vmem:[#allocation16_spill] sm:$0xff] }
 0x760   : > { %8357 = vmatpush2.msra.mxu1 %v11515_v28  ;;  %v11794_v3 = vmax.f32 %v2549_v35, 0.0  ;;  %v11797_v11 = vmul.f32 %v3020_v49, %v11606_v47  ;;  %v11800_v7 = vmul.f32 %v3021_v62, %v11618_v59  ;;  %v2602_v44 = vmax.f32 %v2538_v12, 0.0  ;;  %v15869_v28 = vld [vmem:[#allocation32_spill] sm:$0xff]  ;;  %v15870_v35 = vld [vmem:[#allocation161_spill] sm:$0xff] }
 0x761   : > { %8557 = vset.pattern.permute.xlu1 %v15755_v14  ;;  %8326 = vmatprep.subr.mxu1 %v15715_v20  ;;  %v2896_v29 = vand.u32 2147483647, %v2832_v27  ;;  %v2962_v23 = vsub.f32 1.0, %v2898_v21  ;;  %v3634_v15 = vand.u32 2147483647, %v3570_v48  ;;  %v2414_v47 = vsub.f32 %v10707_v41, %v15870_v35  ;;  %v11808_v59 = vpop.permute.xlu0 %3267  ;;  %v11815_v48 = vpop.permute.xlu1 %4355 }
 0x762   : > { %15866 = vst [vmem:[#allocation31_spill] sm:$0xff] %v11797_v11  ;;  %15867 = vst [vmem:[#allocation147_spill] sm:$0xff] %v11800_v7  ;;  %5599 = vperm.xlu1 %8557, %v15868_v13   ;;  %4919 = vperm.xlu0 %8604, %v15869_v28   ;;  %v2897_v43 = vand.u32 2147483647, %v2833_v30  ;;  %v3635_v49 = vand.u32 2147483647, %v3571_v52 }
 0x763   : > { %v2488_v11 = vand.u32 2147483647, %v2424_v4  ;;  %15871 = vst [vmem:[#allocation16_spill] sm:$0xff] %v11808_v59  ;;  %8358 = vmatpush2.msra.mxu1 %v11534_v54  ;;  %v11811_v62 = vmax.f32 %v3692_v55, 0.0  ;;  %v11813_v12 = vmax.f32 %v3693_v10, 0.0  ;;  %v2963_v27 = vsub.f32 1.0, %v2899_v57 }
 0x764   : > { %v2489_v21 = vand.u32 2147483647, %v2425_v9  ;;  %15874 = vst [vmem:[#allocation291_spill] sm:$0xff] %v11815_v48  ;;  %8327 = vmatprep.subr.mxu1 %v15715_v20  ;;  %v2603_v30 = vmax.f32 %v2539_v22, 0.0  ;;  %v15875_v13 = vld [vmem:[#allocation77_spill] sm:$0xff]  ;;  %v2415_v54 = vsub.f32 %v10710_v17, %v15870_v35  ;;  %v2960_v4 = vsub.f32 1.0, %v2896_v29 }
 0x765   : > { %15872 = vst [vmem:[#allocation32_spill] sm:$0xff] %v11811_v62  ;;  %15873 = vst [vmem:[#allocation161_spill] sm:$0xff] %v11813_v12  ;;  %v3568_v7 = vsub.f32 %v10707_v41, %v15875_v13  ;;  %v3569_v52 = vsub.f32 %v10710_v17, %v15875_v13  ;;  %8359 = vmatpush2.msra.mxu1 %v11551_v40  ;;  %v11825_v55 = vmax.f32 %v2962_v23, 0.0  ;;  %v3698_v57 = vsub.f32 1.0, %v3634_v15  ;;  %v15877_v9 = vld [vmem:[#allocation46_spill] sm:$0xff]  ;;  %v15975_v62 = vld [vmem:[#allocation189_spill] sm:$0xff] }
 0x766   : > { %v11828_v10 = vmul.f32 %v11664_v26, %v2602_v44  ;;  %8558 = vset.pattern.permute.xlu1 %v15745_v16  ;;  %4931 = vperm.xlu0 %8604, %v15877_v9   ;;  %v2961_v22 = vsub.f32 1.0, %v2897_v43  ;;  %v2478_v59 = vand.u32 2147483647, %v2414_v47  ;;  %v3699_v48 = vsub.f32 1.0, %v3635_v49  ;;  %v15878_v23 = vld [vmem:[#allocation150_spill] sm:$0xff]  ;;  %v11840_v44 = vpop.permute.xlu0 %4351  ;;  %v11846_v47 = vpop.permute.xlu1 %3262 }
 0x767   : > { %v2552_v13 = vsub.f32 1.0, %v2488_v11  ;;  %5983 = vperm.xlu1 %8558, %v15857_v51   ;;  %8328 = vmatprep.subr.mxu1 %v15715_v20  ;;  %v11834_v40 = vmax.f32 %v2963_v27, 0.0  ;;  %v2553_v29 = vsub.f32 1.0, %v2489_v21  ;;  %v2838_v15 = vsub.f32 %v10685_v38, %v15878_v23  ;;  %15879 = vst [vmem:[#allocation150_spill] sm:$0xff] %v11840_v44  ;;  %15881 = vst [vmem:[#allocation293_spill] sm:$0xff] %v11846_v47  ;;  %v15883_v21 = vld [vmem:[#allocation153_spill] sm:$0xff] }
 0x768   : > { %15876 = vst [vmem:[#allocation77_spill] sm:$0xff] %v11828_v10  ;;  %v2839_v26 = vsub.f32 %v10688_v24, %v15878_v23  ;;  %8360 = vmatpush2.msra.mxu1 %v11567_v56  ;;  %v3632_v43 = vand.u32 2147483647, %v3568_v7  ;;  %v3633_v35 = vand.u32 2147483647, %v3569_v52  ;;  %v11844_v51 = vmul.f32 %v11667_v33, %v2603_v30  ;;  %v15884_v56 = vld [vmem:[#allocation47_spill] sm:$0xff] }
 0x769   : > { %v2479_v11 = vand.u32 2147483647, %v2415_v54  ;;  %8329 = vmatprep.subr.mxu1 %v15715_v20  ;;  %v3024_v49 = vmax.f32 %v2960_v4, 0.0  ;;  %v11849_v27 = vmax.f32 %v3698_v57, 0.0  ;;  %v3574_v23 = vsub.f32 %v10707_v41, %v15883_v21  ;;  %v15886_v54 = vld [vmem:[#allocation162_spill] sm:$0xff] }
 0x76a   : > { %15880 = vst [vmem:[#allocation292_spill] sm:$0xff] %v11844_v51  ;;  %v3575_v44 = vsub.f32 %v10710_v17, %v15883_v21  ;;  %4943 = vperm.xlu0 %8604, %v15884_v56   ;;  %8361 = vmatpush2.msra.mxu1 %v11589_v58  ;;  %v3025_v7 = vmax.f32 %v2961_v22, 0.0  ;;  %v2542_v33 = vsub.f32 1.0, %v2478_v59  ;;  %v11857_v30 = vmax.f32 %v3699_v48, 0.0  ;;  %v15995_v56 = vld [vmem:[#allocation244_spill] sm:$0xff] }
 0x76b   : > { %15882 = vst [vmem:[#allocation294_spill] sm:$0xff] %v11849_v27  ;;  %v11859_v52 = vmax.f32 %v2552_v13, 0.0  ;;  %8559 = vset.pattern.permute.xlu1 %v15808_v2  ;;  %8330 = vmatprep.subr.mxu1 %v15715_v20  ;;  %v2836_v4 = vsub.f32 %v10685_v38, %v15886_v54  ;;  %v2837_v57 = vsub.f32 %v10688_v24, %v15886_v54  ;;  %v2902_v21 = vand.u32 2147483647, %v2838_v15  ;;  %v15887_v27 = vld [vmem:[#allocation201_spill] sm:$0xff]  ;;  %v11871_v13 = vpop.permute.xlu0 %4563 }
 0x76c   : > { %15885 = vst [vmem:[#allocation153_spill] sm:$0xff] %v11857_v30  ;;  %v2903_v47 = vand.u32 2147483647, %v2839_v26  ;;  %5339 = vperm.xlu1 %8559, %v15887_v27   ;;  %8362 = vmatpush2.msra.mxu1 %v11599_v8  ;;  %v3696_v58 = vsub.f32 1.0, %v3632_v43  ;;  %v3697_v59 = vsub.f32 1.0, %v3633_v35  ;;  %v2543_v48 = vsub.f32 1.0, %v2479_v11  ;;  %v11879_v26 = vpop.permute.xlu1 %4567 }
 0x76d   : > { %v11869_v22 = vmax.f32 %v2553_v29, 0.0  ;;  %15888 = vst [vmem:[#allocation162_spill] sm:$0xff] %v11871_v13  ;;  %8331 = vmatprep.subr.mxu1 %v15715_v20  ;;  %v15889_v30 = vld [vmem:[#allocation6_spill] sm:$0xff]  ;;  %v3638_v51 = vand.u32 2147483647, %v3574_v23  ;;  %v11877_v15 = vmul.f32 %v3024_v49, %v11700_v36  ;;  %v15892_v8 = vld [vmem:[#allocation61_spill] sm:$0xff]  ;;  %v11888_v11 = vmul.f32 %v3025_v7, %v11708_v46 }
 0x76e   : > { %v2418_v50 = vsub.f32 %v10707_v41, %v15889_v30  ;;  %v3639_v54 = vand.u32 2147483647, %v3575_v44  ;;  %15891 = vst [vmem:[#allocation6_spill] sm:$0xff] %v11879_v26  ;;  %4955 = vperm.xlu0 %8604, %v15892_v8   ;;  %8363 = vmatpush2.msra.mxu1 %v11624_v42  ;;  %v2606_v29 = vmax.f32 %v2542_v33, 0.0  ;;  %v15893_v43 = vld [vmem:[#allocation154_spill] sm:$0xff]  ;;  %v2966_v36 = vsub.f32 1.0, %v2902_v21 }
 0x76f   : > { %15890 = vst [vmem:[#allocation201_spill] sm:$0xff] %v11877_v15  ;;  %v2428_v35 = vsub.f32 %v10707_v41, %v15893_v43  ;;  %v2429_v20 = vsub.f32 %v10710_v17, %v15893_v43  ;;  %15894 = vst [vmem:[#allocation61_spill] sm:$0xff] %v11888_v11  ;;  %v2900_v44 = vand.u32 2147483647, %v2836_v4  ;;  %v2901_v23 = vand.u32 2147483647, %v2837_v57  ;;  %v11898_v46 = vpop.permute.xlu0 %4571 }
 0x770   : > { %v2967_v49 = vsub.f32 1.0, %v2903_v47  ;;  %8560 = vset.pattern.permute.xlu1 %v15755_v14  ;;  %v2607_v26 = vmax.f32 %v2543_v48, 0.0  ;;  %v15895_v15 = vld [vmem:[#allocation2_spill] sm:$0xff]  ;;  %v2419_v13 = vsub.f32 %v10710_v17, %v15889_v30  ;;  %v15896_v43 = vld [vmem:[#allocation23_spill] sm:$0xff]  ;;  %15897 = vst [vmem:[#allocation154_spill] sm:$0xff] %v11898_v46  ;;  %v11900_v7 = vmax.f32 %v3696_v58, 0.0  ;;  %v11902_v21 = vpop.permute.xlu1 %4575 }
 0x771   : > { %v3572_v42 = vsub.f32 %v10707_v41, %v15895_v15  ;;  %v3573_v33 = vsub.f32 %v10710_v17, %v15895_v15  ;;  %5603 = vperm.xlu1 %8560, %v15896_v43   ;;  %v2482_v4 = vand.u32 2147483647, %v2418_v50  ;;  %v3702_v47 = vsub.f32 1.0, %v3638_v51  ;;  %15899 = vst [vmem:[#allocation23_spill] sm:$0xff] %v11902_v21  ;;  %v15900_v48 = vld [vmem:[#allocation84_spill] sm:$0xff] }
 0x772   : > { %15898 = vst [vmem:[#allocation2_spill] sm:$0xff] %v11900_v7  ;;  %v3703_v57 = vsub.f32 1.0, %v3639_v54  ;;  %4975 = vperm.xlu0 %8604, %v15900_v48   ;;  %v11905_v11 = vmax.f32 %v3697_v59, 0.0  ;;  %v2492_v10 = vand.u32 2147483647, %v2428_v35  ;;  %v11908_v1 = vmul.f32 %v11757_v34, %v2606_v29  ;;  %v15907_v29 = vld [vmem:[#allocation157_spill] sm:$0xff] }
 0x773   : > { %v2493_v15 = vand.u32 2147483647, %v2429_v20  ;;  %v2964_v30 = vsub.f32 1.0, %v2900_v44  ;;  %v2965_v43 = vsub.f32 1.0, %v2901_v23  ;;  %v11910_v12 = vmax.f32 %v2966_v36, 0.0  ;;  %v11918_v59 = vpop.permute.xlu0 %4579  ;;  %v15908_v23 = vld [vmem:[#allocation21_spill] sm:$0xff] }
 0x774   : > { %15901 = vst [vmem:[#allocation295_spill] sm:$0xff] %v11905_v11  ;;  %15902 = vst [vmem:[#allocation296_spill] sm:$0xff] %v11908_v1  ;;  %v11912_v58 = vmax.f32 %v2967_v49, 0.0  ;;  %v3636_v50 = vand.u32 2147483647, %v3572_v42  ;;  %v11915_v21 = vmul.f32 %v11759_v31, %v2607_v26  ;;  %v2546_v35 = vsub.f32 1.0, %v2482_v4  ;;  %v11927_v36 = vpop.permute.xlu1 %4583 }
 0x775   : > { %v3637_v51 = vand.u32 2147483647, %v3573_v33  ;;  %v2483_v54 = vand.u32 2147483647, %v2419_v13  ;;  %8562 = vset.pattern.permute.xlu1 %v15838_v45  ;;  %15904 = vst [vmem:[#allocation298_spill] sm:$0xff] %v11918_v59  ;;  %v11920_v20 = vmax.f32 %v3702_v47, 0.0  ;;  %v2842_v44 = vsub.f32 %v10685_v38, %v15907_v29 }
 0x776   : > { %15903 = vst [vmem:[#allocation297_spill] sm:$0xff] %v11915_v21  ;;  %v11922_v34 = vmax.f32 %v3703_v57, 0.0  ;;  %4903 = vperm.xlu1 %8562, %v15908_v23   ;;  %15909 = vst [vmem:[#allocation157_spill] sm:$0xff] %v11927_v36  ;;  %v15910_v13 = vld [vmem:[#allocation111_spill] sm:$0xff]  ;;  %v2556_v31 = vsub.f32 1.0, %v2492_v10  ;;  %v2557_v26 = vsub.f32 1.0, %v2493_v15  ;;  %v2843_v33 = vsub.f32 %v10688_v24, %v15907_v29 }
 0x777   : > { %15905 = vst [vmem:[#allocation299_spill] sm:$0xff] %v11920_v20  ;;  %4979 = vperm.xlu0 %8604, %v15910_v13   ;;  %v15911_v49 = vld [vmem:[#allocation95_spill] sm:$0xff]  ;;  %v3028_v4 = vmax.f32 %v2964_v30, 0.0  ;;  %v15912_v57 = vld [vmem:[#allocation20_spill] sm:$0xff]  ;;  %v3029_v36 = vmax.f32 %v2965_v43, 0.0  ;;  %v3700_v21 = vsub.f32 1.0, %v3636_v50  ;;  %v11940_v1 = vpop.permute.xlu0 %4587  ;;  %v3924_v48 = vsub.f32 %v10685_v38, %v15972_v18 }
 0x778   : > { %15906 = vst [vmem:[#allocation300_spill] sm:$0xff] %v11922_v34  ;;  %v2840_v42 = vsub.f32 %v10685_v38, %v15911_v49  ;;  %v2841_v47 = vsub.f32 %v10688_v24, %v15911_v49  ;;  %v2422_v59 = vsub.f32 %v10707_v41, %v15912_v57  ;;  %v2423_v46 = vsub.f32 %v10710_v17, %v15912_v57  ;;  %v15914_v13 = vld [vmem:[#allocation159_spill] sm:$0xff]  ;;  %v11947_v49 = vpop.permute.xlu1 %4591  ;;  %v15916_v11 = vld [vmem:[#allocation105_spill] sm:$0xff] }
 0x779   : > { %v3701_v10 = vsub.f32 1.0, %v3637_v51  ;;  %v2547_v15 = vsub.f32 1.0, %v2483_v54  ;;  %15913 = vst [vmem:[#allocation21_spill] sm:$0xff] %v11940_v1  ;;  %v2610_v34 = vmax.f32 %v2546_v35, 0.0  ;;  %v2906_v20 = vand.u32 2147483647, %v2842_v44 }
 0x77a   : > { %v2432_v30 = vsub.f32 %v10707_v41, %v15914_v13  ;;  %v2433_v29 = vsub.f32 %v10710_v17, %v15914_v13  ;;  %8563 = vset.pattern.permute.xlu1 %v15828_v6  ;;  %15915 = vst [vmem:[#allocation95_spill] sm:$0xff] %v11947_v49  ;;  %v11950_v43 = vmax.f32 %v2556_v31, 0.0  ;;  %v11952_v50 = vmax.f32 %v2557_v26, 0.0 }
 0x77b   : > { %4983 = vperm.xlu0 %8604, %v15916_v11   ;;  %v2904_v51 = vand.u32 2147483647, %v2840_v42  ;;  %v2907_v54 = vand.u32 2147483647, %v2843_v33  ;;  %6427 = vperm.xlu1 %8563, %v15887_v27   ;;  %v2905_v35 = vand.u32 2147483647, %v2841_v47  ;;  %v11956_v1 = vmul.f32 %v3028_v4, %v11780_v5  ;;  %v11965_v26 = vpop.permute.xlu0 %4595 }
 0x77c   : > { %v2486_v44 = vand.u32 2147483647, %v2422_v59  ;;  %v2487_v57 = vand.u32 2147483647, %v2423_v46  ;;  %v11958_v13 = vmax.f32 %v3700_v21, 0.0  ;;  %v11960_v7 = vmax.f32 %v3701_v10, 0.0  ;;  %v11970_v46 = vpop.permute.xlu1 %4599 }
 0x77d   : > { %15917 = vst [vmem:[#allocation20_spill] sm:$0xff] %v11956_v1  ;;  %v2611_v49 = vmax.f32 %v2547_v15, 0.0  ;;  %v11963_v31 = vmul.f32 %v3029_v36, %v11794_v3  ;;  %15921 = vst [vmem:[#allocation302_spill] sm:$0xff] %v11965_v26  ;;  %v2970_v42 = vsub.f32 1.0, %v2906_v20  ;;  %v2496_v33 = vand.u32 2147483647, %v2432_v30 }
 0x77e   : > { %15918 = vst [vmem:[#allocation159_spill] sm:$0xff] %v11958_v13  ;;  %15919 = vst [vmem:[#allocation105_spill] sm:$0xff] %v11960_v7  ;;  %v2497_v37 = vand.u32 2147483647, %v2433_v29  ;;  %v11968_v27 = vmul.f32 %v11825_v55, %v2610_v34  ;;  %v2968_v5 = vsub.f32 1.0, %v2904_v51  ;;  %v2971_v21 = vsub.f32 1.0, %v2907_v54 }
 0x77f   : > { %15920 = vst [vmem:[#allocation301_spill] sm:$0xff] %v11963_v31  ;;  %15923 = vst [vmem:[#allocation304_spill] sm:$0xff] %v11970_v46  ;;  %8622 = vset.pattern.permute.xlu0 %v15808_v2  ;;  %v15924_v59 = vld [vmem:[#allocation124_spill] sm:$0xff]  ;;  %8564 = vset.pattern.permute.xlu1 %v15755_v14  ;;  %v2969_v20 = vsub.f32 1.0, %v2905_v35  ;;  %v2550_v36 = vsub.f32 1.0, %v2486_v44  ;;  %v2551_v55 = vsub.f32 1.0, %v2487_v57  ;;  %v11989_v54 = vmul.f32 %v11834_v40, %v2611_v49 }
 0x780   : > { %15922 = vst [vmem:[#allocation303_spill] sm:$0xff] %v11968_v27  ;;  %v2844_v4 = vsub.f32 %v10685_v38, %v15924_v59  ;;  %v2845_v3 = vsub.f32 %v10688_v24, %v15924_v59  ;;  %5323 = vperm.xlu0 %8622, %v15781_v25   ;;  %v15925_v34 = vld [vmem:[#allocation11_spill] sm:$0xff]  ;;  %v15926_v10 = vld [vmem:[#allocation22_spill] sm:$0xff]  ;;  %v15927_v30 = vld [vmem:[#allocation160_spill] sm:$0xff]  ;;  %v11991_v25 = vpop.permute.xlu0 %4603  ;;  %v11993_v35 = vmax.f32 %v2970_v42, 0.0  ;;  %v2560_v44 = vsub.f32 1.0, %v2496_v33  ;;  %v11997_v46 = vpop.permute.xlu1 %4607 }
 0x781   : > { %v2846_v47 = vsub.f32 %v10685_v38, %v15925_v34  ;;  %5607 = vperm.xlu1 %8564, %v15926_v10   ;;  %v2847_v15 = vsub.f32 %v10688_v24, %v15925_v34  ;;  %v2436_v29 = vsub.f32 %v10707_v41, %v15927_v30  ;;  %v2437_v51 = vsub.f32 %v10710_v17, %v15927_v30  ;;  %v15930_v59 = vld [vmem:[#allocation34_spill] sm:$0xff] }
 0x782   : > { %15928 = vst [vmem:[#allocation124_spill] sm:$0xff] %v11989_v54  ;;  %15929 = vst [vmem:[#allocation11_spill] sm:$0xff] %v11991_v25  ;;  %v2561_v57 = vsub.f32 1.0, %v2497_v37  ;;  %v2426_v10 = vsub.f32 %v10707_v41, %v15930_v59  ;;  %v3032_v34 = vmax.f32 %v2968_v5, 0.0  ;;  %v11999_v26 = vmax.f32 %v2971_v21, 0.0 }
 0x783   : > { %15931 = vst [vmem:[#allocation22_spill] sm:$0xff] %v11997_v46  ;;  %v2908_v27 = vand.u32 2147483647, %v2844_v4  ;;  %v2909_v31 = vand.u32 2147483647, %v2845_v3  ;;  %v3033_v40 = vmax.f32 %v2969_v20, 0.0  ;;  %v2427_v37 = vsub.f32 %v10710_v17, %v15930_v59 }
 0x784   : > { %5335 = vperm.xlu0 %8622, %v15787_v39   ;;  %v2614_v49 = vmax.f32 %v2550_v36, 0.0  ;;  %v2615_v30 = vmax.f32 %v2551_v55, 0.0  ;;  %v2910_v25 = vand.u32 2147483647, %v2846_v47  ;;  %v2911_v42 = vand.u32 2147483647, %v2847_v15  ;;  %v12006_v5 = vpop.permute.xlu0 %4611 }
 0x785   : > { %8565 = vset.pattern.permute.xlu1 %v15745_v16  ;;  %v2500_v33 = vand.u32 2147483647, %v2436_v29  ;;  %v2501_v54 = vand.u32 2147483647, %v2437_v51  ;;  %15932 = vst [vmem:[#allocation160_spill] sm:$0xff] %v12006_v5  ;;  %v12008_v21 = vmax.f32 %v2560_v44, 0.0  ;;  %v12017_v15 = vmul.f32 %v3032_v34, %v11859_v52  ;;  %v12019_v29 = vpop.permute.xlu1 %4871 }
 0x786   : > { %5991 = vperm.xlu1 %8565, %v15908_v23   ;;  %v12010_v4 = vmax.f32 %v2561_v57, 0.0  ;;  %v2490_v39 = vand.u32 2147483647, %v2426_v10  ;;  %v15935_v3 = vld [vmem:[#allocation163_spill] sm:$0xff]  ;;  %v2972_v36 = vsub.f32 1.0, %v2908_v27  ;;  %v2973_v55 = vsub.f32 1.0, %v2909_v31 }
 0x787   : > { %15933 = vst [vmem:[#allocation34_spill] sm:$0xff] %v12008_v21  ;;  %v2850_v20 = vsub.f32 %v10685_v38, %v15935_v3  ;;  %v2851_v47 = vsub.f32 %v10688_v24, %v15935_v3  ;;  %15936 = vst [vmem:[#allocation163_spill] sm:$0xff] %v12017_v15  ;;  %v15937_v23 = vld [vmem:[#allocation204_spill] sm:$0xff]  ;;  %v2974_v51 = vsub.f32 1.0, %v2910_v25  ;;  %v12023_v44 = vmul.f32 %v3033_v40, %v11869_v22  ;;  %v15941_v5 = vld [vmem:[#allocation67_spill] sm:$0xff] }
 0x788   : > { %15934 = vst [vmem:[#allocation305_spill] sm:$0xff] %v12010_v4  ;;  %5343 = vperm.xlu0 %8622, %v15937_v23   ;;  %v12026_v57 = vmul.f32 %v11910_v12, %v2614_v49  ;;  %v12029_v27 = vmul.f32 %v11912_v58, %v2615_v30  ;;  %v2491_v31 = vand.u32 2147483647, %v2427_v37  ;;  %v2975_v59 = vsub.f32 1.0, %v2911_v42  ;;  %v12037_v12 = vpop.permute.xlu0 %5963  ;;  %v15942_v30 = vld [vmem:[#allocation74_spill] sm:$0xff]  ;;  %v15943_v42 = vld [vmem:[#allocation205_spill] sm:$0xff] }
 0x789   : > { %15938 = vst [vmem:[#allocation204_spill] sm:$0xff] %v12023_v44  ;;  %v2564_v10 = vsub.f32 1.0, %v2500_v33  ;;  %v2565_v3 = vsub.f32 1.0, %v2501_v54  ;;  %v2554_v52 = vsub.f32 1.0, %v2490_v39  ;;  %v2914_v34 = vand.u32 2147483647, %v2850_v20  ;;  %v12041_v37 = vpop.permute.xlu1 %4879 }
 0x78a   : > { %15939 = vst [vmem:[#allocation306_spill] sm:$0xff] %v12026_v57  ;;  %15940 = vst [vmem:[#allocation307_spill] sm:$0xff] %v12029_v27  ;;  %8566 = vset.pattern.permute.xlu1 %v15828_v6  ;;  %v3578_v25 = vsub.f32 %v10707_v41, %v15941_v5  ;;  %v3579_v22 = vsub.f32 %v10710_v17, %v15941_v5  ;;  %v3036_v58 = vmax.f32 %v2972_v36, 0.0  ;;  %v3037_v40 = vmax.f32 %v2973_v55, 0.0  ;;  %v15945_v5 = vld [vmem:[#allocation49_spill] sm:$0xff]  ;;  %v15980_v4 = vld [vmem:[#allocation75_spill] sm:$0xff] }
 0x78b   : > { %6431 = vperm.xlu1 %8566, %v15937_v23   ;;  %v2915_v49 = vand.u32 2147483647, %v2851_v47  ;;  %v3582_v54 = vsub.f32 %v10707_v41, %v15942_v30  ;;  %v12044_v33 = vmax.f32 %v2974_v51, 0.0  ;;  %v3583_v39 = vsub.f32 %v10710_v17, %v15942_v30 }
 0x78c   : > { %5355 = vperm.xlu0 %8622, %v15943_v42   ;;  %v2848_v20 = vsub.f32 %v10685_v38, %v15945_v5  ;;  %v2849_v36 = vsub.f32 %v10688_v24, %v15945_v5  ;;  %v2555_v55 = vsub.f32 1.0, %v2491_v31  ;;  %v12052_v47 = vmax.f32 %v2975_v59, 0.0  ;;  %v12059_v30 = vpop.permute.xlu0 %5967 }
 0x78d   : > { %15944 = vst [vmem:[#allocation67_spill] sm:$0xff] %v12044_v33  ;;  %v12054_v23 = vmax.f32 %v2564_v10, 0.0  ;;  %v12056_v46 = vmax.f32 %v2565_v3, 0.0  ;;  %v2618_v27 = vmax.f32 %v2554_v52, 0.0  ;;  %v2978_v57 = vsub.f32 1.0, %v2914_v34  ;;  %v12068_v59 = vpop.permute.xlu1 %4883  ;;  %v15951_v10 = vld [vmem:[#allocation210_spill] sm:$0xff] }
 0x78e   : > { %15946 = vst [vmem:[#allocation74_spill] sm:$0xff] %v12052_v47  ;;  %v3642_v51 = vand.u32 2147483647, %v3578_v25  ;;  %v3643_v44 = vand.u32 2147483647, %v3579_v22  ;;  %v2979_v15 = vsub.f32 1.0, %v2915_v49  ;;  %v12062_v7 = vmul.f32 %v3036_v58, %v11950_v43 }
 0x78f   : > { %15947 = vst [vmem:[#allocation205_spill] sm:$0xff] %v12054_v23  ;;  %15948 = vst [vmem:[#allocation49_spill] sm:$0xff] %v12056_v46  ;;  %8567 = vset.pattern.permute.xlu1 %v15808_v2  ;;  %v3646_v1 = vand.u32 2147483647, %v3582_v54  ;;  %v12065_v31 = vmul.f32 %v3037_v40, %v11952_v50  ;;  %v3647_v3 = vand.u32 2147483647, %v3583_v39  ;;  %v12084_v5 = vmul.f32 %v11993_v35, %v2618_v27 }
 0x790   : > { %15949 = vst [vmem:[#allocation308_spill] sm:$0xff] %v12062_v7  ;;  %5347 = vperm.xlu1 %8567, %v15797_v63   ;;  %5367 = vperm.xlu0 %8622, %v15951_v10   ;;  %v2912_v52 = vand.u32 2147483647, %v2848_v20  ;;  %v2913_v34 = vand.u32 2147483647, %v2849_v36  ;;  %v15952_v25 = vld [vmem:[#allocation8_spill] sm:$0xff]  ;;  %v12086_v20 = vpop.permute.xlu0 %5975 }
 0x791   : > { %15950 = vst [vmem:[#allocation309_spill] sm:$0xff] %v12065_v31  ;;  %v3910_v22 = vsub.f32 %v10685_v38, %v15952_v25  ;;  %v12073_v49 = vmax.f32 %v2555_v55, 0.0  ;;  %v3911_v43 = vsub.f32 %v10688_v24, %v15952_v25  ;;  %v15953_v58 = vld [vmem:[#allocation13_spill] sm:$0xff]  ;;  %v12081_v40 = vmax.f32 %v2978_v57, 0.0  ;;  %v15957_v31 = vld [vmem:[#allocation86_spill] sm:$0xff]  ;;  %v12095_v57 = vpop.permute.xlu1 %4891  ;;  %v15962_v23 = vld [vmem:[#allocation164_spill] sm:$0xff] }
 0x792   : > { %v3916_v50 = vsub.f32 %v10685_v38, %v15953_v58  ;;  %v3917_v63 = vsub.f32 %v10688_v24, %v15953_v58  ;;  %v3706_v54 = vsub.f32 1.0, %v3642_v51  ;;  %v3707_v39 = vsub.f32 1.0, %v3643_v44  ;;  %15955 = vst [vmem:[#allocation13_spill] sm:$0xff] %v12084_v5  ;;  %v15958_v51 = vld [vmem:[#allocation211_spill] sm:$0xff]  ;;  %v15976_v47 = vld [vmem:[#allocation206_spill] sm:$0xff] }
 0x793   : > { %15954 = vst [vmem:[#allocation8_spill] sm:$0xff] %v12081_v40  ;;  %v12088_v36 = vmax.f32 %v2979_v15, 0.0  ;;  %v3710_v55 = vsub.f32 1.0, %v3646_v1  ;;  %v3586_v25 = vsub.f32 %v10707_v41, %v15957_v31  ;;  %v3587_v7 = vsub.f32 %v10710_v17, %v15957_v31 }
 0x794   : > { %8568 = vset.pattern.permute.xlu1 %v15745_v16  ;;  %5379 = vperm.xlu0 %8622, %v15958_v51   ;;  %v3711_v44 = vsub.f32 1.0, %v3647_v3  ;;  %v2976_v35 = vsub.f32 1.0, %v2912_v52  ;;  %v2977_v27 = vsub.f32 1.0, %v2913_v34  ;;  %v3974_v58 = vand.u32 2147483647, %v3910_v22  ;;  %v12109_v52 = vpop.permute.xlu0 %5987 }
 0x795   : > { %15956 = vst [vmem:[#allocation310_spill] sm:$0xff] %v12088_v36  ;;  %5995 = vperm.xlu1 %8568, %v15862_v32   ;;  %v3975_v15 = vand.u32 2147483647, %v3911_v43  ;;  %v3980_v1 = vand.u32 2147483647, %v3916_v50  ;;  %v15959_v36 = vld [vmem:[#allocation104_spill] sm:$0xff]  ;;  %v2430_v13 = vsub.f32 %v10707_v41, %v15962_v23  ;;  %v2431_v3 = vsub.f32 %v10710_v17, %v15962_v23  ;;  %v12119_v50 = vpop.permute.xlu1 %4899 }
 0x796   : > { %v3981_v5 = vand.u32 2147483647, %v3917_v63  ;;  %v3920_v40 = vsub.f32 %v10685_v38, %v15959_v36  ;;  %v12101_v46 = vmax.f32 %v3706_v54, 0.0  ;;  %v12103_v31 = vmax.f32 %v3707_v39, 0.0  ;;  %v15966_v63 = vld [vmem:[#allocation217_spill] sm:$0xff] }
 0x797   : > { %v12111_v34 = vmax.f32 %v3710_v55, 0.0  ;;  %v12113_v32 = vand.u32 2147483647, %v3586_v25  ;;  %v12115_v22 = vand.u32 2147483647, %v3587_v7  ;;  %v3921_v43 = vsub.f32 %v10688_v24, %v15959_v36 }
 0x798   : > { %15960 = vst [vmem:[#allocation86_spill] sm:$0xff] %v12101_v46  ;;  %15961 = vst [vmem:[#allocation104_spill] sm:$0xff] %v12103_v31  ;;  %5395 = vperm.xlu0 %8622, %v15966_v63   ;;  %v12122_v54 = vmax.f32 %v3711_v44, 0.0  ;;  %v12124_v39 = vmax.f32 %v2976_v35, 0.0  ;;  %v12126_v23 = vmax.f32 %v2977_v27, 0.0  ;;  %v4038_v31 = vsub.f32 1.0, %v3974_v58 }
 0x799   : > { %15963 = vst [vmem:[#allocation164_spill] sm:$0xff] %v12111_v34  ;;  %15964 = vst [vmem:[#allocation311_spill] sm:$0xff] %v12113_v32  ;;  %8569 = vset.pattern.permute.xlu1 %v15838_v45  ;;  %v4039_v55 = vsub.f32 1.0, %v3975_v15  ;;  %v4044_v25 = vsub.f32 1.0, %v3980_v1  ;;  %v4045_v7 = vsub.f32 1.0, %v3981_v5  ;;  %v15970_v46 = vld [vmem:[#allocation27_spill] sm:$0xff]  ;;  %v4998_v44 = vsub.f32 %v10685_v38, %v12019_v29 }
 0x79a   : > { %15965 = vst [vmem:[#allocation312_spill] sm:$0xff] %v12115_v22  ;;  %15967 = vst [vmem:[#allocation313_spill] sm:$0xff] %v12122_v54  ;;  %v3984_v34 = vand.u32 2147483647, %v3920_v40  ;;  %4911 = vperm.xlu1 %8569, %v15970_v46   ;;  %v12130_v36 = vand.u32 2147483647, %v2430_v13  ;;  %v4999_v35 = vsub.f32 %v10688_v24, %v12019_v29  ;;  %v5576_v13 = vpop.permute.xlu0 %5575  ;;  %v3925_v54 = vsub.f32 %v10688_v24, %v15972_v18 }
 0x79b   : > { %15968 = vst [vmem:[#allocation314_spill] sm:$0xff] %v12124_v39  ;;  %15969 = vst [vmem:[#allocation315_spill] sm:$0xff] %v12126_v23  ;;  %v12138_v27 = vand.u32 2147483647, %v2431_v3  ;;  %v3985_v40 = vand.u32 2147483647, %v3921_v43  ;;  %v4614_v63 = vsub.f32 %v10707_v41, %v15975_v62  ;;  %v4615_v29 = vsub.f32 %v10710_v17, %v15975_v62  ;;  %v5960_v3 = vpop.permute.xlu1 %5959 }
 0x79c   : > { %15971 = vst [vmem:[#allocation27_spill] sm:$0xff] %v12130_v36  ;;  %v15974_v15 = vld [vmem:[#allocation231_spill] sm:$0xff]  ;;  %v4102_v1 = vmax.f32 %v4038_v31, 0.0  ;;  %v4103_v53 = vmax.f32 %v4039_v55, 0.0  ;;  %v4108_v19 = vmax.f32 %v4044_v25, 0.0  ;;  %v4109_v58 = vmax.f32 %v4045_v7, 0.0 }
 0x79d   : > { %15973 = vst [vmem:[#allocation117_spill] sm:$0xff] %v12138_v27  ;;  %5415 = vperm.xlu0 %8622, %v15974_v15   ;;  %v4048_v61 = vsub.f32 1.0, %v3984_v34  ;;  %v3988_v43 = vand.u32 2147483647, %v3924_v48  ;;  %v5062_v5 = vand.u32 2147483647, %v4998_v44  ;;  %v5702_v31 = vsub.f32 %v10707_v41, %v5576_v13 }
 0x79e   : > { %8570 = vset.pattern.permute.xlu1 %v15808_v2  ;;  %v5063_v15 = vand.u32 2147483647, %v4999_v35  ;;  %v4049_v18 = vsub.f32 1.0, %v3985_v40  ;;  %v6086_v33 = vsub.f32 %v10685_v38, %v5960_v3  ;;  %v6087_v23 = vsub.f32 %v10688_v24, %v5960_v3  ;;  %v15977_v55 = vld [vmem:[#allocation221_spill] sm:$0xff]  ;;  %v12156_v25 = vpop.permute.xlu0 %5595  ;;  %v15982_v22 = vld [vmem:[#allocation242_spill] sm:$0xff] }
 0x79f   : > { %5351 = vperm.xlu1 %8570, %v15976_v47   ;;  %v5703_v62 = vsub.f32 %v10710_v17, %v5576_v13  ;;  %15978 = vst [vmem:[#allocation189_spill] sm:$0xff] %v12156_v25  ;;  %v3989_v34 = vand.u32 2147483647, %v3925_v54  ;;  %v4678_v7 = vand.u32 2147483647, %v4614_v63  ;;  %v12160_v44 = vmul.f32 %v11999_v26, %v12073_v49  ;;  %v15981_v39 = vld [vmem:[#allocation85_spill] sm:$0xff]  ;;  %v12167_v13 = vpop.permute.xlu1 %5579 }
 0x7a0   : > { %v4679_v48 = vand.u32 2147483647, %v4615_v29  ;;  %v4112_v35 = vmax.f32 %v4048_v61, 0.0  ;;  %v4166_v40 = vmul.f32 %v4102_v1, %v15980_v4  ;;  %v4167_v21 = vmul.f32 %v4103_v53, %v15981_v39  ;;  %15983 = vst [vmem:[#allocation75_spill] sm:$0xff] %v12167_v13  ;;  %v15984_v63 = vld [vmem:[#allocation243_spill] sm:$0xff]  ;;  %v15985_v4 = vld [vmem:[#allocation28_spill] sm:$0xff] }
 0x7a1   : > { %5403 = vperm.xlu0 %8622, %v15977_v55   ;;  %15979 = vst [vmem:[#allocation206_spill] sm:$0xff] %v12160_v44  ;;  %v12165_v3 = vmul.f32 %v4108_v19, %v15982_v22  ;;  %v4052_v55 = vsub.f32 1.0, %v3988_v43  ;;  %v5126_v32 = vsub.f32 1.0, %v5062_v5  ;;  %v5127_v27 = vsub.f32 1.0, %v5063_v15  ;;  %v15986_v53 = vld [vmem:[#allocation63_spill] sm:$0xff]  ;;  %v15988_v1 = vld [vmem:[#allocation18_spill] sm:$0xff] }
 0x7a2   : > { %v5766_v54 = vand.u32 2147483647, %v5702_v31  ;;  %v12171_v29 = vmul.f32 %v4109_v58, %v15984_v63  ;;  %v6150_v26 = vand.u32 2147483647, %v6086_v33  ;;  %v6151_v61 = vand.u32 2147483647, %v6087_v23  ;;  %v12175_v19 = vpop.permute.xlu0 %5611 }
 0x7a3   : > { %8571 = vset.pattern.permute.xlu1 %v15755_v14  ;;  %v5767_v49 = vand.u32 2147483647, %v5703_v62  ;;  %15987 = vst [vmem:[#allocation85_spill] sm:$0xff] %v12175_v19  ;;  %v12177_v22 = vmax.f32 %v4049_v18, 0.0  ;;  %v4053_v39 = vsub.f32 1.0, %v3989_v34  ;;  %v4742_v5 = vsub.f32 1.0, %v4678_v7 }
 0x7a4   : > { %5615 = vperm.xlu1 %8571, %v15985_v4   ;;  %v4743_v15 = vsub.f32 1.0, %v4679_v48  ;;  %v3928_v43 = vsub.f32 %v10685_v38, %v15988_v1  ;;  %v3929_v58 = vsub.f32 %v10688_v24, %v15988_v1  ;;  %v15989_v33 = vld [vmem:[#allocation173_spill] sm:$0xff]  ;;  %v12187_v62 = vmax.f32 %v4052_v55, 0.0  ;;  %v15990_v63 = vld [vmem:[#allocation91_spill] sm:$0xff]  ;;  %v5320_v48 = vpop.permute.xlu1 %5319 }
 0x7a5   : > { %5407 = vperm.xlu0 %8622, %v15986_v53   ;;  %v3912_v23 = vsub.f32 %v10685_v38, %v15989_v33  ;;  %v3913_v31 = vsub.f32 %v10688_v24, %v15989_v33  ;;  %v12190_v18 = vmul.f32 %v4112_v35, %v15990_v63  ;;  %v5190_v34 = vmax.f32 %v5126_v32, 0.0 }
 0x7a6   : > { %v5191_v7 = vmax.f32 %v5127_v27, 0.0  ;;  %v6214_v4 = vsub.f32 1.0, %v6150_v26  ;;  %v6215_v44 = vsub.f32 1.0, %v6151_v61  ;;  %v5830_v53 = vsub.f32 1.0, %v5766_v54  ;;  %v12194_v1 = vpop.permute.xlu0 %5623  ;;  %v15993_v27 = vld [vmem:[#allocation36_spill] sm:$0xff] }
 0x7a7   : > { %v5831_v36 = vsub.f32 1.0, %v5767_v49  ;;  %15991 = vst [vmem:[#allocation242_spill] sm:$0xff] %v12194_v1  ;;  %v3914_v55 = vsub.f32 %v10685_v38, %v15992_v0  ;;  %v3915_v35 = vsub.f32 %v10688_v24, %v15992_v0  ;;  %v4806_v33 = vmax.f32 %v4742_v5, 0.0  ;;  %v15994_v61 = vld [vmem:[#allocation72_spill] sm:$0xff]  ;;  %v15996_v1 = vld [vmem:[#allocation82_spill] sm:$0xff] }
 0x7a8   : > { %8572 = vset.pattern.permute.xlu1 %v15838_v45  ;;  %v4807_v32 = vmax.f32 %v4743_v15, 0.0  ;;  %v3976_v54 = vand.u32 2147483647, %v3912_v23  ;;  %v3977_v26 = vand.u32 2147483647, %v3913_v31  ;;  %v4358_v49 = vmul.f32 %v15994_v61, %v4166_v40 }
 0x7a9   : > { %8624 = vset.pattern.permute.xlu0 %v15745_v16  ;;  %4915 = vperm.xlu1 %8572, %v15993_v27   ;;  %v4359_v63 = vmul.f32 %v15994_v61, %v4167_v21  ;;  %v3270_v19 = vmul.f32 %v15996_v1, %v15995_v56  ;;  %v3271_v51 = vmul.f32 %v15996_v1, %v15997_v60  ;;  %v6278_v5 = vmax.f32 %v6214_v4, 0.0  ;;  %v12208_v13 = vpop.permute.xlu1 %5583  ;;  %v16000_v21 = vld [vmem:[#allocation175_spill] sm:$0xff]  ;;  %v16001_v56 = vld [vmem:[#allocation41_spill] sm:$0xff]  ;;  %v16002_v4 = vld [vmem:[#allocation176_spill] sm:$0xff] }
 0x7aa   : > { %5999 = vperm.xlu0 %8624, %v15970_v46   ;;  %v5254_v9 = vmul.f32 %v5190_v34, %v4806_v33  ;;  %v5255_v0 = vmul.f32 %v5191_v7, %v4807_v32  ;;  %v6279_v15 = vmax.f32 %v6215_v44, 0.0  ;;  %v5894_v10 = vmax.f32 %v5830_v53, 0.0  ;;  %15998 = vst [vmem:[#allocation243_spill] sm:$0xff] %v12208_v13  ;;  %v12210_v46 = vpop.permute.xlu0 %5635 }
 0x7ab   : > { %v5895_v25 = vmax.f32 %v5831_v36, 0.0  ;;  %15999 = vst [vmem:[#allocation28_spill] sm:$0xff] %v12210_v46  ;;  %v4117_v23 = vmax.f32 %v4053_v39, 0.0  ;;  %v3978_v40 = vand.u32 2147483647, %v3914_v55  ;;  %v3918_v61 = vsub.f32 %v10685_v38, %v16000_v21 }
 0x7ac   : > { %v3979_v31 = vand.u32 2147483647, %v3915_v35  ;;  %v3992_v60 = vand.u32 2147483647, %v3928_v43  ;;  %v3993_v34 = vand.u32 2147483647, %v3929_v58  ;;  %v5446_v7 = vmul.f32 %v5320_v48, %v5254_v9 }
 0x7ad   : > { %8573 = vset.pattern.permute.xlu1 %v15828_v6  ;;  %v5447_v44 = vmul.f32 %v5320_v48, %v5255_v0  ;;  %v4040_v36 = vsub.f32 1.0, %v3976_v54  ;;  %v4041_v53 = vsub.f32 1.0, %v3977_v26  ;;  %v3919_v39 = vsub.f32 %v10688_v24, %v16000_v21 }
 0x7ae   : > { %6011 = vperm.xlu0 %8624, %v16001_v56   ;;  %6439 = vperm.xlu1 %8573, %v15976_v47   ;;  %v3922_v1 = vsub.f32 %v10685_v38, %v16002_v4  ;;  %v4422_v55 = vadd.f32 %v4358_v49, %v3270_v19  ;;  %v4423_v35 = vadd.f32 %v4359_v63, %v3271_v51  ;;  %v4042_v46 = vsub.f32 1.0, %v3978_v40  ;;  %v6408_v58 = vpop.permute.xlu1 %6407  ;;  %v16003_v47 = vld [vmem:[#allocation42_spill] sm:$0xff]  ;;  %v12224_v48 = vpop.permute.xlu0 %6411  ;;  %v16006_v63 = vld [vmem:[#allocation25_spill] sm:$0xff] }
 0x7af   : > { %v6342_v33 = vmul.f32 %v6278_v5, %v5894_v10  ;;  %v6343_v32 = vmul.f32 %v6279_v15, %v5895_v25  ;;  %v4043_v13 = vsub.f32 1.0, %v3979_v31  ;;  %v3982_v43 = vand.u32 2147483647, %v3918_v61  ;;  %16004 = vst [vmem:[#allocation18_spill] sm:$0xff] %v12224_v48  ;;  %v16005_v25 = vld [vmem:[#allocation24_spill] sm:$0xff] }
 0x7b0   : > { %v3923_v9 = vsub.f32 %v10688_v24, %v16002_v4  ;;  %v5510_v54 = vadd.f32 %v5446_v7, %v4422_v55  ;;  %v5511_v26 = vadd.f32 %v5447_v44, %v4423_v35  ;;  %v4056_v51 = vsub.f32 1.0, %v3992_v60  ;;  %v16007_v4 = vld [vmem:[#allocation257_spill] sm:$0xff]  ;;  %v16008_v60 = vld [vmem:[#allocation56_spill] sm:$0xff] }
 0x7b1   : > { %v6534_v0 = vmul.f32 %v6408_v58, %v6342_v33  ;;  %v6535_v21 = vmul.f32 %v6408_v58, %v6343_v32  ;;  %v4057_v10 = vsub.f32 1.0, %v3993_v34  ;;  %v3932_v19 = vsub.f32 %v10685_v38, %v16005_v25  ;;  %v16010_v32 = vld [vmem:[#allocation270_spill] sm:$0xff]  ;;  %v16035_v48 = vld [vmem:[#allocation252_spill] sm:$0xff] }
 0x7b2   : > { %6023 = vperm.xlu0 %8624, %v16003_v47   ;;  %8574 = vset.pattern.permute.xlu1 %v15755_v14  ;;  %v3983_v49 = vand.u32 2147483647, %v3919_v39  ;;  %v3933_v5 = vsub.f32 %v10688_v24, %v16005_v25  ;;  %v3986_v15 = vand.u32 2147483647, %v3922_v1  ;;  %v4104_v61 = vmax.f32 %v4040_v36, 0.0  ;;  %v12237_v34 = vpop.permute.xlu0 %6423 }
 0x7b3   : > { %5619 = vperm.xlu1 %8574, %v16006_v63   ;;  %v6598_v40 = vadd.f32 %v6534_v0, %v5510_v54  ;;  %v6599_v31 = vadd.f32 %v6535_v21, %v5511_v26  ;;  %v4105_v7 = vmax.f32 %v4041_v53, 0.0  ;;  %v3987_v44 = vand.u32 2147483647, %v3923_v9  ;;  %16009 = vst [vmem:[#allocation173_spill] sm:$0xff] %v12237_v34  ;;  %v12243_v1 = vpop.permute.xlu1 %5587  ;;  %v16013_v9 = vld [vmem:[#allocation271_spill] sm:$0xff]  ;;  %v16020_v63 = vld [vmem:[#allocation177_spill] sm:$0xff] }
 0x7b4   : > { %v12234_v55 = vmul.f32 %v12177_v22, %v16007_v4  ;;  %v4106_v39 = vmax.f32 %v4042_v46, 0.0  ;;  %v4107_v35 = vmax.f32 %v4043_v13, 0.0  ;;  %v4046_v33 = vsub.f32 1.0, %v3982_v43  ;;  %v16028_v0 = vld [vmem:[#allocation194_spill] sm:$0xff] }
 0x7b5   : > { %v12241_v58 = vmul.f32 %v12187_v62, %v16010_v32  ;;  %6726 = vmatprep.mubr.f32.mxu0 %v6599_v31  ;;  %v12245_v36 = vmax.f32 %v4056_v51, 0.0  ;;  %v12247_v53 = vmax.f32 %v4057_v10, 0.0  ;;  %v4047_v22 = vsub.f32 1.0, %v3983_v49  ;;  %v16017_v51 = vld [vmem:[#allocation237_spill] sm:$0xff] }
 0x7b6   : > { %6035 = vperm.xlu0 %8624, %v16008_v60   ;;  %v12250_v54 = vmul.f32 %v4117_v23, %v16013_v9  ;;  %6727 = vmatmul.mubr.f32.vlgmr.msra.gmra.mxu0 %v6598_v40  ;;  %v12253_v13 = vand.u32 2147483647, %v3932_v19  ;;  %v12255_v46 = vand.u32 2147483647, %v3933_v5  ;;  %v4050_v26 = vsub.f32 1.0, %v3986_v15  ;;  %v16018_v10 = vld [vmem:[#allocation241_spill] sm:$0xff]  ;;  %v12269_v19 = vpop.permute.xlu0 %6435 }
 0x7b7   : > { %16011 = vst [vmem:[#allocation91_spill] sm:$0xff] %v12245_v36  ;;  %16012 = vst [vmem:[#allocation174_spill] sm:$0xff] %v12247_v53  ;;  %8575 = vset.pattern.permute.xlu1 %v15745_v16  ;;  %v4051_v21 = vsub.f32 1.0, %v3987_v44  ;;  %v12263_v23 = vmul.f32 %v4104_v61, %v16017_v51  ;;  %v12266_v25 = vmul.f32 %v4105_v7, %v16018_v10  ;;  %v4110_v49 = vmax.f32 %v4046_v33, 0.0  ;;  %v16021_v15 = vld [vmem:[#allocation101_spill] sm:$0xff]  ;;  %v16022_v40 = vld [vmem:[#allocation83_spill] sm:$0xff] }
 0x7b8   : > { %16014 = vst [vmem:[#allocation36_spill] sm:$0xff] %v12253_v13  ;;  %16015 = vst [vmem:[#allocation72_spill] sm:$0xff] %v12255_v46  ;;  %6003 = vperm.xlu1 %8575, %v15993_v27   ;;  %v3926_v5 = vsub.f32 %v10685_v38, %v16020_v63  ;;  %v12274_v27 = vmul.f32 %v4106_v39, %v16021_v15  ;;  %v12277_v31 = vmul.f32 %v4107_v35, %v16022_v40  ;;  %v16023_v61 = vld [vmem:[#allocation191_spill] sm:$0xff]  ;;  %v12285_v33 = vpop.permute.xlu1 %5971  ;;  %v16027_v15 = vld [vmem:[#allocation192_spill] sm:$0xff] }
 0x7b9   : > { %16019 = vst [vmem:[#allocation244_spill] sm:$0xff] %v12269_v19  ;;  %v4111_v44 = vmax.f32 %v4047_v22, 0.0  ;;  %v4620_v4 = vsub.f32 %v10707_v41, %v16023_v61  ;;  %v4621_v7 = vsub.f32 %v10710_v17, %v16023_v61  ;;  %16025 = vst [vmem:[#allocation82_spill] sm:$0xff] %v12285_v33  ;;  %v4114_v9 = vmax.f32 %v4050_v26, 0.0  ;;  %v16026_v51 = vld [vmem:[#allocation195_spill] sm:$0xff] }
 0x7ba   : > { %6043 = vperm.xlu0 %8624, %v15892_v8   ;;  %v16024_v8 = vld [vmem:[#allocation193_spill] sm:$0xff]  ;;  %v4628_v35 = vsub.f32 %v10707_v41, %v16026_v51  ;;  %v4629_v22 = vsub.f32 %v10710_v17, %v16026_v51  ;;  %v4115_v10 = vmax.f32 %v4051_v21, 0.0  ;;  %v4616_v40 = vsub.f32 %v10707_v41, %v16027_v15  ;;  %v12302_v43 = vpop.permute.xlu0 %6447  ;;  %v16032_v51 = vld [vmem:[#allocation196_spill] sm:$0xff] }
 0x7bb   : > { %v4624_v32 = vsub.f32 %v10707_v41, %v16024_v8  ;;  %v4625_v39 = vsub.f32 %v10710_v17, %v16024_v8  ;;  %v4617_v61 = vsub.f32 %v10710_v17, %v16027_v15  ;;  %v4618_v26 = vsub.f32 %v10707_v41, %v16028_v0  ;;  %v16029_v8 = vld [vmem:[#allocation57_spill] sm:$0xff]  ;;  %16030 = vst [vmem:[#allocation245_spill] sm:$0xff] %v12302_v43 }
 0x7bc   : > { %8576 = vset.pattern.permute.xlu1 %v15828_v6  ;;  %v12304_v46 = vand.u32 2147483647, %v3926_v5  ;;  %v4619_v21 = vsub.f32 %v10710_v17, %v16028_v0  ;;  %v4622_v13 = vsub.f32 %v10707_v41, %v16032_v51  ;;  %v4623_v15 = vsub.f32 %v10710_v17, %v16032_v51  ;;  %v16033_v5 = vld [vmem:[#allocation251_spill] sm:$0xff] }
 0x7bd   : > { %6443 = vperm.xlu1 %8576, %v15943_v42   ;;  %v3927_v62 = vsub.f32 %v10688_v24, %v16020_v63  ;;  %v4684_v60 = vand.u32 2147483647, %v4620_v4  ;;  %v4685_v42 = vand.u32 2147483647, %v4621_v7  ;;  %v4688_v53 = vand.u32 2147483647, %v4624_v32 }
 0x7be   : > { %6047 = vperm.xlu0 %8624, %v16029_v8   ;;  %16031 = vst [vmem:[#allocation175_spill] sm:$0xff] %v12304_v46  ;;  %v4689_v8 = vand.u32 2147483647, %v4625_v39  ;;  %v4692_v36 = vand.u32 2147483647, %v4628_v35  ;;  %v12315_v19 = vmul.f32 %v4110_v49, %v16033_v5  ;;  %v12317_v46 = vpop.permute.xlu1 %5327  ;;  %v12320_v33 = vmul.f32 %v4111_v44, %v16035_v48  ;;  %v12324_v63 = vpop.permute.xlu0 %6459  ;;  %v16037_v39 = vld [vmem:[#allocation200_spill] sm:$0xff] }
 0x7bf   : > { %v4693_v43 = vand.u32 2147483647, %v4629_v22  ;;  %16034 = vst [vmem:[#allocation41_spill] sm:$0xff] %v12317_v46  ;;  %v4680_v0 = vand.u32 2147483647, %v4616_v40  ;;  %16036 = vst [vmem:[#allocation176_spill] sm:$0xff] %v12324_v63  ;;  %v4626_v49 = vsub.f32 %v10707_v41, %v16037_v39 }
 0x7c0   : > { %v4681_v34 = vand.u32 2147483647, %v4617_v61  ;;  %v4682_v47 = vand.u32 2147483647, %v4618_v26  ;;  %v4683_v4 = vand.u32 2147483647, %v4619_v21  ;;  %v4627_v61 = vsub.f32 %v10710_v17, %v16037_v39 }
 0x7c1   : > { %8577 = vset.pattern.permute.xlu1 %v15808_v2  ;;  %v4686_v7 = vand.u32 2147483647, %v4622_v13  ;;  %v4687_v32 = vand.u32 2147483647, %v4623_v15  ;;  %v16038_v35 = vld [vmem:[#allocation208_spill] sm:$0xff]  ;;  %v4748_v44 = vsub.f32 1.0, %v4684_v60 }
 0x7c2   : > { %6071 = vperm.xlu0 %8624, %v15916_v11   ;;  %5359 = vperm.xlu1 %8577, %v16038_v35   ;;  %v12329_v22 = vand.u32 2147483647, %v3927_v62  ;;  %v4749_v11 = vsub.f32 1.0, %v4685_v42  ;;  %v4752_v26 = vsub.f32 1.0, %v4688_v53  ;;  %v4753_v51 = vsub.f32 1.0, %v4689_v8  ;;  %v12338_v62 = vpop.permute.xlu0 %6471  ;;  %v16042_v53 = vld [vmem:[#allocation48_spill] sm:$0xff] }
 0x7c3   : > { %v4756_v21 = vsub.f32 1.0, %v4692_v36  ;;  %v4757_v13 = vsub.f32 1.0, %v4693_v43  ;;  %v4744_v15 = vsub.f32 1.0, %v4680_v0  ;;  %v4745_v5 = vsub.f32 1.0, %v4681_v34  ;;  %v12335_v46 = vpop.permute.xlu1 %5591  ;;  %16041 = vst [vmem:[#allocation25_spill] sm:$0xff] %v12338_v62  ;;  %v16044_v8 = vld [vmem:[#allocation256_spill] sm:$0xff] }
 0x7c4   : > { %16039 = vst [vmem:[#allocation24_spill] sm:$0xff] %v12329_v22  ;;  %v4746_v63 = vsub.f32 1.0, %v4682_v47  ;;  %v4747_v35 = vsub.f32 1.0, %v4683_v4  ;;  %v4750_v48 = vsub.f32 1.0, %v4686_v7  ;;  %v4751_v60 = vsub.f32 1.0, %v4687_v32  ;;  %v16043_v47 = vld [vmem:[#allocation253_spill] sm:$0xff] }
 0x7c5   : > { %v12340_v22 = vand.u32 2147483647, %v4626_v49  ;;  %v12344_v36 = vmax.f32 %v4748_v44, 0.0  ;;  %v12346_v43 = vand.u32 2147483647, %v4627_v61  ;;  %v12349_v34 = vmul.f32 %v4114_v9, %v16043_v47  ;;  %v16062_v62 = vld [vmem:[#allocation233_spill] sm:$0xff] }
 0x7c6   : > { %8627 = vset.pattern.permute.xlu0 %v15755_v14  ;;  %8578 = vset.pattern.permute.xlu1 %v15745_v16  ;;  %v12352_v42 = vmul.f32 %v4115_v10, %v16044_v8  ;;  %v12355_v0 = vmax.f32 %v4749_v11, 0.0  ;;  %v12357_v4 = vmax.f32 %v4752_v26, 0.0  ;;  %v12359_v7 = vmax.f32 %v4753_v51, 0.0  ;;  %v12371_v10 = vpop.permute.xlu0 %6475 }
 0x7c7   : > { %5647 = vperm.xlu0 %8627, %v16042_v53   ;;  %6007 = vperm.xlu1 %8578, %v15869_v28   ;;  %v12361_v32 = vmax.f32 %v4756_v21, 0.0  ;;  %v12363_v39 = vmax.f32 %v4757_v13, 0.0  ;;  %v12365_v49 = vmax.f32 %v4744_v15, 0.0  ;;  %v12367_v44 = vmax.f32 %v4745_v5, 0.0  ;;  %16049 = vst [vmem:[#allocation241_spill] sm:$0xff] %v12371_v10  ;;  %v16052_v21 = vld [vmem:[#allocation65_spill] sm:$0xff] }
 0x7c8   : > { %v12369_v9 = vmax.f32 %v4746_v63, 0.0  ;;  %v12373_v61 = vmax.f32 %v4747_v35, 0.0  ;;  %v12375_v28 = vmax.f32 %v4750_v48, 0.0  ;;  %v12377_v11 = vmax.f32 %v4751_v60, 0.0  ;;  %v12380_v51 = vpop.permute.xlu1 %6415  ;;  %v16053_v15 = vld [vmem:[#allocation235_spill] sm:$0xff]  ;;  %v16054_v5 = vld [vmem:[#allocation229_spill] sm:$0xff] }
 0x7c9   : > { %16045 = vst [vmem:[#allocation257_spill] sm:$0xff] %v12361_v32  ;;  %16046 = vst [vmem:[#allocation270_spill] sm:$0xff] %v12363_v39  ;;  %v4754_v26 = vsub.f32 1.0, %v12340_v22  ;;  %v3272_v63 = vmul.f32 %v16054_v5, %v16053_v15  ;;  %v16055_v53 = vld [vmem:[#allocation89_spill] sm:$0xff]  ;;  %v16056_v35 = vld [vmem:[#allocation232_spill] sm:$0xff] }
 0x7ca   : > { %16047 = vst [vmem:[#allocation271_spill] sm:$0xff] %v12365_v49  ;;  %16048 = vst [vmem:[#allocation237_spill] sm:$0xff] %v12367_v44  ;;  %v3273_v47 = vmul.f32 %v16054_v5, %v16055_v53  ;;  %v4360_v48 = vmul.f32 %v16056_v35, %v12263_v23  ;;  %v4361_v22 = vmul.f32 %v16056_v35, %v12266_v25  ;;  %v16057_v60 = vld [vmem:[#allocation73_spill] sm:$0xff]  ;;  %v16058_v13 = vld [vmem:[#allocation94_spill] sm:$0xff] }
 0x7cb   : > { %16050 = vst [vmem:[#allocation177_spill] sm:$0xff] %v12375_v28  ;;  %16051 = vst [vmem:[#allocation101_spill] sm:$0xff] %v12377_v11  ;;  %5671 = vperm.xlu0 %8627, %v16052_v21   ;;  %8579 = vset.pattern.permute.xlu1 %v15838_v45  ;;  %v4364_v8 = vmul.f32 %v16057_v60, %v12165_v3  ;;  %v4365_v21 = vmul.f32 %v16057_v60, %v12171_v29  ;;  %v16059_v10 = vld [vmem:[#allocation92_spill] sm:$0xff]  ;;  %v16060_v5 = vld [vmem:[#allocation78_spill] sm:$0xff] }
 0x7cc   : > { %v3276_v15 = vmul.f32 %v16059_v10, %v16058_v13  ;;  %4923 = vperm.xlu1 %8579, %v16001_v56   ;;  %v3277_v53 = vmul.f32 %v16059_v10, %v16060_v5  ;;  %v16061_v23 = vld [vmem:[#allocation81_spill] sm:$0xff]  ;;  %v16063_v32 = vld [vmem:[#allocation76_spill] sm:$0xff]  ;;  %v16064_v35 = vld [vmem:[#allocation238_spill] sm:$0xff] }
 0x7cd   : > { %v3274_v40 = vmul.f32 %v16062_v62, %v16061_v23  ;;  %v4362_v25 = vmul.f32 %v16063_v32, %v12274_v27  ;;  %v4363_v3 = vmul.f32 %v16063_v32, %v12277_v31  ;;  %v4368_v29 = vmul.f32 %v16064_v35, %v12190_v18  ;;  %v16065_v60 = vld [vmem:[#allocation88_spill] sm:$0xff]  ;;  %v16066_v56 = vld [vmem:[#allocation239_spill] sm:$0xff]  ;;  %v12417_v23 = vpop.permute.xlu0 %4875  ;;  %v16069_v27 = vld [vmem:[#allocation110_spill] sm:$0xff] }
 0x7ce   : > { %v4369_v13 = vmul.f32 %v16064_v35, %v12234_v55  ;;  %v3280_v39 = vmul.f32 %v16066_v56, %v16065_v60  ;;  %v16067_v28 = vld [vmem:[#allocation107_spill] sm:$0xff]  ;;  %v16068_v5 = vld [vmem:[#allocation68_spill] sm:$0xff]  ;;  %v16070_v11 = vld [vmem:[#allocation246_spill] sm:$0xff]  ;;  %v6088_v18 = vsub.f32 %v10685_v38, %v12037_v12  ;;  %v6089_v55 = vsub.f32 %v10688_v24, %v12037_v12  ;;  %v12427_v35 = vpop.permute.xlu1 %5331 }
 0x7cf   : > { %v3281_v10 = vmul.f32 %v16066_v56, %v16067_v28  ;;  %5683 = vperm.xlu0 %8627, %v16068_v5   ;;  %v3278_v44 = vmul.f32 %v16070_v11, %v16069_v27  ;;  %v16071_v31 = vld [vmem:[#allocation247_spill] sm:$0xff]  ;;  %16072 = vst [vmem:[#allocation83_spill] sm:$0xff] %v12427_v35  ;;  %v12429_v60 = vadd.f32 %v4360_v48, %v3272_v63  ;;  %v16074_v28 = vld [vmem:[#allocation249_spill] sm:$0xff] }
 0x7d0   : > { %v4366_v32 = vmul.f32 %v16071_v31, %v12315_v19  ;;  %v3275_v56 = vmul.f32 %v16062_v62, %v16074_v28  ;;  %v5002_v5 = vsub.f32 %v10685_v38, %v12041_v37  ;;  %v5003_v27 = vsub.f32 %v10688_v24, %v12041_v37  ;;  %8580 = vset.pattern.permute.xlu1 %v15808_v2  ;;  %v16077_v63 = vld [vmem:[#allocation207_spill] sm:$0xff]  ;;  %v16079_v28 = vld [vmem:[#allocation261_spill] sm:$0xff] }
 0x7d1   : > { %16073 = vst [vmem:[#allocation191_spill] sm:$0xff] %v12429_v60  ;;  %v12438_v19 = vadd.f32 %v4361_v22, %v3273_v47  ;;  %v12440_v49 = vadd.f32 %v4364_v8, %v3276_v15  ;;  %v12442_v12 = vadd.f32 %v4365_v21, %v3277_v53  ;;  %v12444_v35 = vadd.f32 %v4362_v25, %v3274_v40  ;;  %v16080_v47 = vld [vmem:[#allocation87_spill] sm:$0xff]  ;;  %v12456_v22 = vpop.permute.xlu0 %4887  ;;  %v16083_v53 = vld [vmem:[#allocation122_spill] sm:$0xff] }
 0x7d2   : > { %5363 = vperm.xlu1 %8580, %v16077_v63   ;;  %v12447_v48 = vadd.f32 %v4363_v3, %v3275_v56  ;;  %v12449_v62 = vadd.f32 %v4368_v29, %v3280_v39  ;;  %v3279_v60 = vmul.f32 %v16070_v11, %v16079_v28  ;;  %v4367_v37 = vmul.f32 %v16071_v31, %v12320_v33  ;;  %v16084_v25 = vld [vmem:[#allocation102_spill] sm:$0xff]  ;;  %v16086_v33 = vld [vmem:[#allocation120_spill] sm:$0xff] }
 0x7d3   : > { %16075 = vst [vmem:[#allocation193_spill] sm:$0xff] %v12440_v49  ;;  %16076 = vst [vmem:[#allocation195_spill] sm:$0xff] %v12442_v12  ;;  %5691 = vperm.xlu0 %8627, %v16080_v47   ;;  %v12458_v8 = vadd.f32 %v4369_v13, %v3281_v10  ;;  %v12460_v40 = vadd.f32 %v4366_v32, %v3278_v44  ;;  %v6152_v21 = vand.u32 2147483647, %v6088_v18  ;;  %v6153_v15 = vand.u32 2147483647, %v6089_v55  ;;  %v12466_v28 = vpop.permute.xlu1 %5979 }
 0x7d4   : > { %16078 = vst [vmem:[#allocation192_spill] sm:$0xff] %v12449_v62  ;;  %v3282_v39 = vmul.f32 %v16084_v25, %v16083_v53  ;;  %v16085_v3 = vld [vmem:[#allocation250_spill] sm:$0xff]  ;;  %v5066_v11 = vand.u32 2147483647, %v5002_v5  ;;  %v5067_v56 = vand.u32 2147483647, %v5003_v27  ;;  %v3283_v31 = vmul.f32 %v16084_v25, %v16086_v33 }
 0x7d5   : > { %16081 = vst [vmem:[#allocation194_spill] sm:$0xff] %v12458_v8  ;;  %16082 = vst [vmem:[#allocation196_spill] sm:$0xff] %v12460_v40  ;;  %v4370_v29 = vmul.f32 %v16085_v3, %v12349_v34  ;;  %v4371_v13 = vmul.f32 %v16085_v3, %v12352_v42  ;;  %v5004_v44 = vsub.f32 %v10685_v38, %v12068_v59  ;;  %v12477_v32 = vmax.f32 %v4754_v26, 0.0  ;;  %v16089_v18 = vld [vmem:[#allocation97_spill] sm:$0xff]  ;;  %v16092_v42 = vld [vmem:[#allocation30_spill] sm:$0xff]  ;;  %v12491_v47 = vpop.permute.xlu0 %4895 }
 0x7d6   : > { %v5005_v10 = vsub.f32 %v10688_v24, %v12068_v59  ;;  %8581 = vset.pattern.permute.xlu1 %v15755_v14  ;;  %v12479_v34 = vadd.f32 %v4367_v37, %v3279_v60  ;;  %v12483_v55 = vmul.f32 %v16089_v18, %v12241_v58  ;;  %v12487_v5 = vmul.f32 %v16089_v18, %v12250_v54  ;;  %v16093_v27 = vld [vmem:[#allocation134_spill] sm:$0xff]  ;;  %v16094_v59 = vld [vmem:[#allocation100_spill] sm:$0xff]  ;;  %v16095_v53 = vld [vmem:[#allocation99_spill] sm:$0xff] }
 0x7d7   : > { %16087 = vst [vmem:[#allocation251_spill] sm:$0xff] %v12477_v32  ;;  %5627 = vperm.xlu1 %8581, %v16092_v42   ;;  %5695 = vperm.xlu0 %8627, %v16093_v27   ;;  %v12495_v26 = vmul.f32 %v16095_v53, %v16094_v59  ;;  %v16097_v60 = vld [vmem:[#allocation267_spill] sm:$0xff]  ;;  %v6216_v58 = vsub.f32 1.0, %v6152_v21  ;;  %v6217_v25 = vsub.f32 1.0, %v6153_v15  ;;  %v12501_v3 = vadd.f32 %v4370_v29, %v3282_v39 }
 0x7d8   : > { %16088 = vst [vmem:[#allocation252_spill] sm:$0xff] %v12479_v34  ;;  %16090 = vst [vmem:[#allocation200_spill] sm:$0xff] %v12483_v55  ;;  %v12499_v37 = vmul.f32 %v16095_v53, %v16097_v60  ;;  %v5130_v54 = vsub.f32 1.0, %v5066_v11  ;;  %v5131_v33 = vsub.f32 1.0, %v5067_v56  ;;  %v6090_v18 = vsub.f32 %v10685_v38, %v12059_v30  ;;  %v16106_v62 = vld [vmem:[#allocation75_spill] sm:$0xff] }
 0x7d9   : > { %16091 = vst [vmem:[#allocation208_spill] sm:$0xff] %v12487_v5  ;;  %16096 = vst [vmem:[#allocation48_spill] sm:$0xff] %v12495_v26  ;;  %v12505_v42 = vadd.f32 %v4371_v13, %v3283_v31  ;;  %v5068_v27 = vand.u32 2147483647, %v5004_v44  ;;  %v5069_v55 = vand.u32 2147483647, %v5005_v10  ;;  %v6091_v59 = vsub.f32 %v10688_v24, %v12059_v30  ;;  %v12509_v26 = vpop.permute.xlu1 %6419  ;;  %v12523_v30 = vpop.permute.xlu0 %4907 }
 0x7da   : > { %16098 = vst [vmem:[#allocation253_spill] sm:$0xff] %v12499_v37  ;;  %16099 = vst [vmem:[#allocation256_spill] sm:$0xff] %v12501_v3  ;;  %v16101_v53 = vsub.f32 1.0, %v12346_v43  ;;  %v5008_v15 = vsub.f32 %v10685_v38, %v12095_v57  ;;  %v6094_v39 = vsub.f32 %v10685_v38, %v12086_v20  ;;  %v6095_v29 = vsub.f32 %v10688_v24, %v12086_v20  ;;  %v16104_v13 = vld [vmem:[#allocation37_spill] sm:$0xff]  ;;  %v16105_v44 = vld [vmem:[#allocation234_spill] sm:$0xff] }
 0x7db   : > { %16100 = vst [vmem:[#allocation65_spill] sm:$0xff] %v12505_v42  ;;  %8582 = vset.pattern.permute.xlu1 %v15838_v45  ;;  %8635 = vset.pattern.permute.xlu0 %v15828_v6  ;;  %16103 = vst [vmem:[#allocation229_spill] sm:$0xff] %v12523_v30  ;;  %v12525_v11 = vmax.f32 %v6216_v58, 0.0  ;;  %v12527_v43 = vmax.f32 %v6217_v25, 0.0  ;;  %v5009_v56 = vsub.f32 %v10688_v24, %v12095_v57  ;;  %v12535_v20 = vmax.f32 %v5130_v54, 0.0 }
 0x7dc   : > { %v12513_v21 = vmax.f32 %v16101_v53, 0.0  ;;  %v5012_v31 = vsub.f32 %v10685_v38, %v12119_v50  ;;  %4927 = vperm.xlu1 %8582, %v16104_v13   ;;  %6511 = vperm.xlu0 %8635, %v16105_v44   ;;  %v12537_v10 = vmax.f32 %v5131_v33, 0.0  ;;  %v6154_v60 = vand.u32 2147483647, %v6090_v18 }
 0x7dd   : > { %v5013_v58 = vsub.f32 %v10688_v24, %v12119_v50  ;;  %v5132_v25 = vsub.f32 1.0, %v5068_v27  ;;  %v5133_v53 = vsub.f32 1.0, %v5069_v55  ;;  %v6155_v30 = vand.u32 2147483647, %v6091_v59  ;;  %v12545_v54 = vpop.permute.xlu1 %5599  ;;  %v12547_v33 = vpop.permute.xlu0 %4919  ;;  %v16108_v27 = vld [vmem:[#allocation226_spill] sm:$0xff] }
 0x7de   : > { %16102 = vst [vmem:[#allocation235_spill] sm:$0xff] %v12513_v21  ;;  %v6101_v57 = vsub.f32 %v10688_v24, %v12109_v52  ;;  %v5072_v3 = vand.u32 2147483647, %v5008_v15  ;;  %v6158_v5 = vand.u32 2147483647, %v6094_v39  ;;  %v5704_v44 = vsub.f32 %v10707_v41, %v16106_v62  ;;  %16107 = vst [vmem:[#allocation89_spill] sm:$0xff] %v12547_v33 }
 0x7df   : > { %v6159_v37 = vand.u32 2147483647, %v6095_v29  ;;  %v5073_v18 = vand.u32 2147483647, %v5009_v56  ;;  %v5076_v42 = vand.u32 2147483647, %v5012_v31  ;;  %v6100_v50 = vsub.f32 %v10685_v38, %v12109_v52 }
 0x7e0   : > { %v5705_v55 = vsub.f32 %v10710_v17, %v16106_v62  ;;  %8583 = vset.pattern.permute.xlu1 %v15828_v6  ;;  %6499 = vperm.xlu0 %8635, %v16108_v27   ;;  %v6218_v59 = vsub.f32 1.0, %v6154_v60  ;;  %v5077_v15 = vand.u32 2147483647, %v5013_v58  ;;  %v16109_v39 = vld [vmem:[#allocation189_spill] sm:$0xff]  ;;  %v12560_v56 = vmax.f32 %v5132_v25, 0.0 }
 0x7e1   : > { %v5712_v29 = vsub.f32 %v10707_v41, %v16109_v39  ;;  %v5713_v33 = vsub.f32 %v10710_v17, %v16109_v39  ;;  %6451 = vperm.xlu1 %8583, %v16077_v63   ;;  %v12562_v52 = vmax.f32 %v5133_v53, 0.0  ;;  %v6219_v31 = vsub.f32 1.0, %v6155_v30  ;;  %v12564_v60 = vpop.permute.xlu0 %4931  ;;  %v16111_v63 = vld [vmem:[#allocation240_spill] sm:$0xff]  ;;  %v16112_v30 = vld [vmem:[#allocation243_spill] sm:$0xff] }
 0x7e2   : > { %v6165_v62 = vand.u32 2147483647, %v6101_v57  ;;  %v5136_v8 = vsub.f32 1.0, %v5072_v3  ;;  %v6222_v32 = vsub.f32 1.0, %v6158_v5  ;;  %v6223_v40 = vsub.f32 1.0, %v6159_v37  ;;  %16110 = vst [vmem:[#allocation232_spill] sm:$0xff] %v12564_v60  ;;  %v12568_v39 = vpop.permute.xlu1 %5983 }
 0x7e3   : > { %v5768_v27 = vand.u32 2147483647, %v5704_v44  ;;  %v5137_v58 = vsub.f32 1.0, %v5073_v18  ;;  %v5140_v21 = vsub.f32 1.0, %v5076_v42  ;;  %v12566_v34 = vand.u32 2147483647, %v6100_v50 }
 0x7e4   : > { %v5769_v49 = vand.u32 2147483647, %v5705_v55  ;;  %6519 = vperm.xlu0 %8635, %v16111_v63   ;;  %v5141_v25 = vsub.f32 1.0, %v5077_v15  ;;  %v5776_v53 = vand.u32 2147483647, %v5712_v29  ;;  %v5706_v3 = vsub.f32 %v10707_v41, %v16112_v30  ;;  %v16113_v57 = vld [vmem:[#allocation38_spill] sm:$0xff] }
 0x7e5   : > { %v5777_v12 = vand.u32 2147483647, %v5713_v33  ;;  %8584 = vset.pattern.permute.xlu1 %v15755_v14  ;;  %v12574_v5 = vmax.f32 %v6218_v59, 0.0  ;;  %v12576_v37 = vmax.f32 %v6219_v31, 0.0  ;;  %v6229_v42 = vsub.f32 1.0, %v6165_v62  ;;  %v12585_v15 = vpop.permute.xlu0 %4943 }
 0x7e6   : > { %v5707_v44 = vsub.f32 %v10710_v17, %v16112_v30  ;;  %5631 = vperm.xlu1 %8584, %v16113_v57   ;;  %v5200_v18 = vmax.f32 %v5136_v8, 0.0  ;;  %v12581_v50 = vmax.f32 %v6222_v32, 0.0  ;;  %v12583_v55 = vmax.f32 %v6223_v40, 0.0  ;;  %16114 = vst [vmem:[#allocation73_spill] sm:$0xff] %v12585_v15  ;;  %v16115_v40 = vld [vmem:[#allocation151_spill] sm:$0xff] }
 0x7e7   : > { %v5832_v33 = vsub.f32 1.0, %v5768_v27  ;;  %v5201_v29 = vmax.f32 %v5137_v58, 0.0  ;;  %v12587_v63 = vmax.f32 %v5140_v21, 0.0  ;;  %v5833_v31 = vsub.f32 1.0, %v5769_v49  ;;  %v12593_v32 = vpop.permute.xlu1 %5339  ;;  %v16117_v58 = vld [vmem:[#allocation82_spill] sm:$0xff] }
 0x7e8   : > { %8640 = vset.pattern.permute.xlu0 %v15745_v16  ;;  %v12591_v62 = vmax.f32 %v5141_v25, 0.0  ;;  %v5840_v30 = vsub.f32 1.0, %v5776_v53  ;;  %v5841_v57 = vsub.f32 1.0, %v5777_v12  ;;  %v5770_v8 = vand.u32 2147483647, %v5706_v3 }
 0x7e9   : > { %6083 = vperm.xlu0 %8640, %v16115_v40   ;;  %v12596_v27 = vmax.f32 %v6229_v42, 0.0  ;;  %v5771_v15 = vand.u32 2147483647, %v5707_v44  ;;  %v5708_v21 = vsub.f32 %v10707_v41, %v12243_v1  ;;  %v6092_v49 = vsub.f32 %v10685_v38, %v16117_v58  ;;  %v12610_v42 = vpop.permute.xlu0 %4955 }
 0x7ea   : > { %8585 = vset.pattern.permute.xlu1 %v15745_v16  ;;  %v5896_v25 = vmax.f32 %v5832_v33, 0.0  ;;  %v6093_v12 = vsub.f32 %v10688_v24, %v16117_v58  ;;  %v5000_v53 = vsub.f32 %v10685_v38, %v12417_v23  ;;  %v5001_v3 = vsub.f32 %v10688_v24, %v12417_v23  ;;  %16118 = vst [vmem:[#allocation92_spill] sm:$0xff] %v12610_v42 }
 0x7eb   : > { %16116 = vst [vmem:[#allocation94_spill] sm:$0xff] %v12596_v27  ;;  %6015 = vperm.xlu1 %8585, %v16104_v13   ;;  %v5897_v44 = vmax.f32 %v5833_v31, 0.0  ;;  %v5709_v59 = vsub.f32 %v10710_v17, %v12243_v1  ;;  %v5258_v33 = vmul.f32 %v12535_v20, %v12369_v9  ;;  %v5259_v58 = vmul.f32 %v12537_v10, %v12373_v61  ;;  %v16119_v20 = vld [vmem:[#allocation79_spill] sm:$0xff] }
 0x7ec   : > { %v12618_v40 = vmax.f32 %v5840_v30, 0.0  ;;  %v12620_v60 = vmax.f32 %v5841_v57, 0.0  ;;  %v5834_v27 = vsub.f32 1.0, %v5770_v8  ;;  %v5710_v23 = vsub.f32 %v10707_v41, %v12335_v46  ;;  %v12627_v9 = vpop.permute.xlu1 %5603 }
 0x7ed   : > { %8643 = vset.pattern.permute.xlu0 %v15828_v6  ;;  %v5835_v13 = vsub.f32 1.0, %v5771_v15  ;;  %v5772_v31 = vand.u32 2147483647, %v5708_v21  ;;  %v6156_v42 = vand.u32 2147483647, %v6092_v49  ;;  %v5711_v1 = vsub.f32 %v10710_v17, %v12335_v46  ;;  %v12632_v8 = vpop.permute.xlu0 %4975 }
 0x7ee   : > { %6527 = vperm.xlu0 %8643, %v16119_v20   ;;  %v6344_v61 = vmul.f32 %v12525_v11, %v5896_v25  ;;  %v6157_v10 = vand.u32 2147483647, %v6093_v12  ;;  %v5064_v30 = vand.u32 2147483647, %v5000_v53  ;;  %v5065_v57 = vand.u32 2147483647, %v5001_v3 }
 0x7ef   : > { %8586 = vset.pattern.permute.xlu1 %v15828_v6  ;;  %16120 = vst [vmem:[#allocation78_spill] sm:$0xff] %v12632_v8  ;;  %v6345_v15 = vmul.f32 %v12527_v43, %v5897_v44  ;;  %v5773_v21 = vand.u32 2147483647, %v5709_v59  ;;  %v12637_v49 = vmul.f32 %v12560_v56, %v12344_v36  ;;  %v12641_v46 = vmul.f32 %v12562_v52, %v12355_v0  ;;  %v16121_v20 = vld [vmem:[#allocation210_spill] sm:$0xff] }
 0x7f0   : > { %6455 = vperm.xlu1 %8586, %v16121_v20   ;;  %v5898_v11 = vmax.f32 %v5834_v27, 0.0  ;;  %v5774_v25 = vand.u32 2147483647, %v5710_v23  ;;  %v12645_v12 = vmul.f32 %v5200_v18, %v12357_v4  ;;  %v12648_v53 = vmul.f32 %v5201_v29, %v12359_v7  ;;  %v16124_v23 = vld [vmem:[#allocation18_spill] sm:$0xff] }
 0x7f1   : > { %v5899_v43 = vmax.f32 %v5835_v13, 0.0  ;;  %v6220_v59 = vsub.f32 1.0, %v6156_v42  ;;  %v5775_v3 = vand.u32 2147483647, %v5711_v1  ;;  %v5007_v36 = vsub.f32 %v10688_v24, %v12456_v22  ;;  %v12652_v8 = vpop.permute.xlu1 %4903  ;;  %v16125_v42 = vld [vmem:[#allocation41_spill] sm:$0xff] }
 0x7f2   : > { %v5836_v56 = vsub.f32 1.0, %v5772_v31  ;;  %v6221_v44 = vsub.f32 1.0, %v6157_v10  ;;  %v5128_v0 = vsub.f32 1.0, %v5064_v30  ;;  %v5129_v52 = vsub.f32 1.0, %v5065_v57  ;;  %16122 = vst [vmem:[#allocation81_spill] sm:$0xff] %v12652_v8  ;;  %v12654_v27 = vpop.permute.xlu0 %4979  ;;  %v16126_v10 = vld [vmem:[#allocation209_spill] sm:$0xff] }
 0x7f3   : > { %16123 = vst [vmem:[#allocation233_spill] sm:$0xff] %v12654_v27  ;;  %v12657_v4 = vmul.f32 %v16124_v23, %v6344_v61  ;;  %v12660_v7 = vmul.f32 %v16124_v23, %v6345_v15  ;;  %v5837_v18 = vsub.f32 1.0, %v5773_v21  ;;  %v5006_v29 = vsub.f32 %v10685_v38, %v12456_v22 }
 0x7f4   : > { %8587 = vset.pattern.permute.xlu1 %v15808_v2  ;;  %v5450_v13 = vmul.f32 %v16125_v42, %v5258_v33  ;;  %v5451_v31 = vmul.f32 %v16125_v42, %v5259_v58  ;;  %v5838_v1 = vsub.f32 1.0, %v5774_v25  ;;  %v6346_v20 = vmul.f32 %v12574_v5, %v5898_v11 }
 0x7f5   : > { %5371 = vperm.xlu1 %8587, %v16126_v10   ;;  %v6284_v61 = vmax.f32 %v6220_v59, 0.0  ;;  %v5839_v30 = vsub.f32 1.0, %v5775_v3  ;;  %v6347_v57 = vmul.f32 %v12576_v37, %v5899_v43  ;;  %v5071_v15 = vand.u32 2147483647, %v5007_v36 }
 0x7f6   : > { %v5900_v21 = vmax.f32 %v5836_v56, 0.0  ;;  %v6285_v23 = vmax.f32 %v6221_v44, 0.0  ;;  %v5192_v27 = vmax.f32 %v5128_v0, 0.0  ;;  %v5193_v22 = vmax.f32 %v5129_v52, 0.0  ;;  %v12670_v8 = vpop.permute.xlu0 %4983  ;;  %v12674_v5 = vpop.permute.xlu1 %6427 }
 0x7f7   : > { %16127 = vst [vmem:[#allocation76_spill] sm:$0xff] %v12670_v8  ;;  %v5901_v6 = vmax.f32 %v5837_v18, 0.0  ;;  %v6538_v33 = vmul.f32 %v12380_v51, %v6346_v20  ;;  %v6539_v58 = vmul.f32 %v12380_v51, %v6347_v57  ;;  %v5070_v25 = vand.u32 2147483647, %v5006_v29  ;;  %v16128_v51 = vld [vmem:[#allocation46_spill] sm:$0xff]  ;;  %v16130_v18 = vld [vmem:[#allocation237_spill] sm:$0xff] }
 0x7f8   : > { %v5514_v11 = vadd.f32 %v5450_v13, %v12444_v35  ;;  %v5515_v59 = vadd.f32 %v5451_v31, %v12447_v48  ;;  %v5902_v37 = vmax.f32 %v5838_v1, 0.0  ;;  %v6097_v43 = vsub.f32 %v10688_v24, %v12466_v28  ;;  %v16129_v48 = vld [vmem:[#allocation271_spill] sm:$0xff] }
 0x7f9   : > { %8589 = vset.pattern.permute.xlu1 %v15745_v16  ;;  %v5903_v3 = vmax.f32 %v5839_v30, 0.0  ;;  %v5135_v36 = vsub.f32 1.0, %v5071_v15  ;;  %v5011_v56 = vsub.f32 %v10688_v24, %v12491_v47  ;;  %v12683_v44 = vmul.f32 %v6284_v61, %v5900_v21 }
 0x7fa   : > { %6019 = vperm.xlu1 %8589, %v16128_v51   ;;  %v6096_v35 = vsub.f32 %v10685_v38, %v12466_v28  ;;  %v6349_v0 = vmul.f32 %v6285_v23, %v5901_v6  ;;  %v5256_v52 = vmul.f32 %v5192_v27, %v16129_v48  ;;  %v5257_v29 = vmul.f32 %v5193_v22, %v16130_v18 }
 0x7fb   : > { %v5134_v42 = vsub.f32 1.0, %v5070_v25  ;;  %v5010_v13 = vsub.f32 %v10685_v38, %v12491_v47  ;;  %v5324_v31 = vpop.permute.xlu0 %5323  ;;  %v6603_v1 = vadd.f32 %v6539_v58, %v5515_v59  ;;  %v12692_v20 = vadd.f32 %v6538_v33, %v5514_v11  ;;  %v16131_v47 = vld [vmem:[#allocation83_spill] sm:$0xff]  ;;  %v16133_v25 = vld [vmem:[#allocation42_spill] sm:$0xff] }
 0x7fc   : > { %v6350_v10 = vmul.f32 %v12581_v50, %v5902_v37  ;;  %v6161_v61 = vand.u32 2147483647, %v6097_v43  ;;  %v12695_v30 = vpop.permute.xlu1 %5607  ;;  %v5448_v57 = vmul.f32 %v5324_v31, %v5256_v52  ;;  %v5449_v28 = vmul.f32 %v5324_v31, %v5257_v29  ;;  %v16132_v33 = vld [vmem:[#allocation191_spill] sm:$0xff] }
 0x7fd   : > { %v6351_v6 = vmul.f32 %v12583_v55, %v5903_v3  ;;  %v5199_v27 = vmax.f32 %v5135_v36, 0.0  ;;  %v5075_v15 = vand.u32 2147483647, %v5011_v56  ;;  %v6099_v21 = vsub.f32 %v10688_v24, %v12568_v39 }
 0x7fe   : > { %8590 = vset.pattern.permute.xlu1 %v15838_v45  ;;  %v5452_v23 = vmul.f32 %v16131_v47, %v12637_v49  ;;  %v6160_v22 = vand.u32 2147483647, %v6096_v35  ;;  %v5512_v50 = vadd.f32 %v5448_v57, %v16132_v33  ;;  %v5513_v58 = vadd.f32 %v5449_v28, %v12438_v19  ;;  %v16136_v57 = vld [vmem:[#allocation212_spill] sm:$0xff] }
 0x7ff   : > { %4935 = vperm.xlu1 %8590, %v16133_v25   ;;  %v5453_v55 = vmul.f32 %v16131_v47, %v12641_v46  ;;  %v5198_v11 = vmax.f32 %v5134_v42, 0.0  ;;  %v5074_v59 = vand.u32 2147483647, %v5010_v13  ;;  %v5715_v37 = vsub.f32 %v10710_v17, %v12545_v54  ;;  %v5336_v43 = vpop.permute.xlu0 %5335  ;;  %v16134_v46 = vld [vmem:[#allocation101_spill] sm:$0xff] }
 0x800   : > { %v6225_v3 = vsub.f32 1.0, %v6161_v61  ;;  %v6098_v49 = vsub.f32 %v10685_v38, %v12568_v39  ;;  %v6601_v36 = vadd.f32 %v12660_v7, %v5513_v58  ;;  %v6600_v56 = vadd.f32 %v12657_v4, %v5512_v50  ;;  %v16135_v39 = vld [vmem:[#allocation173_spill] sm:$0xff] }
 0x801   : > { %v5139_v19 = vsub.f32 1.0, %v5075_v15  ;;  %v6163_v51 = vand.u32 2147483647, %v6099_v21  ;;  %v5717_v35 = vsub.f32 %v10710_v17, %v12627_v9  ;;  %v5263_v48 = vmul.f32 %v5199_v27, %v16134_v46  ;;  %v12717_v52 = vpop.permute.xlu1 %5991  ;;  %v16137_v21 = vld [vmem:[#allocation177_spill] sm:$0xff] }
 0x802   : > { %v6224_v18 = vsub.f32 1.0, %v6160_v22  ;;  %v5714_v29 = vsub.f32 %v10707_v41, %v12545_v54  ;;  %v6543_v42 = vmul.f32 %v16135_v39, %v6351_v6  ;;  %v12724_v7 = vmul.f32 %v16135_v39, %v6350_v10  ;;  %6731 = vmatprep.mubr.f32.mxu0 %v6601_v36  ;;  %v16138_v6 = vld [vmem:[#allocation195_spill] sm:$0xff]  ;;  %v16143_v39 = vld [vmem:[#allocation196_spill] sm:$0xff] }
 0x803   : > { %8591 = vset.pattern.permute.xlu1 %v15808_v2  ;;  %v5138_v4 = vsub.f32 1.0, %v5074_v59  ;;  %v6541_v13 = vmul.f32 %v12509_v26, %v6349_v0  ;;  %v5779_v31 = vand.u32 2147483647, %v5715_v37  ;;  %v5455_v61 = vmul.f32 %v5336_v43, %v5263_v48  ;;  %v5344_v28 = vpop.permute.xlu0 %5343  ;;  %6732 = vmatmul.mubr.f32.gmra.mxu0 %v6600_v56 }
 0x804   : > { %5375 = vperm.xlu1 %8591, %v16136_v57   ;;  %v6289_v27 = vmax.f32 %v6225_v3, 0.0  ;;  %v6162_v15 = vand.u32 2147483647, %v6098_v49  ;;  %v5716_v54 = vsub.f32 %v10707_v41, %v12627_v9  ;;  %v5262_v47 = vmul.f32 %v5198_v11, %v16137_v21  ;;  %6736 = vmatprep.mubr.f32.mxu0 %v6603_v1  ;;  %v16139_v3 = vld [vmem:[#allocation193_spill] sm:$0xff]  ;;  %v16140_v9 = vld [vmem:[#allocation252_spill] sm:$0xff] }
 0x805   : > { %v5517_v10 = vadd.f32 %v5453_v55, %v16138_v6  ;;  %v5203_v22 = vmax.f32 %v5139_v19, 0.0  ;;  %v6227_v33 = vsub.f32 1.0, %v6163_v51  ;;  %v5781_v50 = vand.u32 2147483647, %v5717_v35  ;;  %v16141_v35 = vld [vmem:[#allocation43_spill] sm:$0xff] }
 0x806   : > { %v6288_v0 = vmax.f32 %v6224_v18, 0.0  ;;  %v6540_v58 = vmul.f32 %v12509_v26, %v12683_v44  ;;  %v5778_v25 = vand.u32 2147483647, %v5714_v29  ;;  %v5454_v59 = vmul.f32 %v5336_v43, %v5262_v47  ;;  %v6432_v37 = vpop.permute.xlu1 %6431  ;;  %v16142_v43 = vld [vmem:[#allocation235_spill] sm:$0xff] }
 0x807   : > { %v5516_v49 = vadd.f32 %v5452_v23, %v16139_v3  ;;  %v5843_v36 = vsub.f32 1.0, %v5779_v31  ;;  %v5519_v46 = vadd.f32 %v5455_v61, %v16140_v9  ;;  %v12737_v11 = vpop.permute.xlu0 %5355  ;;  %v6605_v55 = vadd.f32 %v6541_v13, %v5517_v10  ;;  %6737 = vmatmul.mubr.f32.gmra.mxu0 %v12692_v20  ;;  %v16144_v47 = vld [vmem:[#allocation251_spill] sm:$0xff] }
 0x808   : > { %8592 = vset.pattern.permute.xlu1 %v15755_v14  ;;  %v5202_v56 = vmax.f32 %v5138_v4, 0.0  ;;  %v6226_v19 = vsub.f32 1.0, %v6162_v15  ;;  %v5780_v1 = vand.u32 2147483647, %v5716_v54  ;;  %v6353_v51 = vmul.f32 %v6289_v27, %v12620_v60 }
 0x809   : > { %5639 = vperm.xlu1 %8592, %v16141_v35   ;;  %v6291_v26 = vmax.f32 %v6227_v33, 0.0  ;;  %v5457_v44 = vmul.f32 %v12593_v32, %v12648_v53  ;;  %v5845_v23 = vsub.f32 1.0, %v5781_v50  ;;  %v5267_v48 = vmul.f32 %v5203_v22, %v16142_v43  ;;  %6741 = vmatprep.mubr.f32.mxu0 %v6605_v55  ;;  %v16146_v50 = vld [vmem:[#allocation270_spill] sm:$0xff]  ;;  %v16150_v55 = vld [vmem:[#allocation192_spill] sm:$0xff] }
 0x80a   : > { %v5842_v18 = vsub.f32 1.0, %v5778_v25  ;;  %v6352_v29 = vmul.f32 %v6288_v0, %v12618_v40  ;;  %v5518_v4 = vadd.f32 %v5454_v59, %v16143_v39  ;;  %v6604_v13 = vadd.f32 %v6540_v58, %v5516_v49  ;;  %v16145_v40 = vld [vmem:[#allocation194_spill] sm:$0xff]  ;;  %v16147_v58 = vld [vmem:[#allocation51_spill] sm:$0xff]  ;;  %v16148_v59 = vld [vmem:[#allocation65_spill] sm:$0xff] }
 0x80b   : > { %v5907_v31 = vmax.f32 %v5843_v36, 0.0  ;;  %v6545_v60 = vmul.f32 %v12674_v5, %v6353_v51  ;;  %v5459_v61 = vmul.f32 %v5344_v28, %v5267_v48  ;;  %v5348_v27 = vpop.permute.xlu1 %5347  ;;  %v12748_v20 = vpop.permute.xlu0 %5367  ;;  %v6607_v15 = vadd.f32 %v6543_v42, %v5519_v46  ;;  %v16156_v48 = vld [vmem:[#allocation94_spill] sm:$0xff]  ;;  %v16158_v39 = vld [vmem:[#allocation256_spill] sm:$0xff] }
 0x80c   : > { %v6290_v54 = vmax.f32 %v6226_v19, 0.0  ;;  %v5456_v53 = vmul.f32 %v12593_v32, %v12645_v12  ;;  %v5844_v21 = vsub.f32 1.0, %v5780_v1  ;;  %v5266_v6 = vmul.f32 %v5202_v56, %v16144_v47  ;;  %6742 = vmatmul.mubr.f32.gmra.mxu0 %v6604_v13  ;;  %v16151_v1 = vld [vmem:[#allocation257_spill] sm:$0xff]  ;;  %v16162_v47 = vld [vmem:[#allocation175_spill] sm:$0xff] }
 0x80d   : > { %8593 = vset.pattern.permute.xlu1 %v15838_v45  ;;  %v5521_v10 = vadd.f32 %v5457_v44, %v16145_v40  ;;  %v5909_v22 = vmax.f32 %v5845_v23, 0.0  ;;  %v6355_v33 = vmul.f32 %v6291_v26, %v5907_v31  ;;  %v5269_v0 = vmul.f32 %v12591_v62, %v16146_v50  ;;  %6746 = vmatprep.mubr.f32.mxu0 %v6607_v15  ;;  %v16154_v26 = vld [vmem:[#allocation208_spill] sm:$0xff]  ;;  %v16160_v15 = vld [vmem:[#allocation81_spill] sm:$0xff]  ;;  %v16166_v50 = vld [vmem:[#allocation214_spill] sm:$0xff] }
 0x80e   : > { %4939 = vperm.xlu1 %8593, %v16147_v58   ;;  %v5906_v42 = vmax.f32 %v5842_v18, 0.0  ;;  %v6544_v25 = vmul.f32 %v12674_v5, %v6352_v29  ;;  %v5458_v32 = vmul.f32 %v5344_v28, %v5266_v6  ;;  %v6606_v12 = vadd.f32 %v12724_v7, %v5518_v4  ;;  %v16152_v5 = vld [vmem:[#allocation178_spill] sm:$0xff]  ;;  %v16153_v28 = vld [vmem:[#allocation253_spill] sm:$0xff]  ;;  %v16163_v40 = vld [vmem:[#allocation48_spill] sm:$0xff] }
 0x80f   : > { %v5523_v3 = vadd.f32 %v5459_v61, %v16148_v59  ;;  %v6547_v49 = vmul.f32 %v6432_v37, %v6355_v33  ;;  %v5461_v36 = vmul.f32 %v5348_v27, %v5269_v0  ;;  %v12761_v9 = vpop.permute.xlu0 %5379  ;;  %v6609_v46 = vadd.f32 %v6545_v60, %v5521_v10  ;;  %v16164_v10 = vld [vmem:[#allocation200_spill] sm:$0xff] }
 0x810   : > { %16149 = vst [vmem:[#allocation238_spill] sm:$0xff] %v12761_v9  ;;  %v5520_v56 = vadd.f32 %v5456_v53, %v16150_v55  ;;  %v5908_v19 = vmax.f32 %v5844_v21, 0.0  ;;  %v6354_v62 = vmul.f32 %v6290_v54, %v5906_v42  ;;  %v5268_v51 = vmul.f32 %v12587_v63, %v16151_v1  ;;  %v12766_v35 = vpop.permute.xlu1 %5995  ;;  %6747 = vmatmul.mubr.f32.gmra.mxu0 %v6606_v12 }
 0x811   : > { %v3931_v7 = vsub.f32 %v10688_v24, %v16152_v5  ;;  %v4437_v44 = vadd.f32 %v16154_v26, %v16153_v28  ;;  %v16155_v23 = vsub.f32 1.0, %v12566_v34  ;;  %v6357_v18 = vmul.f32 %v16156_v48, %v5909_v22  ;;  %6751 = vmatprep.mubr.f32.mxu0 %v6609_v46  ;;  %v16165_v22 = vld [vmem:[#allocation24_spill] sm:$0xff] }
 0x812   : > { %v16157_v29 = vmov 11   ;;  %v5522_v4 = vadd.f32 %v5458_v32, %v16158_v39  ;;  %v6546_v63 = vmul.f32 %v6432_v37, %v6354_v62  ;;  %v5460_v13 = vmul.f32 %v5348_v27, %v5268_v51  ;;  %v16167_v32 = vld [vmem:[#allocation244_spill] sm:$0xff] }
 0x813   : > { %v6292_v43 = vmax.f32 %v16155_v23, 0.0  ;;  %8594 = vset.pattern.permute.xlu1 %v16157_v29  ;;  %v6608_v31 = vadd.f32 %v6544_v25, %v5520_v56  ;;  %v16159_v60 = vsub.f32 %v10685_v38, %v16152_v5  ;;  %v5014_v34 = vsub.f32 %v10685_v38, %v16160_v15  ;;  %v12783_v53 = vpop.permute.xlu0 %5395  ;;  %v16171_v51 = vld [vmem:[#allocation40_spill] sm:$0xff] }
 0x814   : > { %6463 = vperm.xlu1 %8594, %v16136_v57   ;;  %v5525_v54 = vadd.f32 %v5461_v36, %v4437_v44  ;;  %16161 = vst [vmem:[#allocation88_spill] sm:$0xff] %v12783_v53  ;;  %v6611_v21 = vadd.f32 %v6547_v49, %v5523_v3  ;;  %v4054_v6 = vsub.f32 1.0, %v16162_v47  ;;  %v4436_v37 = vadd.f32 %v16164_v10, %v16163_v40  ;;  %v16168_v3 = vld [vmem:[#allocation128_spill] sm:$0xff]  ;;  %v16169_v49 = vld [vmem:[#allocation91_spill] sm:$0xff] }
 0x815   : > { %v3994_v61 = vand.u32 2147483647, %v16159_v60  ;;  %v6356_v27 = vmul.f32 %v6292_v43, %v5908_v19  ;;  %v5015_v57 = vsub.f32 %v10688_v24, %v16160_v15  ;;  %6752 = vmatmul.mubr.f32.gmra.mxu0 %v6608_v31  ;;  %v4055_v33 = vsub.f32 1.0, %v16165_v22  ;;  %v12795_v25 = vpop.permute.xlu1 %4911  ;;  %v16170_v19 = vld [vmem:[#allocation220_spill] sm:$0xff]  ;;  %v16176_v22 = vld [vmem:[#allocation265_spill] sm:$0xff] }
 0x816   : > { %v4630_v0 = vsub.f32 %v10707_v41, %v16166_v50  ;;  %v4631_v42 = vsub.f32 %v10710_v17, %v16166_v50  ;;  %6756 = vmatprep.mubr.f32.mxu0 %v6611_v21  ;;  %v6549_v12 = vmul.f32 %v16167_v32, %v6357_v18  ;;  %v3995_v59 = vand.u32 2147483647, %v3931_v7 }
 0x817   : > { %v12800_v36 = vmul.f32 %v16169_v49, %v16168_v3  ;;  %v5524_v46 = vadd.f32 %v5460_v13, %v4436_v37  ;;  %v6610_v55 = vadd.f32 %v6546_v63, %v5522_v4  ;;  %v4058_v56 = vsub.f32 1.0, %v3994_v61  ;;  %v16173_v4 = vld [vmem:[#allocation130_spill] sm:$0xff] }
 0x818   : > { %8595 = vset.pattern.permute.xlu1 %v15755_v14  ;;  %v4632_v62 = vsub.f32 %v10707_v41, %v16170_v19  ;;  %v5078_v1 = vand.u32 2147483647, %v5014_v34  ;;  %v12806_v5 = vpop.permute.xlu0 %5415  ;;  %v6613_v28 = vadd.f32 %v6549_v12, %v5525_v54  ;;  %v5079_v26 = vand.u32 2147483647, %v5015_v57  ;;  %v16174_v63 = vld [vmem:[#allocation174_spill] sm:$0xff] }
 0x819   : > { %5643 = vperm.xlu1 %8595, %v16171_v51   ;;  %16172 = vst [vmem:[#allocation239_spill] sm:$0xff] %v12806_v5  ;;  %v6102_v7 = vsub.f32 %v10685_v38, %v12717_v52  ;;  %v6103_v44 = vsub.f32 %v10688_v24, %v12717_v52  ;;  %6757 = vmatmul.mubr.f32.gmra.mxu0 %v6610_v55  ;;  %v4118_v43 = vmax.f32 %v4054_v6, 0.0  ;;  %v4119_v48 = vmax.f32 %v4055_v33, 0.0 }
 0x81a   : > { %v6548_v23 = vmul.f32 %v16167_v32, %v6356_v27  ;;  %v4694_v18 = vand.u32 2147483647, %v4630_v0  ;;  %v4695_v39 = vand.u32 2147483647, %v4631_v42  ;;  %6761 = vmatprep.mubr.f32.mxu0 %v6613_v28  ;;  %v12815_v13 = vmul.f32 %v16174_v63, %v16173_v4  ;;  %v5352_v61 = vpop.permute.xlu1 %5351  ;;  %v16178_v0 = vld [vmem:[#allocation216_spill] sm:$0xff] }
 0x81b   : > { %v5718_v31 = vsub.f32 %v10707_v41, %v12695_v30  ;;  %v5719_v60 = vsub.f32 %v10710_v17, %v12695_v30  ;;  %v4059_v15 = vsub.f32 1.0, %v3995_v59  ;;  %v4122_v34 = vmax.f32 %v4058_v56, 0.0  ;;  %v16175_v30 = vld [vmem:[#allocation264_spill] sm:$0xff] }
 0x81c   : > { %v6612_v52 = vadd.f32 %v6548_v23, %v5524_v46  ;;  %v4633_v54 = vsub.f32 %v10710_v17, %v16170_v19  ;;  %v4696_v21 = vand.u32 2147483647, %v4632_v62  ;;  %v5142_v47 = vsub.f32 1.0, %v5078_v1  ;;  %v12827_v50 = vpop.permute.xlu0 %5403  ;;  %v16179_v46 = vld [vmem:[#allocation274_spill] sm:$0xff]  ;;  %v16182_v63 = vld [vmem:[#allocation4_spill] sm:$0xff] }
 0x81d   : > { %8596 = vset.pattern.permute.xlu1 %v15745_v16  ;;  %v5143_v6 = vsub.f32 1.0, %v5079_v26  ;;  %v6166_v40 = vand.u32 2147483647, %v6102_v7  ;;  %v6167_v10 = vand.u32 2147483647, %v6103_v44  ;;  %v4758_v37 = vsub.f32 1.0, %v4694_v18 }
 0x81e   : > { %6027 = vperm.xlu1 %8596, %v16147_v58   ;;  %6762 = vmatmul.mubr.f32.gmra.mxu0 %v6612_v52  ;;  %v4759_v27 = vsub.f32 1.0, %v4695_v39  ;;  %v4182_v57 = vmul.f32 %v4118_v43, %v16175_v30  ;;  %v4183_v33 = vmul.f32 %v4119_v48, %v16176_v22  ;;  %16177 = vst [vmem:[#allocation107_spill] sm:$0xff] %v12827_v50  ;;  %v5782_v12 = vand.u32 2147483647, %v5718_v31  ;;  %v16180_v7 = vld [vmem:[#allocation229_spill] sm:$0xff]  ;;  %v16181_v43 = vld [vmem:[#allocation211_spill] sm:$0xff] }
 0x81f   : > { %v4634_v42 = vsub.f32 %v10707_v41, %v16178_v0  ;;  %v4635_v32 = vsub.f32 %v10710_v17, %v16178_v0  ;;  %v5783_v59 = vand.u32 2147483647, %v5719_v60  ;;  %v12833_v3 = vmax.f32 %v4059_v15, 0.0  ;;  %v12840_v56 = vpop.permute.xlu1 %5615  ;;  %v16183_v31 = vld [vmem:[#allocation258_spill] sm:$0xff]  ;;  %v16184_v52 = vld [vmem:[#allocation277_spill] sm:$0xff] }
 0x820   : > { %v12835_v58 = vand.u32 2147483647, %v4633_v54  ;;  %v4760_v49 = vsub.f32 1.0, %v4696_v21  ;;  %v12838_v55 = vmul.f32 %v4122_v34, %v16179_v46  ;;  %v5206_v19 = vmax.f32 %v5142_v47, 0.0  ;;  %v16185_v34 = vld [vmem:[#allocation259_spill] sm:$0xff]  ;;  %v12854_v47 = vpop.permute.xlu0 %5407 }
 0x821   : > { %v5207_v62 = vmax.f32 %v5143_v6, 0.0  ;;  %v6230_v1 = vsub.f32 1.0, %v6166_v40  ;;  %v6231_v51 = vsub.f32 1.0, %v6167_v10  ;;  %v4822_v28 = vmax.f32 %v4758_v37, 0.0  ;;  %16186 = vst [vmem:[#allocation68_spill] sm:$0xff] %v12854_v47 }
 0x822   : > { %8597 = vset.pattern.permute.xlu1 %v16157_v29  ;;  %v4823_v26 = vmax.f32 %v4759_v27, 0.0  ;;  %v5016_v44 = vsub.f32 %v10685_v38, %v16180_v7  ;;  %v5017_v23 = vsub.f32 %v10688_v24, %v16180_v7  ;;  %v4698_v48 = vand.u32 2147483647, %v4634_v42 }
 0x823   : > { %6467 = vperm.xlu1 %8597, %v16181_v43   ;;  %v4699_v18 = vand.u32 2147483647, %v4635_v32  ;;  %v5846_v39 = vsub.f32 1.0, %v5782_v12  ;;  %v5847_v4 = vsub.f32 1.0, %v5783_v59  ;;  %v3286_v60 = vmul.f32 %v16183_v31, %v16182_v63  ;;  %v16187_v59 = vld [vmem:[#allocation215_spill] sm:$0xff] }
 0x824   : > { %v3287_v15 = vmul.f32 %v16183_v31, %v16184_v52  ;;  %v4374_v54 = vmul.f32 %v16185_v34, %v4182_v57  ;;  %v4375_v21 = vmul.f32 %v16185_v34, %v4183_v33  ;;  %v6294_v6 = vmax.f32 %v6230_v1, 0.0  ;;  %v12856_v27 = vpop.permute.xlu1 %4915 }
 0x825   : > { %v6295_v40 = vmax.f32 %v6231_v51, 0.0  ;;  %v5270_v10 = vmul.f32 %v5206_v19, %v4822_v28  ;;  %v5271_v37 = vmul.f32 %v5207_v62, %v4823_v26  ;;  %v4761_v30 = vsub.f32 1.0, %v12835_v58  ;;  %v16188_v26 = vld [vmem:[#allocation85_spill] sm:$0xff]  ;;  %v6000_v43 = vpop.permute.xlu0 %5999 }
 0x826   : > { %v12859_v22 = vmax.f32 %v4760_v49, 0.0  ;;  %v5080_v0 = vand.u32 2147483647, %v5016_v44  ;;  %v5081_v42 = vand.u32 2147483647, %v5017_v23  ;;  %v5910_v32 = vmax.f32 %v5846_v39, 0.0 }
 0x827   : > { %8598 = vset.pattern.permute.xlu1 %v15808_v2  ;;  %v5911_v57 = vmax.f32 %v5847_v4, 0.0  ;;  %v5462_v12 = vmul.f32 %v5352_v61, %v5270_v10  ;;  %v5463_v33 = vmul.f32 %v5352_v61, %v5271_v37  ;;  %v4762_v46 = vsub.f32 1.0, %v4698_v48 }
 0x828   : > { %5383 = vperm.xlu1 %8598, %v16187_v59   ;;  %v4763_v1 = vsub.f32 1.0, %v4699_v18  ;;  %v6104_v19 = vsub.f32 %v10685_v38, %v12766_v35  ;;  %v6105_v58 = vsub.f32 %v10688_v24, %v12766_v35  ;;  %v4438_v49 = vadd.f32 %v4374_v54, %v3286_v60 }
 0x829   : > { %v4439_v62 = vadd.f32 %v4375_v21, %v3287_v15  ;;  %v6358_v51 = vmul.f32 %v6294_v6, %v5910_v32  ;;  %v6359_v28 = vmul.f32 %v6295_v40, %v5911_v57  ;;  %v5720_v7 = vsub.f32 %v10707_v41, %v16188_v26  ;;  %v6440_v48 = vpop.permute.xlu1 %6439  ;;  %v16189_v15 = vld [vmem:[#allocation47_spill] sm:$0xff] }
 0x82a   : > { %v5721_v61 = vsub.f32 %v10710_v17, %v16188_v26  ;;  %v5144_v44 = vsub.f32 1.0, %v5080_v0  ;;  %v5145_v23 = vsub.f32 1.0, %v5081_v42  ;;  %v5526_v18 = vadd.f32 %v5462_v12, %v4438_v49 }
 0x82b   : > { %v5527_v39 = vadd.f32 %v5463_v33, %v4439_v62  ;;  %v6550_v4 = vmul.f32 %v6440_v48, %v6358_v51  ;;  %v6551_v63 = vmul.f32 %v6440_v48, %v6359_v28  ;;  %v6168_v35 = vand.u32 2147483647, %v6104_v19  ;;  %v16191_v51 = vld [vmem:[#allocation56_spill] sm:$0xff]  ;;  %v16195_v48 = vld [vmem:[#allocation109_spill] sm:$0xff] }
 0x82c   : > { %8599 = vset.pattern.permute.xlu1 %v15745_v16  ;;  %v6169_v31 = vand.u32 2147483647, %v6105_v58  ;;  %v5018_v60 = vsub.f32 %v10685_v38, %v12795_v25  ;;  %v5019_v52 = vsub.f32 %v10688_v24, %v12795_v25  ;;  %v6106_v34 = vsub.f32 %v10685_v38, %v6000_v43 }
 0x82d   : > { %6031 = vperm.xlu1 %8599, %v16189_v15   ;;  %v6107_v54 = vsub.f32 %v10688_v24, %v6000_v43  ;;  %v6615_v21 = vadd.f32 %v6551_v63, %v5527_v39  ;;  %v6614_v6 = vadd.f32 %v6550_v4, %v5526_v18  ;;  %v4825_v40 = vmax.f32 %v4761_v30, 0.0 }
 0x82e   : > { %v12879_v10 = vmax.f32 %v4762_v46, 0.0  ;;  %v5784_v37 = vand.u32 2147483647, %v5720_v7  ;;  %v5785_v0 = vand.u32 2147483647, %v5721_v61  ;;  %v12881_v42 = vmax.f32 %v4763_v1, 0.0  ;;  %v12887_v12 = vpop.permute.xlu1 %5619 }
 0x82f   : > { %v5208_v32 = vmax.f32 %v5144_v44, 0.0  ;;  %v5722_v57 = vsub.f32 %v10707_v41, %v12840_v56  ;;  %v5723_v25 = vsub.f32 %v10710_v17, %v12840_v56  ;;  %6766 = vmatprep.mubr.f32.mxu0 %v6615_v21  ;;  %v5209_v33 = vmax.f32 %v5145_v23, 0.0  ;;  %v16190_v46 = vld [vmem:[#allocation275_spill] sm:$0xff]  ;;  %v16192_v56 = vld [vmem:[#allocation254_spill] sm:$0xff] }
 0x830   : > { %v6232_v59 = vsub.f32 1.0, %v6168_v35  ;;  %v6233_v19 = vsub.f32 1.0, %v6169_v31  ;;  %v5082_v30 = vand.u32 2147483647, %v5018_v60  ;;  %6767 = vmatmul.mubr.f32.gmra.mxu0 %v6614_v6  ;;  %v4187_v1 = vmul.f32 %v12833_v3, %v16190_v46  ;;  %v16193_v44 = vld [vmem:[#allocation106_spill] sm:$0xff]  ;;  %v16194_v23 = vld [vmem:[#allocation255_spill] sm:$0xff] }
 0x831   : > { %8600 = vset.pattern.permute.xlu1 %v15838_v45  ;;  %v5083_v58 = vand.u32 2147483647, %v5019_v52  ;;  %v6170_v49 = vand.u32 2147483647, %v6106_v34  ;;  %v6171_v62 = vand.u32 2147483647, %v6107_v54  ;;  %v4376_v28 = vmul.f32 %v16192_v56, %v12800_v36 }
 0x832   : > { %4947 = vperm.xlu1 %8600, %v16191_v51   ;;  %v4377_v26 = vmul.f32 %v16192_v56, %v12815_v13  ;;  %v5848_v7 = vsub.f32 1.0, %v5784_v37  ;;  %v5849_v61 = vsub.f32 1.0, %v5785_v0  ;;  %v3288_v43 = vmul.f32 %v16194_v23, %v16193_v44  ;;  %v16196_v37 = vld [vmem:[#allocation213_spill] sm:$0xff] }
 0x833   : > { %v3289_v18 = vmul.f32 %v16194_v23, %v16195_v48  ;;  %v5786_v3 = vand.u32 2147483647, %v5722_v57  ;;  %v5787_v39 = vand.u32 2147483647, %v5723_v25  ;;  %v5272_v4 = vmul.f32 %v5208_v32, %v12859_v22  ;;  %v12902_v60 = vpop.permute.xlu1 %6003  ;;  %v16197_v57 = vld [vmem:[#allocation137_spill] sm:$0xff]  ;;  %v16198_v25 = vld [vmem:[#allocation262_spill] sm:$0xff] }
 0x834   : > { %v5273_v63 = vmul.f32 %v5209_v33, %v4825_v40  ;;  %v6296_v35 = vmax.f32 %v6232_v59, 0.0  ;;  %v6297_v31 = vmax.f32 %v6233_v19, 0.0  ;;  %v5146_v36 = vsub.f32 1.0, %v5082_v30  ;;  %v16199_v59 = vld [vmem:[#allocation263_spill] sm:$0xff]  ;;  %v16201_v48 = vld [vmem:[#allocation45_spill] sm:$0xff] }
 0x835   : > { %v5147_v52 = vsub.f32 1.0, %v5083_v58  ;;  %v6234_v13 = vsub.f32 1.0, %v6170_v49  ;;  %v6235_v15 = vsub.f32 1.0, %v6171_v62  ;;  %v5912_v34 = vmax.f32 %v5848_v7, 0.0 }
 0x836   : > { %8601 = vset.pattern.permute.xlu1 %v15808_v2  ;;  %v5913_v54 = vmax.f32 %v5849_v61, 0.0  ;;  %v5464_v21 = vmul.f32 %v12737_v11, %v5272_v4  ;;  %v5465_v6 = vmul.f32 %v12737_v11, %v5273_v63  ;;  %v4440_v22 = vadd.f32 %v4376_v28, %v3288_v43 }
 0x837   : > { %5387 = vperm.xlu1 %8601, %v16196_v37   ;;  %v4441_v40 = vadd.f32 %v4377_v26, %v3289_v18  ;;  %v5850_v0 = vsub.f32 1.0, %v5786_v3  ;;  %v5851_v32 = vsub.f32 1.0, %v5787_v39  ;;  %v3290_v33 = vmul.f32 %v16198_v25, %v16197_v57  ;;  %v16200_v26 = vld [vmem:[#allocation282_spill] sm:$0xff]  ;;  %v16202_v18 = vld [vmem:[#allocation29_spill] sm:$0xff] }
 0x838   : > { %v4378_v19 = vmul.f32 %v16199_v59, %v12838_v55  ;;  %v6360_v30 = vmul.f32 %v6296_v35, %v5912_v34  ;;  %v6361_v46 = vmul.f32 %v6297_v31, %v5913_v54  ;;  %v5210_v58 = vmax.f32 %v5146_v36, 0.0  ;;  %v6444_v56 = vpop.permute.xlu1 %6443  ;;  %v16206_v54 = vld [vmem:[#allocation117_spill] sm:$0xff] }
 0x839   : > { %v5211_v49 = vmax.f32 %v5147_v52, 0.0  ;;  %v6298_v62 = vmax.f32 %v6234_v13, 0.0  ;;  %v6299_v51 = vmax.f32 %v6235_v15, 0.0  ;;  %v5528_v11 = vadd.f32 %v5464_v21, %v4440_v22  ;;  %v16205_v15 = vld [vmem:[#allocation27_spill] sm:$0xff] }
 0x83a   : > { %v5529_v7 = vadd.f32 %v5465_v6, %v4441_v40  ;;  %v6552_v61 = vmul.f32 %v6444_v56, %v6360_v30  ;;  %v6553_v28 = vmul.f32 %v6444_v56, %v6361_v46  ;;  %v3291_v44 = vmul.f32 %v16198_v25, %v16200_v26  ;;  %v16207_v6 = vld [vmem:[#allocation39_spill] sm:$0xff] }
 0x83b   : > { %8602 = vset.pattern.permute.xlu1 %v15755_v14  ;;  %v4379_v23 = vmul.f32 %v16199_v59, %v4187_v1  ;;  %v5914_v43 = vmax.f32 %v5850_v0, 0.0  ;;  %v5915_v55 = vmax.f32 %v5851_v32, 0.0  ;;  %v16203_v3 = vsub.f32 %v10685_v38, %v16202_v18  ;;  %v16208_v0 = vld [vmem:[#allocation36_spill] sm:$0xff] }
 0x83c   : > { %5651 = vperm.xlu1 %8602, %v16201_v48   ;;  %v16204_v4 = vsub.f32 %v10688_v24, %v16202_v18  ;;  %v6617_v35 = vadd.f32 %v6553_v28, %v5529_v7  ;;  %v6616_v31 = vadd.f32 %v6552_v61, %v5528_v11  ;;  %v5274_v13 = vmul.f32 %v5210_v58, %v12879_v10  ;;  %v16209_v10 = vld [vmem:[#allocation72_spill] sm:$0xff]  ;;  %v16212_v11 = vld [vmem:[#allocation311_spill] sm:$0xff]  ;;  %v16219_v48 = vld [vmem:[#allocation34_spill] sm:$0xff] }
 0x83d   : > { %v4000_v39 = vand.u32 2147483647, %v16203_v3  ;;  %v6362_v36 = vmul.f32 %v6298_v62, %v5914_v43  ;;  %v6363_v52 = vmul.f32 %v6299_v51, %v5915_v55  ;;  %v5275_v1 = vmul.f32 %v5211_v49, %v12881_v42  ;;  %v5360_v40 = vpop.permute.xlu1 %5359  ;;  %v16210_v49 = vld [vmem:[#allocation52_spill] sm:$0xff]  ;;  %v16211_v62 = vld [vmem:[#allocation245_spill] sm:$0xff]  ;;  %v16218_v43 = vld [vmem:[#allocation179_spill] sm:$0xff] }
 0x83e   : > { %v4001_v63 = vand.u32 2147483647, %v16204_v4  ;;  %v2558_v34 = vsub.f32 1.0, %v16205_v15  ;;  %v2559_v21 = vsub.f32 1.0, %v16206_v54  ;;  %v3940_v37 = vsub.f32 %v10685_v38, %v16207_v6  ;;  %6771 = vmatprep.mubr.f32.mxu0 %v6617_v35  ;;  %v16215_v28 = vld [vmem:[#allocation312_spill] sm:$0xff]  ;;  %v16220_v18 = vld [vmem:[#allocation314_spill] sm:$0xff] }
 0x83f   : > { %v4442_v22 = vadd.f32 %v4378_v19, %v3290_v33  ;;  %v4060_v32 = vsub.f32 1.0, %v16208_v0  ;;  %v4443_v57 = vadd.f32 %v4379_v23, %v3291_v44  ;;  %v5466_v25 = vmul.f32 %v5360_v40, %v5274_v13  ;;  %6772 = vmatmul.mubr.f32.gmra.mxu0 %v6616_v31  ;;  %v16223_v4 = vld [vmem:[#allocation315_spill] sm:$0xff]  ;;  %v16225_v15 = vld [vmem:[#allocation44_spill] sm:$0xff] }
 0x840   : > { %v5467_v59 = vmul.f32 %v5360_v40, %v5275_v1  ;;  %8603 = vset.pattern.permute.xlu1 %v15838_v45  ;;  %v4061_v42 = vsub.f32 1.0, %v16209_v10  ;;  %v4064_v30 = vsub.f32 1.0, %v4000_v39  ;;  %v4065_v46 = vsub.f32 1.0, %v4001_v63  ;;  %v16222_v39 = vld [vmem:[#allocation305_spill] sm:$0xff] }
 0x841   : > { %v3941_v58 = vsub.f32 %v10688_v24, %v16207_v6  ;;  %4951 = vperm.xlu1 %8603, %v16210_v49   ;;  %v5530_v33 = vadd.f32 %v5466_v25, %v4442_v22  ;;  %v6555_v51 = vmul.f32 %v16211_v62, %v6363_v52  ;;  %v6554_v56 = vmul.f32 %v16211_v62, %v6362_v36  ;;  %v16226_v6 = vld [vmem:[#allocation64_spill] sm:$0xff] }
 0x842   : > { %v5531_v19 = vadd.f32 %v5467_v59, %v4443_v57  ;;  %v16213_v7 = vsub.f32 1.0, %v16212_v11  ;;  %v16216_v26 = vsub.f32 1.0, %v16215_v28  ;;  %v4004_v23 = vand.u32 2147483647, %v3940_v37  ;;  %v12955_v35 = vpop.permute.xlu1 %6007  ;;  %v16227_v59 = vld [vmem:[#allocation224_spill] sm:$0xff]  ;;  %v16230_v28 = vld [vmem:[#allocation125_spill] sm:$0xff] }
 0x843   : > { %v3934_v55 = vsub.f32 %v10685_v38, %v16218_v43  ;;  %v12949_v3 = vmul.f32 %v16220_v18, %v16219_v48  ;;  %v12953_v63 = vmul.f32 %v16223_v4, %v16222_v39  ;;  %v6618_v36 = vadd.f32 %v6554_v56, %v5530_v33  ;;  %v16228_v62 = vld [vmem:[#allocation116_spill] sm:$0xff]  ;;  %v16229_v56 = vld [vmem:[#allocation281_spill] sm:$0xff] }
 0x844   : > { %v12939_v61 = vmax.f32 %v16213_v7, 0.0  ;;  %v12943_v44 = vmax.f32 %v16216_v26, 0.0  ;;  %v6619_v31 = vadd.f32 %v6555_v51, %v5531_v19  ;;  %v4124_v52 = vmax.f32 %v4060_v32, 0.0 }
 0x845   : > { %16221 = vst [vmem:[#allocation247_spill] sm:$0xff] %v12949_v3  ;;  %16224 = vst [vmem:[#allocation249_spill] sm:$0xff] %v12953_v63  ;;  %v4125_v13 = vmax.f32 %v4061_v42, 0.0  ;;  %v4005_v1 = vand.u32 2147483647, %v3941_v58  ;;  %v3944_v54 = vsub.f32 %v10685_v38, %v16225_v15  ;;  %4967 = vperm.xlu1 %8603, %v16226_v6   ;;  %v4128_v37 = vmax.f32 %v4064_v30, 0.0 }
 0x846   : > { %16214 = vst [vmem:[#allocation110_spill] sm:$0xff] %v12939_v61  ;;  %16217 = vst [vmem:[#allocation246_spill] sm:$0xff] %v12943_v44  ;;  %v4129_v22 = vmax.f32 %v4065_v46, 0.0  ;;  %v3945_v40 = vsub.f32 %v10688_v24, %v16225_v15  ;;  %v3935_v0 = vsub.f32 %v10688_v24, %v16218_v43  ;;  %6776 = vmatprep.mubr.f32.mxu0 %v6619_v31  ;;  %v4068_v57 = vsub.f32 1.0, %v4004_v23  ;;  %v16232_v43 = vld [vmem:[#allocation219_spill] sm:$0xff]  ;;  %v16233_v15 = vld [vmem:[#allocation54_spill] sm:$0xff] }
 0x847   : > { %v3998_v25 = vand.u32 2147483647, %v3934_v55  ;;  %v4636_v32 = vsub.f32 %v10707_v41, %v16227_v59  ;;  %v4637_v10 = vsub.f32 %v10710_v17, %v16227_v59  ;;  %6777 = vmatmul.mubr.f32.gmra.mxu0 %v6618_v36  ;;  %v12968_v42 = vmax.f32 %v2558_v34, 0.0  ;;  %v12985_v34 = vpop.permute.xlu1 %4923  ;;  %v16237_v44 = vld [vmem:[#allocation218_spill] sm:$0xff]  ;;  %v16240_v63 = vld [vmem:[#allocation93_spill] sm:$0xff] }
 0x848   : > { %v12970_v30 = vmax.f32 %v2559_v21, 0.0  ;;  %v5020_v46 = vsub.f32 %v10685_v38, %v12856_v27  ;;  %v5021_v58 = vsub.f32 %v10688_v24, %v12856_v27  ;;  %v4069_v33 = vsub.f32 1.0, %v4005_v1  ;;  %v16231_v27 = vld [vmem:[#allocation7_spill] sm:$0xff] }
 0x849   : > { %v12976_v19 = vand.u32 2147483647, %v3944_v54  ;;  %v12979_v51 = vmul.f32 %v4124_v52, %v16228_v62  ;;  %v12982_v11 = vmul.f32 %v4125_v13, %v16229_v56  ;;  %8605 = vset.pattern.permute.xlu1 %v15808_v2  ;;  %v12987_v21 = vand.u32 2147483647, %v3945_v40  ;;  %v16236_v40 = vld [vmem:[#allocation59_spill] sm:$0xff] }
 0x84a   : > { %v3999_v7 = vand.u32 2147483647, %v3935_v0  ;;  %v12990_v26 = vmul.f32 %v4128_v37, %v16230_v28  ;;  %v12993_v23 = vmul.f32 %v4129_v22, %v16231_v27  ;;  %5391 = vperm.xlu1 %8605, %v16232_v43   ;;  %v12996_v55 = vmax.f32 %v4068_v57, 0.0  ;;  %v16234_v37 = vld [vmem:[#allocation227_spill] sm:$0xff] }
 0x84b   : > { %v4062_v48 = vsub.f32 1.0, %v3998_v25  ;;  %v4700_v18 = vand.u32 2147483647, %v4636_v32  ;;  %v4701_v39 = vand.u32 2147483647, %v4637_v10  ;;  %v6108_v36 = vsub.f32 %v10685_v38, %v12902_v60 }
 0x84c   : > { %v5084_v4 = vand.u32 2147483647, %v5020_v46  ;;  %v5085_v31 = vand.u32 2147483647, %v5021_v58  ;;  %v6109_v52 = vsub.f32 %v10688_v24, %v12902_v60  ;;  %v13002_v13 = vmax.f32 %v4069_v33, 0.0  ;;  %v16235_v58 = vld [vmem:[#allocation53_spill] sm:$0xff] }
 0x84d   : > { %v3948_v54 = vsub.f32 %v10685_v38, %v16233_v15  ;;  %v4640_v22 = vsub.f32 %v10707_v41, %v16234_v37  ;;  %v5724_v57 = vsub.f32 %v10707_v41, %v12887_v12  ;;  %v5725_v60 = vsub.f32 %v10710_v17, %v12887_v12  ;;  %v5364_v25 = vpop.permute.xlu1 %5363 }
 0x84e   : > { %8606 = vset.pattern.permute.xlu1 %v15755_v14  ;;  %v4063_v59 = vsub.f32 1.0, %v3999_v7  ;;  %v4126_v32 = vmax.f32 %v4062_v48, 0.0  ;;  %v4764_v10 = vsub.f32 1.0, %v4700_v18  ;;  %v4765_v46 = vsub.f32 1.0, %v4701_v39 }
 0x84f   : > { %5655 = vperm.xlu1 %8606, %v16235_v58   ;;  %v5148_v33 = vsub.f32 1.0, %v5084_v4  ;;  %v5149_v62 = vsub.f32 1.0, %v5085_v31  ;;  %v6172_v56 = vand.u32 2147483647, %v6108_v36  ;;  %v6173_v28 = vand.u32 2147483647, %v6109_v52 }
 0x850   : > { %v13018_v27 = vand.u32 2147483647, %v3948_v54  ;;  %v4641_v12 = vsub.f32 %v10710_v17, %v16234_v37  ;;  %v4704_v1 = vand.u32 2147483647, %v4640_v22  ;;  %v4638_v7 = vsub.f32 %v10707_v41, %v16237_v44  ;;  %v16238_v52 = vld [vmem:[#allocation280_spill] sm:$0xff] }
 0x851   : > { %v4639_v48 = vsub.f32 %v10710_v17, %v16237_v44  ;;  %v5788_v18 = vand.u32 2147483647, %v5724_v57  ;;  %v5789_v39 = vand.u32 2147483647, %v5725_v60  ;;  %v13028_v4 = vmax.f32 %v4063_v59, 0.0  ;;  %v16239_v60 = vld [vmem:[#allocation89_spill] sm:$0xff] }
 0x852   : > { %v4828_v31 = vmax.f32 %v4764_v10, 0.0  ;;  %v4829_v36 = vmax.f32 %v4765_v46, 0.0  ;;  %v13031_v54 = vmul.f32 %v4126_v32, %v16238_v52  ;;  %v13034_v58 = vpop.permute.xlu1 %5627  ;;  %v5212_v37 = vmax.f32 %v5148_v33, 0.0 }
 0x853   : > { %8607 = vset.pattern.permute.xlu1 %v15745_v16  ;;  %v5213_v22 = vmax.f32 %v5149_v62, 0.0  ;;  %v6236_v0 = vsub.f32 1.0, %v6172_v56  ;;  %v6237_v61 = vsub.f32 1.0, %v6173_v28  ;;  %v4705_v44 = vand.u32 2147483647, %v4641_v12  ;;  %v16241_v56 = vld [vmem:[#allocation136_spill] sm:$0xff] }
 0x854   : > { %6039 = vperm.xlu1 %8607, %v16210_v49   ;;  %v4768_v57 = vsub.f32 1.0, %v4704_v1  ;;  %v5022_v59 = vsub.f32 %v10685_v38, %v16239_v60  ;;  %v5023_v10 = vsub.f32 %v10688_v24, %v16239_v60  ;;  %v4702_v32 = vand.u32 2147483647, %v4638_v7  ;;  %v16242_v49 = vld [vmem:[#allocation260_spill] sm:$0xff]  ;;  %v16243_v1 = vld [vmem:[#allocation118_spill] sm:$0xff] }
 0x855   : > { %v4703_v46 = vand.u32 2147483647, %v4639_v48  ;;  %v5852_v52 = vsub.f32 1.0, %v5788_v18  ;;  %v5853_v8 = vsub.f32 1.0, %v5789_v39  ;;  %v4380_v33 = vmul.f32 %v16240_v63, %v12979_v51 }
 0x856   : > { %v4381_v62 = vmul.f32 %v16240_v63, %v12982_v11  ;;  %v3292_v28 = vmul.f32 %v16242_v49, %v16241_v56  ;;  %v3293_v12 = vmul.f32 %v16242_v49, %v16243_v1  ;;  %v6300_v3 = vmax.f32 %v6236_v0, 0.0 }
 0x857   : > { %v6301_v47 = vmax.f32 %v6237_v61, 0.0  ;;  %v5276_v50 = vmul.f32 %v5212_v37, %v4828_v31  ;;  %v5277_v60 = vmul.f32 %v5213_v22, %v4829_v36  ;;  %v13050_v7 = vpop.permute.xlu1 %4927  ;;  %v4769_v48 = vsub.f32 1.0, %v4705_v44  ;;  %v16244_v22 = vld [vmem:[#allocation242_spill] sm:$0xff] }
 0x858   : > { %6055 = vperm.xlu1 %8607, %v16226_v6   ;;  %v13052_v18 = vmax.f32 %v4768_v57, 0.0  ;;  %v5086_v51 = vand.u32 2147483647, %v5022_v59  ;;  %v5087_v39 = vand.u32 2147483647, %v5023_v10  ;;  %v5916_v63 = vmax.f32 %v5852_v52, 0.0  ;;  %v6012_v52 = vpop.permute.xlu0 %6011 }
 0x859   : > { %v5917_v11 = vmax.f32 %v5853_v8, 0.0  ;;  %v5468_v5 = vmul.f32 %v5364_v25, %v5276_v50  ;;  %v5469_v56 = vmul.f32 %v5364_v25, %v5277_v60  ;;  %v4766_v53 = vsub.f32 1.0, %v4702_v32  ;;  %v16245_v57 = vld [vmem:[#allocation90_spill] sm:$0xff] }
 0x85a   : > { %v4767_v9 = vsub.f32 1.0, %v4703_v46  ;;  %v6110_v61 = vsub.f32 %v10685_v38, %v12955_v35  ;;  %v6111_v0 = vsub.f32 %v10688_v24, %v12955_v35  ;;  %v4444_v6 = vadd.f32 %v4380_v33, %v3292_v28 }
 0x85b   : > { %v4445_v31 = vadd.f32 %v4381_v62, %v3293_v12  ;;  %v6364_v36 = vmul.f32 %v6300_v3, %v5916_v63  ;;  %v6365_v37 = vmul.f32 %v6301_v47, %v5917_v11  ;;  %v5726_v44 = vsub.f32 %v10707_v41, %v16244_v22 }
 0x85c   : > { %8608 = vset.pattern.permute.xlu1 %v15838_v45  ;;  %v5727_v8 = vsub.f32 %v10710_v17, %v16244_v22  ;;  %v5150_v50 = vsub.f32 1.0, %v5086_v51  ;;  %v5151_v25 = vsub.f32 1.0, %v5087_v39  ;;  %v6452_v59 = vpop.permute.xlu1 %6451  ;;  %v5532_v10 = vadd.f32 %v5468_v5, %v4444_v6  ;;  %v16247_v22 = vld [vmem:[#allocation284_spill] sm:$0xff] }
 0x85d   : > { %4971 = vperm.xlu1 %8608, %v16245_v57   ;;  %v5533_v32 = vadd.f32 %v5469_v56, %v4445_v31  ;;  %v6556_v35 = vmul.f32 %v6452_v59, %v6364_v36  ;;  %v6557_v46 = vmul.f32 %v6452_v59, %v6365_v37  ;;  %v6174_v33 = vand.u32 2147483647, %v6110_v61 }
 0x85e   : > { %v6175_v62 = vand.u32 2147483647, %v6111_v0  ;;  %v5024_v47 = vsub.f32 %v10685_v38, %v12985_v34  ;;  %v5025_v3 = vsub.f32 %v10688_v24, %v12985_v34  ;;  %v5728_v49 = vsub.f32 %v10707_v41, %v13034_v58 }
 0x85f   : > { %v5729_v28 = vsub.f32 %v10710_v17, %v13034_v58  ;;  %v6621_v1 = vadd.f32 %v6557_v46, %v5533_v32  ;;  %v6620_v5 = vadd.f32 %v6556_v35, %v5532_v10  ;;  %v13072_v12 = vmax.f32 %v4769_v48, 0.0 }
 0x860   : > { %v4830_v60 = vmax.f32 %v4766_v53, 0.0  ;;  %v5790_v51 = vand.u32 2147483647, %v5726_v44  ;;  %v5791_v39 = vand.u32 2147483647, %v5727_v8  ;;  %v4831_v63 = vmax.f32 %v4767_v9, 0.0 }
 0x861   : > { %8609 = vset.pattern.permute.xlu1 %v16157_v29  ;;  %v5214_v11 = vmax.f32 %v5150_v50, 0.0  ;;  %v6112_v56 = vsub.f32 %v10685_v38, %v6012_v52  ;;  %v6113_v34 = vsub.f32 %v10688_v24, %v6012_v52  ;;  %v13078_v61 = vpop.permute.xlu1 %5631  ;;  %6781 = vmatprep.mubr.f32.mxu0 %v6621_v1  ;;  %v5215_v58 = vmax.f32 %v5151_v25, 0.0  ;;  %v16246_v53 = vld [vmem:[#allocation114_spill] sm:$0xff]  ;;  %v16248_v44 = vld [vmem:[#allocation268_spill] sm:$0xff]  ;;  %v16249_v50 = vld [vmem:[#allocation285_spill] sm:$0xff] }
 0x862   : > { %6479 = vperm.xlu1 %8609, %v16232_v43   ;;  %v6238_v0 = vsub.f32 1.0, %v6174_v33  ;;  %v6239_v48 = vsub.f32 1.0, %v6175_v62  ;;  %v5088_v6 = vand.u32 2147483647, %v5024_v47  ;;  %6782 = vmatmul.mubr.f32.gmra.mxu0 %v6620_v5  ;;  %v4191_v31 = vmul.f32 %v13028_v4, %v16246_v53  ;;  %v16250_v25 = vld [vmem:[#allocation269_spill] sm:$0xff] }
 0x863   : > { %v5089_v36 = vand.u32 2147483647, %v5025_v3  ;;  %v5792_v9 = vand.u32 2147483647, %v5728_v49  ;;  %v5793_v37 = vand.u32 2147483647, %v5729_v28  ;;  %v3294_v8 = vmul.f32 %v16248_v44, %v16247_v22 }
 0x864   : > { %v3295_v43 = vmul.f32 %v16248_v44, %v16249_v50  ;;  %v5854_v59 = vsub.f32 1.0, %v5790_v51  ;;  %v5855_v10 = vsub.f32 1.0, %v5791_v39  ;;  %v4382_v32 = vmul.f32 %v16250_v25, %v13031_v54  ;;  %v16251_v3 = vld [vmem:[#allocation50_spill] sm:$0xff] }
 0x865   : > { %v4383_v35 = vmul.f32 %v16250_v25, %v4191_v31  ;;  %v6176_v46 = vand.u32 2147483647, %v6112_v56  ;;  %v6177_v52 = vand.u32 2147483647, %v6113_v34  ;;  %v5278_v4 = vmul.f32 %v5214_v11, %v4830_v60  ;;  %v16252_v34 = vld [vmem:[#allocation98_spill] sm:$0xff]  ;;  %v16254_v25 = vld [vmem:[#allocation197_spill] sm:$0xff] }
 0x866   : > { %8610 = vset.pattern.permute.xlu1 %v15755_v14  ;;  %v5279_v33 = vmul.f32 %v5215_v58, %v4831_v63  ;;  %v6302_v62 = vmax.f32 %v6238_v0, 0.0  ;;  %v6303_v47 = vmax.f32 %v6239_v48, 0.0  ;;  %v13091_v49 = vpop.permute.xlu1 %6015  ;;  %v5152_v28 = vsub.f32 1.0, %v5088_v6  ;;  %v16253_v6 = vld [vmem:[#allocation60_spill] sm:$0xff] }
 0x867   : > { %5659 = vperm.xlu1 %8610, %v16251_v3   ;;  %v5153_v1 = vsub.f32 1.0, %v5089_v36  ;;  %v5856_v5 = vsub.f32 1.0, %v5792_v9  ;;  %v5857_v51 = vsub.f32 1.0, %v5793_v37  ;;  %v5918_v39 = vmax.f32 %v5854_v59, 0.0 }
 0x868   : > { %v5919_v54 = vmax.f32 %v5855_v10, 0.0  ;;  %v5470_v53 = vmul.f32 %v12748_v20, %v5278_v4  ;;  %v5471_v56 = vmul.f32 %v12748_v20, %v5279_v33  ;;  %v4384_v60 = vmul.f32 %v16252_v34, %v12990_v26  ;;  %v16255_v4 = vld [vmem:[#allocation119_spill] sm:$0xff] }
 0x869   : > { %v4385_v63 = vmul.f32 %v16252_v34, %v12993_v23  ;;  %v6240_v11 = vsub.f32 1.0, %v6176_v46  ;;  %v6241_v58 = vsub.f32 1.0, %v6177_v52  ;;  %v4446_v0 = vadd.f32 %v4382_v32, %v3294_v8  ;;  %v16256_v46 = vld [vmem:[#allocation202_spill] sm:$0xff]  ;;  %v16257_v52 = vld [vmem:[#allocation180_spill] sm:$0xff] }
 0x86a   : > { %v4447_v48 = vadd.f32 %v4383_v35, %v3295_v43  ;;  %v6366_v31 = vmul.f32 %v6302_v62, %v5918_v39  ;;  %v6367_v36 = vmul.f32 %v6303_v47, %v5919_v54  ;;  %v5216_v9 = vmax.f32 %v5152_v28, 0.0 }
 0x86b   : > { %5675 = vperm.xlu1 %8610, %v16253_v6   ;;  %v5217_v37 = vmax.f32 %v5153_v1, 0.0  ;;  %v5920_v22 = vmax.f32 %v5856_v5, 0.0  ;;  %v5921_v44 = vmax.f32 %v5857_v51, 0.0  ;;  %v6456_v50 = vpop.permute.xlu1 %6455  ;;  %v5534_v20 = vadd.f32 %v5470_v53, %v4446_v0 }
 0x86c   : > { %v5535_v59 = vadd.f32 %v5471_v56, %v4447_v48  ;;  %v6558_v10 = vmul.f32 %v6456_v50, %v6366_v31  ;;  %v6559_v26 = vmul.f32 %v6456_v50, %v6367_v36  ;;  %v3296_v23 = vmul.f32 %v16255_v4, %v16254_v25  ;;  %v16269_v25 = vld [vmem:[#allocation135_spill] sm:$0xff] }
 0x86d   : > { %v3297_v8 = vmul.f32 %v16255_v4, %v16256_v46  ;;  %v6304_v43 = vmax.f32 %v6240_v11, 0.0  ;;  %v6305_v32 = vmax.f32 %v6241_v58, 0.0  ;;  %v3953_v35 = vsub.f32 %v10688_v24, %v16236_v40 }
 0x86e   : > { %v3938_v33 = vsub.f32 %v10685_v38, %v16257_v52  ;;  %v6623_v62 = vadd.f32 %v6559_v26, %v5535_v59  ;;  %v6622_v47 = vadd.f32 %v6558_v10, %v5534_v20  ;;  %v5280_v1 = vmul.f32 %v5216_v9, %v13052_v18  ;;  %v16266_v20 = vld [vmem:[#allocation74_spill] sm:$0xff]  ;;  %v16268_v10 = vld [vmem:[#allocation57_spill] sm:$0xff] }
 0x86f   : > { %8611 = vset.pattern.permute.xlu1 %v15745_v16  ;;  %v6368_v3 = vmul.f32 %v6304_v43, %v5920_v22  ;;  %v6369_v28 = vmul.f32 %v6305_v32, %v5921_v44  ;;  %v5281_v5 = vmul.f32 %v5217_v37, %v13072_v12  ;;  %v16258_v51 = vsub.f32 1.0, %v12976_v19  ;;  %v16264_v44 = vld [vmem:[#allocation67_spill] sm:$0xff] }
 0x870   : > { %6059 = vperm.xlu1 %8611, %v16245_v57   ;;  %v16259_v54 = vsub.f32 %v10688_v24, %v16233_v15  ;;  %v4076_v56 = vsub.f32 1.0, %v13018_v27  ;;  %v16260_v34 = vsub.f32 %v10685_v38, %v16236_v40  ;;  %v5372_v58 = vpop.permute.xlu1 %5371  ;;  %6786 = vmatprep.mubr.f32.mxu0 %v6623_v62  ;;  %v4448_v57 = vadd.f32 %v4384_v60, %v3296_v23  ;;  %v16261_v15 = vld [vmem:[#allocation181_spill] sm:$0xff]  ;;  %v16262_v40 = vld [vmem:[#allocation176_spill] sm:$0xff] }
 0x871   : > { %v4136_v39 = vmax.f32 %v16258_v51, 0.0  ;;  %v4449_v0 = vadd.f32 %v4385_v63, %v3297_v8  ;;  %v5472_v18 = vmul.f32 %v5372_v58, %v5280_v1  ;;  %v5473_v48 = vmul.f32 %v5372_v58, %v5281_v5  ;;  %6787 = vmatmul.mubr.f32.gmra.mxu0 %v6622_v47  ;;  %v16271_v62 = vld [vmem:[#allocation289_spill] sm:$0xff]  ;;  %v16273_v1 = vld [vmem:[#allocation70_spill] sm:$0xff] }
 0x872   : > { %v4013_v53 = vand.u32 2147483647, %v16259_v54  ;;  %v4016_v11 = vand.u32 2147483647, %v16260_v34  ;;  %v4017_v12 = vand.u32 2147483647, %v3953_v35  ;;  %v3939_v19 = vsub.f32 %v10688_v24, %v16257_v52 }
 0x873   : > { %v4002_v6 = vand.u32 2147483647, %v3938_v33  ;;  %v3942_v31 = vsub.f32 %v10685_v38, %v16261_v15  ;;  %v5536_v27 = vadd.f32 %v5472_v18, %v4448_v57  ;;  %v5537_v36 = vadd.f32 %v5473_v48, %v4449_v0  ;;  %v16274_v51 = vld [vmem:[#allocation158_spill] sm:$0xff]  ;;  %v16278_v48 = vld [vmem:[#allocation32_spill] sm:$0xff] }
 0x874   : > { %8612 = vset.pattern.permute.xlu1 %v15838_v45  ;;  %v6561_v9 = vmul.f32 %v16262_v40, %v6369_v28  ;;  %v6560_v60 = vmul.f32 %v16262_v40, %v6368_v3  ;;  %v16263_v63 = vsub.f32 1.0, %v12987_v21  ;;  %v3943_v22 = vsub.f32 %v10688_v24, %v16261_v15  ;;  %v16277_v0 = vld [vmem:[#allocation222_spill] sm:$0xff] }
 0x875   : > { %v13134_v50 = vmul.f32 %v16264_v44, %v12968_v42  ;;  %v13138_v59 = vmul.f32 %v16266_v20, %v12970_v30  ;;  %4959 = vperm.xlu1 %8612, %v16268_v10   ;;  %v4077_v26 = vsub.f32 1.0, %v4013_v53  ;;  %v13143_v4 = vmul.f32 %v12996_v55, %v16269_v25  ;;  %v13145_v21 = vpop.permute.xlu1 %6019  ;;  %v16270_v42 = vld [vmem:[#allocation112_spill] sm:$0xff]  ;;  %v16272_v55 = vld [vmem:[#allocation66_spill] sm:$0xff] }
 0x876   : > { %v4137_v37 = vmax.f32 %v16263_v63, 0.0  ;;  %v6625_v23 = vadd.f32 %v6561_v9, %v5537_v36  ;;  %v6624_v46 = vadd.f32 %v6560_v60, %v5536_v27  ;;  %v4140_v8 = vmax.f32 %v4076_v56, 0.0 }
 0x877   : > { %16265 = vst [vmem:[#allocation207_spill] sm:$0xff] %v13134_v50  ;;  %16267 = vst [vmem:[#allocation261_spill] sm:$0xff] %v13138_v59  ;;  %v4003_v43 = vand.u32 2147483647, %v3939_v19  ;;  %v4006_v32 = vand.u32 2147483647, %v3942_v31  ;;  %v13149_v35 = vmul.f32 %v13002_v13, %v16270_v42  ;;  %v13152_v47 = vmul.f32 %v4136_v39, %v16271_v62  ;;  %v13162_v13 = vpop.f32.mrf.mxu0 }
 0x878   : > { %v4080_v30 = vsub.f32 1.0, %v4016_v11  ;;  %v4081_v52 = vsub.f32 1.0, %v4017_v12  ;;  %v4066_v33 = vsub.f32 1.0, %v4002_v6  ;;  %6791 = vmatprep.mubr.f32.mxu0 %v6625_v23  ;;  %v3956_v3 = vsub.f32 %v10685_v38, %v16272_v55  ;;  %16275 = vst [vmem:[#allocation87_spill] sm:$0xff] %v13162_v13  ;;  %v16276_v11 = vld [vmem:[#allocation217_spill] sm:$0xff]  ;;  %v16279_v23 = vld [vmem:[#allocation223_spill] sm:$0xff] }
 0x879   : > { %v4007_v28 = vand.u32 2147483647, %v3943_v22  ;;  %v4644_v5 = vsub.f32 %v10707_v41, %v16273_v1  ;;  %v13159_v54 = vmul.f32 %v4137_v37, %v16274_v51  ;;  %8613 = vset.pattern.permute.xlu1 %v16157_v29  ;;  %6792 = vmatmul.mubr.f32.gmra.mxu0 %v6624_v46  ;;  %v13164_v53 = vmax.f32 %v4077_v26, 0.0  ;;  %v6730_v6 = vpop.f32.mrf.mxu0  ;;  %v16281_v62 = vld [vmem:[#allocation230_spill] sm:$0xff] }
 0x87a   : > { %v3957_v39 = vsub.f32 %v10688_v24, %v16272_v55  ;;  %v5026_v56 = vsub.f32 %v10685_v38, %v13050_v7  ;;  %v5027_v34 = vsub.f32 %v10688_v24, %v13050_v7  ;;  %6483 = vperm.xlu1 %8613, %v16276_v11   ;;  %v4067_v58 = vsub.f32 1.0, %v4003_v43  ;;  %v13178_v19 = vpop.permute.xlu1 %4935  ;;  %v16285_v6 = vld [vmem:[#allocation58_spill] sm:$0xff] }
 0x87b   : > { %v4070_v57 = vsub.f32 1.0, %v4006_v32  ;;  %v4642_v18 = vsub.f32 %v10707_v41, %v16277_v0  ;;  %v13176_v12 = vmul.f32 %v4140_v8, %v16278_v48  ;;  %v13180_v15 = vmax.f32 %v4080_v30, 0.0  ;;  %v16280_v8 = vld [vmem:[#allocation283_spill] sm:$0xff] }
 0x87c   : > { %v13182_v31 = vmax.f32 %v4081_v52, 0.0  ;;  %v4130_v27 = vmax.f32 %v4066_v33, 0.0  ;;  %v4643_v7 = vsub.f32 %v10710_v17, %v16277_v0  ;;  %v13186_v36 = vand.u32 2147483647, %v3956_v3 }
 0x87d   : > { %v4071_v40 = vsub.f32 1.0, %v4007_v28  ;;  %v4645_v9 = vsub.f32 %v10710_v17, %v16273_v1  ;;  %v4708_v60 = vand.u32 2147483647, %v4644_v5  ;;  %v5090_v63 = vand.u32 2147483647, %v5026_v56 }
 0x87e   : > { %v5091_v37 = vand.u32 2147483647, %v5027_v34  ;;  %v6114_v22 = vsub.f32 %v10685_v38, %v13091_v49  ;;  %v6115_v44 = vsub.f32 %v10688_v24, %v13091_v49  ;;  %8614 = vset.pattern.permute.xlu1 %v15808_v2  ;;  %v13195_v20 = vand.u32 2147483647, %v3957_v39  ;;  %v16282_v39 = vld [vmem:[#allocation225_spill] sm:$0xff] }
 0x87f   : > { %v4131_v10 = vmax.f32 %v4067_v58, 0.0  ;;  %v4134_v26 = vmax.f32 %v4070_v57, 0.0  ;;  %v4706_v25 = vand.u32 2147483647, %v4642_v18  ;;  %5399 = vperm.xlu1 %8614, %v16279_v23   ;;  %v4707_v46 = vand.u32 2147483647, %v4643_v7  ;;  %v5376_v30 = vpop.permute.xlu1 %5375 }
 0x880   : > { %v4194_v43 = vmul.f32 %v4130_v27, %v16280_v8  ;;  %v5730_v32 = vsub.f32 %v10707_v41, %v13078_v61  ;;  %v5731_v42 = vsub.f32 %v10710_v17, %v13078_v61  ;;  %v4135_v49 = vmax.f32 %v4071_v40, 0.0  ;;  %v16283_v34 = vld [vmem:[#allocation121_spill] sm:$0xff]  ;;  %v16284_v58 = vld [vmem:[#allocation143_spill] sm:$0xff] }
 0x881   : > { %v4709_v52 = vand.u32 2147483647, %v4645_v9  ;;  %v4772_v33 = vsub.f32 1.0, %v4708_v60  ;;  %v4648_v55 = vsub.f32 %v10707_v41, %v16281_v62  ;;  %v5154_v3 = vsub.f32 1.0, %v5090_v63  ;;  %v16286_v9 = vld [vmem:[#allocation266_spill] sm:$0xff] }
 0x882   : > { %v5155_v28 = vsub.f32 1.0, %v5091_v37  ;;  %v6178_v1 = vand.u32 2147483647, %v6114_v22  ;;  %v6179_v5 = vand.u32 2147483647, %v6115_v44  ;;  %v4770_v51 = vsub.f32 1.0, %v4706_v25 }
 0x883   : > { %v4646_v56 = vsub.f32 %v10707_v41, %v16282_v39  ;;  %v4195_v11 = vmul.f32 %v4131_v10, %v16283_v34  ;;  %v13209_v57 = vmul.f32 %v4134_v26, %v16284_v58  ;;  %8615 = vset.pattern.permute.xlu1 %v15755_v14  ;;  %v4771_v61 = vsub.f32 1.0, %v4707_v46  ;;  %v16287_v46 = vld [vmem:[#allocation232_spill] sm:$0xff] }
 0x884   : > { %v4647_v0 = vsub.f32 %v10710_v17, %v16282_v39  ;;  %v5794_v18 = vand.u32 2147483647, %v5730_v32  ;;  %v5795_v48 = vand.u32 2147483647, %v5731_v42  ;;  %5663 = vperm.xlu1 %8615, %v16285_v6   ;;  %v4773_v27 = vsub.f32 1.0, %v4709_v52  ;;  %v13222_v63 = vpop.permute.xlu1 %5639  ;;  %v16292_v39 = vld [vmem:[#allocation126_spill] sm:$0xff] }
 0x885   : > { %v13215_v7 = vmax.f32 %v4772_v33, 0.0  ;;  %v13217_v40 = vand.u32 2147483647, %v4648_v55  ;;  %v13220_v60 = vmul.f32 %v4135_v49, %v16286_v9  ;;  %v5218_v37 = vmax.f32 %v5154_v3, 0.0  ;;  %v16288_v55 = vld [vmem:[#allocation113_spill] sm:$0xff]  ;;  %v16289_v3 = vld [vmem:[#allocation12_spill] sm:$0xff] }
 0x886   : > { %v5219_v22 = vmax.f32 %v5155_v28, 0.0  ;;  %v6242_v44 = vsub.f32 1.0, %v6178_v1  ;;  %v6243_v10 = vsub.f32 1.0, %v6179_v5  ;;  %v4834_v26 = vmax.f32 %v4770_v51, 0.0  ;;  %v16290_v28 = vld [vmem:[#allocation103_spill] sm:$0xff]  ;;  %v16291_v5 = vld [vmem:[#allocation152_spill] sm:$0xff] }
 0x887   : > { %v13224_v25 = vand.u32 2147483647, %v4646_v56  ;;  %v5028_v8 = vsub.f32 %v10685_v38, %v16287_v46  ;;  %v5029_v32 = vsub.f32 %v10688_v24, %v16287_v46  ;;  %v4835_v42 = vmax.f32 %v4771_v61, 0.0 }
 0x888   : > { %v13230_v52 = vand.u32 2147483647, %v4647_v0  ;;  %v5858_v49 = vsub.f32 1.0, %v5794_v18  ;;  %v5859_v33 = vsub.f32 1.0, %v5795_v48  ;;  %5679 = vperm.xlu1 %8615, %v16288_v55   ;;  %v3298_v1 = vmul.f32 %v16290_v28, %v16289_v3 }
 0x889   : > { %v3299_v51 = vmul.f32 %v16290_v28, %v16291_v5  ;;  %v4386_v56 = vmul.f32 %v16292_v39, %v4194_v43  ;;  %v4387_v34 = vmul.f32 %v16292_v39, %v4195_v11  ;;  %v6306_v58 = vmax.f32 %v6242_v44, 0.0  ;;  %v13239_v0 = vpop.permute.xlu1 %4939  ;;  %v16293_v11 = vld [vmem:[#allocation272_spill] sm:$0xff] }
 0x88a   : > { %v6307_v6 = vmax.f32 %v6243_v10, 0.0  ;;  %v5282_v9 = vmul.f32 %v5218_v37, %v4834_v26  ;;  %v5283_v61 = vmul.f32 %v5219_v22, %v4835_v42  ;;  %v13241_v18 = vmax.f32 %v4773_v27, 0.0  ;;  %v16294_v44 = vld [vmem:[#allocation84_spill] sm:$0xff] }
 0x88b   : > { %v4774_v48 = vsub.f32 1.0, %v13224_v25  ;;  %v5092_v46 = vand.u32 2147483647, %v5028_v8  ;;  %v5093_v55 = vand.u32 2147483647, %v5029_v32  ;;  %v5922_v3 = vmax.f32 %v5858_v49, 0.0 }
 0x88c   : > { %v5923_v13 = vmax.f32 %v5859_v33, 0.0  ;;  %v5474_v59 = vmul.f32 %v5376_v30, %v5282_v9  ;;  %v5475_v28 = vmul.f32 %v5376_v30, %v5283_v61  ;;  %8616 = vset.pattern.permute.xlu1 %v15745_v16  ;;  %v4775_v43 = vsub.f32 1.0, %v13230_v52  ;;  %v16295_v30 = vld [vmem:[#allocation28_spill] sm:$0xff] }
 0x88d   : > { %v4388_v37 = vmul.f32 %v16293_v11, %v13143_v4  ;;  %v6116_v22 = vsub.f32 %v10685_v38, %v13145_v21  ;;  %v6117_v27 = vsub.f32 %v10688_v24, %v13145_v21  ;;  %6063 = vperm.xlu1 %8616, %v16294_v44   ;;  %v4450_v10 = vadd.f32 %v4386_v56, %v3298_v1  ;;  %v6024_v21 = vpop.permute.xlu0 %6023  ;;  %v16296_v56 = vld [vmem:[#allocation69_spill] sm:$0xff] }
 0x88e   : > { %v4451_v26 = vadd.f32 %v4387_v34, %v3299_v51  ;;  %v6370_v25 = vmul.f32 %v6306_v58, %v5922_v3  ;;  %v6371_v8 = vmul.f32 %v6307_v6, %v5923_v13  ;;  %v5732_v32 = vsub.f32 %v10707_v41, %v16295_v30 }
 0x88f   : > { %v5733_v42 = vsub.f32 %v10710_v17, %v16295_v30  ;;  %v5156_v52 = vsub.f32 1.0, %v5092_v46  ;;  %v5157_v4 = vsub.f32 1.0, %v5093_v55  ;;  %v6464_v49 = vpop.permute.xlu1 %6463  ;;  %v5538_v33 = vadd.f32 %v5474_v59, %v4450_v10  ;;  %v16297_v46 = vld [vmem:[#allocation115_spill] sm:$0xff]  ;;  %v16298_v55 = vld [vmem:[#allocation273_spill] sm:$0xff] }
 0x890   : > { %v5539_v5 = vadd.f32 %v5475_v28, %v4451_v26  ;;  %v6562_v39 = vmul.f32 %v6464_v49, %v6370_v25  ;;  %v6563_v9 = vmul.f32 %v6464_v49, %v6371_v8  ;;  %v6180_v61 = vand.u32 2147483647, %v6116_v22  ;;  %v16299_v22 = vld [vmem:[#allocation148_spill] sm:$0xff] }
 0x891   : > { %v6181_v44 = vand.u32 2147483647, %v6117_v27  ;;  %v5030_v1 = vsub.f32 %v10685_v38, %v13178_v19  ;;  %v5031_v13 = vsub.f32 %v10688_v24, %v13178_v19  ;;  %8617 = vset.pattern.permute.xlu1 %v15838_v45  ;;  %v5734_v51 = vsub.f32 %v10707_v41, %v13222_v63 }
 0x892   : > { %v5735_v59 = vsub.f32 %v10710_v17, %v13222_v63  ;;  %4963 = vperm.xlu1 %8617, %v16296_v56   ;;  %v6627_v34 = vadd.f32 %v6563_v9, %v5539_v5  ;;  %v6626_v58 = vadd.f32 %v6562_v39, %v5538_v33  ;;  %v4389_v6 = vmul.f32 %v16293_v11, %v13149_v35 }
 0x893   : > { %v3300_v3 = vmul.f32 %v16298_v55, %v16297_v46  ;;  %v5796_v28 = vand.u32 2147483647, %v5732_v32  ;;  %v5797_v19 = vand.u32 2147483647, %v5733_v42  ;;  %v3301_v27 = vmul.f32 %v16298_v55, %v16299_v22  ;;  %v16304_v22 = vld [vmem:[#allocation17_spill] sm:$0xff] }
 0x894   : > { %v5220_v10 = vmax.f32 %v5156_v52, 0.0  ;;  %v6118_v26 = vsub.f32 %v10685_v38, %v6024_v21  ;;  %v6119_v63 = vsub.f32 %v10688_v24, %v6024_v21  ;;  %v13275_v25 = vpop.permute.xlu1 %5643  ;;  %6796 = vmatprep.mubr.f32.mxu0 %v6627_v34  ;;  %v5221_v8 = vmax.f32 %v5157_v4, 0.0 }
 0x895   : > { %v6244_v30 = vsub.f32 1.0, %v6180_v61  ;;  %v6245_v49 = vsub.f32 1.0, %v6181_v44  ;;  %v5094_v35 = vand.u32 2147483647, %v5030_v1  ;;  %6797 = vmatmul.mubr.f32.gmra.mxu0 %v6626_v58  ;;  %v4649_v11 = vsub.f32 %v10710_v17, %v16281_v62 }
 0x896   : > { %v5095_v32 = vand.u32 2147483647, %v5031_v13  ;;  %v5798_v42 = vand.u32 2147483647, %v5734_v51  ;;  %v5799_v33 = vand.u32 2147483647, %v5735_v59  ;;  %8618 = vset.pattern.permute.xlu1 %v16157_v29  ;;  %v4452_v21 = vadd.f32 %v4388_v37, %v3300_v3 }
 0x897   : > { %v4838_v52 = vmax.f32 %v4774_v48, 0.0  ;;  %v4839_v5 = vmax.f32 %v4775_v43, 0.0  ;;  %v5860_v39 = vsub.f32 1.0, %v5796_v28  ;;  %v5861_v9 = vsub.f32 1.0, %v5797_v19  ;;  %6487 = vperm.xlu1 %8618, %v16279_v23   ;;  %v16300_v28 = vld [vmem:[#allocation238_spill] sm:$0xff]  ;;  %v16301_v37 = vld [vmem:[#allocation231_spill] sm:$0xff] }
 0x898   : > { %v4453_v4 = vadd.f32 %v4389_v6, %v3301_v27  ;;  %v6182_v61 = vand.u32 2147483647, %v6118_v26  ;;  %v6183_v44 = vand.u32 2147483647, %v6119_v63  ;;  %v5284_v1 = vmul.f32 %v5220_v10, %v13215_v7  ;;  %v16302_v6 = vld [vmem:[#allocation156_spill] sm:$0xff]  ;;  %v16303_v3 = vld [vmem:[#allocation278_spill] sm:$0xff] }
 0x899   : > { %v5285_v34 = vmul.f32 %v5221_v8, %v13241_v18  ;;  %v6308_v62 = vmax.f32 %v6244_v30, 0.0  ;;  %v6309_v13 = vmax.f32 %v6245_v49, 0.0  ;;  %v6028_v51 = vpop.permute.xlu1 %6027  ;;  %v5158_v59 = vsub.f32 1.0, %v5094_v35  ;;  %v16305_v26 = vld [vmem:[#allocation279_spill] sm:$0xff] }
 0x89a   : > { %v5159_v58 = vsub.f32 1.0, %v5095_v32  ;;  %v5862_v46 = vsub.f32 1.0, %v5798_v42  ;;  %v5863_v48 = vsub.f32 1.0, %v5799_v33  ;;  %v5924_v43 = vmax.f32 %v5860_v39, 0.0 }
 0x89b   : > { %v5925_v55 = vmax.f32 %v5861_v9, 0.0  ;;  %v5476_v19 = vmul.f32 %v16300_v28, %v5284_v1  ;;  %v5477_v23 = vmul.f32 %v16300_v28, %v5285_v34  ;;  %6503 = vperm.xlu1 %8618, %v16301_v37   ;;  %v3302_v7 = vmul.f32 %v16303_v3, %v16302_v6 }
 0x89c   : > { %v3303_v18 = vmul.f32 %v16303_v3, %v16304_v22  ;;  %v6246_v27 = vsub.f32 1.0, %v6182_v61  ;;  %v6247_v10 = vsub.f32 1.0, %v6183_v44  ;;  %v4390_v63 = vmul.f32 %v16305_v26, %v13209_v57 }
 0x89d   : > { %v4391_v8 = vmul.f32 %v16305_v26, %v13220_v60  ;;  %v6372_v30 = vmul.f32 %v6308_v62, %v5924_v43  ;;  %v6373_v49 = vmul.f32 %v6309_v13, %v5925_v55  ;;  %v5222_v35 = vmax.f32 %v5158_v59, 0.0  ;;  %v16306_v62 = vld [vmem:[#allocation71_spill] sm:$0xff] }
 0x89e   : > { %v5223_v32 = vmax.f32 %v5159_v58, 0.0  ;;  %v5926_v42 = vmax.f32 %v5862_v46, 0.0  ;;  %v5927_v33 = vmax.f32 %v5863_v48, 0.0  ;;  %v6468_v39 = vpop.permute.xlu1 %6467  ;;  %v5540_v9 = vadd.f32 %v5476_v19, %v4452_v21 }
 0x89f   : > { %v5541_v1 = vadd.f32 %v5477_v23, %v4453_v4  ;;  %v6564_v34 = vmul.f32 %v6468_v39, %v6372_v30  ;;  %v6565_v28 = vmul.f32 %v6468_v39, %v6373_v49  ;;  %8619 = vset.pattern.permute.xlu1 %v15808_v2  ;;  %v6310_v61 = vmax.f32 %v6246_v27, 0.0  ;;  %v16307_v27 = vld [vmem:[#allocation161_spill] sm:$0xff] }
 0x8a0   : > { %v6311_v44 = vmax.f32 %v6247_v10, 0.0  ;;  %v5032_v57 = vsub.f32 %v10685_v38, %v13239_v0  ;;  %v5033_v60 = vsub.f32 %v10688_v24, %v13239_v0  ;;  %5419 = vperm.xlu1 %8619, %v16306_v62   ;;  %v6120_v13 = vsub.f32 %v10685_v38, %v6028_v51  ;;  %v16308_v10 = vld [vmem:[#allocation55_spill] sm:$0xff]  ;;  %v16310_v49 = vld [vmem:[#allocation165_spill] sm:$0xff] }
 0x8a1   : > { %v6121_v59 = vsub.f32 %v10688_v24, %v6028_v51  ;;  %v6629_v21 = vadd.f32 %v6565_v28, %v5541_v1  ;;  %v6628_v4 = vadd.f32 %v6564_v34, %v5540_v9  ;;  %v6374_v58 = vmul.f32 %v6310_v61, %v5926_v42 }
 0x8a2   : > { %v6375_v46 = vmul.f32 %v6311_v44, %v5927_v33  ;;  %v5286_v48 = vmul.f32 %v5222_v35, %v4838_v52  ;;  %v5287_v43 = vmul.f32 %v5223_v32, %v4839_v5  ;;  %v4713_v55 = vand.u32 2147483647, %v4649_v11  ;;  %v16311_v33 = vld [vmem:[#allocation166_spill] sm:$0xff] }
 0x8a3   : > { %v4454_v19 = vadd.f32 %v4390_v63, %v3302_v7  ;;  %v5736_v23 = vsub.f32 %v10707_v41, %v13275_v25  ;;  %v5737_v0 = vsub.f32 %v10710_v17, %v13275_v25  ;;  %v5384_v37 = vpop.permute.xlu1 %5383  ;;  %6801 = vmatprep.mubr.f32.mxu0 %v6629_v21  ;;  %v4455_v6 = vadd.f32 %v4391_v8, %v3303_v18  ;;  %v16309_v63 = vld [vmem:[#allocation25_spill] sm:$0xff] }
 0x8a4   : > { %v5096_v3 = vand.u32 2147483647, %v5032_v57  ;;  %v5478_v22 = vmul.f32 %v5384_v37, %v5286_v48  ;;  %v5479_v51 = vmul.f32 %v5384_v37, %v5287_v43  ;;  %8620 = vset.pattern.permute.xlu1 %v15755_v14  ;;  %6802 = vmatmul.mubr.f32.gmra.mxu0 %v6628_v4  ;;  %v13309_v52 = vmul.f32 %v13164_v53, %v16307_v27  ;;  %v16313_v4 = vld [vmem:[#allocation295_spill] sm:$0xff] }
 0x8a5   : > { %v5097_v11 = vand.u32 2147483647, %v5033_v60  ;;  %v6184_v5 = vand.u32 2147483647, %v6120_v13  ;;  %v6185_v7 = vand.u32 2147483647, %v6121_v59  ;;  %5667 = vperm.xlu1 %8620, %v16308_v10   ;;  %v6567_v30 = vmul.f32 %v16309_v63, %v6375_v46 }
 0x8a6   : > { %v5542_v26 = vadd.f32 %v5478_v22, %v4454_v19  ;;  %v5543_v25 = vadd.f32 %v5479_v51, %v4455_v6  ;;  %v6566_v18 = vmul.f32 %v16309_v63, %v6374_v58  ;;  %v4084_v8 = vsub.f32 1.0, %v13186_v36  ;;  %v16315_v22 = vld [vmem:[#allocation26_spill] sm:$0xff] }
 0x8a7   : > { %v3960_v35 = vsub.f32 %v10685_v38, %v16310_v49  ;;  %v5800_v32 = vand.u32 2147483647, %v5736_v23  ;;  %v5801_v42 = vand.u32 2147483647, %v5737_v0  ;;  %v4085_v53 = vsub.f32 1.0, %v13195_v20  ;;  %v16312_v20 = vld [vmem:[#allocation2_spill] sm:$0xff] }
 0x8a8   : > { %v2852_v39 = vsub.f32 %v10685_v38, %v16311_v33  ;;  %v13320_v9 = vpop.permute.xlu1 %6031  ;;  %v6631_v1 = vadd.f32 %v6567_v30, %v5543_v25  ;;  %v6630_v34 = vadd.f32 %v6566_v18, %v5542_v26  ;;  %v5160_v28 = vsub.f32 1.0, %v5096_v3  ;;  %v16319_v26 = vld [vmem:[#allocation141_spill] sm:$0xff] }
 0x8a9   : > { %v5161_v61 = vsub.f32 1.0, %v5097_v11  ;;  %v6248_v44 = vsub.f32 1.0, %v6184_v5  ;;  %v6249_v57 = vsub.f32 1.0, %v6185_v7  ;;  %8621 = vset.pattern.permute.xlu1 %v15745_v16  ;;  %v3961_v36 = vsub.f32 %v10688_v24, %v16310_v49  ;;  %v16316_v11 = vld [vmem:[#allocation111_spill] sm:$0xff]  ;;  %v16318_v7 = vld [vmem:[#allocation276_spill] sm:$0xff] }
 0x8aa   : > { %v4776_v60 = vsub.f32 1.0, %v13217_v40  ;;  %v4777_v13 = vsub.f32 1.0, %v4713_v55  ;;  %v13328_v59 = vmul.f32 %v13180_v15, %v16312_v20  ;;  %6051 = vperm.xlu1 %8621, %v16296_v56   ;;  %6806 = vmatprep.mubr.f32.mxu0 %v6631_v1  ;;  %v13331_v21 = vand.u32 2147483647, %v3960_v35  ;;  %v16314_v55 = vld [vmem:[#allocation167_spill] sm:$0xff]  ;;  %v16321_v20 = vld [vmem:[#allocation168_spill] sm:$0xff] }
 0x8ab   : > { %v13335_v58 = vmul.f32 %v13182_v31, %v16313_v4  ;;  %v5864_v46 = vsub.f32 1.0, %v5800_v32  ;;  %v5865_v48 = vsub.f32 1.0, %v5801_v42  ;;  %6807 = vmatmul.mubr.f32.gmra.mxu0 %v6630_v34  ;;  %v2853_v40 = vsub.f32 %v10688_v24, %v16311_v33  ;;  %v16317_v5 = vld [vmem:[#allocation155_spill] sm:$0xff] }
 0x8ac   : > { %v2916_v43 = vand.u32 2147483647, %v2852_v39  ;;  %v3964_v15 = vsub.f32 %v10685_v38, %v16314_v55  ;;  %v3965_v56 = vsub.f32 %v10688_v24, %v16314_v55  ;;  %v5224_v19 = vmax.f32 %v5160_v28, 0.0  ;;  %v16323_v55 = vld [vmem:[#allocation241_spill] sm:$0xff] }
 0x8ad   : > { %v5225_v23 = vmax.f32 %v5161_v61, 0.0  ;;  %v6312_v0 = vmax.f32 %v6248_v44, 0.0  ;;  %v6313_v37 = vmax.f32 %v6249_v57, 0.0  ;;  %v13343_v6 = vpop.permute.xlu1 %4947  ;;  %v4840_v31 = vmax.f32 %v4776_v60, 0.0  ;;  %v13356_v60 = vpop.permute.xlu0 %6035 }
 0x8ae   : > { %v4841_v3 = vmax.f32 %v4777_v13, 0.0  ;;  %v4392_v51 = vmul.f32 %v16315_v22, %v13152_v47  ;;  %v4393_v27 = vmul.f32 %v16315_v22, %v13159_v54  ;;  %6067 = vperm.xlu1 %8621, %v16316_v11   ;;  %v3304_v10 = vmul.f32 %v16318_v7, %v16317_v5 }
 0x8af   : > { %v3305_v25 = vmul.f32 %v16318_v7, %v16319_v26  ;;  %v5928_v63 = vmax.f32 %v5864_v46, 0.0  ;;  %v5929_v30 = vmax.f32 %v5865_v48, 0.0  ;;  %v4148_v18 = vmax.f32 %v4084_v8, 0.0  ;;  %v16322_v46 = vld [vmem:[#allocation169_spill] sm:$0xff] }
 0x8b0   : > { %v4149_v49 = vmax.f32 %v4085_v53, 0.0  ;;  %v4025_v35 = vand.u32 2147483647, %v3961_v36  ;;  %v2917_v32 = vand.u32 2147483647, %v2853_v40  ;;  %v5288_v47 = vmul.f32 %v5224_v19, %v4840_v31  ;;  %v16320_v36 = vld [vmem:[#allocation221_spill] sm:$0xff] }
 0x8b1   : > { %v6376_v42 = vmul.f32 %v6312_v0, %v5928_v63  ;;  %v6377_v33 = vmul.f32 %v6313_v37, %v5929_v30  ;;  %v5289_v39 = vmul.f32 %v5225_v23, %v4841_v3  ;;  %v4088_v54 = vsub.f32 1.0, %v13331_v21  ;;  %v16324_v37 = vld [vmem:[#allocation170_spill] sm:$0xff] }
 0x8b2   : > { %v2980_v1 = vsub.f32 1.0, %v2916_v43  ;;  %v4028_v34 = vand.u32 2147483647, %v3964_v15  ;;  %v4029_v28 = vand.u32 2147483647, %v3965_v56  ;;  %8623 = vset.pattern.permute.xlu1 %v16157_v29  ;;  %v5388_v61 = vpop.permute.xlu1 %5387  ;;  %v4456_v44 = vadd.f32 %v4392_v51, %v3304_v10  ;;  %v16325_v10 = vld [vmem:[#allocation159_spill] sm:$0xff] }
 0x8b3   : > { %v4457_v57 = vadd.f32 %v4393_v27, %v3305_v25  ;;  %v5480_v8 = vmul.f32 %v5388_v61, %v5288_v47  ;;  %v5481_v53 = vmul.f32 %v5388_v61, %v5289_v39  ;;  %6491 = vperm.xlu1 %8623, %v16320_v36   ;;  %v2981_v13 = vsub.f32 1.0, %v2917_v32  ;;  %v16326_v25 = vld [vmem:[#allocation105_spill] sm:$0xff]  ;;  %v16330_v36 = vld [vmem:[#allocation234_spill] sm:$0xff] }
 0x8b4   : > { %v2434_v4 = vsub.f32 %v10707_v41, %v16321_v20  ;;  %v2435_v21 = vsub.f32 %v10710_v17, %v16321_v20  ;;  %v3576_v48 = vsub.f32 %v10707_v41, %v16322_v46  ;;  %v6569_v15 = vmul.f32 %v16323_v55, %v6377_v33  ;;  %v13382_v33 = vpop.permute.xlu0 %6043 }
 0x8b5   : > { %v5544_v40 = vadd.f32 %v5480_v8, %v4456_v44  ;;  %v5545_v43 = vadd.f32 %v5481_v53, %v4457_v57  ;;  %v6568_v56 = vmul.f32 %v16323_v55, %v6376_v42  ;;  %v4089_v19 = vsub.f32 1.0, %v4025_v35  ;;  %16327 = vst [vmem:[#allocation122_spill] sm:$0xff] %v13382_v33  ;;  %v16329_v57 = vld [vmem:[#allocation172_spill] sm:$0xff] }
 0x8b6   : > { %v4092_v23 = vsub.f32 1.0, %v4028_v34  ;;  %v3577_v0 = vsub.f32 %v10710_v17, %v16322_v46  ;;  %v3580_v31 = vsub.f32 %v10707_v41, %v16324_v37  ;;  %v4093_v3 = vsub.f32 1.0, %v4029_v28  ;;  %v16332_v46 = vld [vmem:[#allocation205_spill] sm:$0xff] }
 0x8b7   : > { %v3581_v22 = vsub.f32 %v10710_v17, %v16324_v37  ;;  %6507 = vperm.xlu1 %8623, %v16306_v62   ;;  %v13374_v51 = vpop.permute.xlu1 %5651  ;;  %v6633_v27 = vadd.f32 %v6569_v15, %v5545_v43  ;;  %v6632_v11 = vadd.f32 %v6568_v56, %v5544_v40  ;;  %v2498_v5 = vand.u32 2147483647, %v2434_v4  ;;  %v16331_v4 = vld [vmem:[#allocation182_spill] sm:$0xff]  ;;  %v16334_v40 = vld [vmem:[#allocation49_spill] sm:$0xff] }
 0x8b8   : > { %v2499_v7 = vand.u32 2147483647, %v2435_v21  ;;  %v13377_v26 = vmul.f32 %v4148_v18, %v16325_v10  ;;  %v13380_v63 = vmul.f32 %v4149_v49, %v16326_v25  ;;  %v4152_v30 = vmax.f32 %v4088_v54, 0.0  ;;  %v16328_v18 = vld [vmem:[#allocation171_spill] sm:$0xff] }
 0x8b9   : > { %v3044_v35 = vmax.f32 %v2980_v1, 0.0  ;;  %v3045_v32 = vmax.f32 %v2981_v13, 0.0  ;;  %v3640_v42 = vand.u32 2147483647, %v3576_v48  ;;  %6811 = vmatprep.mubr.f32.mxu0 %v6633_v27  ;;  %v4153_v62 = vmax.f32 %v4089_v19, 0.0  ;;  %v16336_v19 = vld [vmem:[#allocation187_spill] sm:$0xff] }
 0x8ba   : > { %v4156_v47 = vmax.f32 %v4092_v23, 0.0  ;;  %v3641_v39 = vand.u32 2147483647, %v3577_v0  ;;  %v3644_v34 = vand.u32 2147483647, %v3580_v31  ;;  %6812 = vmatmul.mubr.f32.gmra.mxu0 %v6632_v11  ;;  %v13384_v28 = vmax.f32 %v4093_v3, 0.0 }
 0x8bb   : > { %v3645_v61 = vand.u32 2147483647, %v3581_v22  ;;  %v3584_v44 = vsub.f32 %v10707_v41, %v16328_v18  ;;  %v3585_v49 = vsub.f32 %v10710_v17, %v16328_v18  ;;  %8625 = vset.pattern.permute.xlu1 %v15808_v2  ;;  %v2562_v54 = vsub.f32 1.0, %v2498_v5  ;;  %v13412_v22 = vpop.permute.xlu0 %6047 }
 0x8bc   : > { %v2563_v1 = vsub.f32 1.0, %v2499_v7  ;;  %v3588_v8 = vsub.f32 %v10707_v41, %v16329_v57  ;;  %v3589_v53 = vsub.f32 %v10710_v17, %v16329_v57  ;;  %5423 = vperm.xlu1 %8625, %v16330_v36   ;;  %v13396_v13 = vpop.permute.xlu1 %4951  ;;  %v3704_v20 = vsub.f32 1.0, %v3640_v42  ;;  %16337 = vst [vmem:[#allocation120_spill] sm:$0xff] %v13412_v22 }
 0x8bd   : > { %v3946_v21 = vsub.f32 %v10685_v38, %v16331_v4  ;;  %v13401_v48 = vmul.f32 %v3044_v35, %v16332_v46  ;;  %v13404_v43 = vmul.f32 %v3045_v32, %v16334_v40  ;;  %v3705_v55 = vsub.f32 1.0, %v3641_v39  ;;  %v16339_v32 = vld [vmem:[#allocation183_spill] sm:$0xff] }
 0x8be   : > { %v3708_v15 = vsub.f32 1.0, %v3644_v34  ;;  %v3947_v56 = vsub.f32 %v10688_v24, %v16331_v4  ;;  %v3968_v23 = vsub.f32 %v10685_v38, %v16336_v19  ;;  %v3709_v0 = vsub.f32 1.0, %v3645_v61  ;;  %v16340_v34 = vld [vmem:[#allocation133_spill] sm:$0xff] }
 0x8bf   : > { %16333 = vst [vmem:[#allocation102_spill] sm:$0xff] %v13401_v48  ;;  %16335 = vst [vmem:[#allocation250_spill] sm:$0xff] %v13404_v43  ;;  %v3648_v37 = vand.u32 2147483647, %v3584_v44  ;;  %v3649_v31 = vand.u32 2147483647, %v3585_v49  ;;  %v3969_v3 = vsub.f32 %v10688_v24, %v16336_v19  ;;  %v3950_v42 = vsub.f32 %v10685_v38, %v16339_v32 }
 0x8c0   : > { %v2626_v27 = vmax.f32 %v2562_v54, 0.0  ;;  %v2627_v11 = vmax.f32 %v2563_v1, 0.0  ;;  %v3652_v5 = vand.u32 2147483647, %v3588_v8  ;;  %v3653_v7 = vand.u32 2147483647, %v3589_v53  ;;  %8626 = vset.pattern.permute.xlu1 %v15755_v14  ;;  %v13415_v10 = vpop.permute.xlu1 %4967 }
 0x8c1   : > { %16338 = vst [vmem:[#allocation97_spill] sm:$0xff] %v13415_v10  ;;  %v3768_v25 = vmax.f32 %v3704_v20, 0.0  ;;  %v4010_v35 = vand.u32 2147483647, %v3946_v21  ;;  %v3951_v39 = vsub.f32 %v10688_v24, %v16339_v32  ;;  %5687 = vperm.xlu1 %8626, %v16340_v34   ;;  %v3769_v61 = vmax.f32 %v3705_v55, 0.0  ;;  %v16341_v20 = vld [vmem:[#allocation8_spill] sm:$0xff]  ;;  %v13430_v55 = vpop.permute.xlu0 %6071 }
 0x8c2   : > { %v3772_v18 = vmax.f32 %v3708_v15, 0.0  ;;  %v4011_v44 = vand.u32 2147483647, %v3947_v56  ;;  %v4032_v49 = vand.u32 2147483647, %v3968_v23  ;;  %v3773_v54 = vmax.f32 %v3709_v0, 0.0 }
 0x8c3   : > { %v3712_v1 = vsub.f32 1.0, %v3648_v37  ;;  %v3713_v57 = vsub.f32 1.0, %v3649_v31  ;;  %v4033_v8 = vand.u32 2147483647, %v3969_v3  ;;  %v3716_v53 = vsub.f32 1.0, %v3652_v5  ;;  %v16343_v21 = vld [vmem:[#allocation310_spill] sm:$0xff]  ;;  %v13440_v3 = vpop.f32.mrf.mxu0 }
 0x8c4   : > { %v3717_v36 = vsub.f32 1.0, %v3653_v7  ;;  %v13423_v4 = vmul.f32 %v16341_v20, %v2626_v27  ;;  %v13426_v46 = vmul.f32 %v16343_v21, %v2627_v11  ;;  %v4074_v40 = vsub.f32 1.0, %v4010_v35  ;;  %16345 = vst [vmem:[#allocation100_spill] sm:$0xff] %v13430_v55  ;;  %v16347_v31 = vld [vmem:[#allocation132_spill] sm:$0xff]  ;;  %16348 = vst [vmem:[#allocation267_spill] sm:$0xff] %v13440_v3  ;;  %v16350_v35 = vld [vmem:[#allocation73_spill] sm:$0xff] }
 0x8c5   : > { %v4014_v19 = vand.u32 2147483647, %v3950_v42  ;;  %v4015_v32 = vand.u32 2147483647, %v3951_v39  ;;  %v13428_v34 = vmul.f32 %v4152_v30, %v3768_v25  ;;  %8628 = vset.pattern.permute.xlu1 %v15838_v45  ;;  %v13433_v15 = vpop.permute.xlu1 %5391  ;;  %v4075_v56 = vsub.f32 1.0, %v4011_v44  ;;  %v6735_v42 = vpop.f32.mrf.mxu0  ;;  %v16351_v44 = vld [vmem:[#allocation184_spill] sm:$0xff] }
 0x8c6   : > { %16342 = vst [vmem:[#allocation30_spill] sm:$0xff] %v13423_v4  ;;  %16344 = vst [vmem:[#allocation134_spill] sm:$0xff] %v13426_v46  ;;  %v4096_v23 = vsub.f32 1.0, %v4032_v49  ;;  %v13435_v0 = vmul.f32 %v4153_v62, %v3769_v61  ;;  %v13437_v37 = vmul.f32 %v4156_v47, %v3772_v18  ;;  %4987 = vperm.xlu1 %8628, %v16347_v31   ;;  %v3776_v27 = vmax.f32 %v3712_v1, 0.0  ;;  %v16357_v4 = vld [vmem:[#allocation287_spill] sm:$0xff] }
 0x8c7   : > { %v13442_v11 = vmax.f32 %v3713_v57, 0.0  ;;  %v4097_v30 = vsub.f32 1.0, %v4033_v8  ;;  %v13445_v5 = vmul.f32 %v13384_v28, %v3773_v54  ;;  %v13447_v7 = vmax.f32 %v3716_v53, 0.0  ;;  %v16352_v54 = vld [vmem:[#allocation228_spill] sm:$0xff] }
 0x8c8   : > { %16346 = vst [vmem:[#allocation99_spill] sm:$0xff] %v13437_v37  ;;  %v13449_v25 = vmax.f32 %v3717_v36, 0.0  ;;  %v5034_v62 = vsub.f32 %v10685_v38, %v16350_v35  ;;  %v5035_v47 = vsub.f32 %v10688_v24, %v16350_v35  ;;  %v4138_v39 = vmax.f32 %v4074_v40, 0.0  ;;  %v13464_v36 = vpop.f32.mrf.mxu0  ;;  %v16355_v40 = vld [vmem:[#allocation19_spill] sm:$0xff] }
 0x8c9   : > { %16349 = vst [vmem:[#allocation37_spill] sm:$0xff] %v13445_v5  ;;  %v4078_v61 = vsub.f32 1.0, %v4014_v19  ;;  %v4079_v18 = vsub.f32 1.0, %v4015_v32  ;;  %v3954_v49 = vsub.f32 %v10685_v38, %v16351_v44  ;;  %v4139_v1 = vmax.f32 %v4075_v56, 0.0  ;;  %16354 = vst [vmem:[#allocation189_spill] sm:$0xff] %v13464_v36  ;;  %v5648_v56 = vpop.permute.xlu0 %5647 }
 0x8ca   : > { %v4160_v28 = vmax.f32 %v4096_v23, 0.0  ;;  %v4650_v57 = vsub.f32 %v10707_v41, %v16352_v54  ;;  %v4651_v8 = vsub.f32 %v10710_v17, %v16352_v54  ;;  %8629 = vset.pattern.permute.xlu1 %v16157_v29  ;;  %v13462_v53 = vpop.permute.xlu1 %5655  ;;  %v4161_v20 = vmax.f32 %v4097_v30, 0.0  ;;  %v16356_v23 = vld [vmem:[#allocation63_spill] sm:$0xff]  ;;  %v6740_v36 = vpop.f32.mrf.mxu0 }
 0x8cb   : > { %16353 = vst [vmem:[#allocation75_spill] sm:$0xff] %v13462_v53  ;;  %v3955_v21 = vsub.f32 %v10688_v24, %v16351_v44  ;;  %v3972_v19 = vsub.f32 %v10685_v38, %v16355_v40  ;;  %v3973_v32 = vsub.f32 %v10688_v24, %v16355_v40  ;;  %6495 = vperm.xlu1 %8629, %v16356_v23   ;;  %v5098_v35 = vand.u32 2147483647, %v5034_v62 }
 0x8cc   : > { %v5099_v42 = vand.u32 2147483647, %v5035_v47  ;;  %v6122_v54 = vsub.f32 %v10685_v38, %v13320_v9  ;;  %v6123_v30 = vsub.f32 %v10688_v24, %v13320_v9  ;;  %v13477_v3 = vmax.f32 %v4078_v61, 0.0  ;;  %v13484_v47 = vpop.f32.mrf.mxu0  ;;  %v16359_v9 = vld [vmem:[#allocation288_spill] sm:$0xff] }
 0x8cd   : > { %v13479_v44 = vmax.f32 %v4079_v18, 0.0  ;;  %v4018_v46 = vand.u32 2147483647, %v3954_v49  ;;  %v4202_v43 = vmul.f32 %v4138_v39, %v16357_v4  ;;  %v4714_v40 = vand.u32 2147483647, %v4650_v57  ;;  %16358 = vst [vmem:[#allocation243_spill] sm:$0xff] %v13484_v47 }
 0x8ce   : > { %v4715_v48 = vand.u32 2147483647, %v4651_v8  ;;  %v5738_v23 = vsub.f32 %v10707_v41, %v5648_v56  ;;  %v5739_v62 = vsub.f32 %v10710_v17, %v5648_v56  ;;  %v4019_v50 = vand.u32 2147483647, %v3955_v21  ;;  %v16361_v8 = vld [vmem:[#allocation226_spill] sm:$0xff]  ;;  %v6745_v36 = vpop.f32.mrf.mxu0  ;;  %v16362_v56 = vld [vmem:[#allocation185_spill] sm:$0xff] }
 0x8cf   : > { %v4036_v55 = vand.u32 2147483647, %v3972_v19  ;;  %v13486_v5 = vand.u32 2147483647, %v3973_v32  ;;  %v4203_v61 = vmul.f32 %v4139_v1, %v16359_v9  ;;  %8630 = vset.pattern.permute.xlu1 %v15808_v2  ;;  %v13490_v18 = vpop.permute.xlu1 %6039  ;;  %v5162_v49 = vsub.f32 1.0, %v5098_v35  ;;  %v16363_v19 = vld [vmem:[#allocation186_spill] sm:$0xff] }
 0x8d0   : > { %16360 = vst [vmem:[#allocation38_spill] sm:$0xff] %v13490_v18  ;;  %v5163_v4 = vsub.f32 1.0, %v5099_v42  ;;  %v6186_v39 = vand.u32 2147483647, %v6122_v54  ;;  %v6187_v57 = vand.u32 2147483647, %v6123_v30  ;;  %5411 = vperm.xlu1 %8630, %v16361_v8   ;;  %v3958_v47 = vsub.f32 %v10685_v38, %v16362_v56  ;;  %v13501_v54 = vpop.f32.mrf.mxu0 }
 0x8d1   : > { %v3959_v21 = vsub.f32 %v10688_v24, %v16362_v56  ;;  %v3962_v1 = vsub.f32 %v10685_v38, %v16363_v19  ;;  %v13499_v32 = vmul.f32 %v4160_v28, %v3776_v27  ;;  %v4778_v9 = vsub.f32 1.0, %v4714_v40  ;;  %16365 = vst [vmem:[#allocation210_spill] sm:$0xff] %v13501_v54  ;;  %v16367_v27 = vld [vmem:[#allocation80_spill] sm:$0xff]  ;;  %v16369_v54 = vld [vmem:[#allocation77_spill] sm:$0xff] }
 0x8d2   : > { %v4779_v37 = vsub.f32 1.0, %v4715_v48  ;;  %v5802_v35 = vand.u32 2147483647, %v5738_v23  ;;  %v5803_v42 = vand.u32 2147483647, %v5739_v62  ;;  %v4082_v30 = vsub.f32 1.0, %v4018_v46  ;;  %v6750_v28 = vpop.f32.mrf.mxu0 }
 0x8d3   : > { %16364 = vst [vmem:[#allocation82_spill] sm:$0xff] %v13499_v32  ;;  %v4083_v8 = vsub.f32 1.0, %v4019_v50  ;;  %v4100_v36 = vsub.f32 1.0, %v4036_v55  ;;  %v13504_v22 = vmul.f32 %v4161_v20, %v13442_v11  ;;  %v13506_v33 = vpop.permute.xlu1 %6055  ;;  %v5226_v56 = vmax.f32 %v5162_v49, 0.0  ;;  %v16370_v49 = vld [vmem:[#allocation139_spill] sm:$0xff] }
 0x8d4   : > { %v5227_v53 = vmax.f32 %v5163_v4, 0.0  ;;  %v6250_v18 = vsub.f32 1.0, %v6186_v39  ;;  %v6251_v10 = vsub.f32 1.0, %v6187_v57  ;;  %5427 = vperm.xlu1 %8630, %v16367_v27   ;;  %v4022_v48 = vand.u32 2147483647, %v3958_v47  ;;  %v16371_v39 = vld [vmem:[#allocation292_spill] sm:$0xff] }
 0x8d5   : > { %16366 = vst [vmem:[#allocation18_spill] sm:$0xff] %v13504_v22  ;;  %v4023_v40 = vand.u32 2147483647, %v3959_v21  ;;  %v3963_v23 = vsub.f32 %v10688_v24, %v16363_v19  ;;  %v4026_v46 = vand.u32 2147483647, %v3962_v1  ;;  %v4842_v50 = vmax.f32 %v4778_v9, 0.0  ;;  %v13511_v20 = vpop.f32.mrf.mxu0 }
 0x8d6   : > { %v4843_v55 = vmax.f32 %v4779_v37, 0.0  ;;  %v5866_v62 = vsub.f32 1.0, %v5802_v35  ;;  %v5867_v11 = vsub.f32 1.0, %v5803_v42  ;;  %16368 = vst [vmem:[#allocation41_spill] sm:$0xff] %v13511_v20  ;;  %v3306_v4 = vmul.f32 %v16370_v49, %v16369_v54  ;;  %v16372_v22 = vld [vmem:[#allocation33_spill] sm:$0xff] }
 0x8d7   : > { %v3307_v57 = vmul.f32 %v16370_v49, %v16371_v39  ;;  %v4394_v28 = vmul.f32 %v16372_v22, %v4202_v43  ;;  %v4395_v47 = vmul.f32 %v16372_v22, %v4203_v61  ;;  %v6314_v21 = vmax.f32 %v6250_v18, 0.0  ;;  %v6755_v9 = vpop.f32.mrf.mxu0  ;;  %v16374_v39 = vld [vmem:[#allocation188_spill] sm:$0xff] }
 0x8d8   : > { %v6315_v32 = vmax.f32 %v6251_v10, 0.0  ;;  %v5290_v19 = vmul.f32 %v5226_v56, %v4842_v50  ;;  %v5291_v1 = vmul.f32 %v5227_v53, %v4843_v55  ;;  %8631 = vset.pattern.permute.xlu1 %v15745_v16  ;;  %v13520_v37 = vpop.permute.xlu1 %4971  ;;  %v4146_v35 = vmax.f32 %v4082_v30, 0.0 }
 0x8d9   : > { %v4147_v42 = vmax.f32 %v4083_v8, 0.0  ;;  %v4101_v54 = vsub.f32 1.0, %v13486_v5  ;;  %v13523_v20 = vmax.f32 %v4100_v36, 0.0  ;;  %6075 = vperm.xlu1 %8631, %v16347_v31   ;;  %v5930_v43 = vmax.f32 %v5866_v62, 0.0  ;;  %v13528_v53 = vpop.f32.mrf.mxu0 }
 0x8da   : > { %v5931_v49 = vmax.f32 %v5867_v11, 0.0  ;;  %v5482_v22 = vmul.f32 %v13433_v15, %v5290_v19  ;;  %v5483_v10 = vmul.f32 %v13433_v15, %v5291_v1  ;;  %16373 = vst [vmem:[#allocation209_spill] sm:$0xff] %v13528_v53  ;;  %v4086_v61 = vsub.f32 1.0, %v4022_v48  ;;  %v16377_v1 = vld [vmem:[#allocation162_spill] sm:$0xff]  ;;  %v16401_v53 = vld [vmem:[#allocation297_spill] sm:$0xff] }
 0x8db   : > { %v4087_v18 = vsub.f32 1.0, %v4023_v40  ;;  %v4027_v56 = vand.u32 2147483647, %v3963_v23  ;;  %v4090_v50 = vsub.f32 1.0, %v4026_v46  ;;  %v4458_v30 = vadd.f32 %v4394_v28, %v3306_v4  ;;  %v6760_v55 = vpop.f32.mrf.mxu0 }
 0x8dc   : > { %v4459_v8 = vadd.f32 %v4395_v47, %v3307_v57  ;;  %v6378_v5 = vmul.f32 %v6314_v21, %v5930_v43  ;;  %v6379_v36 = vmul.f32 %v6315_v32, %v5931_v49  ;;  %v3966_v31 = vsub.f32 %v10685_v38, %v16374_v39  ;;  %v16375_v32 = vld [vmem:[#allocation127_spill] sm:$0xff]  ;;  %v16378_v55 = vld [vmem:[#allocation14_spill] sm:$0xff] }
 0x8dd   : > { %v3967_v62 = vsub.f32 %v10688_v24, %v16374_v39  ;;  %v5036_v15 = vsub.f32 %v10685_v38, %v13343_v6  ;;  %v5037_v48 = vsub.f32 %v10688_v24, %v13343_v6  ;;  %8632 = vset.pattern.permute.xlu1 %v15838_v45  ;;  %v6480_v40 = vpop.permute.xlu1 %6479  ;;  %v5546_v23 = vadd.f32 %v5482_v22, %v4458_v30 }
 0x8de   : > { %v5547_v46 = vadd.f32 %v5483_v10, %v4459_v8  ;;  %v6570_v11 = vmul.f32 %v6480_v40, %v6378_v5  ;;  %v6571_v4 = vmul.f32 %v6480_v40, %v6379_v36  ;;  %4991 = vperm.xlu1 %8632, %v16375_v32   ;;  %v13540_v57 = vpop.f32.mrf.mxu0  ;;  %v4165_v28 = vmax.f32 %v4101_v54, 0.0  ;;  %v16379_v54 = vld [vmem:[#allocation290_spill] sm:$0xff] }
 0x8df   : > { %16376 = vst [vmem:[#allocation46_spill] sm:$0xff] %v13540_v57  ;;  %v4150_v47 = vmax.f32 %v4086_v61, 0.0  ;;  %v4151_v21 = vmax.f32 %v4087_v18, 0.0  ;;  %v4091_v19 = vsub.f32 1.0, %v4027_v56  ;;  %v4652_v9 = vsub.f32 %v10707_v41, %v16377_v1  ;;  %v16380_v18 = vld [vmem:[#allocation294_spill] sm:$0xff] }
 0x8e0   : > { %v4653_v6 = vsub.f32 %v10710_v17, %v16377_v1  ;;  %v6765_v43 = vpop.f32.mrf.mxu0  ;;  %v6635_v49 = vadd.f32 %v6571_v4, %v5547_v46  ;;  %v6634_v22 = vadd.f32 %v6570_v11, %v5546_v23  ;;  %v4154_v10 = vmax.f32 %v4090_v50, 0.0  ;;  %v16382_v23 = vld [vmem:[#allocation153_spill] sm:$0xff] }
 0x8e1   : > { %v4030_v30 = vand.u32 2147483647, %v3966_v31  ;;  %v4031_v8 = vand.u32 2147483647, %v3967_v62  ;;  %v13548_v5 = vmul.f32 %v13477_v3, %v16378_v55  ;;  %v13552_v61 = vmul.f32 %v13479_v44, %v16379_v54  ;;  %v16381_v31 = vld [vmem:[#allocation190_spill] sm:$0xff]  ;;  %v16384_v43 = vld [vmem:[#allocation300_spill] sm:$0xff] }
 0x8e2   : > { %v13555_v56 = vmul.f32 %v4146_v35, %v16380_v18  ;;  %v5100_v36 = vand.u32 2147483647, %v5036_v15  ;;  %v5101_v39 = vand.u32 2147483647, %v5037_v48  ;;  %8633 = vset.pattern.permute.xlu1 %v16157_v29  ;;  %v13558_v40 = vpop.permute.xlu1 %5659  ;;  %6816 = vmatprep.mubr.f32.mxu0 %v6635_v49  ;;  %v4155_v50 = vmax.f32 %v4091_v19, 0.0  ;;  %v16383_v19 = vld [vmem:[#allocation299_spill] sm:$0xff] }
 0x8e3   : > { %v3970_v62 = vsub.f32 %v10685_v38, %v16381_v31  ;;  %v3971_v3 = vsub.f32 %v10688_v24, %v16381_v31  ;;  %v13565_v44 = vmul.f32 %v4147_v42, %v16382_v23  ;;  %6515 = vperm.xlu1 %8633, %v16367_v27   ;;  %6817 = vmatmul.mubr.f32.gmra.mxu0 %v6634_v22  ;;  %v4716_v35 = vand.u32 2147483647, %v4652_v9 }
 0x8e4   : > { %v4717_v15 = vand.u32 2147483647, %v4653_v6  ;;  %v5740_v48 = vsub.f32 %v10707_v41, %v13374_v51  ;;  %v5741_v46 = vsub.f32 %v10710_v17, %v13374_v51  ;;  %v4094_v11 = vsub.f32 1.0, %v4030_v30  ;;  %v16385_v30 = vld [vmem:[#allocation86_spill] sm:$0xff] }
 0x8e5   : > { %v4095_v4 = vsub.f32 1.0, %v4031_v8  ;;  %v13573_v1 = vmul.f32 %v4150_v47, %v16383_v19  ;;  %v13576_v49 = vmul.f32 %v4151_v21, %v16384_v43  ;;  %v6124_v27 = vsub.f32 %v10685_v38, %v13356_v60  ;;  %v16386_v47 = vld [vmem:[#allocation104_spill] sm:$0xff] }
 0x8e6   : > { %v6125_v42 = vsub.f32 %v10688_v24, %v13356_v60  ;;  %v5164_v9 = vsub.f32 1.0, %v5100_v36  ;;  %v5165_v6 = vsub.f32 1.0, %v5101_v39  ;;  %v13582_v22 = vpop.permute.xlu1 %5675  ;;  %v4034_v55 = vand.u32 2147483647, %v3970_v62  ;;  %v16387_v60 = vld [vmem:[#allocation240_spill] sm:$0xff] }
 0x8e7   : > { %v13584_v51 = vand.u32 2147483647, %v3971_v3  ;;  %v13587_v8 = vmul.f32 %v4154_v10, %v16385_v30  ;;  %v13590_v54 = vmul.f32 %v4155_v50, %v16386_v47  ;;  %8634 = vset.pattern.permute.xlu1 %v15808_v2  ;;  %v4780_v21 = vsub.f32 1.0, %v4716_v35  ;;  %v16395_v47 = vld [vmem:[#allocation9_spill] sm:$0xff]  ;;  %v16398_v35 = vld [vmem:[#allocation296_spill] sm:$0xff] }
 0x8e8   : > { %v4781_v18 = vsub.f32 1.0, %v4717_v15  ;;  %v5804_v31 = vand.u32 2147483647, %v5740_v48  ;;  %v5805_v23 = vand.u32 2147483647, %v5741_v46  ;;  %5431 = vperm.xlu1 %8634, %v16387_v60   ;;  %v4158_v36 = vmax.f32 %v4094_v11, 0.0 }
 0x8e9   : > { %v4159_v39 = vmax.f32 %v4095_v4, 0.0  ;;  %v13596_v62 = vmul.f32 %v13523_v20, %v13447_v7  ;;  %v13599_v10 = vmul.f32 %v4165_v28, %v13449_v25  ;;  %v6188_v3 = vand.u32 2147483647, %v6124_v27  ;;  %v16390_v15 = vld [vmem:[#allocation15_spill] sm:$0xff]  ;;  %v16396_v60 = vld [vmem:[#allocation61_spill] sm:$0xff] }
 0x8ea   : > { %v6189_v50 = vand.u32 2147483647, %v6125_v42  ;;  %v5228_v19 = vmax.f32 %v5164_v9, 0.0  ;;  %v5229_v43 = vmax.f32 %v5165_v6, 0.0  ;;  %v4098_v30 = vsub.f32 1.0, %v4034_v55  ;;  %v16391_v28 = vld [vmem:[#allocation31_spill] sm:$0xff] }
 0x8eb   : > { %16388 = vst [vmem:[#allocation271_spill] sm:$0xff] %v13596_v62  ;;  %16389 = vst [vmem:[#allocation237_spill] sm:$0xff] %v13599_v10  ;;  %v4396_v48 = vmul.f32 %v16390_v15, %v13176_v12  ;;  %v4397_v46 = vmul.f32 %v16390_v15, %v13309_v52  ;;  %v13606_v11 = vpop.permute.xlu1 %6059  ;;  %v4844_v7 = vmax.f32 %v4780_v21, 0.0  ;;  %v4845_v20 = vmax.f32 %v4781_v18, 0.0  ;;  %v16392_v27 = vld [vmem:[#allocation3_spill] sm:$0xff]  ;;  %v16394_v55 = vld [vmem:[#allocation201_spill] sm:$0xff] }
 0x8ec   : > { %v5868_v4 = vsub.f32 1.0, %v5804_v31  ;;  %v5869_v25 = vsub.f32 1.0, %v5805_v23  ;;  %8636 = vset.pattern.permute.xlu1 %v15745_v16  ;;  %v3308_v42 = vmul.f32 %v16392_v27, %v16391_v28  ;;  %v16393_v9 = vld [vmem:[#allocation147_spill] sm:$0xff]  ;;  %v3312_v12 = vmul.f32 %v16395_v47, %v16394_v55 }
 0x8ed   : > { %v3309_v6 = vmul.f32 %v16392_v27, %v16393_v9  ;;  %v3313_v52 = vmul.f32 %v16395_v47, %v16396_v60  ;;  %6079 = vperm.xlu1 %8636, %v16375_v32   ;;  %v6252_v21 = vsub.f32 1.0, %v6188_v3  ;;  %v6253_v18 = vsub.f32 1.0, %v6189_v50  ;;  %v16397_v16 = vld [vmem:[#allocation35_spill] sm:$0xff]  ;;  %v16399_v27 = vld [vmem:[#allocation142_spill] sm:$0xff] }
 0x8ee   : > { %v5292_v31 = vmul.f32 %v5228_v19, %v4844_v7  ;;  %v5293_v23 = vmul.f32 %v5229_v43, %v4845_v20  ;;  %v4400_v15 = vmul.f32 %v16397_v16, %v13328_v59  ;;  %v4401_v28 = vmul.f32 %v16397_v16, %v13335_v58  ;;  %v16400_v55 = vld [vmem:[#allocation123_spill] sm:$0xff]  ;;  %v16403_v58 = vld [vmem:[#allocation164_spill] sm:$0xff] }
 0x8ef   : > { %v3310_v9 = vmul.f32 %v16399_v27, %v16398_v35  ;;  %v4398_v57 = vmul.f32 %v16400_v55, %v13548_v5  ;;  %v3311_v47 = vmul.f32 %v16399_v27, %v16401_v53  ;;  %v4399_v32 = vmul.f32 %v16400_v55, %v13552_v61  ;;  %v16405_v35 = vld [vmem:[#allocation313_spill] sm:$0xff]  ;;  %v16408_v61 = vld [vmem:[#allocation151_spill] sm:$0xff] }
 0x8f0   : > { %v5932_v3 = vmax.f32 %v5868_v4, 0.0  ;;  %v5933_v50 = vmax.f32 %v5869_v25, 0.0  ;;  %v13630_v19 = vpop.permute.xlu1 %4959  ;;  %v13632_v59 = vmax.f32 %v4098_v30, 0.0  ;;  %v4460_v43 = vadd.f32 %v4396_v48, %v3308_v42  ;;  %v13641_v5 = vpop.f32.mrf.mxu0  ;;  %v16409_v4 = vld [vmem:[#allocation88_spill] sm:$0xff]  ;;  %v16411_v55 = vld [vmem:[#allocation145_spill] sm:$0xff] }
 0x8f1   : > { %v13635_v7 = vmul.f32 %v4158_v36, %v16403_v58  ;;  %v13638_v20 = vmul.f32 %v4159_v39, %v16405_v35  ;;  %8637 = vset.pattern.permute.xlu1 %v15838_v45  ;;  %16407 = vst [vmem:[#allocation101_spill] sm:$0xff] %v13641_v5  ;;  %v6316_v53 = vmax.f32 %v6252_v21, 0.0  ;;  %v6317_v60 = vmax.f32 %v6253_v18, 0.0  ;;  %v16410_v45 = vld [vmem:[#allocation20_spill] sm:$0xff]  ;;  %v16412_v35 = vld [vmem:[#allocation286_spill] sm:$0xff] }
 0x8f2   : > { %16402 = vst [vmem:[#allocation83_spill] sm:$0xff] %v13632_v59  ;;  %4995 = vperm.xlu1 %8637, %v16408_v61   ;;  %v5485_v25 = vmul.f32 %v16409_v4, %v5293_v23  ;;  %v5484_v30 = vmul.f32 %v16409_v4, %v5292_v31  ;;  %v4461_v16 = vadd.f32 %v4397_v46, %v3309_v6  ;;  %v6770_v39 = vpop.f32.mrf.mxu0  ;;  %v16413_v6 = vld [vmem:[#allocation301_spill] sm:$0xff]  ;;  %v16419_v61 = vld [vmem:[#allocation96_spill] sm:$0xff] }
 0x8f3   : > { %16404 = vst [vmem:[#allocation191_spill] sm:$0xff] %v13635_v7  ;;  %16406 = vst [vmem:[#allocation42_spill] sm:$0xff] %v13638_v20  ;;  %v13646_v48 = vadd.f32 %v4400_v15, %v3312_v12  ;;  %v13648_v36 = vadd.f32 %v4401_v28, %v3313_v52  ;;  %v13650_v42 = vadd.f32 %v4398_v57, %v3310_v9  ;;  %v16414_v57 = vld [vmem:[#allocation203_spill] sm:$0xff] }
 0x8f4   : > { %v13652_v27 = vadd.f32 %v4399_v32, %v3311_v47  ;;  %v3316_v21 = vmul.f32 %v16411_v55, %v16410_v45  ;;  %v6380_v18 = vmul.f32 %v6316_v53, %v5932_v3  ;;  %v6381_v58 = vmul.f32 %v6317_v60, %v5933_v50  ;;  %v16415_v32 = vld [vmem:[#allocation303_spill] sm:$0xff]  ;;  %v16416_v3 = vld [vmem:[#allocation129_spill] sm:$0xff] }
 0x8f5   : > { %v4404_v23 = vmul.f32 %v16412_v35, %v13377_v26  ;;  %v4405_v46 = vmul.f32 %v16412_v35, %v13380_v63  ;;  %v3317_v12 = vmul.f32 %v16411_v55, %v16413_v6  ;;  %v4402_v52 = vmul.f32 %v16414_v57, %v13555_v56  ;;  %v6484_v31 = vpop.permute.xlu1 %6483  ;;  %v16417_v26 = vld [vmem:[#allocation124_spill] sm:$0xff]  ;;  %v16418_v60 = vld [vmem:[#allocation163_spill] sm:$0xff] }
 0x8f6   : > { %v6572_v15 = vmul.f32 %v6484_v31, %v6380_v18  ;;  %v6573_v28 = vmul.f32 %v6484_v31, %v6381_v58  ;;  %8638 = vset.pattern.permute.xlu1 %v15808_v2  ;;  %v5549_v9 = vadd.f32 %v5485_v25, %v4461_v16  ;;  %v5548_v47 = vadd.f32 %v5484_v30, %v4460_v43  ;;  %v16420_v56 = vld [vmem:[#allocation236_spill] sm:$0xff]  ;;  %v16421_v39 = vld [vmem:[#allocation131_spill] sm:$0xff]  ;;  %v16423_v18 = vld [vmem:[#allocation306_spill] sm:$0xff] }
 0x8f7   : > { %v3314_v50 = vmul.f32 %v16416_v3, %v16415_v32  ;;  %v3315_v53 = vmul.f32 %v16416_v3, %v16417_v26  ;;  %v4403_v63 = vmul.f32 %v16414_v57, %v13565_v44  ;;  %v3320_v4 = vmul.f32 %v16419_v61, %v16418_v60  ;;  %5435 = vperm.xlu1 %8638, %v16420_v56   ;;  %v16422_v55 = vld [vmem:[#allocation204_spill] sm:$0xff]  ;;  %v16424_v58 = vld [vmem:[#allocation149_spill] sm:$0xff]  ;;  %v16425_v44 = vld [vmem:[#allocation199_spill] sm:$0xff] }
 0x8f8   : > { %v4408_v45 = vmul.f32 %v16421_v39, %v13428_v34  ;;  %v3321_v43 = vmul.f32 %v16419_v61, %v16422_v55  ;;  %v6637_v25 = vadd.f32 %v6573_v28, %v5549_v9  ;;  %v6636_v30 = vadd.f32 %v6572_v15, %v5548_v47  ;;  %v16426_v31 = vld [vmem:[#allocation307_spill] sm:$0xff]  ;;  %v16427_v32 = vld [vmem:[#allocation5_spill] sm:$0xff]  ;;  %v16428_v28 = vld [vmem:[#allocation6_spill] sm:$0xff] }
 0x8f9   : > { %v4409_v16 = vmul.f32 %v16421_v39, %v13435_v0  ;;  %v3318_v35 = vmul.f32 %v16424_v58, %v16423_v18  ;;  %v4406_v6 = vmul.f32 %v16425_v44, %v13573_v1  ;;  %v4407_v57 = vmul.f32 %v16425_v44, %v13576_v49  ;;  %v16431_v49 = vld [vmem:[#allocation13_spill] sm:$0xff]  ;;  %v16432_v26 = vld [vmem:[#allocation198_spill] sm:$0xff] }
 0x8fa   : > { %v3319_v34 = vmul.f32 %v16424_v58, %v16426_v31  ;;  %v4410_v3 = vmul.f32 %v16427_v32, %v13587_v8  ;;  %v4654_v15 = vsub.f32 %v10707_v41, %v16428_v28  ;;  %v4655_v0 = vsub.f32 %v10710_v17, %v16428_v28  ;;  %v13694_v9 = vpop.permute.xlu1 %5399  ;;  %6821 = vmatprep.mubr.f32.mxu0 %v6637_v25  ;;  %v16433_v61 = vld [vmem:[#allocation206_spill] sm:$0xff]  ;;  %v16434_v58 = vld [vmem:[#allocation108_spill] sm:$0xff] }
 0x8fb   : > { %v16429_v1 = vsub.f32 1.0, %v13584_v51  ;;  %v3322_v60 = vmul.f32 %v16432_v26, %v16431_v49  ;;  %v3323_v39 = vmul.f32 %v16432_v26, %v16433_v61  ;;  %v4411_v8 = vmul.f32 %v16427_v32, %v13590_v54  ;;  %8639 = vset.pattern.permute.xlu1 %v15755_v14  ;;  %6822 = vmatmul.mubr.f32.gmra.mxu0 %v6636_v30  ;;  %v16440_v61 = vld [vmem:[#allocation23_spill] sm:$0xff] }
 0x8fc   : > { %v13707_v55 = vadd.f32 %v4404_v23, %v3316_v21  ;;  %v13709_v18 = vadd.f32 %v4405_v46, %v3317_v12  ;;  %v5038_v51 = vsub.f32 %v10685_v38, %v13396_v13  ;;  %v5039_v25 = vsub.f32 %v10688_v24, %v13396_v13  ;;  %5699 = vperm.xlu1 %8639, %v16434_v58   ;;  %v16435_v46 = vld [vmem:[#allocation97_spill] sm:$0xff] }
 0x8fd   : > { %v13698_v47 = vmax.f32 %v16429_v1, 0.0  ;;  %v13716_v44 = vadd.f32 %v4402_v52, %v3314_v50  ;;  %v13718_v31 = vadd.f32 %v4403_v63, %v3315_v53  ;;  %v13720_v54 = vadd.f32 %v4408_v45, %v3320_v4  ;;  %v16436_v63 = vld [vmem:[#allocation157_spill] sm:$0xff] }
 0x8fe   : > { %v13722_v14 = vadd.f32 %v4409_v16, %v3321_v43  ;;  %v4718_v21 = vand.u32 2147483647, %v4654_v15  ;;  %v4719_v23 = vand.u32 2147483647, %v4655_v0  ;;  %v5046_v12 = vsub.f32 %v10685_v38, %v16435_v46 }
 0x8ff   : > { %16430 = vst [vmem:[#allocation173_spill] sm:$0xff] %v13698_v47  ;;  %v5047_v30 = vsub.f32 %v10688_v24, %v16435_v46  ;;  %v13728_v32 = vadd.f32 %v4406_v6, %v3318_v35  ;;  %v13730_v13 = vadd.f32 %v4407_v57, %v3319_v34  ;;  %v13732_v52 = vadd.f32 %v4410_v3, %v3322_v60  ;;  %v13736_v53 = vpop.permute.xlu1 %5663  ;;  %v13743_v35 = vpop.f32.mrf.mxu0  ;;  %v16438_v6 = vld [vmem:[#allocation154_spill] sm:$0xff] }
 0x900   : > { %v13734_v50 = vadd.f32 %v4411_v8, %v3323_v39  ;;  %v4662_v4 = vsub.f32 %v10707_v41, %v16436_v63  ;;  %v4663_v45 = vsub.f32 %v10710_v17, %v16436_v63  ;;  %v5102_v43 = vand.u32 2147483647, %v5038_v51  ;;  %8641 = vset.pattern.permute.xlu1 %v16157_v29  ;;  %16437 = vst [vmem:[#allocation212_spill] sm:$0xff] %v13743_v35  ;;  %v16439_v3 = vld [vmem:[#allocation38_spill] sm:$0xff]  ;;  %v5672_v51 = vpop.permute.xlu0 %5671 }
 0x901   : > { %v5103_v16 = vand.u32 2147483647, %v5039_v25  ;;  %v4656_v57 = vsub.f32 %v10707_v41, %v16438_v6  ;;  %v4657_v34 = vsub.f32 %v10710_v17, %v16438_v6  ;;  %v6126_v28 = vsub.f32 %v10685_v38, %v16439_v3  ;;  %6523 = vperm.xlu1 %8641, %v16420_v56   ;;  %v6775_v60 = vpop.f32.mrf.mxu0  ;;  %v16441_v25 = vld [vmem:[#allocation75_spill] sm:$0xff] }
 0x902   : > { %v6127_v15 = vsub.f32 %v10688_v24, %v16439_v3  ;;  %v4782_v0 = vsub.f32 1.0, %v4718_v21  ;;  %v4783_v1 = vsub.f32 1.0, %v4719_v23  ;;  %v5110_v49 = vand.u32 2147483647, %v5046_v12 }
 0x903   : > { %v5111_v26 = vand.u32 2147483647, %v5047_v30  ;;  %v5742_v58 = vsub.f32 %v10707_v41, %v16441_v25  ;;  %v5743_v46 = vsub.f32 %v10710_v17, %v16441_v25  ;;  %v13762_v63 = vpop.permute.xlu1 %5679  ;;  %v4726_v56 = vand.u32 2147483647, %v4662_v4  ;;  %v16442_v4 = vld [vmem:[#allocation79_spill] sm:$0xff] }
 0x904   : > { %v4727_v21 = vand.u32 2147483647, %v4663_v45  ;;  %v5166_v23 = vsub.f32 1.0, %v5102_v43  ;;  %v5167_v12 = vsub.f32 1.0, %v5103_v16  ;;  %v6190_v30 = vand.u32 2147483647, %v6126_v28 }
 0x905   : > { %v6191_v6 = vand.u32 2147483647, %v6127_v15  ;;  %v6134_v3 = vsub.f32 %v10685_v38, %v13506_v33  ;;  %v6135_v60 = vsub.f32 %v10688_v24, %v13506_v33  ;;  %8642 = vset.pattern.permute.xlu1 %v15808_v2  ;;  %v5750_v8 = vsub.f32 %v10707_v41, %v5672_v51 }
 0x906   : > { %v5751_v25 = vsub.f32 %v10710_v17, %v5672_v51  ;;  %v5174_v39 = vsub.f32 1.0, %v5110_v49  ;;  %v5175_v35 = vsub.f32 1.0, %v5111_v26  ;;  %5439 = vperm.xlu1 %8642, %v16442_v4   ;;  %v4846_v45 = vmax.f32 %v4782_v0, 0.0 }
 0x907   : > { %v4847_v43 = vmax.f32 %v4783_v1, 0.0  ;;  %v5806_v16 = vand.u32 2147483647, %v5742_v58  ;;  %v5807_v28 = vand.u32 2147483647, %v5743_v46  ;;  %v13772_v15 = vpop.f32.mrf.mxu0  ;;  %v4790_v5 = vsub.f32 1.0, %v4726_v56 }
 0x908   : > { %16443 = vst [vmem:[#allocation177_spill] sm:$0xff] %v13772_v15  ;;  %v4791_v10 = vsub.f32 1.0, %v4727_v21  ;;  %v5230_v62 = vmax.f32 %v5166_v23, 0.0  ;;  %v5231_v33 = vmax.f32 %v5167_v12, 0.0  ;;  %v13774_v47 = vpop.permute.xlu1 %6063  ;;  %v6254_v2 = vsub.f32 1.0, %v6190_v30  ;;  %v16444_v1 = vld [vmem:[#allocation248_spill] sm:$0xff] }
 0x909   : > { %v6255_v59 = vsub.f32 1.0, %v6191_v6  ;;  %v6198_v20 = vand.u32 2147483647, %v6134_v3  ;;  %v6199_v51 = vand.u32 2147483647, %v6135_v60  ;;  %v6780_v49 = vpop.f32.mrf.mxu0  ;;  %v5238_v4 = vmax.f32 %v5174_v39, 0.0 }
 0x90a   : > { %v5814_v26 = vand.u32 2147483647, %v5750_v8  ;;  %v5815_v7 = vand.u32 2147483647, %v5751_v25  ;;  %v5239_v0 = vmax.f32 %v5175_v35, 0.0  ;;  %5443 = vperm.xlu1 %8642, %v16444_v1   ;;  %v5870_v56 = vsub.f32 1.0, %v5806_v16 }
 0x90b   : > { %v13777_v58 = vand.u32 2147483647, %v4656_v57  ;;  %v13779_v46 = vand.u32 2147483647, %v4657_v34  ;;  %v5871_v21 = vsub.f32 1.0, %v5807_v28  ;;  %v4854_v23 = vmax.f32 %v4790_v5, 0.0 }
 0x90c   : > { %v4855_v12 = vmax.f32 %v4791_v10, 0.0  ;;  %v5294_v15 = vmul.f32 %v5230_v62, %v4846_v45  ;;  %v5295_v30 = vmul.f32 %v5231_v33, %v4847_v43  ;;  %v6318_v6 = vmax.f32 %v6254_v2, 0.0  ;;  %v13786_v35 = vld [vmem:[%s14773_s7 + $0x18] sm:$0xff]  ;;  %v16447_v16 = vld [vmem:[#allocation92_spill] sm:$0xff] }
 0x90d   : > { %v6319_v3 = vmax.f32 %v6255_v59, 0.0  ;;  %v6262_v60 = vsub.f32 1.0, %v6198_v20  ;;  %v6263_v49 = vsub.f32 1.0, %v6199_v51  ;;  %v13781_v8 = vpop.permute.xlu1 %4963  ;;  %v5878_v57 = vsub.f32 1.0, %v5814_v26  ;;  %8244 = vmatprep.subr.mxu1 %v13786_v35 }
 0x90e   : > { %v5879_v34 = vsub.f32 1.0, %v5815_v7  ;;  %v5302_v39 = vmul.f32 %v5238_v4, %v4854_v23  ;;  %v5303_v25 = vmul.f32 %v5239_v0, %v4855_v12  ;;  %8644 = vset.pattern.permute.xlu1 %v16157_v29  ;;  %v5934_v62 = vmax.f32 %v5870_v56, 0.0  ;;  %v16446_v7 = vld [vmem:[#allocation21_spill] sm:$0xff]  ;;  %v16448_v4 = vld [vmem:[#allocation239_spill] sm:$0xff] }
 0x90f   : > { %v5935_v10 = vmax.f32 %v5871_v21, 0.0  ;;  %v5486_v59 = vmul.f32 %v13694_v9, %v5294_v15  ;;  %v5487_v20 = vmul.f32 %v13694_v9, %v5295_v30  ;;  %6531 = vperm.xlu1 %8644, %v16444_v1   ;;  %v16445_v5 = vsub.f32 %v10707_v41, %v16440_v61 }
 0x910   : > { %v4664_v43 = vsub.f32 %v10707_v41, %v16446_v7  ;;  %v5040_v29 = vsub.f32 %v10685_v38, %v16447_v16  ;;  %v5041_v28 = vsub.f32 %v10688_v24, %v16447_v16  ;;  %v6326_v33 = vmax.f32 %v6262_v60, 0.0 }
 0x911   : > { %v13796_v45 = vand.u32 2147483647, %v16445_v5  ;;  %v6327_v15 = vmax.f32 %v6263_v49, 0.0  ;;  %v6382_v2 = vmul.f32 %v6318_v6, %v5934_v62  ;;  %v6383_v9 = vmul.f32 %v6319_v3, %v5935_v10  ;;  %v16449_v5 = vld [vmem:[#allocation95_spill] sm:$0xff] }
 0x912   : > { %v5942_v51 = vmax.f32 %v5878_v57, 0.0  ;;  %v5943_v26 = vmax.f32 %v5879_v34, 0.0  ;;  %v5494_v0 = vmul.f32 %v16448_v4, %v5302_v39  ;;  %v6488_v1 = vpop.permute.xlu1 %6487  ;;  %v5495_v56 = vmul.f32 %v16448_v4, %v5303_v25 }
 0x913   : > { %v5550_v21 = vadd.f32 %v5486_v59, %v13650_v42  ;;  %v5551_v23 = vadd.f32 %v5487_v20, %v13652_v27  ;;  %v6574_v12 = vmul.f32 %v6488_v1, %v6382_v2  ;;  %v6575_v30 = vmul.f32 %v6488_v1, %v6383_v9 }
 0x914   : > { %v4666_v16 = vsub.f32 %v10707_v41, %v16449_v5  ;;  %v4667_v6 = vsub.f32 %v10710_v17, %v16449_v5  ;;  %v4665_v3 = vsub.f32 %v10710_v17, %v16446_v7  ;;  %v5104_v60 = vand.u32 2147483647, %v5040_v29 }
 0x915   : > { %v6390_v49 = vmul.f32 %v6326_v33, %v5942_v51  ;;  %v6391_v57 = vmul.f32 %v6327_v15, %v5943_v26  ;;  %v6639_v34 = vadd.f32 %v6575_v30, %v5551_v23  ;;  %v6638_v39 = vadd.f32 %v6574_v12, %v5550_v21  ;;  %v16451_v33 = vld [vmem:[#allocation298_spill] sm:$0xff]  ;;  %v6889_v30 = vld [vmem:[%s14773_s7 + $0x10] sm:$0xff] }
 0x916   : > { %v16450_v42 = vsub.f32 %v10710_v17, %v16440_v61  ;;  %v4784_v25 = vsub.f32 1.0, %v13777_v58  ;;  %v4785_v62 = vsub.f32 1.0, %v13779_v46  ;;  %v5105_v10 = vand.u32 2147483647, %v5041_v28  ;;  %v6504_v59 = vpop.permute.xlu1 %6503 }
 0x917   : > { %v5558_v20 = vadd.f32 %v5494_v0, %v13728_v32  ;;  %v6582_v2 = vmul.f32 %v6504_v59, %v6390_v49  ;;  %v6583_v7 = vmul.f32 %v6504_v59, %v6391_v57  ;;  %6826 = vmatprep.mubr.f32.mxu0 %v6639_v34  ;;  %v5559_v29 = vadd.f32 %v5495_v56, %v13730_v13  ;;  %v16452_v0 = vld [vmem:[#allocation78_spill] sm:$0xff]  ;;  %v6888_v34 = vld [vmem:[%s14773_s7 + $0x8] sm:$0xff] }
 0x918   : > { %v13817_v27 = vand.u32 2147483647, %v16450_v42  ;;  %v13825_v9 = vand.u32 2147483647, %v4666_v16  ;;  %v4728_v61 = vand.u32 2147483647, %v4664_v43  ;;  %6827 = vmatmul.mubr.f32.gmra.mxu0 %v6638_v39  ;;  %v5050_v13 = vsub.f32 %v10685_v38, %v16452_v0 }
 0x919   : > { %v4729_v51 = vand.u32 2147483647, %v4665_v3  ;;  %v13827_v58 = vand.u32 2147483647, %v4667_v6  ;;  %v5168_v46 = vsub.f32 1.0, %v5104_v60  ;;  %v6646_v28 = vadd.f32 %v6582_v2, %v5558_v20  ;;  %v6887_v2 = vld [vmem:[%s14773_s7] sm:$0xff] }
 0x91a   : > { %v6647_v26 = vadd.f32 %v6583_v7, %v5559_v29  ;;  %v5051_v1 = vsub.f32 %v10688_v24, %v16452_v0  ;;  %v4848_v56 = vmax.f32 %v4784_v25, 0.0  ;;  %v5169_v21 = vsub.f32 1.0, %v5105_v10  ;;  %v16453_v25 = vld [vmem:[#allocation122_spill] sm:$0xff] }
 0x91b   : > { %v5048_v43 = vsub.f32 %v10685_v38, %v13520_v37  ;;  %v5049_v23 = vsub.f32 %v10688_v24, %v13520_v37  ;;  %v13839_v12 = vpop.permute.xlu1 %5419  ;;  %v4849_v5 = vmax.f32 %v4785_v62, 0.0  ;;  %v4792_v16 = vsub.f32 1.0, %v4728_v61 }
 0x91c   : > { %6846 = vmatprep.mubr.f32.mxu1 %v6647_v26  ;;  %v5744_v6 = vsub.f32 %v10707_v41, %v13558_v40  ;;  %v5745_v3 = vsub.f32 %v10710_v17, %v13558_v40  ;;  %v4793_v49 = vsub.f32 1.0, %v4729_v51  ;;  %v5232_v57 = vmax.f32 %v5168_v46, 0.0 }
 0x91d   : > { %6847 = vmatmul.mubr.f32.vlgmr.msra.gmra.mxu1 %v6646_v28  ;;  %v13854_v39 = vand.u32 2147483647, %v5050_v13  ;;  %v13856_v42 = vand.u32 2147483647, %v5051_v1  ;;  %v6128_v40 = vsub.f32 %v10685_v38, %v16453_v25  ;;  %v6129_v62 = vsub.f32 %v10688_v24, %v16453_v25 }
 0x91e   : > { %8245 = vmatpush3.msra.mxu1 %v13786_v35  ;;  %v5233_v59 = vmax.f32 %v5169_v21, 0.0  ;;  %v5112_v35 = vand.u32 2147483647, %v5048_v43  ;;  %v5113_v20 = vand.u32 2147483647, %v5049_v23  ;;  %v6136_v61 = vsub.f32 %v10685_v38, %v13606_v11 }
 0x91f   : > { %8246 = vmatprep.subr.mxu1 %v6889_v30  ;;  %v5808_v7 = vand.u32 2147483647, %v5744_v6  ;;  %v5809_v29 = vand.u32 2147483647, %v5745_v3  ;;  %v6137_v51 = vsub.f32 %v10688_v24, %v13606_v11  ;;  %v4856_v28 = vmax.f32 %v4792_v16, 0.0 }
 0x920   : > { %8247 = vmatpush3.msra.mxu1 %v6889_v30  ;;  %v13871_v46 = vpop.permute.xlu1 %5667  ;;  %v4857_v26 = vmax.f32 %v4793_v49, 0.0  ;;  %v5752_v0 = vsub.f32 %v10707_v41, %v13582_v22  ;;  %v5753_v13 = vsub.f32 %v10710_v17, %v13582_v22  ;;  %v6192_v43 = vand.u32 2147483647, %v6128_v40  ;;  %v13881_v49 = vpop.permute.xlu0 %5683 }
 0x921   : > { %8248 = vmatprep.subr.mxu1 %v6888_v34  ;;  %v6193_v23 = vand.u32 2147483647, %v6129_v62  ;;  %v5296_v11 = vmul.f32 %v5232_v57, %v4848_v56  ;;  %v5297_v30 = vmul.f32 %v5233_v59, %v4849_v5  ;;  %v5176_v6 = vsub.f32 1.0, %v5112_v35 }
 0x922   : > { %8249 = vmatpush3.msra.mxu1 %v6888_v34  ;;  %v5177_v3 = vsub.f32 1.0, %v5113_v20  ;;  %v13879_v16 = vpop.f32.mrf.mxu0  ;;  %v5872_v25 = vsub.f32 1.0, %v5808_v7  ;;  %v5873_v10 = vsub.f32 1.0, %v5809_v29  ;;  %v6200_v22 = vand.u32 2147483647, %v6136_v61 }
 0x923   : > { %8250 = vmatprep.subr.mxu1 %v6887_v2  ;;  %16454 = vst [vmem:[#allocation195_spill] sm:$0xff] %v13879_v16  ;;  %v6201_v34 = vand.u32 2147483647, %v6137_v51  ;;  %v5816_v4 = vand.u32 2147483647, %v5752_v0  ;;  %v6138_v40 = vsub.f32 %v10685_v38, %v13774_v47  ;;  %v6139_v56 = vsub.f32 %v10688_v24, %v13774_v47 }
 0x924   : > { %8251 = vmatpush3.msra.mxu1 %v6887_v2  ;;  %v5817_v15 = vand.u32 2147483647, %v5753_v13  ;;  %v6785_v57 = vpop.f32.mrf.mxu0  ;;  %v6256_v62 = vsub.f32 1.0, %v6192_v43  ;;  %v6257_v59 = vsub.f32 1.0, %v6193_v23  ;;  %v5754_v35 = vsub.f32 %v10707_v41, %v13762_v63  ;;  %v16455_v2 = vld [vmem:[#allocation107_spill] sm:$0xff] }
 0x925   : > { %v13887_v5 = vpop.permute.xlu1 %6051  ;;  %v5755_v20 = vsub.f32 %v10710_v17, %v13762_v63  ;;  %v5488_v7 = vmul.f32 %v16455_v2, %v5296_v11  ;;  %v5489_v29 = vmul.f32 %v16455_v2, %v5297_v30  ;;  %v5240_v61 = vmax.f32 %v5176_v6, 0.0  ;;  %v13899_v6 = vpop.permute.xlu0 %5691 }
 0x926   : > { %v5241_v51 = vmax.f32 %v5177_v3, 0.0  ;;  %v5936_v0 = vmax.f32 %v5872_v25, 0.0  ;;  %v5937_v13 = vmax.f32 %v5873_v10, 0.0  ;;  %v6264_v47 = vsub.f32 1.0, %v6200_v22 }
 0x927   : > { %v6265_v32 = vsub.f32 1.0, %v6201_v34  ;;  %v5880_v37 = vsub.f32 1.0, %v5816_v4  ;;  %v5881_v57 = vsub.f32 1.0, %v5817_v15  ;;  %v6202_v43 = vand.u32 2147483647, %v6138_v40 }
 0x928   : > { %v6203_v23 = vand.u32 2147483647, %v6139_v56  ;;  %v6320_v21 = vmax.f32 %v6256_v62, 0.0  ;;  %v6321_v1 = vmax.f32 %v6257_v59, 0.0  ;;  %v5818_v16 = vand.u32 2147483647, %v5754_v35 }
 0x929   : > { %v13895_v60 = vpop.permute.xlu1 %6067  ;;  %v5819_v63 = vand.u32 2147483647, %v5755_v20  ;;  %v5552_v11 = vadd.f32 %v5488_v7, %v13646_v48  ;;  %v5553_v30 = vadd.f32 %v5489_v29, %v13648_v36  ;;  %v5304_v3 = vmul.f32 %v5240_v61, %v4856_v28 }
 0x92a   : > { %v5305_v10 = vmul.f32 %v5241_v51, %v4857_v26  ;;  %v6328_v25 = vmax.f32 %v6264_v47, 0.0  ;;  %v6329_v22 = vmax.f32 %v6265_v32, 0.0  ;;  %v6384_v4 = vmul.f32 %v6320_v21, %v5936_v0  ;;  %v13911_v51 = vpop.permute.xlu0 %5695 }
 0x92b   : > { %v6385_v15 = vmul.f32 %v6321_v1, %v5937_v13  ;;  %v5944_v34 = vmax.f32 %v5880_v37, 0.0  ;;  %v5945_v40 = vmax.f32 %v5881_v57, 0.0  ;;  %v6266_v56 = vsub.f32 1.0, %v6202_v43 }
 0x92c   : > { %v6267_v2 = vsub.f32 1.0, %v6203_v23  ;;  %v5042_v62 = vsub.f32 %v10685_v38, %v13630_v19  ;;  %v5043_v48 = vsub.f32 %v10688_v24, %v13630_v19  ;;  %v5882_v59 = vsub.f32 1.0, %v5818_v16 }
 0x92d   : > { %v5883_v36 = vsub.f32 1.0, %v5819_v63  ;;  %v5496_v28 = vmul.f32 %v13839_v12, %v5304_v3  ;;  %v5497_v26 = vmul.f32 %v13839_v12, %v5305_v10  ;;  %v16456_v37 = vsub.f32 1.0, %v13854_v39 }
 0x92e   : > { %v6492_v35 = vpop.permute.xlu1 %6491  ;;  %v16457_v20 = vsub.f32 1.0, %v13856_v42  ;;  %v6392_v29 = vmul.f32 %v6328_v25, %v5944_v34  ;;  %v6393_v61 = vmul.f32 %v6329_v22, %v5945_v40  ;;  %v6330_v19 = vmax.f32 %v6266_v56, 0.0 }
 0x92f   : > { %v6576_v32 = vmul.f32 %v6492_v35, %v6384_v4  ;;  %v6577_v21 = vmul.f32 %v6492_v35, %v6385_v15  ;;  %v5242_v1 = vmax.f32 %v16456_v37, 0.0  ;;  %v6331_v16 = vmax.f32 %v6267_v2, 0.0 }
 0x930   : > { %v5243_v7 = vmax.f32 %v16457_v20, 0.0  ;;  %v5106_v47 = vand.u32 2147483647, %v5042_v62  ;;  %v5107_v57 = vand.u32 2147483647, %v5043_v48  ;;  %v5946_v43 = vmax.f32 %v5882_v59, 0.0 }
 0x931   : > { %v6641_v0 = vadd.f32 %v6577_v21, %v5553_v30  ;;  %v6640_v13 = vadd.f32 %v6576_v32, %v5552_v11  ;;  %v5947_v12 = vmax.f32 %v5883_v36, 0.0  ;;  %v13913_v63 = vpop.f32.mrf.mxu0  ;;  %v5560_v39 = vadd.f32 %v5496_v28, %v13720_v54  ;;  %v16462_v36 = vld [vmem:[#allocation120_spill] sm:$0xff]  ;;  %v6512_v21 = vpop.permute.xlu0 %6511 }
 0x932   : > { %v6508_v23 = vpop.permute.xlu1 %6507  ;;  %v5561_v42 = vadd.f32 %v5497_v26, %v13722_v14  ;;  %v16458_v25 = vsub.f32 1.0, %v13825_v9  ;;  %v16459_v30 = vsub.f32 1.0, %v13827_v58  ;;  %v5746_v4 = vsub.f32 %v10707_v41, %v13736_v53 }
 0x933   : > { %v6584_v3 = vmul.f32 %v6508_v23, %v6392_v29  ;;  %v6585_v10 = vmul.f32 %v6508_v23, %v6393_v61  ;;  %6831 = vmatprep.mubr.f32.mxu0 %v6641_v0  ;;  %v5747_v15 = vsub.f32 %v10710_v17, %v13736_v53  ;;  %v6790_v34 = vpop.f32.mrf.mxu0  ;;  %v6394_v54 = vmul.f32 %v6330_v19, %v5946_v43 }
 0x934   : > { %v4858_v22 = vmax.f32 %v16458_v25, 0.0  ;;  %v4859_v11 = vmax.f32 %v16459_v30, 0.0  ;;  %6832 = vmatmul.mubr.f32.gmra.mxu0 %v6640_v13  ;;  %v6395_v40 = vmul.f32 %v6331_v16, %v5947_v12  ;;  %v16460_v2 = vsub.f32 1.0, %v13796_v45 }
 0x935   : > { %v6649_v14 = vadd.f32 %v6585_v10, %v5561_v42  ;;  %v6648_v56 = vadd.f32 %v6584_v3, %v5560_v39  ;;  %v16461_v9 = vsub.f32 %v10707_v41, %v16451_v33  ;;  %v6130_v35 = vsub.f32 %v10685_v38, %v16462_v36 }
 0x936   : > { %v4850_v62 = vmax.f32 %v16460_v2, 0.0  ;;  %v5306_v48 = vmul.f32 %v5242_v1, %v4858_v22  ;;  %v5307_v59 = vmul.f32 %v5243_v7, %v4859_v11  ;;  %v6131_v53 = vsub.f32 %v10688_v24, %v16462_v36 }
 0x937   : > { %v13930_v58 = vand.u32 2147483647, %v16461_v9  ;;  %v5170_v28 = vsub.f32 1.0, %v5106_v47  ;;  %v5171_v26 = vsub.f32 1.0, %v5107_v57  ;;  %v5424_v32 = vpop.permute.xlu1 %5423  ;;  %6851 = vmatprep.mubr.f32.mxu1 %v6649_v14  ;;  %v5810_v45 = vand.u32 2147483647, %v5746_v4 }
 0x938   : > { %v5811_v37 = vand.u32 2147483647, %v5747_v15  ;;  %v5498_v20 = vmul.f32 %v5424_v32, %v5306_v48  ;;  %v5499_v29 = vmul.f32 %v5424_v32, %v5307_v59  ;;  %6852 = vmatmul.mubr.f32.gmra.mxu1 %v6648_v56  ;;  %v5044_v1 = vsub.f32 %v10685_v38, %v13781_v8  ;;  %v16464_v4 = vld [vmem:[#allocation308_spill] sm:$0xff]  ;;  %v16465_v15 = vld [vmem:[#allocation138_spill] sm:$0xff]  ;;  %v16466_v48 = vld [vmem:[#allocation309_spill] sm:$0xff] }
 0x939   : > { %v5045_v7 = vsub.f32 %v10688_v24, %v13781_v8  ;;  %v13940_v61 = vpop.f32.mrf.mxu0  ;;  %v6587_v19 = vmul.f32 %v6512_v21, %v6395_v40  ;;  %v6586_v16 = vmul.f32 %v6512_v21, %v6394_v54  ;;  %v6132_v0 = vsub.f32 %v10685_v38, %v13887_v5  ;;  %v16470_v21 = vld [vmem:[#allocation37_spill] sm:$0xff] }
 0x93a   : > { %v6133_v13 = vsub.f32 %v10688_v24, %v13887_v5  ;;  %v5562_v47 = vadd.f32 %v5498_v20, %v13732_v52  ;;  %v5563_v57 = vadd.f32 %v5499_v29, %v13734_v50  ;;  %v6194_v43 = vand.u32 2147483647, %v6130_v35 }
 0x93b   : > { %v6195_v12 = vand.u32 2147483647, %v6131_v53  ;;  %v5234_v23 = vmax.f32 %v5170_v28, 0.0  ;;  %v5235_v39 = vmax.f32 %v5171_v26, 0.0  ;;  %v6795_v42 = vpop.f32.mrf.mxu0  ;;  %v5748_v8 = vsub.f32 %v10707_v41, %v13871_v46  ;;  %v16468_v28 = vld [vmem:[#allocation99_spill] sm:$0xff]  ;;  %v16469_v26 = vld [vmem:[#allocation140_spill] sm:$0xff] }
 0x93c   : > { %v5749_v3 = vsub.f32 %v10710_v17, %v13871_v46  ;;  %v13952_v10 = vpop.permute.xlu1 %5687  ;;  %v6651_v25 = vadd.f32 %v6587_v19, %v5563_v57  ;;  %v6650_v22 = vadd.f32 %v6586_v16, %v5562_v47  ;;  %v16463_v5 = vsub.f32 1.0, %v13817_v27 }
 0x93d   : > { %v5874_v30 = vsub.f32 1.0, %v5810_v45  ;;  %v5875_v50 = vsub.f32 1.0, %v5811_v37  ;;  %v5108_v11 = vand.u32 2147483647, %v5044_v1  ;;  %v3324_v34 = vmul.f32 %v16465_v15, %v16464_v4 }
 0x93e   : > { %v4851_v52 = vmax.f32 %v16463_v5, 0.0  ;;  %v5109_v54 = vand.u32 2147483647, %v5045_v7  ;;  %v6196_v40 = vand.u32 2147483647, %v6132_v0  ;;  %6856 = vmatprep.mubr.f32.mxu1 %v6651_v25  ;;  %v6258_v56 = vsub.f32 1.0, %v6194_v43 }
 0x93f   : > { %v6197_v14 = vand.u32 2147483647, %v6133_v13  ;;  %v6259_v2 = vsub.f32 1.0, %v6195_v12  ;;  %v5298_v46 = vmul.f32 %v5234_v23, %v4850_v62  ;;  %6857 = vmatmul.mubr.f32.gmra.mxu1 %v6650_v22  ;;  %v3325_v59 = vmul.f32 %v16465_v15, %v16466_v48 }
 0x940   : > { %v5299_v9 = vmul.f32 %v5235_v39, %v4851_v52  ;;  %v16467_v27 = vsub.f32 %v10710_v17, %v16451_v33  ;;  %v5812_v35 = vand.u32 2147483647, %v5748_v8  ;;  %v5813_v53 = vand.u32 2147483647, %v5749_v3  ;;  %v16471_v33 = vld [vmem:[#allocation68_spill] sm:$0xff] }
 0x941   : > { %v4412_v32 = vmul.f32 %v16469_v26, %v16468_v28  ;;  %v4413_v45 = vmul.f32 %v16469_v26, %v16470_v21  ;;  %v5938_v37 = vmax.f32 %v5874_v30, 0.0  ;;  %v5939_v20 = vmax.f32 %v5875_v50, 0.0  ;;  %v13967_v62 = vpop.permute.xlu1 %4987  ;;  %v16476_v26 = vld [vmem:[#allocation302_spill] sm:$0xff] }
 0x942   : > { %v4725_v36 = vand.u32 2147483647, %v16467_v27  ;;  %v5172_v29 = vsub.f32 1.0, %v5108_v11  ;;  %v5173_v1 = vsub.f32 1.0, %v5109_v54  ;;  %v6260_v7 = vsub.f32 1.0, %v6196_v40 }
 0x943   : > { %v6261_v19 = vsub.f32 1.0, %v6197_v14  ;;  %v6322_v16 = vmax.f32 %v6258_v56, 0.0  ;;  %v6323_v0 = vmax.f32 %v6259_v2, 0.0  ;;  %v5490_v13 = vmul.f32 %v16471_v33, %v5298_v46  ;;  %v16472_v14 = vld [vmem:[#allocation233_spill] sm:$0xff] }
 0x944   : > { %v5491_v47 = vmul.f32 %v16471_v33, %v5299_v9  ;;  %v4788_v57 = vsub.f32 1.0, %v13930_v58  ;;  %v4789_v43 = vsub.f32 1.0, %v4725_v36  ;;  %v5876_v12 = vsub.f32 1.0, %v5812_v35  ;;  %v16473_v36 = vld [vmem:[#allocation247_spill] sm:$0xff] }
 0x945   : > { %v5877_v23 = vsub.f32 1.0, %v5813_v53  ;;  %v13972_v39 = vadd.f32 %v4412_v32, %v3324_v34  ;;  %v13974_v42 = vadd.f32 %v4413_v45, %v3325_v59  ;;  %v6386_v8 = vmul.f32 %v6322_v16, %v5938_v37  ;;  %v16475_v53 = vld [vmem:[#allocation249_spill] sm:$0xff]  ;;  %v16477_v37 = vld [vmem:[#allocation82_spill] sm:$0xff] }
 0x946   : > { %v6387_v3 = vmul.f32 %v6323_v0, %v5939_v20  ;;  %v5236_v25 = vmax.f32 %v5172_v29, 0.0  ;;  %v5237_v22 = vmax.f32 %v5173_v1, 0.0  ;;  %v6324_v5 = vmax.f32 %v6260_v7, 0.0  ;;  %v6496_v30 = vpop.permute.xlu1 %6495  ;;  %v16478_v20 = vld [vmem:[#allocation144_spill] sm:$0xff]  ;;  %v16479_v1 = vld [vmem:[#allocation18_spill] sm:$0xff] }
 0x947   : > { %v6325_v52 = vmax.f32 %v6261_v19, 0.0  ;;  %v5554_v50 = vadd.f32 %v5490_v13, %v13716_v44  ;;  %v5555_v11 = vadd.f32 %v5491_v47, %v13718_v31  ;;  %v6578_v4 = vmul.f32 %v6496_v30, %v6386_v8  ;;  %v16474_v31 = vld [vmem:[#allocation10_spill] sm:$0xff]  ;;  %v6500_v13 = vpop.permute.xlu0 %6499 }
 0x948   : > { %v6579_v58 = vmul.f32 %v6496_v30, %v6387_v3  ;;  %v4852_v15 = vmax.f32 %v4788_v57, 0.0  ;;  %v4853_v54 = vmax.f32 %v4789_v43, 0.0  ;;  %v5940_v40 = vmax.f32 %v5876_v12, 0.0  ;;  %v16480_v30 = vld [vmem:[#allocation304_spill] sm:$0xff] }
 0x949   : > { %v5941_v34 = vmax.f32 %v5877_v23, 0.0  ;;  %v5052_v56 = vsub.f32 %v10685_v38, %v16472_v14  ;;  %v5053_v2 = vsub.f32 %v10688_v24, %v16472_v14  ;;  %v6642_v46 = vadd.f32 %v6578_v4, %v5554_v50 }
 0x94a   : > { %v6643_v9 = vadd.f32 %v6579_v58, %v5555_v11  ;;  %v6388_v48 = vmul.f32 %v6324_v5, %v5940_v40  ;;  %v5300_v27 = vmul.f32 %v5236_v25, %v4852_v15  ;;  %v5301_v44 = vmul.f32 %v5237_v22, %v4853_v54  ;;  %v16481_v11 = vld [vmem:[#allocation76_spill] sm:$0xff] }
 0x94b   : > { %v6389_v59 = vmul.f32 %v6325_v52, %v5941_v34  ;;  %v13984_v35 = vmul.f32 %v16474_v31, %v16473_v36  ;;  %v13988_v28 = vmul.f32 %v16474_v31, %v16475_v53  ;;  %v4668_v32 = vsub.f32 %v10707_v41, %v16476_v26  ;;  %v5412_v45 = vpop.permute.xlu1 %5411 }
 0x94c   : > { %v4669_v21 = vsub.f32 %v10710_v17, %v16476_v26  ;;  %6836 = vmatprep.mubr.f32.mxu0 %v6643_v9  ;;  %v13996_v29 = vmul.f32 %v16478_v20, %v16477_v37  ;;  %v14000_v7 = vmul.f32 %v16478_v20, %v16479_v1  ;;  %v5492_v19 = vmul.f32 %v5412_v45, %v5300_v27  ;;  %v16482_v27 = vld [vmem:[#allocation100_spill] sm:$0xff]  ;;  %v16484_v37 = vld [vmem:[#allocation62_spill] sm:$0xff] }
 0x94d   : > { %v5493_v16 = vmul.f32 %v5412_v45, %v5301_v44  ;;  %6837 = vmatmul.mubr.f32.gmra.mxu0 %v6642_v46  ;;  %v5116_v0 = vand.u32 2147483647, %v5052_v56  ;;  %v5117_v33 = vand.u32 2147483647, %v5053_v2  ;;  %v6140_v47 = vsub.f32 %v10685_v38, %v13895_v60  ;;  %v16483_v45 = vld [vmem:[#allocation191_spill] sm:$0xff] }
 0x94e   : > { %v6141_v57 = vsub.f32 %v10688_v24, %v13895_v60  ;;  %v5556_v43 = vadd.f32 %v5492_v19, %v13707_v55  ;;  %v6581_v23 = vmul.f32 %v6500_v13, %v6389_v59  ;;  %v6580_v8 = vmul.f32 %v6500_v13, %v6388_v48 }
 0x94f   : > { %v5557_v12 = vadd.f32 %v5493_v16, %v13709_v18  ;;  %v4732_v3 = vand.u32 2147483647, %v4668_v32  ;;  %v4733_v25 = vand.u32 2147483647, %v4669_v21  ;;  %v5756_v22 = vsub.f32 %v10707_v41, %v13881_v49  ;;  %v5428_v52 = vpop.permute.xlu1 %5427 }
 0x950   : > { %v5757_v5 = vsub.f32 %v10710_v17, %v13881_v49  ;;  %v4670_v50 = vsub.f32 %v10707_v41, %v16480_v30  ;;  %v5054_v60 = vsub.f32 %v10685_v38, %v16481_v11  ;;  %v6644_v4 = vadd.f32 %v6580_v8, %v5556_v43  ;;  %v16485_v43 = vld [vmem:[#allocation42_spill] sm:$0xff] }
 0x951   : > { %v6645_v55 = vadd.f32 %v6581_v23, %v5557_v12  ;;  %v5180_v18 = vsub.f32 1.0, %v5116_v0  ;;  %v5181_v58 = vsub.f32 1.0, %v5117_v33  ;;  %v6204_v15 = vand.u32 2147483647, %v6140_v47 }
 0x952   : > { %v6205_v54 = vand.u32 2147483647, %v6141_v57  ;;  %v4671_v40 = vsub.f32 %v10710_v17, %v16480_v30  ;;  %v5055_v34 = vsub.f32 %v10688_v24, %v16481_v11  ;;  %v5758_v49 = vsub.f32 %v10707_v41, %v13952_v10 }
 0x953   : > { %v5759_v14 = vsub.f32 %v10710_v17, %v13952_v10  ;;  %6841 = vmatprep.mubr.f32.mxu0 %v6645_v55  ;;  %v4796_v56 = vsub.f32 1.0, %v4732_v3  ;;  %v4797_v2 = vsub.f32 1.0, %v4733_v25  ;;  %v5820_v46 = vand.u32 2147483647, %v5756_v22 }
 0x954   : > { %v5821_v9 = vand.u32 2147483647, %v5757_v5  ;;  %6842 = vmatmul.mubr.f32.gmra.mxu0 %v6644_v4  ;;  %v4734_v48 = vand.u32 2147483647, %v4670_v50  ;;  %v5118_v59 = vand.u32 2147483647, %v5054_v60  ;;  %v6142_v44 = vsub.f32 %v10685_v38, %v16482_v27  ;;  %v14028_v31 = vpop.permute.xlu1 %6075 }
 0x955   : > { %v6143_v36 = vsub.f32 %v10688_v24, %v16482_v27  ;;  %v5244_v53 = vmax.f32 %v5180_v18, 0.0  ;;  %v5245_v26 = vmax.f32 %v5181_v58, 0.0  ;;  %v6268_v32 = vsub.f32 1.0, %v6204_v15  ;;  %v14030_v21 = vpop.f32.mrf.mxu0 }
 0x956   : > { %v6269_v10 = vsub.f32 1.0, %v6205_v54  ;;  %v4414_v20 = vmul.f32 %v16484_v37, %v16483_v45  ;;  %v5119_v1 = vand.u32 2147483647, %v5055_v34  ;;  %v5822_v19 = vand.u32 2147483647, %v5758_v49 }
 0x957   : > { %v5823_v16 = vand.u32 2147483647, %v5759_v14  ;;  %v4860_v0 = vmax.f32 %v4796_v56, 0.0  ;;  %v4861_v33 = vmax.f32 %v4797_v2, 0.0  ;;  %v5884_v13 = vsub.f32 1.0, %v5820_v46  ;;  %v6800_v57 = vpop.f32.mrf.mxu0  ;;  %v16486_v56 = vld [vmem:[#allocation207_spill] sm:$0xff] }
 0x958   : > { %v5885_v47 = vsub.f32 1.0, %v5821_v9  ;;  %v4415_v12 = vmul.f32 %v16484_v37, %v16485_v43  ;;  %v4735_v23 = vand.u32 2147483647, %v4671_v40  ;;  %v6206_v8 = vand.u32 2147483647, %v6142_v44  ;;  %v16487_v2 = vld [vmem:[#allocation146_spill] sm:$0xff] }
 0x959   : > { %v6207_v3 = vand.u32 2147483647, %v6143_v36  ;;  %v6332_v25 = vmax.f32 %v6268_v32, 0.0  ;;  %v6333_v22 = vmax.f32 %v6269_v10, 0.0  ;;  %v5308_v5 = vmul.f32 %v5244_v53, %v4860_v0  ;;  %v14036_v50 = vpop.permute.xlu1 %4991  ;;  %v16488_v9 = vld [vmem:[#allocation261_spill] sm:$0xff]  ;;  %v16491_v57 = vld [vmem:[#allocation246_spill] sm:$0xff] }
 0x95a   : > { %v5309_v30 = vmul.f32 %v5245_v26, %v4861_v33  ;;  %v5182_v11 = vsub.f32 1.0, %v5118_v59  ;;  %v5183_v60 = vsub.f32 1.0, %v5119_v1  ;;  %v5886_v55 = vsub.f32 1.0, %v5822_v19  ;;  %v16489_v33 = vld [vmem:[#allocation110_spill] sm:$0xff]  ;;  %v16492_v43 = vld [vmem:[#allocation173_spill] sm:$0xff] }
 0x95b   : > { %v5887_v4 = vsub.f32 1.0, %v5823_v16  ;;  %v5948_v18 = vmax.f32 %v5884_v13, 0.0  ;;  %v5949_v58 = vmax.f32 %v5885_v47, 0.0  ;;  %v5500_v15 = vmul.f32 %v5428_v52, %v5308_v5  ;;  %v16490_v13 = vld [vmem:[#allocation83_spill] sm:$0xff] }
 0x95c   : > { %v5501_v54 = vmul.f32 %v5428_v52, %v5309_v30  ;;  %v4798_v34 = vsub.f32 1.0, %v4734_v48  ;;  %v4799_v49 = vsub.f32 1.0, %v4735_v23  ;;  %v6270_v14 = vsub.f32 1.0, %v6206_v8 }
 0x95d   : > { %v6271_v40 = vsub.f32 1.0, %v6207_v3  ;;  %v3326_v46 = vmul.f32 %v16487_v2, %v16486_v56  ;;  %v3327_v27 = vmul.f32 %v16487_v2, %v16488_v9  ;;  %v6396_v44 = vmul.f32 %v6332_v25, %v5948_v18  ;;  %v16496_v9 = vld [vmem:[#allocation291_spill] sm:$0xff] }
 0x95e   : > { %v6397_v36 = vmul.f32 %v6333_v22, %v5949_v58  ;;  %v5246_v59 = vmax.f32 %v5182_v11, 0.0  ;;  %v5247_v53 = vmax.f32 %v5183_v60, 0.0  ;;  %v5950_v26 = vmax.f32 %v5886_v55, 0.0  ;;  %v6516_v10 = vpop.permute.xlu1 %6515  ;;  %v16493_v60 = vld [vmem:[#allocation11_spill] sm:$0xff] }
 0x95f   : > { %v5951_v32 = vmax.f32 %v5887_v4, 0.0  ;;  %v5564_v45 = vadd.f32 %v5500_v15, %v13972_v39  ;;  %v5565_v52 = vadd.f32 %v5501_v54, %v13974_v42  ;;  %v6588_v48 = vmul.f32 %v6516_v10, %v6396_v44  ;;  %v16497_v44 = vld [vmem:[#allocation102_spill] sm:$0xff] }
 0x960   : > { %v6589_v37 = vmul.f32 %v6516_v10, %v6397_v36  ;;  %v4862_v1 = vmax.f32 %v4798_v34, 0.0  ;;  %v4863_v19 = vmax.f32 %v4799_v49, 0.0  ;;  %v6334_v16 = vmax.f32 %v6270_v14, 0.0  ;;  %v16498_v36 = vld [vmem:[#allocation16_spill] sm:$0xff] }
 0x961   : > { %v6335_v0 = vmax.f32 %v6271_v40, 0.0  ;;  %v4226_v47 = vmul.f32 %v16490_v13, %v16489_v33  ;;  %v4227_v23 = vmul.f32 %v16492_v43, %v16491_v57  ;;  %v6652_v8 = vadd.f32 %v6588_v48, %v5564_v45 }
 0x962   : > { %v6653_v3 = vadd.f32 %v6589_v37, %v5565_v52  ;;  %v6398_v25 = vmul.f32 %v6334_v16, %v5950_v26  ;;  %v5310_v5 = vmul.f32 %v5246_v59, %v4862_v1  ;;  %v5311_v39 = vmul.f32 %v5247_v53, %v4863_v19  ;;  %v16499_v53 = vld [vmem:[#allocation250_spill] sm:$0xff] }
 0x963   : > { %v6399_v22 = vmul.f32 %v6335_v0, %v5951_v32  ;;  %v14050_v42 = vadd.f32 %v13996_v29, %v13984_v35  ;;  %v14054_v30 = vadd.f32 %v14000_v7, %v13988_v28  ;;  %v4478_v11 = vadd.f32 %v4414_v20, %v3326_v46  ;;  %v5432_v4 = vpop.permute.xlu1 %5431  ;;  %v16494_v35 = vld [vmem:[#allocation22_spill] sm:$0xff]  ;;  %v6520_v7 = vpop.permute.xlu0 %6519  ;;  %v16495_v46 = vld [vmem:[#allocation271_spill] sm:$0xff]  ;;  %v16500_v0 = vld [vmem:[#allocation237_spill] sm:$0xff] }
 0x964   : > { %v4672_v55 = vsub.f32 %v10707_v41, %v16493_v60  ;;  %6861 = vmatprep.mubr.f32.mxu1 %v6653_v3  ;;  %v4479_v18 = vadd.f32 %v4415_v12, %v3327_v27  ;;  %v4673_v58 = vsub.f32 %v10710_v17, %v16493_v60  ;;  %v5502_v15 = vmul.f32 %v5432_v4, %v5310_v5  ;;  %v14060_v34 = vpop.f32.mrf.mxu0  ;;  %v16502_v3 = vld [vmem:[#allocation293_spill] sm:$0xff] }
 0x965   : > { %v5503_v54 = vmul.f32 %v5432_v4, %v5311_v39  ;;  %6862 = vmatmul.mubr.f32.gmra.mxu1 %v6652_v8  ;;  %v4674_v29 = vsub.f32 %v10707_v41, %v16494_v35  ;;  %v4675_v28 = vsub.f32 %v10710_v17, %v16494_v35  ;;  %v5056_v20 = vsub.f32 %v10685_v38, %v13967_v62  ;;  %v16501_v8 = vld [vmem:[#allocation30_spill] sm:$0xff] }
 0x966   : > { %v5057_v12 = vsub.f32 %v10688_v24, %v13967_v62  ;;  %v5566_v49 = vadd.f32 %v5502_v15, %v4478_v11  ;;  %v6805_v40 = vpop.f32.mrf.mxu0  ;;  %v6591_v56 = vmul.f32 %v6520_v7, %v6399_v22  ;;  %v6590_v2 = vmul.f32 %v6520_v7, %v6398_v25  ;;  %v16503_v22 = vld [vmem:[#allocation150_spill] sm:$0xff] }
 0x967   : > { %v5567_v14 = vadd.f32 %v5503_v54, %v4479_v18  ;;  %v14072_v27 = vmul.f32 %v16496_v9, %v16495_v46  ;;  %v14076_v59 = vmul.f32 %v16498_v36, %v16497_v44  ;;  %v14080_v26 = vmul.f32 %v16498_v36, %v16499_v53 }
 0x968   : > { %v4736_v32 = vand.u32 2147483647, %v4672_v55  ;;  %v4737_v10 = vand.u32 2147483647, %v4673_v58  ;;  %v5760_v62 = vsub.f32 %v10707_v41, %v13899_v6  ;;  %v6080_v45 = vpop.permute.xlu1 %6079  ;;  %v6654_v48 = vadd.f32 %v6590_v2, %v5566_v49  ;;  %v16504_v55 = vld [vmem:[#allocation160_spill] sm:$0xff] }
 0x969   : > { %v6655_v52 = vadd.f32 %v6591_v56, %v5567_v14  ;;  %v4738_v37 = vand.u32 2147483647, %v4674_v29  ;;  %v4739_v1 = vand.u32 2147483647, %v4675_v28  ;;  %v5761_v19 = vsub.f32 %v10710_v17, %v13899_v6 }
 0x96a   : > { %v5120_v16 = vand.u32 2147483647, %v5056_v20  ;;  %v14088_v33 = vmul.f32 %v16496_v9, %v16500_v0  ;;  %v5121_v13 = vand.u32 2147483647, %v5057_v12  ;;  %v6144_v57 = vsub.f32 %v10685_v38, %v14028_v31 }
 0x96b   : > { %v6145_v43 = vsub.f32 %v10688_v24, %v14028_v31  ;;  %6866 = vmatprep.mubr.f32.mxu1 %v6655_v52  ;;  %v14096_v25 = vmul.f32 %v16502_v3, %v16501_v8  ;;  %v14099_v5 = vmul.f32 %v16503_v22, %v4226_v47  ;;  %v14102_v6 = vmul.f32 %v16503_v22, %v4227_v23  ;;  %v14104_v11 = vpop.f32.mrf.mxu0 }
 0x96c   : > { %v4800_v39 = vsub.f32 1.0, %v4736_v32  ;;  %6867 = vmatmul.mubr.f32.gmra.mxu1 %v6654_v48  ;;  %v4801_v60 = vsub.f32 1.0, %v4737_v10  ;;  %v4676_v4 = vsub.f32 %v10707_v41, %v16504_v55  ;;  %v4677_v31 = vsub.f32 %v10710_v17, %v16504_v55 }
 0x96d   : > { %v5824_v18 = vand.u32 2147483647, %v5760_v62  ;;  %v4802_v58 = vsub.f32 1.0, %v4738_v37  ;;  %v4803_v15 = vsub.f32 1.0, %v4739_v1  ;;  %v5825_v54 = vand.u32 2147483647, %v5761_v19  ;;  %v4996_v35 = vpop.permute.xlu1 %4995  ;;  %v6810_v29 = vpop.f32.mrf.mxu0 }
 0x96e   : > { %v5184_v47 = vsub.f32 1.0, %v5120_v16  ;;  %v5185_v23 = vsub.f32 1.0, %v5121_v13  ;;  %v6208_v28 = vand.u32 2147483647, %v6144_v57  ;;  %v6209_v7 = vand.u32 2147483647, %v6145_v43 }
 0x96f   : > { %v5058_v20 = vsub.f32 %v10685_v38, %v14036_v50  ;;  %v4864_v12 = vmax.f32 %v4800_v39, 0.0  ;;  %v5059_v49 = vsub.f32 %v10688_v24, %v14036_v50  ;;  %v6146_v14 = vsub.f32 %v10685_v38, %v6080_v45 }
 0x970   : > { %v6147_v40 = vsub.f32 %v10688_v24, %v6080_v45  ;;  %v4865_v56 = vmax.f32 %v4801_v60, 0.0  ;;  %v14116_v2 = vand.u32 2147483647, %v4676_v4  ;;  %v14118_v46 = vand.u32 2147483647, %v4677_v31  ;;  %v16505_v45 = vld [vmem:[#allocation134_spill] sm:$0xff] }
 0x971   : > { %v5888_v9 = vsub.f32 1.0, %v5824_v18  ;;  %v5889_v44 = vsub.f32 1.0, %v5825_v54  ;;  %v5762_v36 = vsub.f32 %v10707_v41, %v13911_v51  ;;  %v5763_v53 = vsub.f32 %v10710_v17, %v13911_v51  ;;  %v6084_v18 = vpop.permute.xlu0 %6083 }
 0x972   : > { %v5248_v32 = vmax.f32 %v5184_v47, 0.0  ;;  %v5249_v10 = vmax.f32 %v5185_v23, 0.0  ;;  %v6272_v50 = vsub.f32 1.0, %v6208_v28  ;;  %v6273_v62 = vsub.f32 1.0, %v6209_v7  ;;  %v5436_v48 = vpop.permute.xlu1 %5435 }
 0x973   : > { %v5122_v52 = vand.u32 2147483647, %v5058_v20  ;;  %v14126_v37 = vmul.f32 %v16502_v3, %v16505_v45  ;;  %v5123_v1 = vand.u32 2147483647, %v5059_v49  ;;  %v6210_v19 = vand.u32 2147483647, %v6146_v14 }
 0x974   : > { %v6211_v16 = vand.u32 2147483647, %v6147_v40  ;;  %v4866_v0 = vmax.f32 %v4802_v58, 0.0  ;;  %v4867_v13 = vmax.f32 %v4803_v15, 0.0  ;;  %v5060_v57 = vsub.f32 %v10685_v38, %v4996_v35 }
 0x975   : > { %v5061_v43 = vsub.f32 %v10688_v24, %v4996_v35  ;;  %v5952_v51 = vmax.f32 %v5888_v9, 0.0  ;;  %v5953_v8 = vmax.f32 %v5889_v44, 0.0  ;;  %v5826_v22 = vand.u32 2147483647, %v5762_v36 }
 0x976   : > { %v5827_v39 = vand.u32 2147483647, %v5763_v53  ;;  %v6336_v60 = vmax.f32 %v6272_v50, 0.0  ;;  %v6337_v55 = vmax.f32 %v6273_v62, 0.0  ;;  %v5312_v4 = vmul.f32 %v5248_v32, %v4864_v12 }
 0x977   : > { %v5313_v31 = vmul.f32 %v5249_v10, %v4865_v56  ;;  %v5186_v3 = vsub.f32 1.0, %v5122_v52  ;;  %v5187_v54 = vsub.f32 1.0, %v5123_v1  ;;  %v6274_v47 = vsub.f32 1.0, %v6210_v19  ;;  %v5700_v23 = vpop.permute.xlu1 %5699 }
 0x978   : > { %v6275_v29 = vsub.f32 1.0, %v6211_v16  ;;  %v5124_v58 = vand.u32 2147483647, %v5060_v57  ;;  %v5125_v15 = vand.u32 2147483647, %v5061_v43  ;;  %v5504_v28 = vmul.f32 %v5436_v48, %v5312_v4 }
 0x979   : > { %v5505_v7 = vmul.f32 %v5436_v48, %v5313_v31  ;;  %v5890_v20 = vsub.f32 1.0, %v5826_v22  ;;  %v5891_v35 = vsub.f32 1.0, %v5827_v39  ;;  %v5764_v49 = vsub.f32 %v10707_v41, %v5700_v23 }
 0x97a   : > { %v5765_v14 = vsub.f32 %v10710_v17, %v5700_v23  ;;  %v6148_v40 = vsub.f32 %v10685_v38, %v6084_v18  ;;  %v6149_v12 = vsub.f32 %v10688_v24, %v6084_v18  ;;  %v14134_v56 = vpop.f32.mrf.mxu0  ;;  %v6400_v9 = vmul.f32 %v6336_v60, %v5952_v51 }
 0x97b   : > { %v6401_v44 = vmul.f32 %v6337_v55, %v5953_v8  ;;  %v5250_v36 = vmax.f32 %v5186_v3, 0.0  ;;  %v5251_v53 = vmax.f32 %v5187_v54, 0.0  ;;  %v6338_v32 = vmax.f32 %v6274_v47, 0.0 }
 0x97c   : > { %v6339_v10 = vmax.f32 %v6275_v29, 0.0  ;;  %v5188_v50 = vsub.f32 1.0, %v5124_v58  ;;  %v5189_v62 = vsub.f32 1.0, %v5125_v15  ;;  %v5568_v52 = vadd.f32 %v5504_v28, %v14050_v42  ;;  %v6524_v48 = vpop.permute.xlu1 %6523  ;;  %v6815_v17 = vpop.f32.mrf.mxu0 }
 0x97d   : > { %v5569_v41 = vadd.f32 %v5505_v7, %v14054_v30  ;;  %v5828_v45 = vand.u32 2147483647, %v5764_v49  ;;  %v5829_v38 = vand.u32 2147483647, %v5765_v14  ;;  %v6592_v1 = vmul.f32 %v6524_v48, %v6400_v9 }
 0x97e   : > { %v6593_v24 = vmul.f32 %v6524_v48, %v6401_v44  ;;  %v4804_v19 = vsub.f32 1.0, %v14116_v2  ;;  %v4805_v16 = vsub.f32 1.0, %v14118_v46  ;;  %v5954_v57 = vmax.f32 %v5890_v20, 0.0 }
 0x97f   : > { %v5955_v43 = vmax.f32 %v5891_v35, 0.0  ;;  %v6212_v51 = vand.u32 2147483647, %v6148_v40  ;;  %v6213_v8 = vand.u32 2147483647, %v6149_v12  ;;  %v6656_v22 = vadd.f32 %v6592_v1, %v5568_v52  ;;  %v16506_v1 = vld [vmem:[#allocation87_spill] sm:$0xff] }
 0x980   : > { %v6657_v39 = vadd.f32 %v6593_v24, %v5569_v41  ;;  %v6402_v60 = vmul.f32 %v6338_v32, %v5954_v57  ;;  %v5314_v55 = vmul.f32 %v5250_v36, %v4866_v0  ;;  %v5315_v30 = vmul.f32 %v5251_v53, %v4867_v13  ;;  %v6528_v13 = vpop.permute.xlu0 %6527  ;;  %v16507_v24 = vld [vmem:[#allocation267_spill] sm:$0xff]  ;;  %v16514_v57 = vld [vmem:[#allocation101_spill] sm:$0xff] }
 0x981   : > { %v6403_v42 = vmul.f32 %v6339_v10, %v5955_v43  ;;  %v5252_v4 = vmax.f32 %v5188_v50, 0.0  ;;  %v5253_v31 = vmax.f32 %v5189_v62, 0.0  ;;  %v5892_v18 = vsub.f32 1.0, %v5828_v45  ;;  %v5440_v54 = vpop.permute.xlu1 %5439 }
 0x982   : > { %v5893_v3 = vsub.f32 1.0, %v5829_v38  ;;  %6871 = vmatprep.mubr.f32.mxu1 %v6657_v39  ;;  %v4482_v2 = vadd.f32 %v14099_v5, %v14096_v25  ;;  %v4483_v46 = vadd.f32 %v14102_v6, %v14126_v37  ;;  %v5506_v47 = vmul.f32 %v5440_v54, %v5314_v55  ;;  %v16517_v39 = vld [vmem:[#allocation195_spill] sm:$0xff] }
 0x983   : > { %v5507_v29 = vmul.f32 %v5440_v54, %v5315_v30  ;;  %6872 = vmatmul.mubr.f32.gmra.mxu1 %v6656_v22  ;;  %v4868_v23 = vmax.f32 %v4804_v19, 0.0  ;;  %v4869_v58 = vmax.f32 %v4805_v16, 0.0  ;;  %v6276_v15 = vsub.f32 1.0, %v6212_v51  ;;  %v16512_v19 = vld [vmem:[#allocation209_spill] sm:$0xff]  ;;  %v16513_v16 = vld [vmem:[#allocation46_spill] sm:$0xff]  ;;  %v16515_v51 = vld [vmem:[#allocation212_spill] sm:$0xff] }
 0x984   : > { %v6277_v0 = vsub.f32 1.0, %v6213_v8  ;;  %v5570_v28 = vadd.f32 %v5506_v47, %v4482_v2  ;;  %v6595_v20 = vmul.f32 %v6528_v13, %v6403_v42  ;;  %v6594_v35 = vmul.f32 %v6528_v13, %v6402_v60  ;;  %v16516_v22 = vld [vmem:[#allocation177_spill] sm:$0xff] }
 0x985   : > { %v5571_v7 = vadd.f32 %v5507_v29, %v4483_v46  ;;  %v5956_v49 = vmax.f32 %v5892_v18, 0.0  ;;  %v5957_v14 = vmax.f32 %v5893_v3, 0.0  ;;  %v5444_v40 = vpop.permute.xlu1 %5443  ;;  %v5316_v12 = vmul.f32 %v5252_v4, %v4868_v23 }
 0x986   : > { %v5317_v25 = vmul.f32 %v5253_v31, %v4869_v58  ;;  %v6658_v9 = vadd.f32 %v6594_v35, %v5570_v28  ;;  %v6340_v6 = vmax.f32 %v6276_v15, 0.0  ;;  %v6341_v37 = vmax.f32 %v6277_v0, 0.0 }
 0x987   : > { %v6659_v5 = vadd.f32 %v6595_v20, %v5571_v7  ;;  %v5508_v44 = vmul.f32 %v5444_v40, %v5316_v12  ;;  %v4484_v53 = vadd.f32 %v14072_v27, %v14076_v59  ;;  %v4485_v32 = vadd.f32 %v14088_v33, %v14080_v26  ;;  %v16508_v27 = vld [vmem:[#allocation189_spill] sm:$0xff]  ;;  %v16509_v59 = vld [vmem:[#allocation243_spill] sm:$0xff]  ;;  %v16510_v26 = vld [vmem:[#allocation210_spill] sm:$0xff] }
 0x988   : > { %v5509_v36 = vmul.f32 %v5444_v40, %v5317_v25  ;;  %v6404_v10 = vmul.f32 %v6340_v6, %v5956_v49  ;;  %v6405_v50 = vmul.f32 %v6341_v37, %v5957_v14  ;;  %v16511_v33 = vld [vmem:[#allocation41_spill] sm:$0xff]  ;;  %v14201_v20 = vld [vmem:[%s14774_s8] ss:$0 sm:$0xff]  ;;  %v8838_v40 = vld [vmem:[%s8987_s19 + $0x8] sm:$0xff] }
 0x989   : > { %6876 = vmatprep.mubr.f32.mxu1 %v6659_v5  ;;  %v5572_v52 = vadd.f32 %v5508_v44, %v4484_v53 }
 0x98a   : > { %6877 = vmatmul.mubr.f32.gmra.mxu1 %v6658_v9  ;;  %v6532_v62 = vpop.permute.xlu1 %6531  ;;  %v5573_v41 = vadd.f32 %v5509_v36, %v4485_v32  ;;  %v8839_v9 = vld [vmem:[%s8987_s19] sm:$0xff] }
 0x98b   : > { %v6596_v48 = vmul.f32 %v6532_v62, %v6404_v10  ;;  %v6597_v17 = vmul.f32 %v6532_v62, %v6405_v50  ;;  %v8840_v50 = vld [vmem:[%s8987_s19 + $0x10] sm:$0xff] }
 0x98d   : > { %v6660_v45 = vadd.f32 %v6596_v48, %v5572_v52  ;;  %v6661_v38 = vadd.f32 %v6597_v17, %v5573_v41  ;;  %v8841_v41 = vld [vmem:[%s8987_s19 + $0x18] sm:$0xff] }
 0x98f   : > { %6881 = vmatprep.mubr.f32.mxu1 %v6661_v38 }
 0x990   : > { %6882 = vmatmul.mubr.f32.gmra.mxu1 %v6660_v45 }
 0x991   : > { %8252 = vmatprep.mubr.msk.f32.mxu1 %vm551_vm0, %v16506_v1 }
 0x994   : > { %8253 = vmatmul.mubr.msk.f32.vlgmr.msra.gmra.mxu1 %vm551_vm0, %v16507_v24  ;;  %v8842_v24 = vld [vmem:[%s8987_s19 + $0x20] sm:$0xff] }
 0x995   : > { %8255 = vmatprep.mubr.msk.f32.mxu1 %vm551_vm0, %v16508_v27 }
 0x998   : > { %8256 = vmatmul.mubr.msk.f32.gmra.mxu1 %vm551_vm0, %v16509_v59 }
 0x999   : > { %8258 = vmatprep.mubr.msk.f32.mxu1 %vm551_vm0, %v16510_v26 }
 0x99c   : > { %8259 = vmatmul.mubr.msk.f32.gmra.mxu1 %vm551_vm0, %v16511_v33  ;;  %v8843_v33 = vld [vmem:[%s8987_s19 + $0x28] sm:$0xff] }
 0x99d   : > { %8261 = vmatprep.mubr.msk.f32.mxu1 %vm551_vm0, %v16512_v19 }
 0x9a0   : > { %8262 = vmatmul.mubr.msk.f32.gmra.mxu1 %vm551_vm0, %v16513_v16 }
 0x9a1   : > { %8264 = vmatprep.mubr.msk.f32.mxu1 %vm551_vm0, %v16514_v57 }
 0x9a3   : > { %v6818_v43 = vpop.f32.mrf.mxu0 }
 0x9a4   : > { %8265 = vmatmul.mubr.msk.f32.gmra.mxu1 %vm551_vm0, %v16515_v51 }
 0x9a5   : > { %v6820_v8 = vpop.f32.mrf.mxu0  ;;  %8267 = vmatprep.mubr.msk.f32.mxu1 %vm551_vm0, %v16516_v22 }
 0x9a6   : > { %v8844_v8 = vld [vmem:[%s8987_s19 + $0x30] sm:$0xff] }
 0x9a8   : > { %8268 = vmatmul.mubr.msk.f32.gmra.mxu1 %vm551_vm0, %v16517_v39  ;;  %v8845_v39 = vld [vmem:[%s8987_s19 + $0x38] sm:$0xff] }
 0x9a9   : > { %8270 = vmatprep.mubr.msk.f32.mxu1 %vm551_vm0, %v13913_v63 }
 0x9ac   : > { %8271 = vmatmul.mubr.msk.f32.gmra.mxu1 %vm551_vm0, %v13940_v61 }
 0x9ad   : > { %8273 = vmatprep.mubr.msk.f32.mxu1 %vm551_vm0, %v14030_v21 }
 0x9b0   : > { %8274 = vmatmul.mubr.msk.f32.gmra.mxu1 %vm551_vm0, %v14060_v34 }
 0x9b1   : > { %8276 = vmatprep.mubr.msk.f32.mxu1 %vm551_vm0, %v14104_v11 }
 0x9b4   : > { %8277 = vmatmul.mubr.msk.f32.gmra.mxu1 %vm551_vm0, %v14134_v56 }
 0x9b5   : > { %8279 = vmatprep.mubr.msk.f32.mxu1 %vm551_vm0, %v6818_v43 }
 0x9bb   : > { %v6823_v60 = vpop.f32.mrf.mxu0 }
 0x9bc   : > { %8280 = vmatmul.mubr.msk.f32.gmra.mxu1 %vm551_vm0, %v6823_v60 }
 0x9bd   : > { %v6825_v63 = vpop.f32.mrf.mxu0 }
 0x9d8   : > { %v6828_v42 = vpop.f32.mrf.mxu0 }
 0x9d9   : > { %8282 = vmatprep.mubr.msk.f32.mxu1 %vm551_vm0, %v6828_v42 }
 0x9da   : > { %v6830_v61 = vpop.f32.mrf.mxu0 }
 0x9dd   : > { %v6848_v21 = vpop.f32.mrf.mxu1 }
 0x9df   : > { %v6850_v55 = vpop.f32.mrf.mxu1 }
 0x9f4   : > { %v6833_v30 = vpop.f32.mrf.mxu0 }
 0x9f5   : > { %8283 = vmatmul.mubr.msk.f32.gmra.mxu1 %vm551_vm0, %v6833_v30 }
 0x9f6   : > { %v6835_v34 = vpop.f32.mrf.mxu0 }
 0x9f7   : > { %v8846_v34 = vld [vmem:[%s8987_s19 + $0x40] sm:$0xff] }
 0x9f8   : > { %v6853_v11 = vpop.f32.mrf.mxu1 }
 0x9fa   : > { %v6855_v4 = vpop.f32.mrf.mxu1 }
 0x9ff   : > { %v6858_v31 = vpop.f32.mrf.mxu1 }
 0xa01   : > { %v6860_v56 = vpop.f32.mrf.mxu1 }
 0xa02   : > { %v8847_v56 = vld [vmem:[%s8987_s19 + $0x48] sm:$0xff] }
 0xa0d   : > { %v6838_v18 = vpop.f32.mrf.mxu0 }
 0xa0e   : > { %8285 = vmatprep.mubr.msk.f32.mxu1 %vm551_vm0, %v6838_v18 }
 0xa0f   : > { %v6840_v3 = vpop.f32.mrf.mxu0 }
 0xa14   : > { %v6843_v54 = vpop.f32.mrf.mxu0 }
 0xa15   : > { %8286 = vmatmul.mubr.msk.f32.gmra.mxu1 %vm551_vm0, %v6843_v54 }
 0xa16   : > { %v6845_v2 = vpop.f32.mrf.mxu0  ;;  %8288 = vmatprep.mubr.msk.f32.mxu1 %vm551_vm0, %v6848_v21 }
 0xa19   : > { %8289 = vmatmul.mubr.msk.f32.gmra.mxu1 %vm551_vm0, %v6853_v11 }
 0xa1a   : > { %8291 = vmatprep.mubr.msk.f32.mxu1 %vm551_vm0, %v6858_v31 }
 0xa25   : > { %v6863_v46 = vpop.f32.mrf.mxu1 }
 0xa26   : > { %8292 = vmatmul.mubr.msk.f32.gmra.mxu1 %vm551_vm0, %v6863_v46 }
 0xa27   : > { %v6865_v47 = vpop.f32.mrf.mxu1 }
 0xa28   : > { %v8848_v47 = vld [vmem:[%s8987_s19 + $0x50] sm:$0xff] }
 0xa2c   : > { %v6868_v29 = vpop.f32.mrf.mxu1 }
 0xa2d   : > { %8294 = vmatprep.mubr.msk.f32.mxu1 %vm551_vm0, %v6868_v29 }
 0xa2e   : > { %v6870_v23 = vpop.f32.mrf.mxu1 }
 0xa43   : > { %v6873_v58 = vpop.f32.mrf.mxu1 }
 0xa44   : > { %8295 = vmatmul.mubr.msk.f32.gmra.mxu1 %vm551_vm0, %v6873_v58 }
 0xa45   : > { %v6875_v15 = vpop.f32.mrf.mxu1 }
 0xa46   : > { %v8849_v15 = vld [vmem:[%s8987_s19 + $0x58] sm:$0xff] }
 0xa4a   : > { %v6878_v0 = vpop.f32.mrf.mxu1 }
 0xa4b   : > { %8297 = vmatprep.mubr.msk.f32.mxu1 %vm551_vm0, %v6878_v0 }
 0xa4c   : > { %v6880_v13 = vpop.f32.mrf.mxu1 }
 0xa50   : > { %v6883_v28 = vpop.f32.mrf.mxu1 }
 0xa51   : > { %8298 = vmatmul.mubr.msk.f32.gmra.mxu1 %vm551_vm0, %v6883_v28 }
 0xa52   : > { %v6885_v7 = vpop.f32.mrf.mxu1 }
 0xa54   : > { %v8254_v35 = vpop.f32.mrf.mxu1 }
 0xa55   : > { %v7066_v49 = vadd.f32 %v8254_v35, %v14201_v20 }
 0xa56   : > { %v7060_v14 = vpop.f32.mrf.mxu1 }
 0xa57   : > { %v14205_v12 = vadd.f32 %v8838_v40, %v7066_v49  ;;  %v7061_v25 = vadd.f32 %v14201_v20, %v7060_v14  ;;  %v8850_v49 = vld [vmem:[%s8987_s19 + $0x60] sm:$0xff]  ;;  %v8851_v40 = vld [vmem:[%s8987_s19 + $0x68] sm:$0xff] }
 0xa58   : > { %v8257_v5 = vpop.f32.mrf.mxu1 }
 0xa59   : > { %v14209_v6 = vadd.f32 %v8839_v9, %v7061_v25  ;;  %v7254_v37 = vsel %vm551_vm0, %v14205_v12, 0.0  ;;  %v7076_v36 = vadd.f32 %v8257_v5, %v14201_v20 }
 0xa5a   : > { %7255 = vadd.xlane.f32.xlu1 %v7254_v37  ;;  %v7070_v44 = vpop.f32.mrf.mxu1 }
 0xa5b   : > { %v7071_v53 = vadd.f32 %v14201_v20, %v7070_v44  ;;  %v7251_v32 = vsel %vm551_vm0, %v14209_v6, 0.0  ;;  %v14221_v48 = vadd.f32 %v8841_v41, %v7076_v36  ;;  %v8853_v41 = vld [vmem:[%s8987_s19 + $0x78] sm:$0xff] }
 0xa5c   : > { %v8260_v10 = vpop.f32.mrf.mxu1  ;;  %7252 = vadd.xlane.f32.xlu0 %v7251_v32  ;;  %v8852_v32 = vld [vmem:[%s8987_s19 + $0x70] sm:$0xff] }
 0xa5d   : > { %v14218_v62 = vadd.f32 %v8840_v50, %v7071_v53  ;;  %v7086_v17 = vadd.f32 %v8260_v10, %v14201_v20  ;;  %v7260_v43 = vsel %vm551_vm0, %v14221_v48, 0.0 }
 0xa5e   : > { %v7080_v52 = vpop.f32.mrf.mxu1 }
 0xa5f   : > { %v7081_v45 = vadd.f32 %v14201_v20, %v7080_v52  ;;  %v7257_v38 = vsel %vm551_vm0, %v14218_v62, 0.0  ;;  %v14232_v19 = vadd.f32 %v8843_v33, %v7086_v17 }
 0xa60   : > { %v8263_v1 = vpop.f32.mrf.mxu1  ;;  %7258 = vadd.xlane.f32.xlu0 %v7257_v38 }
 0xa61   : > { %v14228_v27 = vadd.f32 %v8842_v24, %v7081_v45  ;;  %v7096_v59 = vadd.f32 %v8263_v1, %v14201_v20  ;;  %v7266_v55 = vsel %vm551_vm0, %v14232_v19, 0.0  ;;  %v8854_v24 = vld [vmem:[%s8987_s19 + $0x80] sm:$0xff] }
 0xa62   : > { %v7090_v26 = vpop.f32.mrf.mxu1 }
 0xa63   : > { %v7091_v16 = vadd.f32 %v14201_v20, %v7090_v26  ;;  %v7263_v57 = vsel %vm551_vm0, %v14228_v27, 0.0  ;;  %v14243_v60 = vadd.f32 %v8845_v39, %v7096_v59  ;;  %v8855_v26 = vld [vmem:[%s8987_s19 + $0x88] sm:$0xff]  ;;  %v8856_v39 = vld [vmem:[%s8987_s19 + $0x98] sm:$0xff] }
 0xa64   : > { %v8266_v51 = vpop.f32.mrf.mxu1  ;;  %7264 = vadd.xlane.f32.xlu1 %v7263_v57  ;;  %7261 = vadd.xlane.f32.xlu0 %v7260_v43 }
 0xa65   : > { %v14240_v22 = vadd.f32 %v8844_v8, %v7091_v16  ;;  %v7106_v42 = vadd.f32 %v8266_v51, %v14201_v20  ;;  %v7272_v31 = vsel %vm551_vm0, %v14243_v60, 0.0 }
 0xa66   : > { %v7100_v63 = vpop.f32.mrf.mxu1 }
 0xa67   : > { %v7101_v61 = vadd.f32 %v14201_v20, %v7100_v63  ;;  %v7269_v21 = vsel %vm551_vm0, %v14240_v22, 0.0  ;;  %v14257_v18 = vadd.f32 %v8847_v56, %v7106_v42 }
 0xa68   : > { %v8269_v30 = vpop.f32.mrf.mxu1  ;;  %7270 = vadd.xlane.f32.xlu1 %v7269_v21  ;;  %7267 = vadd.xlane.f32.xlu0 %v7266_v55  ;;  %v8857_v21 = vld [vmem:[%s8987_s19 + $0x90] sm:$0xff] }
 0xa69   : > { %v14252_v11 = vadd.f32 %v8846_v34, %v7101_v61  ;;  %v7116_v3 = vadd.f32 %v8269_v30, %v14201_v20  ;;  %v7278_v7 = vsel %vm551_vm0, %v14257_v18, 0.0 }
 0xa6a   : > { %v7110_v4 = vpop.f32.mrf.mxu1 }
 0xa6b   : > { %v7111_v54 = vadd.f32 %v14201_v20, %v7110_v4  ;;  %v7275_v2 = vsel %vm551_vm0, %v14252_v11, 0.0  ;;  %v14268_v0 = vadd.f32 %v8849_v15, %v7116_v3  ;;  %v8858_v3 = vld [vmem:[%s8987_s19 + $0xa8] sm:$0xff] }
 0xa6c   : > { %v8272_v46 = vpop.f32.mrf.mxu1  ;;  %7276 = vadd.xlane.f32.xlu1 %v7275_v2  ;;  %7273 = vadd.xlane.f32.xlu0 %v7272_v31 }
 0xa6d   : > { %v14264_v29 = vadd.f32 %v8848_v47, %v7111_v54  ;;  %v7126_v23 = vadd.f32 %v8272_v46, %v14201_v20  ;;  %v7284_v36 = vsel %vm551_vm0, %v14268_v0, 0.0  ;;  %v8859_v46 = vld [vmem:[%s8987_s19 + $0xa0] sm:$0xff] }
 0xa6e   : > { %v7120_v58 = vpop.f32.mrf.mxu1 }
 0xa6f   : > { %v7121_v13 = vadd.f32 %v14201_v20, %v7120_v58  ;;  %v7281_v28 = vsel %vm551_vm0, %v14264_v29, 0.0  ;;  %v14279_v25 = vadd.f32 %v8851_v40, %v7126_v23 }
 0xa70   : > { %v8275_v35 = vpop.f32.mrf.mxu1  ;;  %7282 = vadd.xlane.f32.xlu1 %v7281_v28  ;;  %7279 = vadd.xlane.f32.xlu0 %v7278_v7  ;;  %v8860_v7 = vld [vmem:[%s8987_s19 + $0xb8] sm:$0xff] }
 0xa71   : > { %v14276_v14 = vadd.f32 %v8850_v49, %v7121_v13  ;;  %v7136_v9 = vadd.f32 %v8275_v35, %v14201_v20  ;;  %v7290_v52 = vsel %vm551_vm0, %v14279_v25, 0.0 }
 0xa72   : > { %v7130_v5 = vpop.f32.mrf.mxu1 }
 0xa73   : > { %v7131_v37 = vadd.f32 %v14201_v20, %v7130_v5  ;;  %v7287_v44 = vsel %vm551_vm0, %v14276_v14, 0.0  ;;  %v14293_v17 = vadd.f32 %v8853_v41, %v7136_v9  ;;  %v8861_v5 = vld [vmem:[%s8987_s19 + $0xb0] sm:$0xff]  ;;  %v8863_v41 = vld [vmem:[%s8987_s19 + $0xc0] sm:$0xff] }
 0xa74   : > { %v8278_v53 = vpop.f32.mrf.mxu1  ;;  %7288 = vadd.xlane.f32.xlu1 %v7287_v44  ;;  %7285 = vadd.xlane.f32.xlu0 %v7284_v36 }
 0xa75   : > { %v14288_v10 = vadd.f32 %v8852_v32, %v7131_v37  ;;  %v7146_v45 = vadd.f32 %v8278_v53, %v14201_v20  ;;  %v7296_v57 = vsel %vm551_vm0, %v14293_v17, 0.0  ;;  %v8862_v53 = vld [vmem:[%s8987_s19 + $0xc8] sm:$0xff] }
 0xa76   : > { %v7140_v50 = vpop.f32.mrf.mxu1 }
 0xa77   : > { %v7141_v38 = vadd.f32 %v14201_v20, %v7140_v50  ;;  %v7293_v1 = vsel %vm551_vm0, %v14288_v10, 0.0  ;;  %v14303_v33 = vadd.f32 %v8855_v26, %v7146_v45 }
 0xa78   : > { %7294 = vadd.xlane.f32.xlu1 %v7293_v1  ;;  %7291 = vadd.xlane.f32.xlu0 %v7290_v52 }
 0xa79   : > { %v14300_v59 = vadd.f32 %v8854_v24, %v7141_v38  ;;  %v7302_v61 = vsel %vm551_vm0, %v14303_v33, 0.0 }
 0xa7b   : > { %v7299_v16 = vsel %vm551_vm0, %v14300_v59, 0.0 }
 0xa7c   : > { %v8281_v43 = vpop.f32.mrf.mxu1  ;;  %7300 = vadd.xlane.f32.xlu1 %v7299_v16  ;;  %7297 = vadd.xlane.f32.xlu0 %v7296_v57  ;;  %v8864_v57 = vld [vmem:[%s8987_s19 + $0xd8] sm:$0xff] }
 0xa7d   : > { %v7156_v51 = vadd.f32 %v8281_v43, %v14201_v20 }
 0xa7e   : > { %v7150_v8 = vpop.f32.mrf.mxu1 }
 0xa7f   : > { %v14311_v63 = vadd.f32 %v8856_v39, %v7156_v51  ;;  %v7151_v42 = vadd.f32 %v14201_v20, %v7150_v8  ;;  %v8865_v8 = vld [vmem:[%s8987_s19 + $0xd0] sm:$0xff] }
 0xa80   : > { %7303 = vadd.xlane.f32.xlu0 %v7302_v61 }
 0xa81   : > { %v14317_v55 = vadd.f32 %v8857_v21, %v7151_v42  ;;  %v7308_v34 = vsel %vm551_vm0, %v14311_v63, 0.0 }
 0xa83   : > { %v7305_v30 = vsel %vm551_vm0, %v14317_v55, 0.0 }
 0xa84   : > { %7306 = vadd.xlane.f32.xlu1 %v7305_v30  ;;  %7309 = vadd.xlane.f32.xlu0 %v7308_v34 }
 0xab5   : > { %v8284_v4 = vpop.f32.mrf.mxu1 }
 0xab6   : > { %v7166_v31 = vadd.f32 %v8284_v4, %v14201_v20 }
 0xab7   : > { %v7160_v56 = vpop.f32.mrf.mxu1 }
 0xab8   : > { %v14325_v54 = vadd.f32 %v8858_v3, %v7166_v31  ;;  %v7161_v2 = vadd.f32 %v14201_v20, %v7160_v56 }
 0xaba   : > { %v14329_v47 = vadd.f32 %v8859_v46, %v7161_v2  ;;  %v7314_v23 = vsel %vm551_vm0, %v14325_v54, 0.0  ;;  %v8866_v46 = vld [vmem:[%s8987_s19 + $0xe8] sm:$0xff] }
 0xabb   : > { %7315 = vadd.xlane.f32.xlu0 %v7314_v23 }
 0xabc   : > { %v7311_v58 = vsel %vm551_vm0, %v14329_v47, 0.0 }
 0xabd   : > { %7312 = vadd.xlane.f32.xlu1 %v7311_v58 }
 0xad5   : > { %v8287_v15 = vpop.f32.mrf.mxu1 }
 0xad6   : > { %v7176_v13 = vadd.f32 %v8287_v15, %v14201_v20  ;;  %v8867_v15 = vld [vmem:[%s8987_s19 + $0xe0] sm:$0xff] }
 0xad7   : > { %v7170_v28 = vpop.f32.mrf.mxu1 }
 0xad8   : > { %v14337_v35 = vadd.f32 %v8860_v7, %v7176_v13  ;;  %v7171_v49 = vadd.f32 %v14201_v20, %v7170_v28 }
 0xad9   : > { %v8290_v40 = vpop.f32.mrf.mxu1 }
 0xada   : > { %v14341_v9 = vadd.f32 %v8861_v5, %v7171_v49  ;;  %v7186_v37 = vadd.f32 %v8290_v40, %v14201_v20  ;;  %v7320_v44 = vsel %vm551_vm0, %v14337_v35, 0.0 }
 0xadb   : > { %v7180_v36 = vpop.f32.mrf.mxu1  ;;  %7321 = vadd.xlane.f32.xlu0 %v7320_v44 }
 0xadc   : > { %v14347_v32 = vadd.f32 %v8862_v53, %v7186_v37  ;;  %v7181_v50 = vadd.f32 %v14201_v20, %v7180_v36  ;;  %v7317_v52 = vsel %vm551_vm0, %v14341_v9, 0.0 }
 0xadd   : > { %7318 = vadd.xlane.f32.xlu1 %v7317_v52 }
 0xade   : > { %v14353_v45 = vadd.f32 %v8863_v41, %v7181_v50  ;;  %v7326_v38 = vsel %vm551_vm0, %v14347_v32, 0.0 }
 0xadf   : > { %7327 = vadd.xlane.f32.xlu0 %v7326_v38 }
 0xae0   : > { %v7323_v1 = vsel %vm551_vm0, %v14353_v45, 0.0 }
 0xae1   : > { %7324 = vadd.xlane.f32.xlu1 %v7323_v1 }
 0xae3   : > { %v7256_v31 = vpop.xlane.xlu1 %7255 }
 0xae4   : > { %v7349_v5 = vmul.f32 0.03125, %v7256_v31 }
 0xae5   : > { %v7253_v21 = vpop.xlane.xlu0 %7252 }
 0xae6   : > { %v8293_v24 = vpop.f32.mrf.mxu1  ;;  %v7348_v44 = vmul.f32 0.03125, %v7253_v21  ;;  %v14384_v36 = vsub.f32 %v14205_v12, %v7349_v5 }
 0xae7   : > { %v7196_v26 = vadd.f32 %v8293_v24, %v14201_v20 }
 0xae8   : > { %v7190_v16 = vpop.f32.mrf.mxu1  ;;  %v14388_v1 = vsub.f32 %v14209_v6, %v7348_v44  ;;  %v7413_v12 = vmul.f32 %v14384_v36, %v14384_v36 }
 0xae9   : > { %v14361_v43 = vadd.f32 %v8864_v57, %v7196_v26  ;;  %v7191_v51 = vadd.f32 %v14201_v20, %v7190_v16  ;;  %v7259_v30 = vpop.xlane.xlu0 %7258  ;;  %v8868_v26 = vld [vmem:[%s8987_s19 + $0xf8] sm:$0xff] }
 0xaea   : > { %v7350_v24 = vmul.f32 0.03125, %v7259_v30 }
 0xaeb   : > { %v14365_v39 = vadd.f32 %v8865_v8, %v7191_v51  ;;  %v7332_v42 = vsel %vm551_vm0, %v14361_v43, 0.0 }
 0xaec   : > { %7333 = vadd.xlane.f32.xlu0 %v7332_v42 }
 0xaed   : > { %v7329_v61 = vsel %vm551_vm0, %v14365_v39, 0.0  ;;  %v7262_v34 = vpop.xlane.xlu0 %7261  ;;  %v7265_v7 = vpop.xlane.xlu1 %7264 }
 0xaee   : > { %7330 = vadd.xlane.f32.xlu1 %v7329_v61  ;;  %v7351_v52 = vmul.f32 0.03125, %v7262_v34  ;;  %v8869_v61 = vld [vmem:[%s8987_s19 + $0xf0] sm:$0xff]  ;;  %v14405_v34 = vsub.f32 %v14218_v62, %v7350_v24 }
 0xaf0   : > { %v14397_v8 = vsub.f32 %v14221_v48, %v7351_v52  ;;  %v7412_v48 = vmul.f32 %v14388_v1, %v14388_v1 }
 0xaf1   : > { %v7268_v3 = vpop.xlane.xlu0 %7267  ;;  %v7271_v37 = vpop.xlane.xlu1 %7270 }
 0xaf2   : > { %v7353_v42 = vmul.f32 0.03125, %v7268_v3  ;;  %v7447_v3 = vsel %vm551_vm0, %v7413_v12, 0.0 }
 0xaf4   : > { %v14412_v31 = vsub.f32 %v14232_v19, %v7353_v42 }
 0xaf5   : > { %v7274_v40 = vpop.xlane.xlu0 %7273  ;;  %v7277_v51 = vpop.xlane.xlu1 %7276 }
 0xaf6   : > { %v7417_v5 = vmul.f32 %v14412_v31, %v14412_v31 }
 0xaf9   : > { %v7280_v53 = vpop.xlane.xlu0 %7279 }
 0xafd   : > { %v7286_v30 = vpop.xlane.xlu0 %7285 }
 0xb04   : > { %v8296_v4 = vpop.f32.mrf.mxu1 }
 0xb05   : > { %v7206_v56 = vadd.f32 %v8296_v4, %v14201_v20 }
 0xb06   : > { %v7200_v2 = vpop.f32.mrf.mxu1 }
 0xb07   : > { %v14373_v23 = vadd.f32 %v8866_v46, %v7206_v56  ;;  %v7201_v58 = vadd.f32 %v14201_v20, %v7200_v2  ;;  %v7355_v56 = vmul.f32 0.03125, %v7274_v40  ;;  %v7415_v2 = vmul.f32 %v14397_v8, %v14397_v8  ;;  %v7283_v46 = vpop.xlane.xlu1 %7282 }
 0xb09   : > { %v14377_v13 = vadd.f32 %v8867_v15, %v7201_v58  ;;  %v7338_v28 = vsel %vm551_vm0, %v14373_v23, 0.0  ;;  %v7354_v58 = vmul.f32 0.03125, %v7271_v37  ;;  %v7444_v15 = vsel %vm551_vm0, %v7412_v48, 0.0 }
 0xb0a   : > { %7339 = vadd.xlane.f32.xlu0 %v7338_v28  ;;  %v7414_v28 = vmul.f32 %v14405_v34, %v14405_v34  ;;  %v14424_v19 = vsub.f32 %v14243_v60, %v7355_v56  ;;  %v7453_v40 = vsel %vm551_vm0, %v7415_v2, 0.0  ;;  %v7356_v37 = vmul.f32 0.03125, %v7277_v51 }
 0xb0b   : > { %v7335_v49 = vsel %vm551_vm0, %v14377_v13, 0.0  ;;  %v7289_v52 = vpop.xlane.xlu1 %7288 }
 0xb0c   : > { %7336 = vadd.xlane.f32.xlu1 %v7335_v49  ;;  %v7357_v49 = vmul.f32 0.03125, %v7280_v53  ;;  %v7450_v44 = vsel %vm551_vm0, %v7414_v28, 0.0  ;;  %v7359_v53 = vmul.f32 0.03125, %v7286_v30  ;;  %v7360_v30 = vmul.f32 0.03125, %v7289_v52 }
 0xb0e   : > { %v14436_v60 = vsub.f32 %v14257_v18, %v7357_v49  ;;  %v14448_v18 = vsub.f32 %v14268_v0, %v7359_v53 }
 0xb10   : > { %v7423_v2 = vmul.f32 %v14448_v18, %v14448_v18 }
 0xb11   : > { %v8299_v50 = vpop.f32.mrf.mxu1 }
 0xb12   : > { %v7216_v41 = vadd.f32 %v8299_v50, %v14201_v20  ;;  %v7477_v49 = vsel %vm551_vm0, %v7423_v2, 0.0 }
 0xb13   : > { %v7210_v38 = vpop.f32.mrf.mxu1 }
 0xb14   : > { %v14391_v16 = vadd.f32 %v8868_v26, %v7216_v41  ;;  %v7211_v57 = vadd.f32 %v14201_v20, %v7210_v38  ;;  %v7352_v20 = vmul.f32 0.03125, %v7265_v7  ;;  %v7292_v7 = vpop.xlane.xlu0 %7291  ;;  %v7459_v41 = vsel %vm551_vm0, %v7417_v5, 0.0 }
 0xb15   : > { %v7419_v38 = vmul.f32 %v14424_v19, %v14424_v19  ;;  %v7358_v26 = vmul.f32 0.03125, %v7283_v46  ;;  %v7361_v12 = vmul.f32 0.03125, %v7292_v7 }
 0xb16   : > { %v14400_v21 = vadd.f32 %v8869_v61, %v7211_v57  ;;  %v7344_v6 = vsel %vm551_vm0, %v14391_v16, 0.0  ;;  %v14418_v62 = vsub.f32 %v14228_v27, %v7352_v20  ;;  %v14430_v27 = vsub.f32 %v14240_v22, %v7354_v58 }
 0xb17   : > { %7345 = vadd.xlane.f32.xlu0 %v7344_v6  ;;  %v14442_v22 = vsub.f32 %v14252_v11, %v7356_v37  ;;  %v7465_v42 = vsel %vm551_vm0, %v7419_v38, 0.0  ;;  %v7421_v61 = vmul.f32 %v14436_v60, %v14436_v60  ;;  %v7295_v6 = vpop.xlane.xlu1 %7294  ;;  %v14454_v11 = vsub.f32 %v14264_v29, %v7358_v26 }
 0xb18   : > { %v7341_v4 = vsel %vm551_vm0, %v14400_v21, 0.0  ;;  %v7416_v50 = vmul.f32 %v14418_v62, %v14418_v62  ;;  %v7298_v24 = vpop.xlane.xlu0 %7297  ;;  %v7418_v51 = vmul.f32 %v14430_v27, %v14430_v27  ;;  %v14460_v0 = vsub.f32 %v14279_v25, %v7361_v12 }
 0xb19   : > { %7342 = vadd.xlane.f32.xlu1 %v7341_v4  ;;  %v7420_v4 = vmul.f32 %v14442_v22, %v14442_v22  ;;  %v7363_v56 = vmul.f32 0.03125, %v7298_v24  ;;  %v14466_v29 = vsub.f32 %v14276_v14, %v7360_v30  ;;  %v7362_v46 = vmul.f32 0.03125, %v7295_v6 }
 0xb1a   : > { %v7456_v57 = vsel %vm551_vm0, %v7416_v50, 0.0  ;;  %v7462_v20 = vsel %vm551_vm0, %v7418_v51, 0.0 }
 0xb1b   : > { %7448 = vadd.xlane.f32.xlu0 %v7447_v3  ;;  %v7471_v3 = vsel %vm551_vm0, %v7421_v61, 0.0  ;;  %v7468_v58 = vsel %vm551_vm0, %v7420_v4, 0.0  ;;  %v7301_v28 = vpop.xlane.xlu1 %7300  ;;  %v14472_v25 = vsub.f32 %v14293_v17, %v7363_v56  ;;  %v14478_v14 = vsub.f32 %v14288_v10, %v7362_v46 }
 0xb1c   : > { %v7304_v48 = vpop.xlane.xlu0 %7303  ;;  %v7364_v37 = vmul.f32 0.03125, %v7301_v28  ;;  %v7424_v50 = vmul.f32 %v14466_v29, %v14466_v29 }
 0xb1d   : > { %7445 = vadd.xlane.f32.xlu1 %v7444_v15  ;;  %v7422_v15 = vmul.f32 %v14454_v11, %v14454_v11  ;;  %v7365_v7 = vmul.f32 0.03125, %v7304_v48  ;;  %v7427_v38 = vmul.f32 %v14472_v25, %v14472_v25 }
 0xb1e   : > { %v14490_v10 = vsub.f32 %v14300_v59, %v7364_v37  ;;  %v7480_v26 = vsel %vm551_vm0, %v7424_v50, 0.0 }
 0xb1f   : > { %7454 = vadd.xlane.f32.xlu0 %v7453_v40  ;;  %v7425_v40 = vmul.f32 %v14460_v0, %v14460_v0  ;;  %v7307_v52 = vpop.xlane.xlu1 %7306  ;;  %v14484_v17 = vsub.f32 %v14303_v33, %v7365_v7  ;;  %v7489_v51 = vsel %vm551_vm0, %v7427_v38, 0.0 }
 0xb20   : > { %v7310_v5 = vpop.xlane.xlu0 %7309  ;;  %v7366_v24 = vmul.f32 0.03125, %v7307_v52  ;;  %v7428_v61 = vmul.f32 %v14490_v10, %v14490_v10 }
 0xb21   : > { %7451 = vadd.xlane.f32.xlu1 %v7450_v44  ;;  %v7474_v44 = vsel %vm551_vm0, %v7422_v15, 0.0  ;;  %v7367_v53 = vmul.f32 0.03125, %v7310_v5  ;;  %v7429_v12 = vmul.f32 %v14484_v17, %v14484_v17 }
 0xb22   : > { %v7492_v30 = vsel %vm551_vm0, %v7428_v61, 0.0 }
 0xb23   : > { %7460 = vadd.xlane.f32.xlu0 %v7459_v41  ;;  %v7483_v41 = vsel %vm551_vm0, %v7425_v40, 0.0  ;;  %v14496_v33 = vsub.f32 %v14311_v63, %v7367_v53  ;;  %v7495_v6 = vsel %vm551_vm0, %v7429_v12, 0.0 }
 0xb25   : > { %7457 = vadd.xlane.f32.xlu1 %v7456_v57  ;;  %v7426_v57 = vmul.f32 %v14478_v14, %v14478_v14  ;;  %v7431_v63 = vmul.f32 %v14496_v33, %v14496_v33 }
 0xb27   : > { %7466 = vadd.xlane.f32.xlu0 %v7465_v42  ;;  %v14502_v42 = vsub.f32 %v14317_v55, %v7366_v24  ;;  %v7486_v59 = vsel %vm551_vm0, %v7426_v57, 0.0  ;;  %v7501_v55 = vsel %vm551_vm0, %v7431_v63, 0.0 }
 0xb29   : > { %7463 = vadd.xlane.f32.xlu1 %v7462_v20  ;;  %v7430_v20 = vmul.f32 %v14502_v42, %v14502_v42 }
 0xb2b   : > { %7472 = vadd.xlane.f32.xlu0 %v7471_v3  ;;  %v7498_v4 = vsel %vm551_vm0, %v7430_v20, 0.0 }
 0xb2d   : > { %7469 = vadd.xlane.f32.xlu1 %v7468_v58 }
 0xb2f   : > { %7478 = vadd.xlane.f32.xlu0 %v7477_v49 }
 0xb31   : > { %7475 = vadd.xlane.f32.xlu1 %v7474_v44 }
 0xb33   : > { %7484 = vadd.xlane.f32.xlu0 %v7483_v41 }
 0xb35   : > { %7481 = vadd.xlane.f32.xlu1 %v7480_v26 }
 0xb37   : > { %7490 = vadd.xlane.f32.xlu0 %v7489_v51 }
 0xb39   : > { %7487 = vadd.xlane.f32.xlu1 %v7486_v59 }
 0xb3b   : > { %7496 = vadd.xlane.f32.xlu0 %v7495_v6 }
 0xb3d   : > { %7493 = vadd.xlane.f32.xlu1 %v7492_v30 }
 0xb3f   : > { %7502 = vadd.xlane.f32.xlu0 %v7501_v55 }
 0xb41   : > { %7499 = vadd.xlane.f32.xlu1 %v7498_v4 }
 0xb44   : > { %v7316_v48 = vpop.xlane.xlu0 %7315 }
 0xb45   : > { %v7369_v56 = vmul.f32 0.03125, %v7316_v48 }
 0xb46   : > { %v7313_v3 = vpop.xlane.xlu1 %7312 }
 0xb47   : > { %v14516_v2 = vsub.f32 %v14325_v54, %v7369_v56  ;;  %v7368_v46 = vmul.f32 0.03125, %v7313_v3 }
 0xb49   : > { %v14519_v58 = vsub.f32 %v14329_v47, %v7368_v46  ;;  %v7433_v15 = vmul.f32 %v14516_v2, %v14516_v2 }
 0xb4b   : > { %v7507_v28 = vsel %vm551_vm0, %v7433_v15, 0.0  ;;  %v7432_v7 = vmul.f32 %v14519_v58, %v14519_v58 }
 0xb4c   : > { %7508 = vadd.xlane.f32.xlu0 %v7507_v28 }
 0xb4d   : > { %v7504_v49 = vsel %vm551_vm0, %v7432_v7, 0.0 }
 0xb4e   : > { %7505 = vadd.xlane.f32.xlu1 %v7504_v49 }
 0xb64   : > { %v7322_v40 = vpop.xlane.xlu0 %7321 }
 0xb65   : > { %v7371_v5 = vmul.f32 0.03125, %v7322_v40 }
 0xb66   : > { %v7319_v54 = vpop.xlane.xlu1 %7318 }
 0xb67   : > { %v14528_v37 = vsub.f32 %v14337_v35, %v7371_v5  ;;  %v7370_v47 = vmul.f32 0.03125, %v7319_v54 }
 0xb68   : > { %v7328_v44 = vpop.xlane.xlu0 %7327 }
 0xb69   : > { %v14531_v50 = vsub.f32 %v14341_v9, %v7370_v47  ;;  %v7373_v52 = vmul.f32 0.03125, %v7328_v44  ;;  %v7435_v53 = vmul.f32 %v14528_v37, %v14528_v37 }
 0xb6a   : > { %v7325_v41 = vpop.xlane.xlu1 %7324 }
 0xb6b   : > { %v14536_v38 = vsub.f32 %v14347_v32, %v7373_v52  ;;  %v7372_v24 = vmul.f32 0.03125, %v7325_v41  ;;  %v7513_v26 = vsel %vm551_vm0, %v7435_v53, 0.0  ;;  %v7434_v35 = vmul.f32 %v14531_v50, %v14531_v50 }
 0xb6c   : > { %7514 = vadd.xlane.f32.xlu0 %v7513_v26 }
 0xb6d   : > { %v14542_v57 = vsub.f32 %v14353_v45, %v7372_v24  ;;  %v7510_v9 = vsel %vm551_vm0, %v7434_v35, 0.0  ;;  %v7437_v51 = vmul.f32 %v14536_v38, %v14536_v38 }
 0xb6e   : > { %7511 = vadd.xlane.f32.xlu1 %v7510_v9 }
 0xb6f   : > { %v7519_v12 = vsel %vm551_vm0, %v7437_v51, 0.0  ;;  %v7436_v32 = vmul.f32 %v14542_v57, %v14542_v57 }
 0xb70   : > { %7520 = vadd.xlane.f32.xlu0 %v7519_v12 }
 0xb71   : > { %v7516_v59 = vsel %vm551_vm0, %v7436_v32, 0.0 }
 0xb72   : > { %7517 = vadd.xlane.f32.xlu1 %v7516_v59 }
 0xb75   : > { %v7334_v61 = vpop.xlane.xlu0 %7333 }
 0xb76   : > { %v7375_v6 = vmul.f32 0.03125, %v7334_v61 }
 0xb77   : > { %v7331_v63 = vpop.xlane.xlu1 %7330 }
 0xb78   : > { %v14552_v45 = vsub.f32 %v14361_v43, %v7375_v6  ;;  %v7374_v30 = vmul.f32 0.03125, %v7331_v63 }
 0xb7a   : > { %v14555_v20 = vsub.f32 %v14365_v39, %v7374_v30  ;;  %v7439_v55 = vmul.f32 %v14552_v45, %v14552_v45 }
 0xb7c   : > { %v7525_v4 = vsel %vm551_vm0, %v7439_v55, 0.0  ;;  %v7438_v48 = vmul.f32 %v14555_v20, %v14555_v20 }
 0xb7d   : > { %7526 = vadd.xlane.f32.xlu0 %v7525_v4 }
 0xb7e   : > { %v7522_v56 = vsel %vm551_vm0, %v7438_v48, 0.0 }
 0xb7f   : > { %7523 = vadd.xlane.f32.xlu1 %v7522_v56 }
 0xb93   : > { %v7340_v3 = vpop.xlane.xlu0 %7339 }
 0xb94   : > { %v7377_v46 = vmul.f32 0.03125, %v7340_v3 }
 0xb95   : > { %v7337_v43 = vpop.xlane.xlu1 %7336 }
 0xb96   : > { %v14564_v15 = vsub.f32 %v14373_v23, %v7377_v46  ;;  %v7376_v39 = vmul.f32 0.03125, %v7337_v43 }
 0xb98   : > { %v14567_v28 = vsub.f32 %v14377_v13, %v7376_v39  ;;  %v7441_v7 = vmul.f32 %v14564_v15, %v14564_v15 }
 0xb9a   : > { %v7531_v49 = vsel %vm551_vm0, %v7441_v7, 0.0  ;;  %v7440_v40 = vmul.f32 %v14567_v28, %v14567_v28 }
 0xb9b   : > { %7532 = vadd.xlane.f32.xlu0 %v7531_v49 }
 0xb9c   : > { %v7528_v5 = vsel %vm551_vm0, %v7440_v40, 0.0 }
 0xb9d   : > { %7529 = vadd.xlane.f32.xlu1 %v7528_v5 }
 0xba0   : > { %v7346_v54 = vpop.xlane.xlu0 %7345 }
 0xba1   : > { %v7379_v47 = vmul.f32 0.03125, %v7346_v54 }
 0xba2   : > { %v7343_v23 = vpop.xlane.xlu1 %7342 }
 0xba3   : > { %v14576_v44 = vsub.f32 %v14391_v16, %v7379_v47  ;;  %v7378_v13 = vmul.f32 0.03125, %v7343_v23 }
 0xba4   : > { %v7449_v52 = vpop.xlane.xlu0 %7448 }
 0xba5   : > { %v14579_v53 = vsub.f32 %v14400_v21, %v7378_v13  ;;  %v7541_v41 = vmul.f32 0.03125, %v7449_v52  ;;  %v7443_v24 = vmul.f32 %v14576_v44, %v14576_v44  ;;  %v14590_v13 = vld [vmem:[%s14775_s9] ss:$0 sm:$0xff] }
 0xba6   : > { %v7446_v26 = vpop.xlane.xlu1 %7445 }
 0xba7   : > { %v7573_v35 = vadd.f32 1e-05, %v7541_v41  ;;  %v7540_v9 = vmul.f32 0.03125, %v7446_v26  ;;  %v7537_v51 = vsel %vm551_vm0, %v7443_v24, 0.0  ;;  %v7442_v12 = vmul.f32 %v14579_v53, %v14579_v53 }
 0xba8   : > { %7538 = vadd.xlane.f32.xlu0 %v7537_v51  ;;  %v7455_v16 = vpop.xlane.xlu0 %7454 }
 0xba9   : > { %8773 = vrsqrt.f32 %v7573_v35  ;;  %v7572_v32 = vadd.f32 1e-05, %v7540_v9  ;;  %v7543_v59 = vmul.f32 0.03125, %v7455_v16  ;;  %v7534_v21 = vsel %vm551_vm0, %v7442_v12, 0.0  ;;  %v14596_v9 = vld [vmem:[%s14776_s10] ss:$0 sm:$0xff] }
 0xbaa   : > { %7535 = vadd.xlane.f32.xlu1 %v7534_v21  ;;  %v7452_v61 = vpop.xlane.xlu1 %7451 }
 0xbab   : > { %8775 = vrsqrt.f32 %v7572_v32  ;;  %v7575_v6 = vadd.f32 1e-05, %v7543_v59  ;;  %v7542_v63 = vmul.f32 0.03125, %v7452_v61 }
 0xbac   : > { %v7461_v30 = vpop.xlane.xlu0 %7460 }
 0xbad   : > { %8777 = vrsqrt.f32 %v7575_v6  ;;  %v7574_v55 = vadd.f32 1e-05, %v7542_v63  ;;  %v7545_v4 = vmul.f32 0.03125, %v7461_v30 }
 0xbae   : > { %v7458_v48 = vpop.xlane.xlu1 %7457 }
 0xbaf   : > { %8779 = vrsqrt.f32 %v7574_v55  ;;  %v7577_v56 = vadd.f32 1e-05, %v7545_v4  ;;  %v7544_v3 = vmul.f32 0.03125, %v7458_v48 }
 0xbb0   : > { %v7467_v46 = vpop.xlane.xlu0 %7466 }
 0xbb1   : > { %8781 = vrsqrt.f32 %v7577_v56  ;;  %v7576_v43 = vadd.f32 1e-05, %v7544_v3  ;;  %v7547_v39 = vmul.f32 0.03125, %v7467_v46 }
 0xbb2   : > { %v7464_v7 = vpop.xlane.xlu1 %7463 }
 0xbb3   : > { %8783 = vrsqrt.f32 %v7576_v43  ;;  %v7579_v49 = vadd.f32 1e-05, %v7547_v39  ;;  %v7546_v40 = vmul.f32 0.03125, %v7464_v7 }
 0xbb4   : > { %v7473_v5 = vpop.xlane.xlu0 %7472 }
 0xbb5   : > { %8785 = vrsqrt.f32 %v7579_v49  ;;  %v7578_v54 = vadd.f32 1e-05, %v7546_v40  ;;  %v7549_v47 = vmul.f32 0.03125, %v7473_v5 }
 0xbb6   : > { %v8774_v23 = vpop.eup %8773  ;;  %v7470_v52 = vpop.xlane.xlu1 %7469 }
 0xbb7   : > { %v7637_v41 = vmul.f32 %v8774_v23, %v14384_v36  ;;  %8787 = vrsqrt.f32 %v7578_v54  ;;  %v7581_v24 = vadd.f32 1e-05, %v7549_v47  ;;  %v7548_v26 = vmul.f32 0.03125, %v7470_v52 }
 0xbb8   : > { %v8776_v35 = vpop.eup %8775  ;;  %v7479_v51 = vpop.xlane.xlu0 %7478 }
 0xbb9   : > { %v7676_v12 = vmul.f32 %v14590_v13, %v7637_v41  ;;  %v7636_v16 = vmul.f32 %v8776_v35, %v14388_v1  ;;  %8789 = vrsqrt.f32 %v7581_v24  ;;  %v7580_v32 = vadd.f32 1e-05, %v7548_v26 }
 0xbba   : > { %v8778_v59 = vpop.eup %8777  ;;  %v7551_v36 = vmul.f32 0.03125, %v7479_v51  ;;  %v7476_v21 = vpop.xlane.xlu1 %7475 }
 0xbbb   : > { %v7715_v61 = vadd.f32 %v14596_v9, %v7676_v12  ;;  %v7675_v6 = vmul.f32 %v14590_v13, %v7636_v16  ;;  %v7639_v63 = vmul.f32 %v8778_v59, %v14397_v8  ;;  %8791 = vrsqrt.f32 %v7580_v32 }
 0xbbc   : > { %v8780_v1 = vpop.eup %8779  ;;  %v7583_v30 = vadd.f32 1e-05, %v7551_v36  ;;  %v7550_v55 = vmul.f32 0.03125, %v7476_v21  ;;  %v7485_v4 = vpop.xlane.xlu0 %7484 }
 0xbbd   : > { %7747 = vst.msk [vmem:[%s14604_s13 + $0x8] sm:$0xff] %vm551_vm0, %v7715_v61  ;;  %v7714_v48 = vadd.f32 %v14596_v9, %v7675_v6  ;;  %v7678_v56 = vmul.f32 %v14590_v13, %v7639_v63  ;;  %v7638_v3 = vmul.f32 %v8780_v1, %v14405_v34  ;;  %v7553_v46 = vmul.f32 0.03125, %v7485_v4 }
 0xbbe   : > { %v8782_v43 = vpop.eup %8781  ;;  %8793 = vrsqrt.f32 %v7583_v30  ;;  %v7582_v39 = vadd.f32 1e-05, %v7550_v55  ;;  %v7482_v7 = vpop.xlane.xlu1 %7481 }
 0xbbf   : > { %7746 = vst.msk [vmem:[%s14604_s13] sm:$0xff] %vm551_vm0, %v7714_v48  ;;  %v7717_v8 = vadd.f32 %v14596_v9, %v7678_v56  ;;  %v7677_v49 = vmul.f32 %v14590_v13, %v7638_v3  ;;  %v7641_v40 = vmul.f32 %v8782_v43, %v14412_v31  ;;  %v7585_v5 = vadd.f32 1e-05, %v7553_v46 }
 0xbc0   : > { %v8784_v54 = vpop.eup %8783  ;;  %8795 = vrsqrt.f32 %v7582_v39  ;;  %v7552_v47 = vmul.f32 0.03125, %v7482_v7  ;;  %v7491_v23 = vpop.xlane.xlu0 %7490 }
 0xbc1   : > { %7749 = vst.msk [vmem:[%s14604_s13 + $0x18] sm:$0xff] %vm551_vm0, %v7717_v8  ;;  %v7716_v34 = vadd.f32 %v14596_v9, %v7677_v49  ;;  %v7680_v52 = vmul.f32 %v14590_v13, %v7641_v40  ;;  %v7640_v41 = vmul.f32 %v8784_v54, %v14418_v62  ;;  %8797 = vrsqrt.f32 %v7585_v5 }
 0xbc2   : > { %v8786_v24 = vpop.eup %8785  ;;  %v7584_v26 = vadd.f32 1e-05, %v7552_v47  ;;  %v7555_v35 = vmul.f32 0.03125, %v7491_v23  ;;  %v7488_v51 = vpop.xlane.xlu1 %7487 }
 0xbc3   : > { %7748 = vst.msk [vmem:[%s14604_s13 + $0x10] sm:$0xff] %vm551_vm0, %v7716_v34  ;;  %v7719_v31 = vadd.f32 %v14596_v9, %v7680_v52  ;;  %v7679_v12 = vmul.f32 %v14590_v13, %v7640_v41  ;;  %v7643_v16 = vmul.f32 %v8786_v24, %v14424_v19  ;;  %v7554_v32 = vmul.f32 0.03125, %v7488_v51 }
 0xbc4   : > { %v8788_v59 = vpop.eup %8787  ;;  %8799 = vrsqrt.f32 %v7584_v26  ;;  %v7587_v36 = vadd.f32 1e-05, %v7555_v35  ;;  %v7497_v21 = vpop.xlane.xlu0 %7496 }
 0xbc5   : > { %7751 = vst.msk [vmem:[%s14604_s13 + $0x28] sm:$0xff] %vm551_vm0, %v7719_v31  ;;  %v7718_v62 = vadd.f32 %v14596_v9, %v7679_v12  ;;  %v7682_v61 = vmul.f32 %v14590_v13, %v7643_v16  ;;  %v7642_v6 = vmul.f32 %v8788_v59, %v14430_v27  ;;  %v7586_v63 = vadd.f32 1e-05, %v7554_v32 }
 0xbc6   : > { %v8790_v1 = vpop.eup %8789  ;;  %8801 = vrsqrt.f32 %v7587_v36  ;;  %v7557_v30 = vmul.f32 0.03125, %v7497_v21  ;;  %v7494_v55 = vpop.xlane.xlu1 %7493 }
 0xbc7   : > { %7750 = vst.msk [vmem:[%s14604_s13 + $0x20] sm:$0xff] %vm551_vm0, %v7718_v62  ;;  %v7721_v19 = vadd.f32 %v14596_v9, %v7682_v61  ;;  %v7681_v4 = vmul.f32 %v14590_v13, %v7642_v6  ;;  %v7645_v48 = vmul.f32 %v8790_v1, %v14436_v60  ;;  %8803 = vrsqrt.f32 %v7586_v63 }
 0xbc8   : > { %v8792_v56 = vpop.eup %8791  ;;  %v7589_v3 = vadd.f32 1e-05, %v7557_v30  ;;  %v7556_v46 = vmul.f32 0.03125, %v7494_v55  ;;  %v7503_v43 = vpop.xlane.xlu0 %7502 }
 0xbc9   : > { %7753 = vst.msk [vmem:[%s14604_s13 + $0x38] sm:$0xff] %vm551_vm0, %v7721_v19  ;;  %v7720_v27 = vadd.f32 %v14596_v9, %v7681_v4  ;;  %v7684_v39 = vmul.f32 %v14590_v13, %v7645_v48  ;;  %v7644_v7 = vmul.f32 %v8792_v56, %v14442_v22  ;;  %v7559_v8 = vmul.f32 0.03125, %v7503_v43 }
 0xbca   : > { %8805 = vrsqrt.f32 %v7589_v3  ;;  %v7588_v49 = vadd.f32 1e-05, %v7556_v46  ;;  %v7500_v40 = vpop.xlane.xlu1 %7499 }
 0xbcb   : > { %v8794_v5 = vpop.eup %8793  ;;  %7752 = vst.msk [vmem:[%s14604_s13 + $0x30] sm:$0xff] %vm551_vm0, %v7720_v27  ;;  %v7723_v60 = vadd.f32 %v14596_v9, %v7684_v39  ;;  %v7683_v54 = vmul.f32 %v14590_v13, %v7644_v7  ;;  %v7591_v47 = vadd.f32 1e-05, %v7559_v8  ;;  %v7558_v23 = vmul.f32 0.03125, %v7500_v40 }
 0xbcc   : > { %v7647_v34 = vmul.f32 %v8794_v5, %v14448_v18  ;;  %8807 = vrsqrt.f32 %v7588_v49 }
 0xbcd   : > { %v8796_v52 = vpop.eup %8795  ;;  %7755 = vst.msk [vmem:[%s14604_s13 + $0x48] sm:$0xff] %vm551_vm0, %v7723_v60  ;;  %v7722_v22 = vadd.f32 %v14596_v9, %v7683_v54  ;;  %8809 = vrsqrt.f32 %v7591_v47  ;;  %v7590_v41 = vadd.f32 1e-05, %v7558_v23 }
 0xbce   : > { %v8798_v24 = vpop.eup %8797  ;;  %v7686_v26 = vmul.f32 %v14590_v13, %v7647_v34  ;;  %v7646_v35 = vmul.f32 %v8796_v52, %v14454_v11 }
 0xbcf   : > { %7754 = vst.msk [vmem:[%s14604_s13 + $0x40] sm:$0xff] %vm551_vm0, %v7722_v22  ;;  %v7649_v18 = vmul.f32 %v8798_v24, %v14460_v0  ;;  %8811 = vrsqrt.f32 %v7590_v41 }
 0xbd0   : > { %v7725_v51 = vadd.f32 %v14596_v9, %v7686_v26  ;;  %v7685_v31 = vmul.f32 %v14590_v13, %v7646_v35 }
 0xbd1   : > { %v8800_v12 = vpop.eup %8799  ;;  %v7688_v16 = vmul.f32 %v14590_v13, %v7649_v18 }
 0xbd2   : > { %7757 = vst.msk [vmem:[%s14604_s13 + $0x58] sm:$0xff] %vm551_vm0, %v7725_v51  ;;  %v7724_v32 = vadd.f32 %v14596_v9, %v7685_v31  ;;  %v7648_v59 = vmul.f32 %v8800_v12, %v14466_v29 }
 0xbd3   : > { %v8802_v11 = vpop.eup %8801  ;;  %v7727_v36 = vadd.f32 %v14596_v9, %v7688_v16 }
 0xbd4   : > { %v8804_v21 = vpop.eup %8803  ;;  %7756 = vst.msk [vmem:[%s14604_s13 + $0x50] sm:$0xff] %vm551_vm0, %v7724_v32  ;;  %v7687_v0 = vmul.f32 %v14590_v13, %v7648_v59  ;;  %v7651_v62 = vmul.f32 %v8802_v11, %v14472_v25 }
 0xbd5   : > { %7759 = vst.msk [vmem:[%s14604_s13 + $0x68] sm:$0xff] %vm551_vm0, %v7727_v36  ;;  %v7650_v61 = vmul.f32 %v8804_v21, %v14478_v14  ;;  %v7509_v6 = vpop.xlane.xlu0 %7508 }
 0xbd6   : > { %v7726_v63 = vadd.f32 %v14596_v9, %v7687_v0  ;;  %v7690_v29 = vmul.f32 %v14590_v13, %v7651_v62  ;;  %v7561_v1 = vmul.f32 0.03125, %v7509_v6 }
 0xbd7   : > { %v8806_v30 = vpop.eup %8805  ;;  %v7689_v55 = vmul.f32 %v14590_v13, %v7650_v61  ;;  %v7506_v19 = vpop.xlane.xlu1 %7505 }
 0xbd8   : > { %7758 = vst.msk [vmem:[%s14604_s13 + $0x60] sm:$0xff] %vm551_vm0, %v7726_v63  ;;  %v7729_v25 = vadd.f32 %v14596_v9, %v7690_v29  ;;  %v7653_v4 = vmul.f32 %v8806_v30, %v14484_v17  ;;  %v7593_v48 = vadd.f32 1e-05, %v7561_v1  ;;  %v7560_v14 = vmul.f32 0.03125, %v7506_v19 }
 0xbd9   : > { %v8808_v56 = vpop.eup %8807  ;;  %v7728_v3 = vadd.f32 %v14596_v9, %v7689_v55 }
 0xbda   : > { %v8810_v46 = vpop.eup %8809  ;;  %7761 = vst.msk [vmem:[%s14604_s13 + $0x78] sm:$0xff] %vm551_vm0, %v7729_v25  ;;  %v7692_v43 = vmul.f32 %v14590_v13, %v7653_v4  ;;  %v7652_v27 = vmul.f32 %v8808_v56, %v14490_v10  ;;  %8813 = vrsqrt.f32 %v7593_v48  ;;  %v7592_v39 = vadd.f32 1e-05, %v7560_v14 }
 0xbdb   : > { %7760 = vst.msk [vmem:[%s14604_s13 + $0x70] sm:$0xff] %vm551_vm0, %v7728_v3  ;;  %v7655_v17 = vmul.f32 %v8810_v46, %v14496_v33 }
 0xbdc   : > { %v8812_v7 = vpop.eup %8811  ;;  %v7731_v8 = vadd.f32 %v14596_v9, %v7692_v43  ;;  %v7691_v49 = vmul.f32 %v14590_v13, %v7652_v27  ;;  %8815 = vrsqrt.f32 %v7592_v39 }
 0xbdd   : > { %v7694_v40 = vmul.f32 %v14590_v13, %v7655_v17  ;;  %v7654_v5 = vmul.f32 %v8812_v7, %v14502_v42 }
 0xbde   : > { %7763 = vst.msk [vmem:[%s14604_s13 + $0x88] sm:$0xff] %vm551_vm0, %v7731_v8  ;;  %v7730_v10 = vadd.f32 %v14596_v9, %v7691_v49 }
 0xbdf   : > { %v7733_v60 = vadd.f32 %v14596_v9, %v7694_v40  ;;  %v7693_v33 = vmul.f32 %v14590_v13, %v7654_v5 }
 0xbe0   : > { %7762 = vst.msk [vmem:[%s14604_s13 + $0x80] sm:$0xff] %vm551_vm0, %v7730_v10 }
 0xbe1   : > { %7765 = vst.msk [vmem:[%s14604_s13 + $0x98] sm:$0xff] %vm551_vm0, %v7733_v60  ;;  %v7732_v54 = vadd.f32 %v14596_v9, %v7693_v33 }
 0xbe3   : > { %7764 = vst.msk [vmem:[%s14604_s13 + $0x90] sm:$0xff] %vm551_vm0, %v7732_v54 }
 0xbe7   : > { %v8814_v47 = vpop.eup %8813 }
 0xbe8   : > { %v7657_v42 = vmul.f32 %v8814_v47, %v14516_v2 }
 0xbe9   : > { %v8816_v23 = vpop.eup %8815 }
 0xbea   : > { %v7696_v34 = vmul.f32 %v14590_v13, %v7657_v42  ;;  %v7656_v52 = vmul.f32 %v8816_v23, %v14519_v58 }
 0xbec   : > { %v7735_v22 = vadd.f32 %v14596_v9, %v7696_v34  ;;  %v7695_v41 = vmul.f32 %v14590_v13, %v7656_v52 }
 0xbee   : > { %7767 = vst.msk [vmem:[%s14604_s13 + $0xa8] sm:$0xff] %vm551_vm0, %v7735_v22  ;;  %v7734_v24 = vadd.f32 %v14596_v9, %v7695_v41 }
 0xbf0   : > { %7766 = vst.msk [vmem:[%s14604_s13 + $0xa0] sm:$0xff] %vm551_vm0, %v7734_v24 }
 0xbf5   : > { %v7515_v26 = vpop.xlane.xlu0 %7514 }
 0xbf6   : > { %v7563_v35 = vmul.f32 0.03125, %v7515_v26 }
 0xbf7   : > { %v7512_v18 = vpop.xlane.xlu1 %7511 }
 0xbf8   : > { %v7595_v51 = vadd.f32 1e-05, %v7563_v35  ;;  %v7562_v2 = vmul.f32 0.03125, %v7512_v18 }
 0xbf9   : > { %v7521_v31 = vpop.xlane.xlu0 %7520 }
 0xbfa   : > { %8817 = vrsqrt.f32 %v7595_v51  ;;  %v7594_v12 = vadd.f32 1e-05, %v7562_v2  ;;  %v7565_v16 = vmul.f32 0.03125, %v7521_v31 }
 0xbfb   : > { %v7518_v58 = vpop.xlane.xlu1 %7517 }
 0xbfc   : > { %8819 = vrsqrt.f32 %v7594_v12  ;;  %v7597_v32 = vadd.f32 1e-05, %v7565_v16  ;;  %v7564_v59 = vmul.f32 0.03125, %v7518_v58 }
 0xbfe   : > { %8821 = vrsqrt.f32 %v7597_v32  ;;  %v7596_v11 = vadd.f32 1e-05, %v7564_v59 }
 0xc00   : > { %8823 = vrsqrt.f32 %v7596_v11 }
 0xc06   : > { %v7527_v36 = vpop.xlane.xlu0 %7526 }
 0xc07   : > { %v8818_v21 = vpop.eup %8817  ;;  %v7567_v0 = vmul.f32 0.03125, %v7527_v36 }
 0xc08   : > { %v7659_v62 = vmul.f32 %v8818_v21, %v14528_v37  ;;  %v7524_v61 = vpop.xlane.xlu1 %7523 }
 0xc09   : > { %v8820_v6 = vpop.eup %8819  ;;  %v7599_v63 = vadd.f32 1e-05, %v7567_v0  ;;  %v7566_v29 = vmul.f32 0.03125, %v7524_v61 }
 0xc0a   : > { %v7698_v1 = vmul.f32 %v14590_v13, %v7659_v62  ;;  %v7658_v30 = vmul.f32 %v8820_v6, %v14531_v50 }
 0xc0b   : > { %v8822_v55 = vpop.eup %8821  ;;  %8825 = vrsqrt.f32 %v7599_v63  ;;  %v7598_v19 = vadd.f32 1e-05, %v7566_v29 }
 0xc0c   : > { %v7737_v25 = vadd.f32 %v14596_v9, %v7698_v1  ;;  %v7697_v4 = vmul.f32 %v14590_v13, %v7658_v30  ;;  %v7661_v37 = vmul.f32 %v8822_v55, %v14536_v38 }
 0xc0d   : > { %v8824_v48 = vpop.eup %8823  ;;  %8827 = vrsqrt.f32 %v7598_v19 }
 0xc0e   : > { %7769 = vst.msk [vmem:[%s14604_s13 + $0xb8] sm:$0xff] %vm551_vm0, %v7737_v25  ;;  %v7736_v14 = vadd.f32 %v14596_v9, %v7697_v4  ;;  %v7700_v50 = vmul.f32 %v14590_v13, %v7661_v37  ;;  %v7660_v56 = vmul.f32 %v8824_v48, %v14542_v57 }
 0xc10   : > { %7768 = vst.msk [vmem:[%s14604_s13 + $0xb0] sm:$0xff] %vm551_vm0, %v7736_v14  ;;  %v7739_v3 = vadd.f32 %v14596_v9, %v7700_v50  ;;  %v7699_v46 = vmul.f32 %v14590_v13, %v7660_v56 }
 0xc12   : > { %7771 = vst.msk [vmem:[%s14604_s13 + $0xc8] sm:$0xff] %vm551_vm0, %v7739_v3  ;;  %v7738_v38 = vadd.f32 %v14596_v9, %v7699_v46 }
 0xc14   : > { %7770 = vst.msk [vmem:[%s14604_s13 + $0xc0] sm:$0xff] %vm551_vm0, %v7738_v38 }
 0xc18   : > { %v8826_v43 = vpop.eup %8825 }
 0xc19   : > { %v7663_v27 = vmul.f32 %v8826_v43, %v14552_v45 }
 0xc1a   : > { %v8828_v39 = vpop.eup %8827 }
 0xc1b   : > { %v7702_v17 = vmul.f32 %v14590_v13, %v7663_v27  ;;  %v7662_v57 = vmul.f32 %v8828_v39, %v14555_v20 }
 0xc1d   : > { %v7741_v7 = vadd.f32 %v14596_v9, %v7702_v17  ;;  %v7701_v8 = vmul.f32 %v14590_v13, %v7662_v57 }
 0xc1f   : > { %7773 = vst.msk [vmem:[%s14604_s13 + $0xd8] sm:$0xff] %vm551_vm0, %v7741_v7  ;;  %v7740_v49 = vadd.f32 %v14596_v9, %v7701_v8 }
 0xc21   : > { %7772 = vst.msk [vmem:[%s14604_s13 + $0xd0] sm:$0xff] %vm551_vm0, %v7740_v49 }
 0xc24   : > { %v7533_v40 = vpop.xlane.xlu0 %7532 }
 0xc25   : > { %v7569_v5 = vmul.f32 0.03125, %v7533_v40 }
 0xc26   : > { %v7530_v10 = vpop.xlane.xlu1 %7529 }
 0xc27   : > { %v7601_v60 = vadd.f32 1e-05, %v7569_v5  ;;  %v7568_v45 = vmul.f32 0.03125, %v7530_v10 }
 0xc29   : > { %8829 = vrsqrt.f32 %v7601_v60  ;;  %v7600_v33 = vadd.f32 1e-05, %v7568_v45 }
 0xc2b   : > { %8831 = vrsqrt.f32 %v7600_v33 }
 0xc31   : > { %v7539_v20 = vpop.xlane.xlu0 %7538 }
 0xc32   : > { %v7571_v54 = vmul.f32 0.03125, %v7539_v20 }
 0xc33   : > { %v7536_v47 = vpop.xlane.xlu1 %7535 }
 0xc34   : > { %v7603_v42 = vadd.f32 1e-05, %v7571_v54  ;;  %v7570_v23 = vmul.f32 0.03125, %v7536_v47 }
 0xc36   : > { %v8830_v34 = vpop.eup %8829  ;;  %8833 = vrsqrt.f32 %v7603_v42  ;;  %v7602_v22 = vadd.f32 1e-05, %v7570_v23 }
 0xc37   : > { %v7665_v52 = vmul.f32 %v8830_v34, %v14564_v15 }
 0xc38   : > { %v8832_v41 = vpop.eup %8831  ;;  %8835 = vrsqrt.f32 %v7602_v22 }
 0xc39   : > { %v7704_v24 = vmul.f32 %v14590_v13, %v7665_v52  ;;  %v7664_v26 = vmul.f32 %v8832_v41, %v14567_v28 }
 0xc3b   : > { %v7743_v35 = vadd.f32 %v14596_v9, %v7704_v24  ;;  %v7703_v18 = vmul.f32 %v14590_v13, %v7664_v26 }
 0xc3d   : > { %7775 = vst.msk [vmem:[%s14604_s13 + $0xe8] sm:$0xff] %vm551_vm0, %v7743_v35  ;;  %v7742_v51 = vadd.f32 %v14596_v9, %v7703_v18 }
 0xc3f   : > { %7774 = vst.msk [vmem:[%s14604_s13 + $0xe0] sm:$0xff] %vm551_vm0, %v7742_v51 }
 0xc43   : > { %v8834_v15 = vpop.eup %8833 }
 0xc44   : > { %v7667_v2 = vmul.f32 %v8834_v15, %v14576_v44 }
 0xc45   : > { %v8836_v31 = vpop.eup %8835 }
 0xc46   : > { %v7706_v12 = vmul.f32 %v14590_v13, %v7667_v2  ;;  %v7666_v28 = vmul.f32 %v8836_v31, %v14579_v53 }
 0xc48   : > { %v7745_v16 = vadd.f32 %v14596_v9, %v7706_v12  ;;  %v7705_v58 = vmul.f32 %v14590_v13, %v7666_v28 }
 0xc4a   : > { %7777 = vst.msk [vmem:[%s14604_s13 + $0xf8] sm:$0xff] %vm551_vm0, %v7745_v16  ;;  %v7744_v32 = vadd.f32 %v14596_v9, %v7705_v58 }
 0xc4c   : > { %7776 = vst.msk [vmem:[%s14604_s13 + $0xf0] sm:$0xff] %vm551_vm0, %v7744_v32 }
 0xc4d PF: > { %s21_s17 = sadd.s32 1, %s8876_s17  }
 0xc4e   : > { %p18_p4 = scmp.ge.s32.totalorder %s21_s17, 4  }
 0xc50   :  { %20 = sbr.rel (!%p18_p4) target bundleno = 1 (0x1), region = 97 }

</bundles_post_ra>
